<compile_context>
chip_gen: v7x
topology: tpu7x:2x2x1
jax: 0.10.0
libtpu: 0.0.40
codegen_flags: <defaults>
</compile_context>

<pallas_src>
import functools

import numpy as np
import jax
import jax.numpy as jnp
from jax.experimental import pallas as pl
from jax.experimental.pallas import tpu as pltpu


# =============================================================================
# Pallas kernel: one batch element per grid step, all labels at once
# =============================================================================
def _lowrank_attn_kernel(x1_ref, x2_ref, w1_ref, w2_ref, wv_ref, c_ref,
                         alpha_ref, *, inv_tau):
    """alpha[b] = softmax_S( (tanh(linear1(x1) ⊙ linear2(x2)) @ wv + c) / tau )."""
    x1 = x1_ref[0]                                    # (S, D1) f32
    x2 = x2_ref[0]                                    # (L, D2) f32

    # linear1 / linear2 (bias-free): bf16 operands, f32 accumulation on the MXU.
    x1p = jnp.dot(x1.astype(jnp.bfloat16), w1_ref[...],
                  preferred_element_type=jnp.float32)             # (S, A)
    x2p = jnp.dot(x2.astype(jnp.bfloat16), w2_ref[...],
                  preferred_element_type=jnp.float32)             # (L, A)

    # Folded hidden_linear -> target_linear:
    #   temp[l, s] = sum_a tanh(x1p[s, a] * x2p[l, a]) * wv[a]  (+ c)
    t = jnp.tanh(x2p[:, None, :] * x1p[None, :, :])               # (L, S, A) f32
    temp = jnp.sum(t * wv_ref[...][None], axis=-1)                # (L, S)
    logits = (temp + c_ref[...]) * inv_tau                        # (L, S)

    # softmax over pixels (last axis); reciprocal goes to the EUP slot.
    m = jnp.max(logits, axis=-1, keepdims=True)
    e = jnp.exp(logits - m)
    denom = jnp.sum(e, axis=-1, keepdims=True)
    alpha_ref[0] = e * pl.reciprocal(denom, approx=True)


# =============================================================================
# Wrapper
# =============================================================================
def low_rank_bilinear_attention(params, x1, x2, tau=1.0):
    """x1: (B, num_pixels, dim1), x2: (B, num_labels, dim2) -> alpha (B, L, S)."""
    B, S, D1 = x1.shape
    B2, L, D2 = x2.shape
    assert B2 == B
    A = params["w1"].shape[1]

    # Parameter preprocessing (exact fold, hoisted out of the kernel).
    w1 = params["w1"].astype(jnp.bfloat16)                         # (D1, A)
    w2 = params["w2"].astype(jnp.bfloat16)                         # (D2, A)
    wv = (params["wh"] @ params["wt"]).reshape(1, A)               # (1, A)  f32
    c = (params["bh"] @ params["wt"] + params["bt"]).reshape(1, 1) # (1, 1)  f32

    kernel = functools.partial(_lowrank_attn_kernel, inv_tau=float(1.0 / tau))
    return pl.pallas_call(
        kernel,
        out_shape=jax.ShapeDtypeStruct((B, L, S), jnp.float32),
        grid=(B,),
        in_specs=[
            pl.BlockSpec((1, S, D1), lambda b: (b, 0, 0)),   # x1 per batch
            pl.BlockSpec((1, L, D2), lambda b: (b, 0, 0)),   # x2 per batch
            pl.BlockSpec((D1, A), lambda b: (0, 0)),         # linear1 weight (bf16)
            pl.BlockSpec((D2, A), lambda b: (0, 0)),         # linear2 weight (bf16)
            pl.BlockSpec((1, A), lambda b: (0, 0)),          # folded wv = Wh @ Wt
            pl.BlockSpec((1, 1), lambda b: (0, 0)),          # folded c  = bh @ Wt + bt
        ],
        out_specs=pl.BlockSpec((1, L, S), lambda b: (b, 0, 0)),
        compiler_params=pltpu.CompilerParams(
            dimension_semantics=("parallel",)),               # 2-TC split on v7x
    )(x1, x2, w1, w2, wv, c)


# =============================================================================
# Parameter init (weights stored pre-transposed to (in, out); deterministic)
# =============================================================================
def init_params(key, dim1, dim2, att_dim):
    ks = jax.random.split(key, 6)

    def nrm(k, shape, s=0.05):
        return (s * jax.random.normal(k, shape)).astype(jnp.float32)

    return {
        "w1": nrm(ks[0], (dim1, att_dim)),     # linear1.weight^T (no bias)
        "w2": nrm(ks[1], (dim2, att_dim)),     # linear2.weight^T (no bias)
        "wh": nrm(ks[2], (att_dim, att_dim)),  # hidden_linear.weight^T
        "bh": nrm(ks[3], (att_dim,)),          # hidden_linear.bias
        "wt": nrm(ks[4], (att_dim, 1)),        # target_linear.weight^T
        "bt": nrm(ks[5], (1,)),                # target_linear.bias
    }


# =============================================================================
# Pure-JAX reference mirroring the PyTorch module (no fold, full f32)
# =============================================================================
def low_rank_bilinear_attention_ref(params, x1, x2, tau=1.0):
    _x1 = x1 @ params["w1"]                                     # (B, S, A)
    _x2 = x2 @ params["w2"]                                     # (B, L, A)
    t = jnp.tanh(_x1[:, None, :, :] * _x2[:, :, None, :])       # (B, L, S, A)
    h = t @ params["wh"] + params["bh"]                         # hidden_linear
    temp = (h @ params["wt"])[..., 0] + params["bt"]            # target_linear
    z = temp / tau
    m = jnp.max(z, axis=-1, keepdims=True)
    e = jnp.exp(z - m)
    return e / jnp.sum(e, axis=-1, keepdims=True)               # softmax over pixels


# =============================================================================
if __name__ == "__main__":
    B, S, L = 2, 64, 16                 # batch, num_pixels, num_labels
    DIM1, DIM2, ATT_DIM = 128, 256, 512
    TAU = 1.0

    key = jax.random.PRNGKey(0)
    k1, k2, kp = jax.random.split(key, 3)
    x1 = jax.random.normal(k1, (B, S, DIM1), dtype=jnp.float32)
    x2 = jax.random.normal(k2, (B, L, DIM2), dtype=jnp.float32)
    params = init_params(kp, DIM1, DIM2, ATT_DIM)

    fwd = jax.jit(functools.partial(low_rank_bilinear_attention, tau=TAU))
    alpha = jax.block_until_ready(fwd(params, x1, x2))

    assert alpha.shape == (B, L, S)
    assert bool(jnp.all(jnp.isfinite(alpha)))
    # rows are a softmax over pixels -> must sum to ~1
    np.testing.assert_allclose(np.asarray(jnp.sum(alpha, axis=-1)),
                               np.ones((B, L), np.float32),
                               rtol=2e-3, atol=2e-3)

    with jax.default_matmul_precision("highest"):
        ref = jax.block_until_ready(
            low_rank_bilinear_attention_ref(params, x1, x2, tau=TAU))

    np.testing.assert_allclose(np.asarray(alpha), np.asarray(ref),
                               rtol=3e-2, atol=1e-3)

    print("KERNEL_OK")
</pallas_src>

<mosaic_0001>
module attributes {stable_mosaic.version = 11 : i64} {
  func.func @_lowrank_attn_kernel(%arg0: i32, %arg1: memref<1x64x128xf32, #tpu.memory_space<vmem>>, %arg2: memref<1x16x256xf32, #tpu.memory_space<vmem>>, %arg3: memref<128x512xbf16, #tpu.memory_space<vmem>>, %arg4: memref<256x512xbf16, #tpu.memory_space<vmem>>, %arg5: memref<1x512xf32, #tpu.memory_space<vmem>>, %arg6: memref<1x1xf32, #tpu.memory_space<vmem>>, %arg7: memref<1x16x64xf32, #tpu.memory_space<vmem>>) attributes {dimension_semantics = [#tpu.dimension_semantics<parallel>], iteration_bounds = array<i64: 2>, scalar_prefetch = 0 : i64, scratch_operands = 0 : i64, tpu.core_type = #tpu.core_type<tc>, window_params = [{transform_indices = @transform_0, window_bounds = array<i64: 1, 64, 128>}, {transform_indices = @transform_1, window_bounds = array<i64: 1, 16, 256>}, {pipeline_mode = #tpu.pipeline_mode<synchronous>, transform_indices = @transform_2, window_bounds = array<i64: 128, 512>}, {pipeline_mode = #tpu.pipeline_mode<synchronous>, transform_indices = @transform_3, window_bounds = array<i64: 256, 512>}, {pipeline_mode = #tpu.pipeline_mode<synchronous>, transform_indices = @transform_4, window_bounds = array<i64: 1, 512>}, {pipeline_mode = #tpu.pipeline_mode<synchronous>, transform_indices = @transform_5, window_bounds = array<i64: 1, 1>}, {transform_indices = @transform_6, window_bounds = array<i64: 1, 16, 64>}]} {
    %c0 = arith.constant 0 : index
    %c0_0 = arith.constant 0 : index
    %c0_1 = arith.constant 0 : index
    %0 = vector.load %arg1[%c0, %c0_0, %c0_1] : memref<1x64x128xf32, #tpu.memory_space<vmem>>, vector<1x64x128xf32>
    %1 = vector.shape_cast %0 : vector<1x64x128xf32> to vector<64x128xf32>
    %c0_2 = arith.constant 0 : index
    %c0_3 = arith.constant 0 : index
    %c0_4 = arith.constant 0 : index
    %2 = vector.load %arg2[%c0_2, %c0_3, %c0_4] : memref<1x16x256xf32, #tpu.memory_space<vmem>>, vector<1x16x256xf32>
    %3 = vector.shape_cast %2 : vector<1x16x256xf32> to vector<16x256xf32>
    %4 = arith.truncf %1 : vector<64x128xf32> to vector<64x128xbf16>
    %c0_5 = arith.constant 0 : index
    %c0_6 = arith.constant 0 : index
    %5 = vector.load %arg3[%c0_5, %c0_6] : memref<128x512xbf16, #tpu.memory_space<vmem>>, vector<128x512xbf16>
    %cst = arith.constant dense<0.000000e+00> : vector<64x512xf32>
    %6 = tpu.matmul %4, %5, %cst {dimension_numbers = #tpu.dot_dimension_numbers<[1], [0], [0], [1], [0, 0, 1, 1], [], []>} : vector<64x128xbf16>, vector<128x512xbf16>, vector<64x512xf32> -> vector<64x512xf32>
    %7 = arith.truncf %3 : vector<16x256xf32> to vector<16x256xbf16>
    %c0_7 = arith.constant 0 : index
    %c0_8 = arith.constant 0 : index
    %8 = vector.load %arg4[%c0_7, %c0_8] : memref<256x512xbf16, #tpu.memory_space<vmem>>, vector<256x512xbf16>
    %cst_9 = arith.constant dense<0.000000e+00> : vector<16x512xf32>
    %9 = tpu.matmul %7, %8, %cst_9 {dimension_numbers = #tpu.dot_dimension_numbers<[1], [0], [0], [1], [0, 0, 1, 1], [], []>} : vector<16x256xbf16>, vector<256x512xbf16>, vector<16x512xf32> -> vector<16x512xf32>
    %10 = vector.shape_cast %9 : vector<16x512xf32> to vector<16x1x512xf32>
    %11 = vector.shape_cast %6 : vector<64x512xf32> to vector<1x64x512xf32>
    %12 = vector.broadcast %10 : vector<16x1x512xf32> to vector<16x64x512xf32>
    %13 = vector.broadcast %11 : vector<1x64x512xf32> to vector<16x64x512xf32>
    %14 = arith.mulf %12, %13 : vector<16x64x512xf32>
    %15 = math.tanh %14 : vector<16x64x512xf32>
    %c0_10 = arith.constant 0 : index
    %c0_11 = arith.constant 0 : index
    %16 = vector.load %arg5[%c0_10, %c0_11] : memref<1x512xf32, #tpu.memory_space<vmem>>, vector<1x512xf32>
    %17 = vector.shape_cast %16 : vector<1x512xf32> to vector<1x1x512xf32>
    %18 = vector.broadcast %17 : vector<1x1x512xf32> to vector<16x64x512xf32>
    %19 = arith.mulf %15, %18 : vector<16x64x512xf32>
    %cst_12 = arith.constant dense<0.000000e+00> : vector<16x64xf32>
    %20 = vector.multi_reduction <add>, %19, %cst_12 [2] : vector<16x64x512xf32> to vector<16x64xf32>
    %c0_13 = arith.constant 0 : index
    %c0_14 = arith.constant 0 : index
    %21 = vector.load %arg6[%c0_13, %c0_14] : memref<1x1xf32, #tpu.memory_space<vmem>>, vector<1x1xf32>
    %22 = vector.broadcast %21 : vector<1x1xf32> to vector<16x64xf32>
    %23 = arith.addf %20, %22 : vector<16x64xf32>
    %cst_15 = arith.constant 1.000000e+00 : f32
    %24 = vector.broadcast %cst_15 : f32 to vector<16x64xf32>
    %25 = arith.mulf %23, %24 : vector<16x64xf32>
    %cst_16 = arith.constant dense<0xFF800000> : vector<16xf32>
    %26 = vector.multi_reduction <maximumf>, %25, %cst_16 [1] : vector<16x64xf32> to vector<16xf32>
    %27 = vector.shape_cast %26 : vector<16xf32> to vector<16x1xf32>
    %28 = vector.broadcast %27 : vector<16x1xf32> to vector<16x64xf32>
    %29 = arith.subf %25, %28 : vector<16x64xf32>
    %30 = math.exp %29 : vector<16x64xf32>
    %cst_17 = arith.constant dense<0.000000e+00> : vector<16xf32>
    %31 = vector.multi_reduction <add>, %30, %cst_17 [1] : vector<16x64xf32> to vector<16xf32>
    %32 = vector.shape_cast %31 : vector<16xf32> to vector<16x1xf32>
    %33 = tpu.reciprocal %32 {approx = true} : vector<16x1xf32> -> vector<16x1xf32>
    %34 = vector.broadcast %33 : vector<16x1xf32> to vector<16x64xf32>
    %35 = arith.mulf %30, %34 : vector<16x64xf32>
    %c0_18 = arith.constant 0 : index
    %c0_19 = arith.constant 0 : index
    %c0_20 = arith.constant 0 : index
    %36 = vector.load %arg7[%c0_18, %c0_19, %c0_20] : memref<1x16x64xf32, #tpu.memory_space<vmem>>, vector<1x16x64xf32>
    %37 = vector.shape_cast %36 : vector<1x16x64xf32> to vector<16x64xf32>
    %38 = vector.shape_cast %35 : vector<16x64xf32> to vector<1x16x64xf32>
    tpu.vector_store %arg7[%c0_18, %c0_19, %c0_20], %38 {strides = array<i32>} : memref<1x16x64xf32, #tpu.memory_space<vmem>>, vector<1x16x64xf32>,
    return
  }
  func.func @transform_0(%arg0: i32) -> (i32, i32, i32) {
    %c0_i32 = arith.constant 0 : i32
    %c0_i32_0 = arith.constant 0 : i32
    %c0_i32_1 = arith.constant 0 : i32
    return %arg0, %c0_i32, %c0_i32_0 : i32, i32, i32
  }
  func.func @transform_1(%arg0: i32) -> (i32, i32, i32) {
    %c0_i32 = arith.constant 0 : i32
    %c0_i32_0 = arith.constant 0 : i32
    %c0_i32_1 = arith.constant 0 : i32
    return %arg0, %c0_i32, %c0_i32_0 : i32, i32, i32
  }
  func.func @transform_2(%arg0: i32) -> (i32, i32) {
    %c0_i32 = arith.constant 0 : i32
    %c0_i32_0 = arith.constant 0 : i32
    %c0_i32_1 = arith.constant 0 : i32
    return %c0_i32, %c0_i32_0 : i32, i32
  }
  func.func @transform_3(%arg0: i32) -> (i32, i32) {
    %c0_i32 = arith.constant 0 : i32
    %c0_i32_0 = arith.constant 0 : i32
    %c0_i32_1 = arith.constant 0 : i32
    return %c0_i32, %c0_i32_0 : i32, i32
  }
  func.func @transform_4(%arg0: i32) -> (i32, i32) {
    %c0_i32 = arith.constant 0 : i32
    %c0_i32_0 = arith.constant 0 : i32
    %c0_i32_1 = arith.constant 0 : i32
    return %c0_i32, %c0_i32_0 : i32, i32
  }
  func.func @transform_5(%arg0: i32) -> (i32, i32) {
    %c0_i32 = arith.constant 0 : i32
    %c0_i32_0 = arith.constant 0 : i32
    %c0_i32_1 = arith.constant 0 : i32
    return %c0_i32, %c0_i32_0 : i32, i32
  }
  func.func @transform_6(%arg0: i32) -> (i32, i32, i32) {
    %c0_i32 = arith.constant 0 : i32
    %c0_i32_0 = arith.constant 0 : i32
    %c0_i32_1 = arith.constant 0 : i32
    return %arg0, %c0_i32, %c0_i32_0 : i32, i32, i32
  }
}

</mosaic_0001>

<bundles_post_ra>
// kernel: low_rank_bilinear_attention.1
= control target key start
LH: loop header
LB: loop body
LE: loop exit
PB: predicated region body
PF: predicated region fallthrough
CT: control target
= control target key end

     0   :  { %s16158_s0 = inlined_call_operand.vmem [shape: f32[2,64,128], index: 0, kind: input, shape index: {}]   ;;  %s16159_s1 = inlined_call_operand.vmem [shape: f32[2,16,256], index: 1, kind: input, shape index: {}]   ;;  %s16160_s2 = inlined_call_operand.vmem [shape: bf16[128,512], index: 2, kind: input, shape index: {}]   ;;  %s16161_s3 = inlined_call_operand.vmem [shape: bf16[256,512], index: 3, kind: input, shape index: {}]   ;;  %s16162_s4 = inlined_call_operand.vmem [shape: f32[1,512], index: 4, kind: input, shape index: {}]   ;;  %s16163_s5 = inlined_call_operand.<no memory space> [shape: f32[1,1], index: 5, kind: input, shape index: {}]   ;;  %s16164_s6 = inlined_call_operand.hbm [shape: f32[2,16,64], index: 6, kind: output, shape index: {}]  }
   0x1   :  { %v11_v0 = vstv %s16163_s5 }
   0x2   :  { %12 = vst [vmem:[#allocation2] sm:$0x1] %v11_v0 }
   0x3   :  { %13 = vsyncpa [#allocation4], 0 }
   0x4   :  { %15 = vsyncpa [#allocation4 + $0x1], 0  ;;  %s9469_s23 = smov 0   ;;  %s9471_s24 = smov 0  }
   0x5   :  { %s9473_s25 = smov 0   ;;  %s9475_s26 = smov 0  }
   0x6 LB: > { %s9490_s5 = sadd.s32 4294967295, %s9424_s26   ;;  %s7775_s27 = sadd.s32 4294967294, %s9424_s26   ;;  %s9424_s26 = sphi %s9475_s26, %s18035_s26   ;;  %s9420_s25 = sphi %s9473_s25, %s18034_s25   ;;  %s9416_s24 = sphi %s9471_s24, %s18033_s24   ;;  %s9412_s23 = sphi %s9469_s23, %s18032_s23  }
   0x7   : > { %s9494_s28 = sadd.s32 1, %s9424_s26   ;;  %s164_s29 = sadd.s32 1, %s9420_s25 }
   0x8   : > { %s161_s30 = ssub.s32 %s9424_s26, %s9494_s28  ;;  %p174_p0 = scmp.ne.s32.totalorder %s9420_s25, %s9416_s24 }
   0x9   : > { %p162_p1 = scmp.eq.s32.totalorder %s161_s30, 0  ;;  %p175_p2 = scmp.eq.s32.totalorder %s9490_s5, 1 }
   0xa   : > { %p180_p3 = scmp.ne.s32.totalorder %s9416_s24, %s9412_s23  ;;  %p181_p4 = scmp.eq.s32.totalorder %s7775_s27, 1 }
   0xb   : > { %s9505_s7 = scalar_select %p162_p1, %s9420_s25, %s164_s29  }
   0xc   : > { %p9507_p5 = por %p175_p2, %p174_p0  ;;  %p9511_p6 = por %p181_p4, %p180_p3 }
   0xd   : > { %p7778_p7 = scmp.ge.s32.totalorder %s9424_s26, 1  ;;  %p227_p8 = scmp.lt.s32.totalorder %s9424_s26, 3 }
   0xf   : > { %p228_p9 = pnand %p7778_p7, %p227_p8 }
  0x11   : > { %231 = sbr.rel (%p228_p9) target bundleno = 1932 (0x78c), region = 44 }
  0x18   : > { %v7934_v1 = vld [vmem:[%s16160_s2 + $0x4] ss:$16 sps:$4 sm:$0xff]   ;;  %v7936_v2 = vld [vmem:[%s16160_s2 + $0xc] ss:$16 sps:$4 sm:$0xff]   ;;  %v9426_v3 = vmov 0   ;;  %p262_p10 = scmp.lt.s32.totalorder %s9490_s5, 1 }
  0x19   : > { %513 = vmatprep.mubr.bf16.mxu0 %v9426_v3  ;;  %586 = vmatprep.mubr.bf16.mxu1 %v9426_v3  ;;  %v7938_v4 = vld [vmem:[%s16160_s2] ss:$16 sps:$4 sm:$0xff]   ;;  %v7939_v5 = vld [vmem:[%s16160_s2 + $0x8] ss:$16 sps:$4 sm:$0xff]   ;;  %v7940_v6 = vld [vmem:[%s16160_s2 + $0x24] ss:$16 sps:$4 sm:$0xff]  }
  0x1a   : > { %481 = vmatprep.subr.bf16.mxu0 %v7934_v1  ;;  %7932 = vset.pattern.permute.xlu0 %v9426_v3  ;;  %v7942_v7 = vld [vmem:[%s16160_s2 + $0x2c] ss:$16 sps:$4 sm:$0xff]   ;;  %v7944_v8 = vld [vmem:[%s16160_s2 + $0x20] ss:$16 sps:$4 sm:$0xff]   ;;  %v7945_v9 = vld [vmem:[%s16160_s2 + $0x28] ss:$16 sps:$4 sm:$0xff]  }
  0x1b   : > { %554 = vmatprep.subr.bf16.mxu1 %v7936_v2  ;;  %7933 = vset.pattern.permute.xlu1 %v9426_v3  ;;  %v7946_v10 = vld [vmem:[%s16160_s2 + $0x44] ss:$16 sps:$4 sm:$0xff]   ;;  %v7948_v11 = vld [vmem:[%s16160_s2 + $0x4c] ss:$16 sps:$4 sm:$0xff]   ;;  %v7950_v12 = vld [vmem:[%s16160_s2 + $0x40] ss:$16 sps:$4 sm:$0xff]  }
  0x1c   : > { %482 = vmatpush1.bf16.msra.mxu0 %v7938_v4  ;;  %555 = vmatpush1.bf16.msra.mxu1 %v7939_v5  ;;  %v7951_v13 = vld [vmem:[%s16160_s2 + $0x48] ss:$16 sps:$4 sm:$0xff]   ;;  %v7952_v14 = vld [vmem:[%s16160_s2 + $0x64] ss:$16 sps:$4 sm:$0xff]   ;;  %v7954_v15 = vld [vmem:[%s16160_s2 + $0x6c] ss:$16 sps:$4 sm:$0xff]  }
  0x1d   : > { %483 = vmatprep.subr.bf16.mxu0 %v7940_v6  ;;  %556 = vmatprep.subr.bf16.mxu1 %v7942_v7  ;;  %v7956_v16 = vld [vmem:[%s16160_s2 + $0x60] ss:$16 sps:$4 sm:$0xff]   ;;  %v7957_v17 = vld [vmem:[%s16160_s2 + $0x68] ss:$16 sps:$4 sm:$0xff]   ;;  %v7958_v18 = vld [vmem:[%s16160_s2 + $0x84] ss:$16 sps:$4 sm:$0xff]  }
  0x1e   : > { %v7960_v19 = vld [vmem:[%s16160_s2 + $0x8c] ss:$16 sps:$4 sm:$0xff]   ;;  %v7962_v20 = vld [vmem:[%s16160_s2 + $0x80] ss:$16 sps:$4 sm:$0xff]   ;;  %v7963_v21 = vld [vmem:[%s16160_s2 + $0x88] ss:$16 sps:$4 sm:$0xff]  }
  0x1f   : > { %v7964_v22 = vld [vmem:[%s16160_s2 + $0xa4] ss:$16 sps:$4 sm:$0xff]   ;;  %v7966_v23 = vld [vmem:[%s16160_s2 + $0xac] ss:$16 sps:$4 sm:$0xff]   ;;  %s9589_s22 = scalar_select %p262_p10, %s9490_s5, 1  ;;  %vm4038_vm0 = vcmask 130112  }
  0x20   : > { %484 = vmatpush1.bf16.msra.mxu0 %v7944_v8  ;;  %557 = vmatpush1.bf16.msra.mxu1 %v7945_v9  ;;  %v7968_v24 = vld [vmem:[%s16160_s2 + $0xa0] ss:$16 sps:$4 sm:$0xff]   ;;  %v7969_v25 = vld [vmem:[%s16160_s2 + $0xa8] ss:$16 sps:$4 sm:$0xff]   ;;  %v7970_v26 = vld [vmem:[%s16160_s2 + $0xc4] ss:$16 sps:$4 sm:$0xff]  }
  0x21   : > { %485 = vmatprep.subr.bf16.mxu0 %v7946_v10  ;;  %558 = vmatprep.subr.bf16.mxu1 %v7948_v11  ;;  %v7972_v27 = vld [vmem:[%s16160_s2 + $0xcc] ss:$16 sps:$4 sm:$0xff]   ;;  %s7886_s15 = sshll.u32 %s9589_s22, 6  ;;  %v7974_v28 = vld [vmem:[%s16160_s2 + $0xc0] ss:$16 sps:$4 sm:$0xff]   ;;  %s7887_s20 = sshll.u32 %s9589_s22, 5 }
  0x22   : > { %v7975_v29 = vld [vmem:[%s16160_s2 + $0xc8] ss:$16 sps:$4 sm:$0xff]   ;;  %v7976_v30 = vld [vmem:[%s16160_s2 + $0xe4] ss:$16 sps:$4 sm:$0xff]   ;;  %v7978_v31 = vld [vmem:[%s16160_s2 + $0xec] ss:$16 sps:$4 sm:$0xff]   ;;  %s9619_s11 = scalar_lea.vmem %s16158_s0, %s7886_s15  ;;  %s9753_s21 = scalar_lea.vmem %s16159_s1, %s7887_s20 }
  0x23   : > { %v7980_v32 = vld [vmem:[%s16160_s2 + $0xe0] ss:$16 sps:$4 sm:$0xff]   ;;  %v7981_v33 = vld [vmem:[%s16160_s2 + $0xe8] ss:$16 sps:$4 sm:$0xff]   ;;  %v7984_v36 = vld [vmem:[%s16161_s3 + $0x4] ss:$16 sps:$4 sm:$0xff]  }
  0x24   : > { %486 = vmatpush1.bf16.msra.mxu0 %v7950_v12  ;;  %559 = vmatpush1.bf16.msra.mxu1 %v7951_v13  ;;  %v273_v34 = vld [vmem:[%s9619_s11] sm:$0xff]  ;;  %v274_v35 = vld [vmem:[%s9619_s11 + $0x8] sm:$0xff]  ;;  %v275_v59 = vld [vmem:[%s9619_s11 + $0x10] sm:$0xff]  ;;  %vm4045_vm1 = vcmask 195712   ;;  %vm4052_vm2 = vcmask 261312   ;;  %vm4059_vm3 = vcmask 326912  }
  0x25   : > { %487 = vmatprep.subr.bf16.mxu0 %v7952_v14  ;;  %560 = vmatprep.subr.bf16.mxu1 %v7954_v15  ;;  %v7987_v37 = vld [vmem:[%s16161_s3 + $0xc] ss:$16 sps:$4 sm:$0xff]   ;;  %v285_v38 = vpack.c.bf16 %v274_v35, %v273_v34  ;;  %v7982_v39 = vld [vmem:[%s16161_s3] ss:$16 sps:$4 sm:$0xff]   ;;  %v7985_v40 = vld [vmem:[%s16161_s3 + $0x8] ss:$16 sps:$4 sm:$0xff]  }
  0x26   : > { %v7990_v41 = vld [vmem:[%s16161_s3 + $0x24] ss:$16 sps:$4 sm:$0xff]   ;;  %v7993_v42 = vld [vmem:[%s16161_s3 + $0x2c] ss:$16 sps:$4 sm:$0xff]   ;;  %v7988_v43 = vld [vmem:[%s16161_s3 + $0x20] ss:$16 sps:$4 sm:$0xff]  }
  0x27   : > { %v7991_v44 = vld [vmem:[%s16161_s3 + $0x28] ss:$16 sps:$4 sm:$0xff]   ;;  %v7996_v45 = vld [vmem:[%s16161_s3 + $0x44] ss:$16 sps:$4 sm:$0xff]   ;;  %v7999_v46 = vld [vmem:[%s16161_s3 + $0x4c] ss:$16 sps:$4 sm:$0xff]  }
  0x28   : > { %488 = vmatpush1.bf16.msra.mxu0 %v7956_v16  ;;  %561 = vmatpush1.bf16.msra.mxu1 %v7957_v17  ;;  %v7994_v47 = vld [vmem:[%s16161_s3 + $0x40] ss:$16 sps:$4 sm:$0xff]   ;;  %v7997_v48 = vld [vmem:[%s16161_s3 + $0x48] ss:$16 sps:$4 sm:$0xff]   ;;  %v8002_v49 = vld [vmem:[%s16161_s3 + $0x64] ss:$16 sps:$4 sm:$0xff]  }
  0x29   : > { %489 = vmatprep.subr.bf16.mxu0 %v7958_v18  ;;  %562 = vmatprep.subr.bf16.mxu1 %v7960_v19  ;;  %v8005_v50 = vld [vmem:[%s16161_s3 + $0x6c] ss:$16 sps:$4 sm:$0xff]   ;;  %v8000_v51 = vld [vmem:[%s16161_s3 + $0x60] ss:$16 sps:$4 sm:$0xff]   ;;  %v8003_v52 = vld [vmem:[%s16161_s3 + $0x68] ss:$16 sps:$4 sm:$0xff]  }
  0x2a   : > { %v8008_v53 = vld [vmem:[%s16161_s3 + $0x84] ss:$16 sps:$4 sm:$0xff]   ;;  %v8011_v54 = vld [vmem:[%s16161_s3 + $0x8c] ss:$16 sps:$4 sm:$0xff]   ;;  %v8006_v55 = vld [vmem:[%s16161_s3 + $0x80] ss:$16 sps:$4 sm:$0xff]  }
  0x2b   : > { %v8009_v56 = vld [vmem:[%s16161_s3 + $0x88] ss:$16 sps:$4 sm:$0xff]   ;;  %v8014_v57 = vld [vmem:[%s16161_s3 + $0xa4] ss:$16 sps:$4 sm:$0xff]   ;;  %v8017_v58 = vld [vmem:[%s16161_s3 + $0xac] ss:$16 sps:$4 sm:$0xff]  }
  0x2c   : > { %490 = vmatpush1.bf16.msra.mxu0 %v7962_v20  ;;  %563 = vmatpush1.bf16.msra.mxu1 %v7963_v21  ;;  %v276_v60 = vld [vmem:[%s9619_s11 + $0x18] sm:$0xff]  ;;  %v8012_v62 = vld [vmem:[%s16161_s3 + $0xa0] ss:$16 sps:$4 sm:$0xff]   ;;  %v8020_v0 = vld [vmem:[%s16161_s3 + $0xc4] ss:$16 sps:$4 sm:$0xff]   ;;  %vm4066_vm4 = vcmask 392512  }
  0x2d   : > { %491 = vmatprep.subr.bf16.mxu0 %v7964_v22  ;;  %564 = vmatprep.subr.bf16.mxu1 %v7966_v23  ;;  %v286_v61 = vpack.c.bf16 %v276_v60, %v275_v59  ;;  %v8015_v63 = vld [vmem:[%s16161_s3 + $0xa8] ss:$16 sps:$4 sm:$0xff]   ;;  %v8023_v1 = vld [vmem:[%s16161_s3 + $0xcc] ss:$16 sps:$4 sm:$0xff]   ;;  %v277_v2 = vld [vmem:[%s9619_s11 + $0x20] sm:$0xff]  ;;  %vm4073_vm5 = vcmask 458112  }
  0x2e   : > { %v278_v4 = vld [vmem:[%s9619_s11 + $0x28] sm:$0xff]  ;;  %v8018_v5 = vld [vmem:[%s16161_s3 + $0xc0] ss:$16 sps:$4 sm:$0xff]   ;;  %v8026_v7 = vld [vmem:[%s16161_s3 + $0xe4] ss:$16 sps:$4 sm:$0xff]   ;;  %vm4080_vm6 = vcmask 523712  }
  0x2f   : > { %v8021_v6 = vld [vmem:[%s16161_s3 + $0xc8] ss:$16 sps:$4 sm:$0xff]   ;;  %v8029_v8 = vld [vmem:[%s16161_s3 + $0xec] ss:$16 sps:$4 sm:$0xff]   ;;  %v287_v9 = vpack.c.bf16 %v278_v4, %v277_v2  ;;  %v8024_v10 = vld [vmem:[%s16161_s3 + $0xe0] ss:$16 sps:$4 sm:$0xff]  }
  0x30   : > { %492 = vmatpush1.bf16.msra.mxu0 %v7968_v24  ;;  %565 = vmatpush1.bf16.msra.mxu1 %v7969_v25  ;;  %v8027_v11 = vld [vmem:[%s16161_s3 + $0xe8] ss:$16 sps:$4 sm:$0xff]   ;;  %v8032_v12 = vld [vmem:[%s16161_s3 + $0x104] ss:$16 sps:$4 sm:$0xff]   ;;  %v8035_v13 = vld [vmem:[%s16161_s3 + $0x10c] ss:$16 sps:$4 sm:$0xff]  }
  0x31   : > { %493 = vmatprep.subr.bf16.mxu0 %v7970_v26  ;;  %566 = vmatprep.subr.bf16.mxu1 %v7972_v27  ;;  %v8030_v14 = vld [vmem:[%s16161_s3 + $0x100] ss:$16 sps:$4 sm:$0xff]   ;;  %v8033_v15 = vld [vmem:[%s16161_s3 + $0x108] ss:$16 sps:$4 sm:$0xff]   ;;  %v8038_v18 = vld [vmem:[%s16161_s3 + $0x124] ss:$16 sps:$4 sm:$0xff]  }
  0x32   : > { %v279_v16 = vld [vmem:[%s9619_s11 + $0x30] sm:$0xff]  ;;  %v280_v17 = vld [vmem:[%s9619_s11 + $0x38] sm:$0xff]  ;;  %v282_v20 = vld [vmem:[%s9753_s21 + $0x8] sm:$0xff]  ;;  %vm4667_vm7 = vcmask 1041409   ;;  %vm4669_vm8 = vcmask 1042434   ;;  %vm4671_vm9 = vcmask 1043459  }
  0x33   : > { %v288_v19 = vpack.c.bf16 %v280_v17, %v279_v16  ;;  %v284_v21 = vld [vmem:[%s9753_s21 + $0x18] sm:$0xff]  ;;  %v8036_v22 = vld [vmem:[%s16161_s3 + $0x120] ss:$16 sps:$4 sm:$0xff]   ;;  %v8044_v25 = vld [vmem:[%s16161_s3 + $0x144] ss:$16 sps:$4 sm:$0xff]   ;;  %vm4673_vm10 = vcmask 1044484  }
  0x34   : > { %494 = vmatpush1.bf16.msra.mxu0 %v7974_v28  ;;  %567 = vmatpush1.bf16.msra.mxu1 %v7975_v29  ;;  %v8039_v23 = vld [vmem:[%s16161_s3 + $0x128] ss:$16 sps:$4 sm:$0xff]   ;;  %v628_v24 = vpack.c.bf16 %v284_v21, %v282_v20  ;;  %v8047_v26 = vld [vmem:[%s16161_s3 + $0x14c] ss:$16 sps:$4 sm:$0xff]   ;;  %v8042_v27 = vld [vmem:[%s16161_s3 + $0x140] ss:$16 sps:$4 sm:$0xff]  }
  0x35   : > { %495 = vmatprep.subr.bf16.mxu0 %v7976_v30  ;;  %568 = vmatprep.subr.bf16.mxu1 %v7978_v31  ;;  %v8045_v28 = vld [vmem:[%s16161_s3 + $0x148] ss:$16 sps:$4 sm:$0xff]   ;;  %v8050_v29 = vld [vmem:[%s16161_s3 + $0x164] ss:$16 sps:$4 sm:$0xff]   ;;  %v8053_v30 = vld [vmem:[%s16161_s3 + $0x16c] ss:$16 sps:$4 sm:$0xff]  }
  0x36   : > { %v8048_v31 = vld [vmem:[%s16161_s3 + $0x160] ss:$16 sps:$4 sm:$0xff]   ;;  %v8059_v34 = vld [vmem:[%s16161_s3 + $0x18c] ss:$16 sps:$4 sm:$0xff]   ;;  %v9427_v21 = vmov 1966171168  }
  0x37   : > { %v8054_v35 = vld [vmem:[%s16161_s3 + $0x180] ss:$16 sps:$4 sm:$0xff]   ;;  %vm4675_vm11 = vcmask 1045509   ;;  %vm4677_vm12 = vcmask 1046534   ;;  %vm4679_vm13 = vcmask 1047559   ;;  %vm4690_vm14 = vcmask 523264  }
  0x38   : > { %496 = vmatpush1.bf16.msra.mxu0 %v7980_v32  ;;  %569 = vmatpush1.bf16.msra.mxu1 %v7981_v33  ;;  %v8051_v32 = vld [vmem:[%s16161_s3 + $0x168] ss:$16 sps:$4 sm:$0xff]   ;;  %v8056_v33 = vld [vmem:[%s16161_s3 + $0x184] ss:$16 sps:$4 sm:$0xff]   ;;  %s259_s18 = sand.u32 1, %s9416_s24   ;;  %s7888_s27 = sshll.u32 %s9490_s5, 8 }
  0x39   : > { %1013 = vmatprep.subr.bf16.mxu0 %v7984_v36  ;;  %1056 = vmatprep.subr.bf16.mxu1 %v7987_v37  ;;  %v8057_v36 = vld [vmem:[%s16161_s3 + $0x188] ss:$16 sps:$4 sm:$0xff]   ;;  %v8062_v37 = vld [vmem:[%s16161_s3 + $0x1a4] ss:$16 sps:$4 sm:$0xff]   ;;  %s7779_s15 = sshll.u32 %s259_s18, 4  ;;  %s16106_s10 = scalar_lea.hbm %s16164_s6, %s7888_s27 }
  0x3a   : > { %s15970_s19 = scalar_lea.vmem [#allocation3], %s7779_s15  ;;  %s16117_s11 = scalar_lea.sflag [#allocation4], %s259_s18 }
  0x3b   : > { %514 = vmatmul.mubr.bf16.vlgmr.msra.gmra.mrb[0].mxu0 %v285_v38  ;;  %587 = vmatmul.mubr.bf16.vlgmr.msra.gmra.mrb[0].mxu1 %v285_v38  ;;  %v8065_v38 = vld [vmem:[%s16161_s3 + $0x1ac] ss:$16 sps:$4 sm:$0xff]   ;;  %s7701_s29 = sshll.u32 %s15970_s19, 4  ;;  %s9428_s12 = smov [#allocation3]   ;;  %s16108_s29 = int_to_ptr.vmem [resolvable:$true] %s7701_s29 }
  0x3c   : > { %1014 = vmatpush1.bf16.msra.mxu0 %v7982_v39  ;;  %1057 = vmatpush1.bf16.msra.mxu1 %v7985_v40  ;;  %v8060_v39 = vld [vmem:[%s16161_s3 + $0x1a0] ss:$16 sps:$4 sm:$0xff]   ;;  %v8063_v40 = vld [vmem:[%s16161_s3 + $0x1a8] ss:$16 sps:$4 sm:$0xff]   ;;  %s9362_s20 = scalar_lea.vmem %s16108_s29, 256  ;;  %s9366_s13 = sshll.u32 %s9428_s12, 4  ;;  %s9367_s13 = int_to_ptr.vmem [resolvable:$false] %s9366_s13 }
  0x3d   : > { %1015 = vmatprep.subr.bf16.mxu0 %v7990_v41  ;;  %1058 = vmatprep.subr.bf16.mxu1 %v7993_v42  ;;  %v8068_v41 = vld [vmem:[%s16161_s3 + $0x1c4] ss:$16 sps:$4 sm:$0xff]   ;;  %v8071_v42 = vld [vmem:[%s16161_s3 + $0x1cc] ss:$16 sps:$4 sm:$0xff]   ;;  %p9363_p11 = scmp.ne.s32.totalorder %s16108_s29, %s9362_s20  ;;  %s9368_s14 = scalar_lea.vmem %s9367_s13, 512 }
  0x3e   : > { %523 = vmatprep.mubr.bf16.mxu0 %v9426_v3  ;;  %596 = vmatprep.mubr.bf16.mxu1 %v9426_v3  ;;  %p9369_p0 = scmp.lt.s32.totalorder %s16108_s29, %s9367_s13  ;;  %p9370_p1 = scmp.lt.s32.totalorder %s9368_s14, %s9362_s20 }
  0x3f   : > { %p9364_p12 = pnand %p9363_p11, %p9507_p5 }
  0x40   : > { %1016 = vmatpush1.bf16.msra.mxu0 %v7988_v43  ;;  %1059 = vmatpush1.bf16.msra.mxu1 %v7991_v44  ;;  %v8066_v43 = vld [vmem:[%s16161_s3 + $0x1c0] ss:$16 sps:$4 sm:$0xff]   ;;  %v8069_v44 = vld [vmem:[%s16161_s3 + $0x1c8] ss:$16 sps:$4 sm:$0xff]   ;;  %p9371_p2 = por %p9370_p1, %p9369_p0 }
  0x41   : > { %1017 = vmatprep.subr.bf16.mxu0 %v7996_v45  ;;  %1060 = vmatprep.subr.bf16.mxu1 %v7999_v46  ;;  %v8074_v45 = vld [vmem:[%s16161_s3 + $0x1e4] ss:$16 sps:$4 sm:$0xff]   ;;  %v8077_v46 = vld [vmem:[%s16161_s3 + $0x1ec] ss:$16 sps:$4 sm:$0xff]   ;;  %p9365_p13 = pneg %p9364_p12 }
  0x43   : > { %524 = vmatmul.mubr.bf16.gmra.mrb[4].mxu0 %v286_v61  ;;  %597 = vmatmul.mubr.bf16.gmra.mrb[4].mxu1 %v286_v61  ;;  %p9372_p3 = pnand %p9371_p2, %p9365_p13 }
  0x44   : > { %1018 = vmatpush1.bf16.msra.mxu0 %v7994_v47  ;;  %1061 = vmatpush1.bf16.msra.mxu1 %v7997_v48  ;;  %v8072_v47 = vld [vmem:[%s16161_s3 + $0x1e0] ss:$16 sps:$4 sm:$0xff]   ;;  %v8075_v48 = vld [vmem:[%s16161_s3 + $0x1e8] ss:$16 sps:$4 sm:$0xff]  }
  0x45   : > { %1019 = vmatprep.subr.bf16.mxu0 %v8002_v49  ;;  %1062 = vmatprep.subr.bf16.mxu1 %v8005_v50  ;;  %v281_v49 = vld [vmem:[%s9753_s21] sm:$0xff]  ;;  %v283_v50 = vld [vmem:[%s9753_s21 + $0x10] sm:$0xff] }
  0x46   : > { %533 = vmatprep.mubr.bf16.mxu0 %v9426_v3  ;;  %606 = vmatprep.mubr.bf16.mxu1 %v9426_v3 }
  0x48   : > { %1020 = vmatpush1.bf16.msra.mxu0 %v8000_v51  ;;  %1063 = vmatpush1.bf16.msra.mxu1 %v8003_v52  ;;  %v627_v51 = vpack.c.bf16 %v283_v50, %v281_v49  ;;  %v7880_v52 = vld [vmem:[#allocation2] ss:$0 sm:$0xff] }
  0x49   : > { %1021 = vmatprep.subr.bf16.mxu0 %v8008_v53  ;;  %1064 = vmatprep.subr.bf16.mxu1 %v8011_v54 }
  0x4a   : > { %3768 = vperm.xlu0 %7932, %v7880_v52  }
  0x4b   : > { %534 = vmatmul.mubr.bf16.gmra.mrb[8].mxu0 %v287_v9  ;;  %607 = vmatmul.mubr.bf16.gmra.mrb[8].mxu1 %v287_v9 }
  0x4c   : > { %1022 = vmatpush1.bf16.msra.mxu0 %v8006_v55  ;;  %1065 = vmatpush1.bf16.msra.mxu1 %v8009_v56 }
  0x4d   : > { %1023 = vmatprep.subr.bf16.mxu0 %v8014_v57  ;;  %1066 = vmatprep.subr.bf16.mxu1 %v8017_v58 }
  0x4e   : > { %543 = vmatprep.mubr.bf16.mxu0 %v9426_v3  ;;  %616 = vmatprep.mubr.bf16.mxu1 %v9426_v3  ;;  %v8041_v3 = vld [vmem:[%s16161_s3 + $0x12c] ss:$16 sps:$4 sm:$0xff]  }
  0x50   : > { %1024 = vmatpush1.bf16.msra.mxu0 %v8012_v62  ;;  %1067 = vmatpush1.bf16.msra.mxu1 %v8015_v63 }
  0x51   : > { %1025 = vmatprep.subr.bf16.mxu0 %v8020_v0  ;;  %1068 = vmatprep.subr.bf16.mxu1 %v8023_v1 }
  0x53   : > { %544 = vmatmul.mubr.bf16.gmra.mrb[12].mxu0 %v288_v19  ;;  %617 = vmatmul.mubr.bf16.gmra.mrb[12].mxu1 %v288_v19 }
  0x54   : > { %1026 = vmatpush1.bf16.msra.mxu0 %v8018_v5  ;;  %1069 = vmatpush1.bf16.msra.mxu1 %v8021_v6 }
  0x55   : > { %1027 = vmatprep.subr.bf16.mxu0 %v8026_v7  ;;  %1070 = vmatprep.subr.bf16.mxu1 %v8029_v8 }
  0x56   : > { %1045 = vmatprep.mubr.bf16.mxu0 %v628_v24  ;;  %1088 = vmatprep.mubr.bf16.mxu1 %v628_v24 }
  0x58   : > { %1028 = vmatpush1.bf16.msra.mxu0 %v8024_v10  ;;  %1071 = vmatpush1.bf16.msra.mxu1 %v8027_v11 }
  0x59   : > { %1029 = vmatprep.subr.bf16.mxu0 %v8032_v12  ;;  %1072 = vmatprep.subr.bf16.mxu1 %v8035_v13 }
  0x5c   : > { %1030 = vmatpush1.bf16.msra.mxu0 %v8030_v14  ;;  %1073 = vmatpush1.bf16.msra.mxu1 %v8033_v15 }
  0x5d   : > { %1031 = vmatprep.subr.bf16.mxu0 %v8038_v18  ;;  %1074 = vmatprep.subr.bf16.mxu1 %v8041_v3 }
  0x60   : > { %1032 = vmatpush1.bf16.msra.mxu0 %v8036_v22  ;;  %1075 = vmatpush1.bf16.msra.mxu1 %v8039_v23  ;;  %v1112_v22 = vunpack.c.l.s4 %v9427_v21  ;;  %v1114_v23 = vlaneseq }
  0x61   : > { %1033 = vmatprep.subr.bf16.mxu0 %v8044_v25  ;;  %1076 = vmatprep.subr.bf16.mxu1 %v8047_v26 }
  0x62   : > { %v1113_v24 = vunpack.c.0.s8 %v1112_v22  ;;  %v9907_v25 = vshrl.u32 %v1114_v23, 7  ;;  %v4028_v26 = vand.u32 127, %v1114_v23 }
  0x64   : > { %1034 = vmatpush1.bf16.msra.mxu0 %v8042_v27  ;;  %1077 = vmatpush1.bf16.msra.mxu1 %v8045_v28  ;;  %16607 = vst [vmem:[#allocation36_spill] sm:$0xff] %v9907_v25 }
  0x65   : > { %1035 = vmatprep.subr.bf16.mxu0 %v8050_v29  ;;  %1078 = vmatprep.subr.bf16.mxu1 %v8053_v30  ;;  %v9910_v29 = vsub.s32 %v1113_v24, %v9907_v25 }
  0x68   : > { %1036 = vmatpush1.bf16.msra.mxu0 %v8048_v31  ;;  %1079 = vmatpush1.bf16.msra.mxu1 %v8051_v32  ;;  %v9913_v31 = vsub.s32 %v4028_v26, %v9907_v25  ;;  %v4033_v32 = vadd.s32 4294967288, %v4028_v26 }
  0x69   : > { %1037 = vmatprep.subr.bf16.mxu0 %v8056_v33  ;;  %1080 = vmatprep.subr.bf16.mxu1 %v8059_v34  ;;  %v4040_v33 = vadd.s32 4294967280, %v4028_v26  ;;  %v4047_v34 = vadd.s32 4294967272, %v4028_v26 }
  0x6a   : > { %16608 = vst [vmem:[#allocation37_spill] sm:$0xff] %v9913_v31 }
  0x6c   : > { %1038 = vmatpush1.bf16.msra.mxu0 %v8054_v35  ;;  %1081 = vmatpush1.bf16.msra.mxu1 %v8057_v36 }
  0x6d   : > { %1039 = vmatprep.subr.bf16.mxu0 %v8062_v37  ;;  %1082 = vmatprep.subr.bf16.mxu1 %v8065_v38 }
  0x70   : > { %1040 = vmatpush1.bf16.msra.mxu0 %v8060_v39  ;;  %1083 = vmatpush1.bf16.msra.mxu1 %v8063_v40 }
  0x71   : > { %1041 = vmatprep.subr.bf16.mxu0 %v8068_v41  ;;  %1084 = vmatprep.subr.bf16.mxu1 %v8071_v42  ;;  %v4054_v42 = vadd.s32 4294967264, %v4028_v26 }
  0x74   : > { %1042 = vmatpush1.bf16.msra.mxu0 %v8066_v43  ;;  %1085 = vmatpush1.bf16.msra.mxu1 %v8069_v44  ;;  %v4061_v43 = vadd.s32 4294967256, %v4028_v26  ;;  %v4068_v44 = vadd.s32 4294967248, %v4028_v26 }
  0x75   : > { %1043 = vmatprep.subr.bf16.mxu0 %v8074_v45  ;;  %1086 = vmatprep.subr.bf16.mxu1 %v8077_v46  ;;  %v4075_v45 = vadd.s32 4294967240, %v4028_v26 }
  0x78   : > { %1044 = vmatpush1.bf16.msra.mxu0 %v8072_v47  ;;  %1087 = vmatpush1.bf16.msra.mxu1 %v8075_v48 }
  0x7b   : > { %1046 = vmatmul.mubr.bf16.vlgmr.msra.gmra.mrb[16].mxu0 %v627_v51  ;;  %1089 = vmatmul.mubr.bf16.vlgmr.msra.gmra.mrb[16].mxu1 %v627_v51 }
 0x10e   : > { %v9843_v53 = vpop.f32.mrb[0].mxu0  ;;  %v9845_v54 = vpop.f32.mrb[0].mxu1 }
 0x10f   : > { %16577 = vst [vmem:[#allocation6_spill] sm:$0xff] %v9843_v53  ;;  %16578 = vst [vmem:[#allocation7_spill] sm:$0xff] %v9845_v54  ;;  %v9847_v55 = vpop.f32.mrb[1].mxu0  ;;  %v9849_v56 = vpop.f32.mrb[1].mxu1 }
 0x110   : > { %16579 = vst [vmem:[#allocation8_spill] sm:$0xff] %v9847_v55  ;;  %16580 = vst [vmem:[#allocation9_spill] sm:$0xff] %v9849_v56  ;;  %v9851_v57 = vpop.f32.mrb[2].mxu0  ;;  %v9853_v58 = vpop.f32.mrb[2].mxu1 }
 0x111   : > { %16581 = vst [vmem:[#allocation10_spill] sm:$0xff] %v9851_v57  ;;  %16582 = vst [vmem:[#allocation11_spill] sm:$0xff] %v9853_v58  ;;  %v9855_v59 = vpop.f32.mrb[3].mxu0  ;;  %v9857_v60 = vpop.f32.mrb[3].mxu1 }
 0x112   : > { %16583 = vst [vmem:[#allocation12_spill] sm:$0xff] %v9855_v59  ;;  %16584 = vst [vmem:[#allocation13_spill] sm:$0xff] %v9857_v60 }
 0x116   : > { %v9859_v61 = vpop.f32.mrb[4].mxu0  ;;  %v9861_v62 = vpop.f32.mrb[4].mxu1 }
 0x117   : > { %16585 = vst [vmem:[#allocation14_spill] sm:$0xff] %v9859_v61  ;;  %16586 = vst [vmem:[#allocation15_spill] sm:$0xff] %v9861_v62  ;;  %v9863_v63 = vpop.f32.mrb[5].mxu0  ;;  %v9865_v0 = vpop.f32.mrb[5].mxu1 }
 0x118   : > { %16587 = vst [vmem:[#allocation16_spill] sm:$0xff] %v9863_v63  ;;  %16588 = vst [vmem:[#allocation17_spill] sm:$0xff] %v9865_v0  ;;  %v9867_v1 = vpop.f32.mrb[6].mxu0  ;;  %v9869_v2 = vpop.f32.mrb[6].mxu1 }
 0x119   : > { %16589 = vst [vmem:[#allocation18_spill] sm:$0xff] %v9867_v1  ;;  %16590 = vst [vmem:[#allocation19_spill] sm:$0xff] %v9869_v2  ;;  %v9871_v4 = vpop.f32.mrb[7].mxu0  ;;  %v9873_v5 = vpop.f32.mrb[7].mxu1 }
 0x11a   : > { %16591 = vst [vmem:[#allocation20_spill] sm:$0xff] %v9871_v4  ;;  %16592 = vst [vmem:[#allocation21_spill] sm:$0xff] %v9873_v5 }
 0x11e   : > { %v9875_v6 = vpop.f32.mrb[8].mxu0  ;;  %v9877_v7 = vpop.f32.mrb[8].mxu1 }
 0x11f   : > { %16593 = vst [vmem:[#allocation22_spill] sm:$0xff] %v9875_v6  ;;  %16594 = vst [vmem:[#allocation23_spill] sm:$0xff] %v9877_v7  ;;  %v9879_v8 = vpop.f32.mrb[9].mxu0  ;;  %v9881_v9 = vpop.f32.mrb[9].mxu1 }
 0x120   : > { %16595 = vst [vmem:[#allocation24_spill] sm:$0xff] %v9879_v8  ;;  %16596 = vst [vmem:[#allocation25_spill] sm:$0xff] %v9881_v9  ;;  %v9883_v10 = vpop.f32.mrb[10].mxu0  ;;  %v9885_v11 = vpop.f32.mrb[10].mxu1 }
 0x121   : > { %16597 = vst [vmem:[#allocation26_spill] sm:$0xff] %v9883_v10  ;;  %16598 = vst [vmem:[#allocation27_spill] sm:$0xff] %v9885_v11  ;;  %v9887_v12 = vpop.f32.mrb[11].mxu0  ;;  %v9889_v13 = vpop.f32.mrb[11].mxu1 }
 0x122   : > { %16599 = vst [vmem:[#allocation28_spill] sm:$0xff] %v9887_v12  ;;  %16600 = vst [vmem:[#allocation29_spill] sm:$0xff] %v9889_v13 }
 0x126   : > { %v9891_v14 = vpop.f32.mrb[12].mxu0  ;;  %v9893_v15 = vpop.f32.mrb[12].mxu1 }
 0x127   : > { %16601 = vst [vmem:[#allocation30_spill] sm:$0xff] %v9891_v14  ;;  %16602 = vst [vmem:[#allocation31_spill] sm:$0xff] %v9893_v15  ;;  %v9895_v16 = vpop.f32.mrb[13].mxu0  ;;  %v9897_v17 = vpop.f32.mrb[13].mxu1 }
 0x128   : > { %16603 = vst [vmem:[#allocation32_spill] sm:$0xff] %v9895_v16  ;;  %16604 = vst [vmem:[#allocation33_spill] sm:$0xff] %v9897_v17  ;;  %v9899_v18 = vpop.f32.mrb[14].mxu0  ;;  %v9901_v3 = vpop.f32.mrb[14].mxu1 }
 0x129   : > { %16605 = vst [vmem:[#allocation34_spill] sm:$0xff] %v9899_v18  ;;  %v9903_v19 = vpop.f32.mrb[15].mxu0  ;;  %v9905_v20 = vpop.f32.mrb[15].mxu1 }
 0x12a   : > { %16606 = vst [vmem:[#allocation35_spill] sm:$0xff] %v9905_v20 }
 0x14e   : > { %v1047_v27 = vpop.f32.mrb[16].mxu0  ;;  %v1090_v28 = vpop.f32.mrb[16].mxu1 }
 0x14f   : > { %v1049_v30 = vpop.f32.mrb[17].mxu0  ;;  %v1092_v35 = vpop.f32.mrb[17].mxu1 }
 0x150   : > { %v1107_v36 = vcombine.low %v1047_v27, %v1049_v30  ;;  %v1108_v37 = vcombine.high %v1047_v27, %v1049_v30  ;;  %v1109_v38 = vcombine.low %v1090_v28, %v1092_v35  ;;  %v1110_v39 = vcombine.high %v1090_v28, %v1092_v35  ;;  %v1051_v40 = vpop.f32.mrb[18].mxu0  ;;  %v1094_v41 = vpop.f32.mrb[18].mxu1 }
 0x151   : > { %v1053_v46 = vpop.f32.mrb[19].mxu0  ;;  %v1096_v47 = vpop.f32.mrb[19].mxu1 }
 0x152   : > { %v1117_v48 = vrot.slane %v1107_v36, %v9910_v29  ;;  %v1124_v49 = vrot.slane %v1108_v37, %v9910_v29  ;;  %v1131_v50 = vrot.slane %v1109_v38, %v9910_v29  ;;  %v1138_v51 = vrot.slane %v1110_v39, %v9910_v29 }
 0x153   : > { %v1175_v52 = vcombine.low %v1051_v40, %v1053_v46  ;;  %v1176_v21 = vcombine.high %v1051_v40, %v1053_v46  ;;  %v1177_v22 = vcombine.low %v1094_v41, %v1096_v47  ;;  %v1178_v23 = vcombine.high %v1094_v41, %v1096_v47 }
 0x154   : > { %v1139_v24 = vcombine.low %v1117_v48, %v1131_v50  ;;  %v1140_v27 = vcombine.high %v1117_v48, %v1131_v50  ;;  %v1141_v28 = vcombine.low %v1124_v49, %v1138_v51  ;;  %v1142_v30 = vcombine.high %v1124_v49, %v1138_v51 }
 0x155   : > { %v1185_v26 = vrot.slane %v1175_v52, %v9910_v29  ;;  %v1192_v35 = vrot.slane %v1176_v21, %v9910_v29  ;;  %v1199_v36 = vrot.slane %v1177_v22, %v9910_v29  ;;  %v1206_v37 = vrot.slane %v1178_v23, %v9910_v29  ;;  %v2587_v22 = vld [vmem:[%s16162_s4] sm:$0xf] }
 0x156   : > { %v1149_v38 = vrot.slane %v1139_v24, %v9910_v29  ;;  %v1156_v39 = vrot.slane %v1141_v28, %v9910_v29  ;;  %v1163_v40 = vrot.slane %v1140_v27, %v9910_v29  ;;  %v1170_v41 = vrot.slane %v1142_v30, %v9910_v29 }
 0x157   : > { %v1207_v46 = vcombine.low %v1185_v26, %v1199_v36  ;;  %v1208_v47 = vcombine.high %v1185_v26, %v1199_v36  ;;  %v1209_v48 = vcombine.low %v1192_v35, %v1206_v37  ;;  %v1210_v49 = vcombine.high %v1192_v35, %v1206_v37 }
 0x158   : > { %v9928_v50 = vsub.s32 %v4033_v32, %v9907_v25  ;;  %v9931_v51 = vsub.s32 %v4040_v33, %v9907_v25  ;;  %v9934_v52 = vsub.s32 %v4047_v34, %v9907_v25  ;;  %v9937_v21 = vsub.s32 0, %v9907_v25 }
 0x159   : > { %v9943_v23 = vsub.s32 %v4054_v42, %v9907_v25  ;;  %v9946_v24 = vsub.s32 1, %v9907_v25  ;;  %v9949_v32 = vsub.s32 2, %v9907_v25  ;;  %v9952_v33 = vsub.s32 3, %v9907_v25 }
 0x15a   : > { %16609 = vst [vmem:[#allocation38_spill] sm:$0xff] %v9928_v50  ;;  %16610 = vst [vmem:[#allocation39_spill] sm:$0xff] %v9931_v51  ;;  %v9955_v34 = vsub.s32 %v4061_v43, %v9907_v25  ;;  %v9958_v27 = vsub.s32 %v4068_v44, %v9907_v25  ;;  %v9961_v28 = vsub.s32 %v4075_v45, %v9907_v25 }
 0x15b   : > { %16611 = vst [vmem:[#allocation40_spill] sm:$0xff] %v9934_v52  ;;  %16612 = vst [vmem:[#allocation41_spill] sm:$0xff] %v9937_v21  ;;  %v1171_v42 = vcombine.high %v1149_v38, %v1149_v38  ;;  %v1173_v30 = vcombine.high %v1163_v40, %v1163_v40  ;;  %v9964_v26 = vrot.slane %v2587_v22, %v9937_v21 }
 0x15c   : > { %16613 = vst [vmem:[#allocation42_spill] sm:$0xff] %v9943_v23  ;;  %16614 = vst [vmem:[#allocation43_spill] sm:$0xff] %v9946_v24  ;;  %v9967_v35 = vrot.slane %v2587_v22, %v9946_v24  ;;  %v9970_v36 = vrot.slane %v2587_v22, %v9949_v32  ;;  %v1172_v37 = vcombine.high %v1156_v39, %v1156_v39 }
 0x15d   : > { %16615 = vst [vmem:[#allocation44_spill] sm:$0xff] %v9949_v32  ;;  %16616 = vst [vmem:[#allocation45_spill] sm:$0xff] %v9952_v33  ;;  %v1174_v43 = vcombine.high %v1170_v41, %v1170_v41  ;;  %v9976_v44 = vrot.slane %v2587_v22, %v9952_v33  ;;  %v9979_v45 = vrot.slane %v1149_v38, %v9946_v24 }
 0x15e   : > { %16617 = vst [vmem:[#allocation46_spill] sm:$0xff] %v9955_v34  ;;  %16618 = vst [vmem:[#allocation47_spill] sm:$0xff] %v9958_v27  ;;  %v9973_v34 = vrot.slane %v1149_v38, %v9937_v21  ;;  %v9982_v25 = vrot.slane %v1149_v38, %v9949_v32  ;;  %v9985_v27 = vrot.slane %v1149_v38, %v9952_v33 }
 0x15f   : > { %16619 = vst [vmem:[#allocation48_spill] sm:$0xff] %v9961_v28  ;;  %16620 = vst [vmem:[#allocation49_spill] sm:$0xff] %v9970_v36  ;;  %v9988_v28 = vrot.slane %v1163_v40, %v9937_v21  ;;  %v9991_v23 = vrot.slane %v1163_v40, %v9946_v24  ;;  %v9994_v52 = vrot.slane %v1163_v40, %v9949_v32 }
 0x160   : > { %16621 = vst [vmem:[#allocation50_spill] sm:$0xff] %v9976_v44  ;;  %v9997_v22 = vrot.slane %v1163_v40, %v9952_v33  ;;  %v10000_v51 = vrot.slane %v1171_v42, %v9937_v21  ;;  %v10003_v50 = vrot.slane %v1171_v42, %v9946_v24  ;;  %v10006_v38 = vrot.slane %v1171_v42, %v9949_v32 }
 0x161   : > { %v10009_v31 = vrot.slane %v1171_v42, %v9952_v33  ;;  %v10012_v44 = vrot.slane %v1173_v30, %v9937_v21  ;;  %v10015_v36 = vrot.slane %v1173_v30, %v9946_v24  ;;  %v10018_v40 = vrot.slane %v1173_v30, %v9949_v32 }
 0x162   : > { %16622 = vst [vmem:[#allocation51_spill] sm:$0xff] %v10000_v51  ;;  %16623 = vst [vmem:[#allocation52_spill] sm:$0xff] %v10003_v50  ;;  %v10021_v51 = vrot.slane %v1173_v30, %v9952_v33  ;;  %v10024_v50 = vrot.slane %v1156_v39, %v9937_v21  ;;  %v10028_v42 = vrot.slane %v1209_v48, %v9910_v29 }
 0x163   : > { %16624 = vst [vmem:[#allocation53_spill] sm:$0xff] %v10006_v38  ;;  %16625 = vst [vmem:[#allocation54_spill] sm:$0xff] %v10009_v31  ;;  %v1217_v38 = vrot.slane %v1207_v46, %v9910_v29  ;;  %v1231_v31 = vrot.slane %v1208_v47, %v9910_v29  ;;  %v1572_v30 = vmul.f32 %v9979_v45, %v9863_v63 }
 0x164   : > { %16626 = vst [vmem:[#allocation55_spill] sm:$0xff] %v10012_v44  ;;  %16627 = vst [vmem:[#allocation56_spill] sm:$0xff] %v10015_v36  ;;  %v10032_v44 = vrot.slane %v1210_v49, %v9910_v29  ;;  %v1571_v36 = vmul.f32 %v9973_v34, %v9859_v61  ;;  %v1574_v46 = vmul.f32 %v9985_v27, %v9865_v0 }
 0x165   : > { %16628 = vst [vmem:[#allocation57_spill] sm:$0xff] %v10018_v40  ;;  %16629 = vst [vmem:[#allocation58_spill] sm:$0xff] %v10021_v51  ;;  %v1573_v51 = vmul.f32 %v9982_v25, %v9861_v62  ;;  %v10043_v48 = vrot.slane %v1156_v39, %v9946_v24  ;;  %v10046_v47 = vrot.slane %v1156_v39, %v9949_v32 }
 0x166   : > { %16630 = vst [vmem:[#allocation59_spill] sm:$0xff] %v10024_v50  ;;  %16631 = vst [vmem:[#allocation60_spill] sm:$0xff] %v10028_v42  ;;  %v10049_v29 = vrot.slane %v1156_v39, %v9952_v33  ;;  %v10052_v49 = vrot.slane %v1170_v41, %v9937_v21  ;;  %v10055_v40 = vrot.slane %v1170_v41, %v9946_v24  ;;  %8078 = vtanh.f32 %v1571_v36 }
 0x167   : > { %16632 = vst [vmem:[#allocation61_spill] sm:$0xff] %v10032_v44  ;;  %16633 = vst [vmem:[#allocation62_spill] sm:$0xff] %v10043_v48  ;;  %v10058_v50 = vrot.slane %v1170_v41, %v9949_v32  ;;  %v10061_v0 = vrot.slane %v1170_v41, %v9952_v33  ;;  %v10064_v48 = vrot.slane %v1172_v37, %v9937_v21  ;;  %8080 = vtanh.f32 %v1572_v30 }
 0x168   : > { %16634 = vst [vmem:[#allocation63_spill] sm:$0xff] %v10046_v47  ;;  %16635 = vst [vmem:[#allocation64_spill] sm:$0xff] %v10049_v29  ;;  %v10067_v47 = vrot.slane %v1172_v37, %v9946_v24  ;;  %v10070_v39 = vrot.slane %v1172_v37, %v9949_v32  ;;  %v1239_v29 = vcombine.high %v1217_v38, %v1217_v38  ;;  %8082 = vtanh.f32 %v1573_v51 }
 0x169   : > { %16636 = vst [vmem:[#allocation65_spill] sm:$0xff] %v10052_v49  ;;  %16637 = vst [vmem:[#allocation66_spill] sm:$0xff] %v10055_v40  ;;  %v10073_v49 = vrot.slane %v1172_v37, %v9952_v33  ;;  %v10076_v40 = vrot.slane %v1174_v43, %v9937_v21  ;;  %v10082_v41 = vrot.slane %v1174_v43, %v9949_v32  ;;  %8084 = vtanh.f32 %v1574_v46 }
 0x16a   : > { %16638 = vst [vmem:[#allocation67_spill] sm:$0xff] %v10058_v50  ;;  %16639 = vst [vmem:[#allocation68_spill] sm:$0xff] %v10061_v0  ;;  %v10079_v50 = vrot.slane %v1174_v43, %v9946_v24  ;;  %v10085_v0 = vrot.slane %v1174_v43, %v9952_v33  ;;  %v10093_v37 = vcombine.high %v10032_v44, %v10032_v44 }
 0x16b   : > { %16640 = vst [vmem:[#allocation69_spill] sm:$0xff] %v10064_v48  ;;  %16641 = vst [vmem:[#allocation70_spill] sm:$0xff] %v10067_v47  ;;  %v1241_v48 = vcombine.high %v1231_v31, %v1231_v31  ;;  %v10105_v43 = vrot.slane %v1217_v38, %v9952_v33  ;;  %v10117_v44 = vrot.slane %v1231_v31, %v9952_v33 }
 0x16c   : > { %16642 = vst [vmem:[#allocation71_spill] sm:$0xff] %v10070_v39  ;;  %16643 = vst [vmem:[#allocation72_spill] sm:$0xff] %v10073_v49  ;;  %v10089_v39 = vcombine.high %v10028_v42, %v10028_v42  ;;  %v1577_v36 = vmul.f32 %v9982_v25, %v9869_v2  ;;  %v1568_v30 = vmul.f32 %v9979_v45, %v9855_v59 }
 0x16d   : > { %16644 = vst [vmem:[#allocation73_spill] sm:$0xff] %v10076_v40  ;;  %16645 = vst [vmem:[#allocation74_spill] sm:$0xff] %v10079_v50  ;;  %v10096_v40 = vrot.slane %v1217_v38, %v9937_v21  ;;  %v10099_v50 = vrot.slane %v1217_v38, %v9946_v24  ;;  %v1583_v51 = vmul.f32 %v9973_v34, %v9883_v10 }
 0x16e   : > { %16646 = vst [vmem:[#allocation75_spill] sm:$0xff] %v10082_v41  ;;  %16647 = vst [vmem:[#allocation76_spill] sm:$0xff] %v10085_v0  ;;  %v10102_v41 = vrot.slane %v1217_v38, %v9949_v32  ;;  %v10108_v0 = vrot.slane %v1231_v31, %v9937_v21  ;;  %v10126_v38 = vrot.slane %v1239_v29, %v9949_v32 }
 0x16f   : > { %16648 = vst [vmem:[#allocation77_spill] sm:$0xff] %v10089_v39  ;;  %16649 = vst [vmem:[#allocation78_spill] sm:$0xff] %v10093_v37  ;;  %v10111_v39 = vrot.slane %v1231_v31, %v9946_v24  ;;  %v10114_v37 = vrot.slane %v1231_v31, %v9949_v32  ;;  %v10138_v31 = vrot.slane %v1241_v48, %v9949_v32 }
 0x170   : > { %16650 = vst [vmem:[#allocation79_spill] sm:$0xff] %v10096_v40  ;;  %16651 = vst [vmem:[#allocation80_spill] sm:$0xff] %v10099_v50  ;;  %v10120_v50 = vrot.slane %v1239_v29, %v9937_v21  ;;  %v10181_v46 = vmul.f32 %v9985_v27, %v9889_v13  ;;  %v10185_v32 = vmul.f32 %v9973_v34, %v9875_v6 }
 0x171   : > { %16652 = vst [vmem:[#allocation81_spill] sm:$0xff] %v10102_v41  ;;  %16653 = vst [vmem:[#allocation82_spill] sm:$0xff] %v10105_v43  ;;  %v10123_v41 = vrot.slane %v1239_v29, %v9946_v24  ;;  %v10205_v43 = vmul.f32 %v9979_v45, %v9903_v19  ;;  %v10213_v40 = vmul.f32 %v9985_v27, %v9905_v20 }
 0x172   : > { %16654 = vst [vmem:[#allocation83_spill] sm:$0xff] %v10108_v0  ;;  %16655 = vst [vmem:[#allocation84_spill] sm:$0xff] %v10111_v39  ;;  %v10129_v0 = vrot.slane %v1239_v29, %v9952_v33  ;;  %v10132_v39 = vrot.slane %v1241_v48, %v9937_v21  ;;  %v1563_v29 = vmul.f32 %v9973_v34, %v9843_v53 }
 0x173   : > { %16656 = vst [vmem:[#allocation85_spill] sm:$0xff] %v10114_v37  ;;  %16657 = vst [vmem:[#allocation86_spill] sm:$0xff] %v10117_v44  ;;  %v10135_v37 = vrot.slane %v1241_v48, %v9946_v24  ;;  %v1570_v44 = vmul.f32 %v9985_v27, %v9857_v60  ;;  %v10201_v24 = vmul.f32 %v9973_v34, %v9899_v18 }
 0x174   : > { %16658 = vst [vmem:[#allocation87_spill] sm:$0xff] %v10120_v50  ;;  %16659 = vst [vmem:[#allocation88_spill] sm:$0xff] %v10123_v41  ;;  %v10141_v50 = vrot.slane %v1241_v48, %v9952_v33  ;;  %v10145_v41 = vrot.slane %v10028_v42, %v9937_v21  ;;  %v1575_v48 = vmul.f32 %v9973_v34, %v9867_v1  ;;  %8086 = vtanh.f32 %v1563_v29 }
 0x175   : > { %16660 = vst [vmem:[#allocation89_spill] sm:$0xff] %v10126_v38  ;;  %16661 = vst [vmem:[#allocation90_spill] sm:$0xff] %v10129_v0  ;;  %v1578_v0 = vmul.f32 %v9985_v27, %v9873_v5  ;;  %v1567_v38 = vmul.f32 %v9973_v34, %v9851_v57  ;;  %v1584_v21 = vmul.f32 %v9979_v45, %v9887_v12 }
 0x176   : > { %16662 = vst [vmem:[#allocation91_spill] sm:$0xff] %v10132_v39  ;;  %16663 = vst [vmem:[#allocation92_spill] sm:$0xff] %v10135_v37  ;;  %v1564_v39 = vmul.f32 %v9979_v45, %v9847_v55  ;;  %v1565_v37 = vmul.f32 %v9982_v25, %v9845_v54  ;;  %v10177_v33 = vmul.f32 %v9982_v25, %v9885_v11 }
 0x177   : > { %16664 = vst [vmem:[#allocation93_spill] sm:$0xff] %v10138_v31  ;;  %16665 = vst [vmem:[#allocation94_spill] sm:$0xff] %v10141_v50  ;;  %v1566_v31 = vmul.f32 %v9985_v27, %v9849_v56  ;;  %v1576_v50 = vmul.f32 %v9979_v45, %v9871_v4  ;;  %v10189_v29 = vmul.f32 %v9979_v45, %v9879_v8 }
 0x178   : > { %16666 = vst [vmem:[#allocation95_spill] sm:$0xff] %v10145_v41  ;;  %v1569_v41 = vmul.f32 %v9982_v25, %v9853_v58  ;;  %8088 = vtanh.f32 %v1564_v39  ;;  %v10193_v42 = vmul.f32 %v9982_v25, %v9877_v7  ;;  %v10197_v39 = vmul.f32 %v9985_v27, %v9881_v9 }
 0x179   : > { %8090 = vtanh.f32 %v1565_v37  ;;  %v10209_v37 = vmul.f32 %v9982_v25, %v9901_v3  ;;  %v10217_v49 = vmul.f32 %v9973_v34, %v9891_v14  ;;  %v10225_v47 = vmul.f32 %v9982_v25, %v9893_v15 }
 0x17a   : > { %8092 = vtanh.f32 %v1566_v31  ;;  %v10221_v31 = vmul.f32 %v9979_v45, %v9895_v16  ;;  %v10237_v34 = vmul.f32 %v9991_v23, %v9855_v59  ;;  %v10241_v45 = vmul.f32 %v9994_v52, %v9853_v58 }
 0x17b   : > { %16667 = vst [vmem:[#allocation96_spill] sm:$0xff] %v10209_v37  ;;  %8094 = vtanh.f32 %v1575_v48  ;;  %16668 = vst [vmem:[#allocation97_spill] sm:$0xff] %v10217_v49  ;;  %v10229_v37 = vmul.f32 %v9985_v27, %v9897_v17  ;;  %v10233_v48 = vmul.f32 %v9988_v28, %v9851_v57  ;;  %v8079_v49 = vpop.eup %8078  ;;  %v10245_v25 = vmul.f32 %v9997_v22, %v9857_v60 }
 0x17c   : > { %8096 = vtanh.f32 %v1576_v50  ;;  %16670 = vst [vmem:[#allocation99_spill] sm:$0xff] %v10237_v34  ;;  %16671 = vst [vmem:[#allocation100_spill] sm:$0xff] %v10241_v45  ;;  %v10249_v50 = vmul.f32 %v9988_v28, %v9843_v53  ;;  %v8081_v27 = vpop.eup %8080  ;;  %v10254_v34 = vmul.f32 %v9991_v23, %v9847_v55 }
 0x17d   : > { %16669 = vst [vmem:[#allocation98_spill] sm:$0xff] %v10233_v48  ;;  %8098 = vtanh.f32 %v1577_v36  ;;  %16672 = vst [vmem:[#allocation101_spill] sm:$0xff] %v10245_v25  ;;  %v2617_v48 = vmul.f32 %v8079_v49, %v9964_v26  ;;  %v10258_v36 = vmul.f32 %v9994_v52, %v9845_v54  ;;  %v8083_v45 = vpop.eup %8082  ;;  %v2618_v60 = vmul.f32 %v8081_v27, %v9967_v35 }
 0x17e   : > { %16673 = vst [vmem:[#allocation102_spill] sm:$0xff] %v10249_v50  ;;  %8100 = vtanh.f32 %v1578_v0  ;;  %16674 = vst [vmem:[#allocation103_spill] sm:$0xff] %v10254_v34  ;;  %v10263_v25 = vmul.f32 %v9997_v22, %v9849_v56  ;;  %v10267_v49 = vmul.f32 %v9988_v28, %v9867_v1  ;;  %v8085_v0 = vpop.eup %8084  ;;  %v16678_v50 = vld [vmem:[#allocation49_spill] sm:$0xff]  ;;  %v10272_v34 = vmul.f32 %v9991_v23, %v9871_v4 }
 0x17f   : > { %16675 = vst [vmem:[#allocation104_spill] sm:$0xff] %v10258_v36  ;;  %8102 = vtanh.f32 %v1567_v38  ;;  %v2619_v55 = vmul.f32 %v8083_v45, %v16678_v50  ;;  %v10276_v27 = vmul.f32 %v9994_v52, %v9869_v2  ;;  %v8087_v38 = vpop.eup %8086  ;;  %v16681_v36 = vld [vmem:[#allocation50_spill] sm:$0xff]  ;;  %v10286_v45 = vmul.f32 %v9988_v28, %v9859_v61 }
 0x180   : > { %16676 = vst [vmem:[#allocation105_spill] sm:$0xff] %v10263_v25  ;;  %16677 = vst [vmem:[#allocation106_spill] sm:$0xff] %v10267_v49  ;;  %8104 = vtanh.f32 %v1568_v30  ;;  %v2620_v56 = vmul.f32 %v8085_v0, %v16681_v36  ;;  %v3131_v25 = vadd.f32 %v2618_v60, %v2617_v48  ;;  %v10281_v49 = vmul.f32 %v9997_v22, %v9873_v5 }
 0x181   : > { %16679 = vst [vmem:[#allocation49_spill] sm:$0xff] %v10272_v34  ;;  %16680 = vst [vmem:[#allocation107_spill] sm:$0xff] %v10276_v27  ;;  %8106 = vtanh.f32 %v1569_v41  ;;  %v2609_v30 = vmul.f32 %v8087_v38, %v9964_v26  ;;  %v10290_v27 = vmul.f32 %v9991_v23, %v9863_v63  ;;  %v10295_v41 = vmul.f32 %v9994_v52, %v9861_v62  ;;  %v16686_v38 = vld [vmem:[#allocation17_spill] sm:$0xff] }
 0x182   : > { %16682 = vst [vmem:[#allocation50_spill] sm:$0xff] %v10281_v49  ;;  %v8089_v1 = vpop.eup %8088  ;;  %8108 = vtanh.f32 %v1570_v44  ;;  %16683 = vst [vmem:[#allocation108_spill] sm:$0xff] %v10286_v45  ;;  %v3132_v0 = vadd.f32 %v3131_v25, %v2619_v55  ;;  %v10300_v45 = vmul.f32 %v9997_v22, %v16686_v38 }
 0x183   : > { %16684 = vst [vmem:[#allocation109_spill] sm:$0xff] %v10290_v27  ;;  %v8091_v34 = vpop.eup %8090  ;;  %v2610_v60 = vmul.f32 %v8089_v1, %v9967_v35  ;;  %8110 = vtanh.f32 %v1583_v51  ;;  %16685 = vst [vmem:[#allocation110_spill] sm:$0xff] %v10295_v41  ;;  %v10304_v27 = vmul.f32 %v9988_v28, %v9883_v10 }
 0x184   : > { %v8093_v48 = vpop.eup %8092  ;;  %v2611_v44 = vmul.f32 %v8091_v34, %v16678_v50  ;;  %8112 = vtanh.f32 %v1584_v21  ;;  %v3133_v25 = vadd.f32 %v3132_v0, %v2620_v56  ;;  %v10312_v21 = vmul.f32 %v9991_v23, %v9887_v12 }
 0x185   : > { %16687 = vst [vmem:[#allocation111_spill] sm:$0xff] %v10304_v27  ;;  %v8095_v55 = vpop.eup %8094  ;;  %v2612_v1 = vmul.f32 %v8093_v48, %v16681_v36  ;;  %v3121_v51 = vadd.f32 %v2610_v60, %v2609_v30  ;;  %8114 = vtanh.f32 %v10177_v33  ;;  %v10316_v34 = vmul.f32 %v9994_v52, %v9885_v11 }
 0x186   : > { %v8097_v41 = vpop.eup %8096  ;;  %v2621_v49 = vmul.f32 %v8095_v55, %v9964_v26  ;;  %8116 = vtanh.f32 %v10181_v46  ;;  %3134 = vadd.xlane.f32.xlu1 %v3133_v25  ;;  %v10322_v33 = vmul.f32 %v9997_v22, %v9889_v13  ;;  %v10328_v60 = vmul.f32 %v9988_v28, %v9875_v6 }
 0x187   : > { %v8099_v27 = vpop.eup %8098  ;;  %v3122_v56 = vadd.f32 %v3121_v51, %v2611_v44  ;;  %v2622_v30 = vmul.f32 %v8097_v41, %v9967_v35  ;;  %8118 = vtanh.f32 %v10185_v32  ;;  %v10332_v48 = vmul.f32 %v9991_v23, %v9879_v8 }
 0x188   : > { %v8101_v46 = vpop.eup %8100  ;;  %v2623_v0 = vmul.f32 %v8099_v27, %v16678_v50  ;;  %8120 = vtanh.f32 %v10189_v29  ;;  %v10340_v29 = vmul.f32 %v9994_v52, %v9877_v7  ;;  %v10344_v51 = vmul.f32 %v9997_v22, %v9881_v9 }
 0x189   : > { %16688 = vst [vmem:[#allocation112_spill] sm:$0xff] %v10332_v48  ;;  %v8103_v41 = vpop.eup %8102  ;;  %v3123_v44 = vadd.f32 %v3122_v56, %v2612_v1  ;;  %v2624_v32 = vmul.f32 %v8101_v46, %v16681_v36  ;;  %v3136_v55 = vadd.f32 %v2622_v30, %v2621_v49  ;;  %8122 = vtanh.f32 %v10193_v42 }
 0x18a   : > { %v8105_v25 = vpop.eup %8104  ;;  %v2613_v27 = vmul.f32 %v8103_v41, %v9964_v26  ;;  %8124 = vtanh.f32 %v10197_v39  ;;  %v10350_v42 = vmul.f32 %v9988_v28, %v9899_v18  ;;  %v10356_v30 = vmul.f32 %v9991_v23, %v9903_v19 }
 0x18b   : > { %v8107_v48 = vpop.eup %8106  ;;  %3124 = vadd.xlane.f32.xlu0 %v3123_v44  ;;  %v3137_v1 = vadd.f32 %v3136_v55, %v2623_v0  ;;  %v2614_v49 = vmul.f32 %v8105_v25, %v9967_v35  ;;  %8126 = vtanh.f32 %v10201_v24  ;;  %v10360_v46 = vmul.f32 %v9994_v52, %v9901_v3  ;;  %v16691_v55 = vld [vmem:[#allocation96_spill] sm:$0xff] }
 0x18c   : > { %v8109_v39 = vpop.eup %8108  ;;  %v2615_v56 = vmul.f32 %v8107_v48, %v16678_v50  ;;  %8128 = vtanh.f32 %v10205_v43  ;;  %16689 = vst [vmem:[#allocation113_spill] sm:$0xff] %v10356_v30  ;;  %v10368_v43 = vmul.f32 %v9997_v22, %v9905_v20  ;;  %v10372_v30 = vmul.f32 %v9988_v28, %v9891_v14 }
 0x18d   : > { %16690 = vst [vmem:[#allocation114_spill] sm:$0xff] %v10360_v46  ;;  %v8111_v0 = vpop.eup %8110  ;;  %v3138_v41 = vadd.f32 %v3137_v1, %v2624_v32  ;;  %v2616_v24 = vmul.f32 %v8109_v39, %v16681_v36  ;;  %v3126_v44 = vadd.f32 %v2614_v49, %v2613_v27  ;;  %8130 = vtanh.f32 %v16691_v55  ;;  %v16693_v1 = vld [vmem:[#allocation97_spill] sm:$0xff] }
 0x18e   : > { %v8113_v25 = vpop.eup %8112  ;;  %v2629_v48 = vmul.f32 %v8111_v0, %v9964_v26  ;;  %8132 = vtanh.f32 %v10213_v40  ;;  %16692 = vst [vmem:[#allocation96_spill] sm:$0xff] %v10372_v30  ;;  %v10378_v49 = vmul.f32 %v9991_v23, %v9895_v16  ;;  %v10384_v28 = vmul.f32 %v9994_v52, %v9893_v15 }
 0x18f   : > { %v8115_v46 = vpop.eup %8114  ;;  %3139 = vadd.xlane.f32.xlu1 %v3138_v41  ;;  %v3127_v32 = vadd.f32 %v3126_v44, %v2615_v56  ;;  %v2630_v27 = vmul.f32 %v8113_v25, %v9967_v35  ;;  %8134 = vtanh.f32 %v16693_v1  ;;  %v10388_v56 = vmul.f32 %v9997_v22, %v9897_v17  ;;  %v16699_v25 = vld [vmem:[#allocation62_spill] sm:$0xff] }
 0x190   : > { %16694 = vst [vmem:[#allocation97_spill] sm:$0xff] %v10378_v49  ;;  %v8117_v40 = vpop.eup %8116  ;;  %v2631_v39 = vmul.f32 %v8115_v46, %v16678_v50  ;;  %8136 = vtanh.f32 %v10221_v31  ;;  %16695 = vst [vmem:[#allocation115_spill] sm:$0xff] %v10384_v28  ;;  %v16697_v31 = vld [vmem:[#allocation59_spill] sm:$0xff]  ;;  %v10400_v22 = vmul.f32 %v16699_v25, %v9855_v59  ;;  %v16710_v49 = vld [vmem:[#allocation101_spill] sm:$0xff] }
 0x191   : > { %16696 = vst [vmem:[#allocation116_spill] sm:$0xff] %v10388_v56  ;;  %v8119_v0 = vpop.eup %8118  ;;  %v3128_v41 = vadd.f32 %v3127_v32, %v2616_v24  ;;  %v2632_v44 = vmul.f32 %v8117_v40, %v16681_v36  ;;  %v3146_v55 = vadd.f32 %v2630_v27, %v2629_v48  ;;  %8138 = vtanh.f32 %v10225_v47  ;;  %v16701_v32 = vld [vmem:[#allocation98_spill] sm:$0xff]  ;;  %v16702_v47 = vld [vmem:[#allocation63_spill] sm:$0xff]  ;;  %v16706_v56 = vld [vmem:[#allocation64_spill] sm:$0xff] }
 0x192   : > { %v8121_v23 = vpop.eup %8120  ;;  %v2625_v46 = vmul.f32 %v8119_v0, %v9964_v26  ;;  %8140 = vtanh.f32 %v10229_v37  ;;  %v10396_v52 = vmul.f32 %v16697_v31, %v9851_v57  ;;  %16700 = vst [vmem:[#allocation62_spill] sm:$0xff] %v10400_v22  ;;  %v10406_v27 = vmul.f32 %v16702_v47, %v9853_v58  ;;  %v16704_v0 = vld [vmem:[#allocation99_spill] sm:$0xff]  ;;  %v16709_v22 = vld [vmem:[#allocation100_spill] sm:$0xff] }
 0x193   : > { %v8123_v1 = vpop.eup %8122  ;;  %3129 = vadd.xlane.f32.xlu0 %v3128_v41  ;;  %v3147_v24 = vadd.f32 %v3146_v55, %v2631_v39  ;;  %v2626_v48 = vmul.f32 %v8121_v23, %v9967_v35  ;;  %8142 = vtanh.f32 %v16701_v32  ;;  %v10416_v39 = vmul.f32 %v16697_v31, %v9843_v53 }
 0x194   : > { %16698 = vst [vmem:[#allocation59_spill] sm:$0xff] %v10396_v52  ;;  %16703 = vst [vmem:[#allocation98_spill] sm:$0xff] %v10406_v27  ;;  %v8125_v37 = vpop.eup %8124  ;;  %v2627_v40 = vmul.f32 %v8123_v1, %v16678_v50  ;;  %8144 = vtanh.f32 %v16704_v0  ;;  %v16705_v52 = vld [vmem:[#allocation13_spill] sm:$0xff]  ;;  %v16711_v0 = vld [vmem:[#allocation8_spill] sm:$0xff] }
 0x195   : > { %v10412_v28 = vmul.f32 %v16706_v56, %v16705_v52  ;;  %16708 = vst [vmem:[#allocation99_spill] sm:$0xff] %v10416_v39  ;;  %v8127_v41 = vpop.eup %8126  ;;  %v3148_v55 = vadd.f32 %v3147_v24, %v2632_v44  ;;  %v2628_v23 = vmul.f32 %v8125_v37, %v16681_v36  ;;  %v3141_v32 = vadd.f32 %v2626_v48, %v2625_v46  ;;  %v16714_v24 = vld [vmem:[#allocation102_spill] sm:$0xff] }
 0x196   : > { %8146 = vtanh.f32 %v16709_v22  ;;  %v8129_v27 = vpop.eup %8128  ;;  %v2637_v1 = vmul.f32 %v8127_v41, %v9964_v26  ;;  %v10424_v30 = vmul.f32 %v16699_v25, %v16711_v0  ;;  %v16715_v22 = vld [vmem:[#allocation9_spill] sm:$0xff]  ;;  %v16717_v41 = vld [vmem:[#allocation103_spill] sm:$0xff] }
 0x197   : > { %16707 = vst [vmem:[#allocation63_spill] sm:$0xff] %v10412_v28  ;;  %8148 = vtanh.f32 %v16710_v49  ;;  %v10428_v28 = vmul.f32 %v16702_v47, %v9845_v54  ;;  %v8131_v39 = vpop.eup %8130  ;;  %3149 = vadd.xlane.f32.xlu1 %v3148_v55  ;;  %v3142_v44 = vadd.f32 %v3141_v32, %v2627_v40  ;;  %v2638_v46 = vmul.f32 %v8129_v27, %v9967_v35 }
 0x198   : > { %16712 = vst [vmem:[#allocation64_spill] sm:$0xff] %v10424_v30  ;;  %8150 = vtanh.f32 %v16714_v24  ;;  %v10434_v48 = vmul.f32 %v16706_v56, %v16715_v22  ;;  %v8133_v49 = vpop.eup %8132  ;;  %v2639_v37 = vmul.f32 %v8131_v39, %v16678_v50  ;;  %v16718_v30 = vld [vmem:[#allocation18_spill] sm:$0xff]  ;;  %v10444_v40 = vmul.f32 %v16699_v25, %v9871_v4  ;;  %v16722_v22 = vld [vmem:[#allocation105_spill] sm:$0xff] }
 0x199   : > { %16713 = vst [vmem:[#allocation100_spill] sm:$0xff] %v10428_v28  ;;  %8152 = vtanh.f32 %v16717_v41  ;;  %v10440_v54 = vmul.f32 %v16697_v31, %v16718_v30  ;;  %v8135_v27 = vpop.eup %8134  ;;  %v3143_v55 = vadd.f32 %v3142_v44, %v2628_v23  ;;  %v2640_v32 = vmul.f32 %v8133_v49, %v16681_v36  ;;  %v16721_v28 = vld [vmem:[#allocation104_spill] sm:$0xff]  ;;  %v16725_v44 = vld [vmem:[#allocation106_spill] sm:$0xff]  ;;  %v16727_v49 = vld [vmem:[#allocation49_spill] sm:$0xff] }
 0x19a   : > { %16716 = vst [vmem:[#allocation101_spill] sm:$0xff] %v10434_v48  ;;  %16720 = vst [vmem:[#allocation103_spill] sm:$0xff] %v10444_v40  ;;  %v3156_v24 = vadd.f32 %v2638_v46, %v2637_v1  ;;  %8154 = vtanh.f32 %v16721_v28  ;;  %v8137_v48 = vpop.eup %8136  ;;  %v2633_v39 = vmul.f32 %v8135_v27, %v9964_v26  ;;  %v10452_v41 = vmul.f32 %v16702_v47, %v9869_v2 }
 0x19b   : > { %16719 = vst [vmem:[#allocation102_spill] sm:$0xff] %v10440_v54  ;;  %8156 = vtanh.f32 %v16722_v22  ;;  %v10456_v54 = vmul.f32 %v16706_v56, %v9873_v5  ;;  %v8139_v40 = vpop.eup %8138  ;;  %3144 = vadd.xlane.f32.xlu0 %v3143_v55  ;;  %v2634_v1 = vmul.f32 %v8137_v48, %v9967_v35  ;;  %v10462_v28 = vmul.f32 %v16697_v31, %v9859_v61 }
 0x19c   : > { %16723 = vst [vmem:[#allocation104_spill] sm:$0xff] %v10452_v41  ;;  %v3157_v23 = vadd.f32 %v3156_v24, %v2639_v37  ;;  %8158 = vtanh.f32 %v16725_v44  ;;  %v8141_v46 = vpop.eup %8140  ;;  %v2635_v22 = vmul.f32 %v8139_v40, %v16678_v50  ;;  %v10468_v27 = vmul.f32 %v16699_v25, %v9863_v63  ;;  %v16731_v41 = vld [vmem:[#allocation50_spill] sm:$0xff] }
 0x19d   : > { %16724 = vst [vmem:[#allocation105_spill] sm:$0xff] %v10456_v54  ;;  %16726 = vst [vmem:[#allocation106_spill] sm:$0xff] %v10462_v28  ;;  %8160 = vtanh.f32 %v16727_v49  ;;  %v10472_v37 = vmul.f32 %v16702_v47, %v9861_v62  ;;  %v8143_v48 = vpop.eup %8142  ;;  %v2636_v24 = vmul.f32 %v8141_v46, %v16681_v36  ;;  %v3151_v44 = vadd.f32 %v2634_v1, %v2633_v39  ;;  %v16730_v54 = vld [vmem:[#allocation107_spill] sm:$0xff]  ;;  %v16735_v46 = vld [vmem:[#allocation109_spill] sm:$0xff] }
 0x19e   : > { %16728 = vst [vmem:[#allocation49_spill] sm:$0xff] %v10468_v27  ;;  %v3158_v55 = vadd.f32 %v3157_v23, %v2640_v32  ;;  %8162 = vtanh.f32 %v16730_v54  ;;  %v8145_v28 = vpop.eup %8144  ;;  %v2645_v40 = vmul.f32 %v8143_v48, %v9964_v26  ;;  %v10480_v49 = vmul.f32 %v16706_v56, %v16686_v38  ;;  %v16733_v23 = vld [vmem:[#allocation108_spill] sm:$0xff] }
 0x19f   : > { %16729 = vst [vmem:[#allocation117_spill] sm:$0xff] %v10472_v37  ;;  %8164 = vtanh.f32 %v16731_v41  ;;  %v10484_v27 = vmul.f32 %v16697_v31, %v9883_v10  ;;  %v3152_v32 = vadd.f32 %v3151_v44, %v2635_v22  ;;  %v2646_v39 = vmul.f32 %v8145_v28, %v9967_v35 }
 0x1a0   : > { %v8147_v37 = vpop.eup %8146  ;;  %3159 = vadd.xlane.f32.xlu1 %v3158_v55  ;;  %8166 = vtanh.f32 %v16733_v23  ;;  %v10490_v54 = vmul.f32 %v16699_v25, %v9887_v12  ;;  %v10496_v48 = vmul.f32 %v16702_v47, %v9885_v11  ;;  %v10500_v22 = vmul.f32 %v16706_v56, %v9889_v13 }
 0x1a1   : > { %16732 = vst [vmem:[#allocation107_spill] sm:$0xff] %v10484_v27  ;;  %v8149_v41 = vpop.eup %8148  ;;  %v2647_v1 = vmul.f32 %v8147_v37, %v16678_v50  ;;  %8168 = vtanh.f32 %v16735_v46  ;;  %v3153_v55 = vadd.f32 %v3152_v32, %v2636_v24  ;;  %v3166_v23 = vadd.f32 %v2646_v39, %v2645_v40  ;;  %v16738_v27 = vld [vmem:[#allocation110_spill] sm:$0xff]  ;;  %v16739_v32 = vld [vmem:[#allocation111_spill] sm:$0xff] }
 0x1a2   : > { %16734 = vst [vmem:[#allocation50_spill] sm:$0xff] %v10490_v54  ;;  %16736 = vst [vmem:[#allocation108_spill] sm:$0xff] %v10496_v48  ;;  %v8151_v28 = vpop.eup %8150  ;;  %v2648_v44 = vmul.f32 %v8149_v41, %v16681_v36  ;;  %8170 = vtanh.f32 %v16738_v27  ;;  %v10508_v46 = vmul.f32 %v16697_v31, %v9875_v6  ;;  %v10512_v48 = vmul.f32 %v16699_v25, %v9879_v8 }
 0x1a3   : > { %16737 = vst [vmem:[#allocation109_spill] sm:$0xff] %v10500_v22  ;;  %v8153_v54 = vpop.eup %8152  ;;  %v2641_v37 = vmul.f32 %v8151_v28, %v9964_v26  ;;  %8172 = vtanh.f32 %v10300_v45  ;;  %3154 = vadd.xlane.f32.xlu0 %v3153_v55  ;;  %v3167_v24 = vadd.f32 %v3166_v23, %v2647_v1  ;;  %v10518_v27 = vmul.f32 %v16702_v47, %v9877_v7 }
 0x1a4   : > { %v8155_v22 = vpop.eup %8154  ;;  %v2642_v40 = vmul.f32 %v8153_v54, %v9967_v35  ;;  %8174 = vtanh.f32 %v16739_v32  ;;  %v10524_v41 = vmul.f32 %v16706_v56, %v9881_v9  ;;  %v10528_v1 = vmul.f32 %v16697_v31, %v9899_v18 }
 0x1a5   : > { %v8157_v45 = vpop.eup %8156  ;;  %v2643_v39 = vmul.f32 %v8155_v22, %v16678_v50  ;;  %8176 = vtanh.f32 %v10312_v21  ;;  %v3168_v28 = vadd.f32 %v3167_v24, %v2648_v44  ;;  %v10536_v21 = vmul.f32 %v16699_v25, %v9903_v19 }
 0x1a6   : > { %16740 = vst [vmem:[#allocation110_spill] sm:$0xff] %v10524_v41  ;;  %16741 = vst [vmem:[#allocation111_spill] sm:$0xff] %v10528_v1  ;;  %v8159_v54 = vpop.eup %8158  ;;  %v2644_v55 = vmul.f32 %v8157_v45, %v16681_v36  ;;  %v3161_v23 = vadd.f32 %v2642_v40, %v2641_v37  ;;  %8178 = vtanh.f32 %v10316_v34  ;;  %v10540_v41 = vmul.f32 %v16702_v47, %v9901_v3  ;;  %v16742_v40 = vld [vmem:[#allocation112_spill] sm:$0xff] }
 0x1a7   : > { %v8161_v32 = vpop.eup %8160  ;;  %v2653_v22 = vmul.f32 %v8159_v54, %v9964_v26  ;;  %8180 = vtanh.f32 %v10322_v33  ;;  %3169 = vadd.xlane.f32.xlu1 %v3168_v28  ;;  %v10546_v34 = vmul.f32 %v16706_v56, %v9905_v20  ;;  %v10552_v45 = vmul.f32 %v16697_v31, %v9891_v14 }
 0x1a8   : > { %v8163_v1 = vpop.eup %8162  ;;  %v3162_v44 = vadd.f32 %v3161_v23, %v2643_v39  ;;  %v2654_v37 = vmul.f32 %v8161_v32, %v9967_v35  ;;  %8182 = vtanh.f32 %v10328_v60  ;;  %v10556_v39 = vmul.f32 %v16699_v25, %v9895_v16 }
 0x1a9   : > { %v8165_v33 = vpop.eup %8164  ;;  %v2655_v24 = vmul.f32 %v8163_v1, %v16678_v50  ;;  %8184 = vtanh.f32 %v16742_v40  ;;  %16743 = vst [vmem:[#allocation112_spill] sm:$0xff] %v10552_v45  ;;  %v10564_v31 = vmul.f32 %v16702_v47, %v9893_v15  ;;  %v10568_v25 = vmul.f32 %v16706_v56, %v9897_v17  ;;  %v16749_v47 = vld [vmem:[#allocation113_spill] sm:$0xff]  ;;  %v16766_v45 = vld [vmem:[#allocation116_spill] sm:$0xff] }
 0x1aa   : > { %16744 = vst [vmem:[#allocation118_spill] sm:$0xff] %v10556_v39  ;;  %v8167_v54 = vpop.eup %8166  ;;  %v3163_v28 = vadd.f32 %v3162_v44, %v2644_v55  ;;  %v2656_v60 = vmul.f32 %v8165_v33, %v16681_v36  ;;  %v3176_v23 = vadd.f32 %v2654_v37, %v2653_v22  ;;  %8186 = vtanh.f32 %v10340_v29  ;;  %v16747_v29 = vld [vmem:[#allocation65_spill] sm:$0xff]  ;;  %v16750_v33 = vld [vmem:[#allocation66_spill] sm:$0xff]  ;;  %v16765_v39 = vld [vmem:[#allocation115_spill] sm:$0xff] }
 0x1ab   : > { %v8169_v32 = vpop.eup %8168  ;;  %v2649_v1 = vmul.f32 %v8167_v54, %v9964_v26  ;;  %8188 = vtanh.f32 %v10344_v51  ;;  %16745 = vst [vmem:[#allocation119_spill] sm:$0xff] %v10564_v31  ;;  %16746 = vst [vmem:[#allocation120_spill] sm:$0xff] %v10568_v25  ;;  %v10574_v44 = vmul.f32 %v16747_v29, %v9851_v57  ;;  %v10580_v56 = vmul.f32 %v16750_v33, %v9855_v59  ;;  %v16752_v54 = vld [vmem:[#allocation67_spill] sm:$0xff]  ;;  %v16754_v25 = vld [vmem:[#allocation114_spill] sm:$0xff] }
 0x1ac   : > { %v8171_v40 = vpop.eup %8170  ;;  %3164 = vadd.xlane.f32.xlu0 %v3163_v28  ;;  %v3177_v55 = vadd.f32 %v3176_v23, %v2655_v24  ;;  %v2650_v22 = vmul.f32 %v8169_v32, %v9967_v35  ;;  %8190 = vtanh.f32 %v10350_v42  ;;  %v10584_v24 = vmul.f32 %v16752_v54, %v9853_v58 }
 0x1ad   : > { %16748 = vst [vmem:[#allocation65_spill] sm:$0xff] %v10574_v44  ;;  %v8173_v51 = vpop.eup %8172  ;;  %v2651_v37 = vmul.f32 %v8171_v40, %v16678_v50  ;;  %8192 = vtanh.f32 %v16749_v47  ;;  %16751 = vst [vmem:[#allocation113_spill] sm:$0xff] %v10580_v56  ;;  %v16755_v47 = vld [vmem:[#allocation68_spill] sm:$0xff]  ;;  %v10596_v56 = vmul.f32 %v16747_v29, %v9843_v53 }
 0x1ae   : > { %16753 = vst [vmem:[#allocation66_spill] sm:$0xff] %v10584_v24  ;;  %v8175_v28 = vpop.eup %8174  ;;  %v3178_v23 = vadd.f32 %v3177_v55, %v2656_v60  ;;  %v2652_v42 = vmul.f32 %v8173_v51, %v16681_v36  ;;  %v3171_v32 = vadd.f32 %v2650_v22, %v2649_v1  ;;  %8194 = vtanh.f32 %v16754_v25  ;;  %v16758_v55 = vld [vmem:[#allocation96_spill] sm:$0xff]  ;;  %v16760_v51 = vld [vmem:[#allocation97_spill] sm:$0xff] }
 0x1af   : > { %v8177_v44 = vpop.eup %8176  ;;  %v2661_v40 = vmul.f32 %v8175_v28, %v9964_v26  ;;  %8196 = vtanh.f32 %v10368_v43  ;;  %v10592_v31 = vmul.f32 %v16755_v47, %v16705_v52  ;;  %16757 = vst [vmem:[#allocation114_spill] sm:$0xff] %v10596_v56  ;;  %v10602_v25 = vmul.f32 %v16750_v33, %v16711_v0  ;;  %v16761_v28 = vld [vmem:[#allocation7_spill] sm:$0xff]  ;;  %v16763_v56 = vld [vmem:[#allocation9_spill] sm:$0xff] }
 0x1b0   : > { %v8179_v24 = vpop.eup %8178  ;;  %3179 = vadd.xlane.f32.xlu1 %v3178_v23  ;;  %v3172_v60 = vadd.f32 %v3171_v32, %v2651_v37  ;;  %v2662_v1 = vmul.f32 %v8177_v44, %v9967_v35  ;;  %8198 = vtanh.f32 %v16758_v55  ;;  %v10612_v37 = vmul.f32 %v16755_v47, %v16763_v56 }
 0x1b1   : > { %16756 = vst [vmem:[#allocation67_spill] sm:$0xff] %v10592_v31  ;;  %16759 = vst [vmem:[#allocation68_spill] sm:$0xff] %v10602_v25  ;;  %v8181_v43 = vpop.eup %8180  ;;  %v2663_v22 = vmul.f32 %v8179_v24, %v16678_v50  ;;  %8200 = vtanh.f32 %v16760_v51  ;;  %v10608_v31 = vmul.f32 %v16752_v54, %v16761_v28  ;;  %v10620_v51 = vmul.f32 %v16747_v29, %v16718_v30 }
 0x1b2   : > { %16764 = vst [vmem:[#allocation97_spill] sm:$0xff] %v10612_v37  ;;  %v8183_v44 = vpop.eup %8182  ;;  %v3173_v23 = vadd.f32 %v3172_v60, %v2652_v42  ;;  %v2664_v32 = vmul.f32 %v8181_v43, %v16681_v36  ;;  %v3186_v55 = vadd.f32 %v2662_v1, %v2661_v40  ;;  %8202 = vtanh.f32 %v16765_v39  ;;  %v16769_v60 = vld [vmem:[#allocation59_spill] sm:$0xff]  ;;  %v16771_v43 = vld [vmem:[#allocation62_spill] sm:$0xff] }
 0x1b3   : > { %16762 = vst [vmem:[#allocation96_spill] sm:$0xff] %v10608_v31  ;;  %v8185_v25 = vpop.eup %8184  ;;  %v2657_v24 = vmul.f32 %v8183_v44, %v9964_v26  ;;  %8204 = vtanh.f32 %v16766_v45  ;;  %16767 = vst [vmem:[#allocation115_spill] sm:$0xff] %v10620_v51  ;;  %v10624_v31 = vmul.f32 %v16750_v33, %v9871_v4  ;;  %v10630_v39 = vmul.f32 %v16752_v54, %v9869_v2  ;;  %v16775_v51 = vld [vmem:[#allocation63_spill] sm:$0xff] }
 0x1b4   : > { %v8187_v37 = vpop.eup %8186  ;;  %3174 = vadd.xlane.f32.xlu0 %v3173_v23  ;;  %v3187_v42 = vadd.f32 %v3186_v55, %v2663_v22  ;;  %v2658_v40 = vmul.f32 %v8185_v25, %v9967_v35  ;;  %8206 = vtanh.f32 %v16769_v60  ;;  %v10636_v44 = vmul.f32 %v16755_v47, %v9873_v5 }
 0x1b5   : > { %16768 = vst [vmem:[#allocation116_spill] sm:$0xff] %v10624_v31  ;;  %16770 = vst [vmem:[#allocation59_spill] sm:$0xff] %v10630_v39  ;;  %v8189_v45 = vpop.eup %8188  ;;  %v2659_v1 = vmul.f32 %v8187_v37, %v16678_v50  ;;  %8208 = vtanh.f32 %v16771_v43  ;;  %v10640_v22 = vmul.f32 %v16747_v29, %v9859_v61  ;;  %v16774_v31 = vld [vmem:[#allocation98_spill] sm:$0xff]  ;;  %v10648_v43 = vmul.f32 %v16750_v33, %v9863_v63 }
 0x1b6   : > { %16772 = vst [vmem:[#allocation62_spill] sm:$0xff] %v10636_v44  ;;  %v8191_v25 = vpop.eup %8190  ;;  %v3188_v23 = vadd.f32 %v3187_v42, %v2664_v32  ;;  %v2660_v55 = vmul.f32 %v8189_v45, %v16681_v36  ;;  %v3181_v60 = vadd.f32 %v2658_v40, %v2657_v24  ;;  %8210 = vtanh.f32 %v16774_v31  ;;  %v16778_v42 = vld [vmem:[#allocation99_spill] sm:$0xff]  ;;  %v16780_v45 = vld [vmem:[#allocation64_spill] sm:$0xff] }
 0x1b7   : > { %16773 = vst [vmem:[#allocation121_spill] sm:$0xff] %v10640_v22  ;;  %v8193_v39 = vpop.eup %8192  ;;  %v2669_v37 = vmul.f32 %v8191_v25, %v9964_v26  ;;  %8212 = vtanh.f32 %v16775_v51  ;;  %16776 = vst [vmem:[#allocation98_spill] sm:$0xff] %v10648_v43  ;;  %v10652_v44 = vmul.f32 %v16752_v54, %v9861_v62  ;;  %v10658_v31 = vmul.f32 %v16755_v47, %v16686_v38  ;;  %v16784_v43 = vld [vmem:[#allocation101_spill] sm:$0xff] }
 0x1b8   : > { %v8195_v22 = vpop.eup %8194  ;;  %3189 = vadd.xlane.f32.xlu1 %v3188_v23  ;;  %v3182_v32 = vadd.f32 %v3181_v60, %v2659_v1  ;;  %v2670_v24 = vmul.f32 %v8193_v39, %v9967_v35  ;;  %8214 = vtanh.f32 %v16778_v42  ;;  %v10664_v25 = vmul.f32 %v16747_v29, %v9883_v10 }
 0x1b9   : > { %16777 = vst [vmem:[#allocation63_spill] sm:$0xff] %v10652_v44  ;;  %16779 = vst [vmem:[#allocation99_spill] sm:$0xff] %v10658_v31  ;;  %v8197_v51 = vpop.eup %8196  ;;  %v2671_v40 = vmul.f32 %v8195_v22, %v16678_v50  ;;  %8216 = vtanh.f32 %v16780_v45  ;;  %v10668_v1 = vmul.f32 %v16750_v33, %v9887_v12  ;;  %v16783_v44 = vld [vmem:[#allocation100_spill] sm:$0xff]  ;;  %v10676_v45 = vmul.f32 %v16752_v54, %v9885_v11 }
 0x1ba   : > { %16781 = vst [vmem:[#allocation64_spill] sm:$0xff] %v10664_v25  ;;  %v8199_v39 = vpop.eup %8198  ;;  %v3183_v23 = vadd.f32 %v3182_v32, %v2660_v55  ;;  %v2672_v60 = vmul.f32 %v8197_v51, %v16681_v36  ;;  %v3196_v42 = vadd.f32 %v2670_v24, %v2669_v37  ;;  %8218 = vtanh.f32 %v16783_v44  ;;  %v16787_v32 = vld [vmem:[#allocation102_spill] sm:$0xff]  ;;  %v16789_v51 = vld [vmem:[#allocation103_spill] sm:$0xff] }
 0x1bb   : > { %16782 = vst [vmem:[#allocation122_spill] sm:$0xff] %v10668_v1  ;;  %v8201_v31 = vpop.eup %8200  ;;  %v2665_v22 = vmul.f32 %v8199_v39, %v9964_v26  ;;  %8220 = vtanh.f32 %v16784_v43  ;;  %16785 = vst [vmem:[#allocation100_spill] sm:$0xff] %v10676_v45  ;;  %v10680_v25 = vmul.f32 %v16755_v47, %v9889_v13  ;;  %v10686_v44 = vmul.f32 %v16747_v29, %v9875_v6  ;;  %v16793_v45 = vld [vmem:[#allocation105_spill] sm:$0xff] }
 0x1bc   : > { %v8203_v1 = vpop.eup %8202  ;;  %3184 = vadd.xlane.f32.xlu0 %v3183_v23  ;;  %v3197_v55 = vadd.f32 %v3196_v42, %v2671_v40  ;;  %v2666_v37 = vmul.f32 %v8201_v31, %v9967_v35  ;;  %8222 = vtanh.f32 %v16787_v32  ;;  %v10692_v39 = vmul.f32 %v16750_v33, %v9879_v8 }
 0x1bd   : > { %16786 = vst [vmem:[#allocation101_spill] sm:$0xff] %v10680_v25  ;;  %16788 = vst [vmem:[#allocation102_spill] sm:$0xff] %v10686_v44  ;;  %v8205_v43 = vpop.eup %8204  ;;  %v2667_v24 = vmul.f32 %v8203_v1, %v16678_v50  ;;  %8224 = vtanh.f32 %v16789_v51  ;;  %v10696_v40 = vmul.f32 %v16752_v54, %v9877_v7  ;;  %v16792_v25 = vld [vmem:[#allocation104_spill] sm:$0xff]  ;;  %v10704_v51 = vmul.f32 %v16755_v47, %v9881_v9 }
 0x1be   : > { %16790 = vst [vmem:[#allocation103_spill] sm:$0xff] %v10692_v39  ;;  %v8207_v31 = vpop.eup %8206  ;;  %v3198_v23 = vadd.f32 %v3197_v55, %v2672_v60  ;;  %v2668_v42 = vmul.f32 %v8205_v43, %v16681_v36  ;;  %v3191_v32 = vadd.f32 %v2666_v37, %v2665_v22  ;;  %8226 = vtanh.f32 %v16792_v25  ;;  %v16795_v55 = vld [vmem:[#allocation106_spill] sm:$0xff]  ;;  %v16797_v43 = vld [vmem:[#allocation49_spill] sm:$0xff] }
 0x1bf   : > { %16791 = vst [vmem:[#allocation123_spill] sm:$0xff] %v10696_v40  ;;  %v8209_v44 = vpop.eup %8208  ;;  %v2741_v1 = vmul.f32 %v8207_v31, %v9964_v26  ;;  %8228 = vtanh.f32 %v16793_v45  ;;  %v10708_v39 = vmul.f32 %v16747_v29, %v9899_v18  ;;  %v10714_v25 = vmul.f32 %v16750_v33, %v9903_v19 }
 0x1c0   : > { %v8211_v40 = vpop.eup %8210  ;;  %3199 = vadd.xlane.f32.xlu1 %v3198_v23  ;;  %v3192_v60 = vadd.f32 %v3191_v32, %v2667_v24  ;;  %v2742_v22 = vmul.f32 %v8209_v44, %v9967_v35  ;;  %8230 = vtanh.f32 %v16795_v55  ;;  %v10720_v31 = vmul.f32 %v16752_v54, %v9901_v3 }
 0x1c1   : > { %16794 = vst [vmem:[#allocation104_spill] sm:$0xff] %v10708_v39  ;;  %16796 = vst [vmem:[#allocation105_spill] sm:$0xff] %v10714_v25  ;;  %v8213_v45 = vpop.eup %8212  ;;  %v2743_v37 = vmul.f32 %v8211_v40, %v16678_v50  ;;  %8232 = vtanh.f32 %v16797_v43  ;;  %v10724_v24 = vmul.f32 %v16755_v47, %v9905_v20  ;;  %v16800_v39 = vld [vmem:[#allocation117_spill] sm:$0xff]  ;;  %v10732_v43 = vmul.f32 %v16747_v29, %v9891_v14  ;;  %v16804_v29 = vld [vmem:[#allocation50_spill] sm:$0xff] }
 0x1c2   : > { %16798 = vst [vmem:[#allocation106_spill] sm:$0xff] %v10720_v31  ;;  %v8215_v44 = vpop.eup %8214  ;;  %v3193_v23 = vadd.f32 %v3192_v60, %v2668_v42  ;;  %v2744_v32 = vmul.f32 %v8213_v45, %v16681_v36  ;;  %v3286_v55 = vadd.f32 %v2742_v22, %v2741_v1  ;;  %8234 = vtanh.f32 %v16800_v39  ;;  %v16802_v60 = vld [vmem:[#allocation107_spill] sm:$0xff] }
 0x1c3   : > { %16799 = vst [vmem:[#allocation49_spill] sm:$0xff] %v10724_v24  ;;  %v8217_v25 = vpop.eup %8216  ;;  %v2737_v40 = vmul.f32 %v8215_v44, %v9964_v26  ;;  %8236 = vtanh.f32 %v10480_v49  ;;  %v10736_v31 = vmul.f32 %v16750_v33, %v9895_v16  ;;  %v10742_v39 = vmul.f32 %v16752_v54, %v9893_v15  ;;  %v16806_v45 = vld [vmem:[#allocation51_spill] sm:$0xff]  ;;  %v16808_v54 = vld [vmem:[#allocation108_spill] sm:$0xff] }
 0x1c4   : > { %v8219_v24 = vpop.eup %8218  ;;  %3194 = vadd.xlane.f32.xlu0 %v3193_v23  ;;  %v3287_v42 = vadd.f32 %v3286_v55, %v2743_v37  ;;  %v2738_v1 = vmul.f32 %v8217_v25, %v9967_v35  ;;  %8238 = vtanh.f32 %v16802_v60  ;;  %v10748_v33 = vmul.f32 %v16755_v47, %v9897_v17 }
 0x1c5   : > { %16801 = vst [vmem:[#allocation117_spill] sm:$0xff] %v10736_v31  ;;  %16803 = vst [vmem:[#allocation107_spill] sm:$0xff] %v10742_v39  ;;  %v8221_v49 = vpop.eup %8220  ;;  %v2739_v22 = vmul.f32 %v8219_v24, %v16678_v50  ;;  %8240 = vtanh.f32 %v16804_v29  ;;  %v10752_v37 = vmul.f32 %v16806_v45, %v9851_v57  ;;  %v16809_v39 = vld [vmem:[#allocation109_spill] sm:$0xff]  ;;  %v16810_v29 = vld [vmem:[#allocation52_spill] sm:$0xff] }
 0x1c6   : > { %16805 = vst [vmem:[#allocation50_spill] sm:$0xff] %v10748_v33  ;;  %v8223_v25 = vpop.eup %8222  ;;  %v3288_v44 = vadd.f32 %v3287_v42, %v2744_v32  ;;  %v2740_v23 = vmul.f32 %v8221_v49, %v16681_v36  ;;  %v3281_v55 = vadd.f32 %v2738_v1, %v2737_v40  ;;  %8242 = vtanh.f32 %v16808_v54  ;;  %v16811_v33 = vld [vmem:[#allocation53_spill] sm:$0xff]  ;;  %v16812_v42 = vld [vmem:[#allocation54_spill] sm:$0xff] }
 0x1c7   : > { %16807 = vst [vmem:[#allocation51_spill] sm:$0xff] %v10752_v37  ;;  %v8225_v60 = vpop.eup %8224  ;;  %v2749_v24 = vmul.f32 %v8223_v25, %v9964_v26  ;;  %8244 = vtanh.f32 %v16809_v39  ;;  %v10760_v47 = vmul.f32 %v16810_v29, %v9855_v59  ;;  %v10764_v31 = vmul.f32 %v16811_v33, %v9853_v58 }
 0x1c8   : > { %v8227_v37 = vpop.eup %8226  ;;  %3289 = vadd.xlane.f32.xlu1 %v3288_v44  ;;  %v3282_v32 = vadd.f32 %v3281_v55, %v2739_v22  ;;  %v2750_v40 = vmul.f32 %v8225_v60, %v9967_v35  ;;  %8246 = vtanh.f32 %v10508_v46  ;;  %v10770_v1 = vmul.f32 %v16812_v42, %v16705_v52 }
 0x1c9   : > { %v8229_v39 = vpop.eup %8228  ;;  %v2751_v49 = vmul.f32 %v8227_v37, %v16678_v50  ;;  %8248 = vtanh.f32 %v10512_v48  ;;  %v10776_v25 = vmul.f32 %v16806_v45, %v9843_v53  ;;  %v10780_v22 = vmul.f32 %v16810_v29, %v16711_v0 }
 0x1ca   : > { %16813 = vst [vmem:[#allocation108_spill] sm:$0xff] %v10770_v1  ;;  %v8231_v44 = vpop.eup %8230  ;;  %v3283_v55 = vadd.f32 %v3282_v32, %v2740_v23  ;;  %v2752_v46 = vmul.f32 %v8229_v39, %v16681_v36  ;;  %v3296_v54 = vadd.f32 %v2750_v40, %v2749_v24  ;;  %8250 = vtanh.f32 %v10518_v27  ;;  %v16816_v1 = vld [vmem:[#allocation110_spill] sm:$0xff]  ;;  %v16817_v32 = vld [vmem:[#allocation111_spill] sm:$0xff] }
 0x1cb   : > { %16814 = vst [vmem:[#allocation109_spill] sm:$0xff] %v10776_v25  ;;  %16815 = vst [vmem:[#allocation52_spill] sm:$0xff] %v10780_v22  ;;  %v8233_v60 = vpop.eup %8232  ;;  %v2745_v37 = vmul.f32 %v8231_v44, %v9964_v26  ;;  %8252 = vtanh.f32 %v16816_v1  ;;  %v10788_v48 = vmul.f32 %v16811_v33, %v16761_v28  ;;  %v10792_v25 = vmul.f32 %v16812_v42, %v16763_v56 }
 0x1cc   : > { %v8235_v22 = vpop.eup %8234  ;;  %3284 = vadd.xlane.f32.xlu0 %v3283_v55  ;;  %v3297_v23 = vadd.f32 %v3296_v54, %v2751_v49  ;;  %v2746_v24 = vmul.f32 %v8233_v60, %v9967_v35  ;;  %8254 = vtanh.f32 %v16817_v32  ;;  %v10798_v27 = vmul.f32 %v16806_v45, %v16718_v30 }
 0x1cd   : > { %v8237_v40 = vpop.eup %8236  ;;  %v2747_v1 = vmul.f32 %v8235_v22, %v16678_v50  ;;  %8256 = vtanh.f32 %v10536_v21  ;;  %v10804_v39 = vmul.f32 %v16810_v29, %v9871_v4  ;;  %v10808_v49 = vmul.f32 %v16811_v33, %v9869_v2 }
 0x1ce   : > { %v8239_v44 = vpop.eup %8238  ;;  %v3298_v55 = vadd.f32 %v3297_v23, %v2752_v46  ;;  %v2748_v54 = vmul.f32 %v8237_v40, %v16681_v36  ;;  %v3291_v60 = vadd.f32 %v2746_v24, %v2745_v37  ;;  %8258 = vtanh.f32 %v10540_v41  ;;  %v16822_v23 = vld [vmem:[#allocation112_spill] sm:$0xff]  ;;  %v16824_v40 = vld [vmem:[#allocation118_spill] sm:$0xff] }
 0x1cf   : > { %16818 = vst [vmem:[#allocation53_spill] sm:$0xff] %v10804_v39  ;;  %16819 = vst [vmem:[#allocation54_spill] sm:$0xff] %v10808_v49  ;;  %v8241_v32 = vpop.eup %8240  ;;  %v2757_v22 = vmul.f32 %v8239_v44, %v9964_v26  ;;  %8260 = vtanh.f32 %v10546_v34  ;;  %v10816_v21 = vmul.f32 %v16812_v42, %v9873_v5  ;;  %v10820_v39 = vmul.f32 %v16806_v45, %v9859_v61 }
 0x1d0   : > { %v8243_v49 = vpop.eup %8242  ;;  %3299 = vadd.xlane.f32.xlu1 %v3298_v55  ;;  %v3292_v46 = vadd.f32 %v3291_v60, %v2747_v1  ;;  %v2758_v37 = vmul.f32 %v8241_v32, %v9967_v35  ;;  %8262 = vtanh.f32 %v16822_v23  ;;  %v10826_v41 = vmul.f32 %v16810_v29, %v9863_v63 }
 0x1d1   : > { %16820 = vst [vmem:[#allocation110_spill] sm:$0xff] %v10816_v21  ;;  %16821 = vst [vmem:[#allocation111_spill] sm:$0xff] %v10820_v39  ;;  %v8245_v34 = vpop.eup %8244  ;;  %v2759_v24 = vmul.f32 %v8243_v49, %v16678_v50  ;;  %8264 = vtanh.f32 %v16824_v40  ;;  %v10832_v44 = vmul.f32 %v16811_v33, %v9861_v62  ;;  %v10836_v1 = vmul.f32 %v16812_v42, %v16686_v38  ;;  %v16827_v39 = vld [vmem:[#allocation119_spill] sm:$0xff]  ;;  %v16828_v21 = vld [vmem:[#allocation120_spill] sm:$0xff] }
 0x1d2   : > { %16823 = vst [vmem:[#allocation112_spill] sm:$0xff] %v10826_v41  ;;  %v8247_v55 = vpop.eup %8246  ;;  %v3293_v60 = vadd.f32 %v3292_v46, %v2748_v54  ;;  %v2760_v32 = vmul.f32 %v8245_v34, %v16681_v36  ;;  %v3306_v23 = vadd.f32 %v2758_v37, %v2757_v22  ;;  %8266 = vtanh.f32 %v16827_v39  ;;  %v16831_v46 = vld [vmem:[#allocation65_spill] sm:$0xff] }
 0x1d3   : > { %16825 = vst [vmem:[#allocation118_spill] sm:$0xff] %v10832_v44  ;;  %16826 = vst [vmem:[#allocation124_spill] sm:$0xff] %v10836_v1  ;;  %v8249_v41 = vpop.eup %8248  ;;  %v2753_v49 = vmul.f32 %v8247_v55, %v9964_v26  ;;  %8268 = vtanh.f32 %v16828_v21  ;;  %v10844_v40 = vmul.f32 %v16806_v45, %v9883_v10  ;;  %v10848_v44 = vmul.f32 %v16810_v29, %v9887_v12  ;;  %v16833_v34 = vld [vmem:[#allocation113_spill] sm:$0xff] }
 0x1d4   : > { %v8251_v1 = vpop.eup %8250  ;;  %3294 = vadd.xlane.f32.xlu0 %v3293_v60  ;;  %v3307_v54 = vadd.f32 %v3306_v23, %v2759_v24  ;;  %v2754_v22 = vmul.f32 %v8249_v41, %v9967_v35  ;;  %8270 = vtanh.f32 %v16831_v46  ;;  %v10854_v39 = vmul.f32 %v16811_v33, %v9885_v11 }
 0x1d5   : > { %16829 = vst [vmem:[#allocation119_spill] sm:$0xff] %v10844_v40  ;;  %16830 = vst [vmem:[#allocation120_spill] sm:$0xff] %v10848_v44  ;;  %v8253_v21 = vpop.eup %8252  ;;  %v2755_v37 = vmul.f32 %v8251_v1, %v16678_v50  ;;  %8272 = vtanh.f32 %v16833_v34  ;;  %v10860_v55 = vmul.f32 %v16812_v42, %v9889_v13  ;;  %v10864_v24 = vmul.f32 %v16806_v45, %v9875_v6  ;;  %v16836_v44 = vld [vmem:[#allocation66_spill] sm:$0xff]  ;;  %v16837_v40 = vld [vmem:[#allocation67_spill] sm:$0xff] }
 0x1d6   : > { %16832 = vst [vmem:[#allocation65_spill] sm:$0xff] %v10854_v39  ;;  %v8255_v41 = vpop.eup %8254  ;;  %v3308_v60 = vadd.f32 %v3307_v54, %v2760_v32  ;;  %v2756_v23 = vmul.f32 %v8253_v21, %v16681_v36  ;;  %v3301_v46 = vadd.f32 %v2754_v22, %v2753_v49  ;;  %8274 = vtanh.f32 %v16836_v44  ;;  %v16840_v54 = vld [vmem:[#allocation114_spill] sm:$0xff]  ;;  %v16842_v21 = vld [vmem:[#allocation68_spill] sm:$0xff] }
 0x1d7   : > { %16834 = vst [vmem:[#allocation113_spill] sm:$0xff] %v10860_v55  ;;  %16835 = vst [vmem:[#allocation125_spill] sm:$0xff] %v10864_v24  ;;  %v8257_v39 = vpop.eup %8256  ;;  %v2765_v1 = vmul.f32 %v8255_v41, %v9964_v26  ;;  %8276 = vtanh.f32 %v16837_v40  ;;  %v10872_v34 = vmul.f32 %v16810_v29, %v9879_v8  ;;  %v10876_v55 = vmul.f32 %v16811_v33, %v9877_v7 }
 0x1d8   : > { %v8259_v24 = vpop.eup %8258  ;;  %3309 = vadd.xlane.f32.xlu1 %v3308_v60  ;;  %v3302_v32 = vadd.f32 %v3301_v46, %v2755_v37  ;;  %v2766_v49 = vmul.f32 %v8257_v39, %v9967_v35  ;;  %8278 = vtanh.f32 %v16840_v54  ;;  %v10882_v44 = vmul.f32 %v16812_v42, %v9881_v9 }
 0x1d9   : > { %16838 = vst [vmem:[#allocation66_spill] sm:$0xff] %v10872_v34  ;;  %16839 = vst [vmem:[#allocation67_spill] sm:$0xff] %v10876_v55  ;;  %v8261_v40 = vpop.eup %8260  ;;  %v2767_v22 = vmul.f32 %v8259_v24, %v16678_v50  ;;  %8280 = vtanh.f32 %v16842_v21  ;;  %v10888_v41 = vmul.f32 %v16806_v45, %v9899_v18  ;;  %v10892_v37 = vmul.f32 %v16810_v29, %v9903_v19  ;;  %v16845_v55 = vld [vmem:[#allocation96_spill] sm:$0xff]  ;;  %v16846_v34 = vld [vmem:[#allocation97_spill] sm:$0xff] }
 0x1da   : > { %16841 = vst [vmem:[#allocation114_spill] sm:$0xff] %v10882_v44  ;;  %v8263_v39 = vpop.eup %8262  ;;  %v3303_v60 = vadd.f32 %v3302_v32, %v2756_v23  ;;  %v2768_v46 = vmul.f32 %v8261_v40, %v16681_v36  ;;  %v3316_v54 = vadd.f32 %v2766_v49, %v2765_v1  ;;  %8282 = vtanh.f32 %v16845_v55  ;;  %v16849_v32 = vld [vmem:[#allocation115_spill] sm:$0xff]  ;;  %v16851_v40 = vld [vmem:[#allocation116_spill] sm:$0xff] }
 0x1db   : > { %16843 = vst [vmem:[#allocation68_spill] sm:$0xff] %v10888_v41  ;;  %16844 = vst [vmem:[#allocation126_spill] sm:$0xff] %v10892_v37  ;;  %v8265_v44 = vpop.eup %8264  ;;  %v2761_v24 = vmul.f32 %v8263_v39, %v9964_v26  ;;  %8284 = vtanh.f32 %v16846_v34  ;;  %v10900_v21 = vmul.f32 %v16811_v33, %v9901_v3  ;;  %v10904_v41 = vmul.f32 %v16812_v42, %v9905_v20 }
 0x1dc   : > { %v8267_v37 = vpop.eup %8266  ;;  %3304 = vadd.xlane.f32.xlu0 %v3303_v60  ;;  %v3317_v23 = vadd.f32 %v3316_v54, %v2767_v22  ;;  %v2762_v1 = vmul.f32 %v8265_v44, %v9967_v35  ;;  %8286 = vtanh.f32 %v16849_v32  ;;  %v10910_v55 = vmul.f32 %v16806_v45, %v9891_v14  ;;  %v16854_v45 = vld [vmem:[#allocation59_spill] sm:$0xff] }
 0x1dd   : > { %16847 = vst [vmem:[#allocation96_spill] sm:$0xff] %v10900_v21  ;;  %16848 = vst [vmem:[#allocation97_spill] sm:$0xff] %v10904_v41  ;;  %v8269_v34 = vpop.eup %8268  ;;  %v2763_v49 = vmul.f32 %v8267_v37, %v16678_v50  ;;  %8288 = vtanh.f32 %v16851_v40  ;;  %v10916_v39 = vmul.f32 %v16810_v29, %v9895_v16  ;;  %v10920_v22 = vmul.f32 %v16811_v33, %v9893_v15  ;;  %v16855_v41 = vld [vmem:[#allocation62_spill] sm:$0xff]  ;;  %v16857_v40 = vld [vmem:[#allocation55_spill] sm:$0xff] }
 0x1de   : > { %16850 = vst [vmem:[#allocation115_spill] sm:$0xff] %v10910_v55  ;;  %v8271_v44 = vpop.eup %8270  ;;  %v3318_v60 = vadd.f32 %v3317_v23, %v2768_v46  ;;  %v2764_v54 = vmul.f32 %v8269_v34, %v16681_v36  ;;  %v3311_v32 = vadd.f32 %v2762_v1, %v2761_v24  ;;  %8290 = vtanh.f32 %v16854_v45  ;;  %v16859_v23 = vld [vmem:[#allocation121_spill] sm:$0xff]  ;;  %v16860_v1 = vld [vmem:[#allocation56_spill] sm:$0xff]  ;;  %v16868_v21 = vld [vmem:[#allocation99_spill] sm:$0xff] }
 0x1df   : > { %16852 = vst [vmem:[#allocation116_spill] sm:$0xff] %v10916_v39  ;;  %16853 = vst [vmem:[#allocation127_spill] sm:$0xff] %v10920_v22  ;;  %v8273_v55 = vpop.eup %8272  ;;  %v2773_v37 = vmul.f32 %v8271_v44, %v9964_v26  ;;  %8292 = vtanh.f32 %v16855_v41  ;;  %v10928_v29 = vmul.f32 %v16812_v42, %v9897_v17  ;;  %v10932_v33 = vmul.f32 %v16857_v40, %v9851_v57  ;;  %v16862_v42 = vld [vmem:[#allocation98_spill] sm:$0xff]  ;;  %v16863_v45 = vld [vmem:[#allocation57_spill] sm:$0xff] }
 0x1e0   : > { %v8275_v22 = vpop.eup %8274  ;;  %3319 = vadd.xlane.f32.xlu1 %v3318_v60  ;;  %v3312_v46 = vadd.f32 %v3311_v32, %v2763_v49  ;;  %v2774_v24 = vmul.f32 %v8273_v55, %v9967_v35  ;;  %8294 = vtanh.f32 %v16859_v23  ;;  %v10938_v34 = vmul.f32 %v16860_v1, %v9855_v59  ;;  %v16865_v60 = vld [vmem:[#allocation58_spill] sm:$0xff]  ;;  %v16867_v39 = vld [vmem:[#allocation63_spill] sm:$0xff] }
 0x1e1   : > { %16856 = vst [vmem:[#allocation59_spill] sm:$0xff] %v10928_v29  ;;  %16858 = vst [vmem:[#allocation62_spill] sm:$0xff] %v10932_v33  ;;  %v8277_v41 = vpop.eup %8276  ;;  %v2775_v44 = vmul.f32 %v8275_v22, %v16678_v50  ;;  %8296 = vtanh.f32 %v16862_v42  ;;  %v10944_v29 = vmul.f32 %v16863_v45, %v9853_v58  ;;  %v10948_v49 = vmul.f32 %v16865_v60, %v16705_v52 }
 0x1e2   : > { %16861 = vst [vmem:[#allocation55_spill] sm:$0xff] %v10938_v34  ;;  %v8279_v55 = vpop.eup %8278  ;;  %v3313_v32 = vadd.f32 %v3312_v46, %v2764_v54  ;;  %v2776_v23 = vmul.f32 %v8277_v41, %v16681_v36  ;;  %v3326_v33 = vadd.f32 %v2774_v24, %v2773_v37  ;;  %8298 = vtanh.f32 %v16867_v39  ;;  %v16871_v46 = vld [vmem:[#allocation64_spill] sm:$0xff]  ;;  %v16873_v41 = vld [vmem:[#allocation122_spill] sm:$0xff] }
 0x1e3   : > { %16864 = vst [vmem:[#allocation121_spill] sm:$0xff] %v10944_v29  ;;  %16866 = vst [vmem:[#allocation56_spill] sm:$0xff] %v10948_v49  ;;  %v8281_v34 = vpop.eup %8280  ;;  %v2769_v22 = vmul.f32 %v8279_v55, %v9964_v26  ;;  %8300 = vtanh.f32 %v16868_v21  ;;  %v10956_v42 = vmul.f32 %v16857_v40, %v9843_v53  ;;  %v10960_v29 = vmul.f32 %v16860_v1, %v16711_v0 }
 0x1e4   : > { %v8283_v49 = vpop.eup %8282  ;;  %3314 = vadd.xlane.f32.xlu0 %v3313_v32  ;;  %v3327_v54 = vadd.f32 %v3326_v33, %v2775_v44  ;;  %v2770_v37 = vmul.f32 %v8281_v34, %v9967_v35  ;;  %8302 = vtanh.f32 %v16871_v46  ;;  %v10966_v39 = vmul.f32 %v16863_v45, %v16761_v28 }
 0x1e5   : > { %16869 = vst [vmem:[#allocation98_spill] sm:$0xff] %v10956_v42  ;;  %16870 = vst [vmem:[#allocation57_spill] sm:$0xff] %v10960_v29  ;;  %v8285_v21 = vpop.eup %8284  ;;  %v2771_v24 = vmul.f32 %v8283_v49, %v16678_v50  ;;  %8304 = vtanh.f32 %v16873_v41  ;;  %v10972_v55 = vmul.f32 %v16865_v60, %v16763_v56  ;;  %v10976_v33 = vmul.f32 %v16857_v40, %v16718_v30  ;;  %v16876_v29 = vld [vmem:[#allocation100_spill] sm:$0xff]  ;;  %v16877_v42 = vld [vmem:[#allocation101_spill] sm:$0xff] }
 0x1e6   : > { %16872 = vst [vmem:[#allocation58_spill] sm:$0xff] %v10966_v39  ;;  %v8287_v34 = vpop.eup %8286  ;;  %v3328_v44 = vadd.f32 %v3327_v54, %v2776_v23  ;;  %v2772_v32 = vmul.f32 %v8285_v21, %v16681_v36  ;;  %v3321_v46 = vadd.f32 %v2770_v37, %v2769_v22  ;;  %8306 = vtanh.f32 %v16876_v29  ;;  %v16879_v54 = vld [vmem:[#allocation102_spill] sm:$0xff]  ;;  %v16881_v21 = vld [vmem:[#allocation103_spill] sm:$0xff] }
 0x1e7   : > { %16874 = vst [vmem:[#allocation63_spill] sm:$0xff] %v10972_v55  ;;  %16875 = vst [vmem:[#allocation99_spill] sm:$0xff] %v10976_v33  ;;  %v8289_v39 = vpop.eup %8288  ;;  %v2781_v49 = vmul.f32 %v8287_v34, %v9964_v26  ;;  %8308 = vtanh.f32 %v16877_v42  ;;  %v10984_v41 = vmul.f32 %v16860_v1, %v9871_v4  ;;  %v10988_v55 = vmul.f32 %v16863_v45, %v9869_v2 }
 0x1e8   : > { %v8291_v33 = vpop.eup %8290  ;;  %3329 = vadd.xlane.f32.xlu1 %v3328_v44  ;;  %v3322_v23 = vadd.f32 %v3321_v46, %v2771_v24  ;;  %v2782_v22 = vmul.f32 %v8289_v39, %v9967_v35  ;;  %8310 = vtanh.f32 %v16879_v54  ;;  %v10994_v29 = vmul.f32 %v16865_v60, %v9873_v5 }
 0x1e9   : > { %16878 = vst [vmem:[#allocation64_spill] sm:$0xff] %v10988_v55  ;;  %v8293_v42 = vpop.eup %8292  ;;  %v2783_v37 = vmul.f32 %v8291_v33, %v16678_v50  ;;  %8312 = vtanh.f32 %v16881_v21  ;;  %v11000_v34 = vmul.f32 %v16857_v40, %v9859_v61  ;;  %v11004_v24 = vmul.f32 %v16860_v1, %v9863_v63  ;;  %v16884_v55 = vld [vmem:[#allocation123_spill] sm:$0xff] }
 0x1ea   : > { %16880 = vst [vmem:[#allocation122_spill] sm:$0xff] %v10994_v29  ;;  %v8295_v39 = vpop.eup %8294  ;;  %v3323_v44 = vadd.f32 %v3322_v23, %v2772_v32  ;;  %v2784_v46 = vmul.f32 %v8293_v42, %v16681_v36  ;;  %v3336_v54 = vadd.f32 %v2782_v22, %v2781_v49  ;;  %8314 = vtanh.f32 %v16884_v55  ;;  %v16887_v23 = vld [vmem:[#allocation104_spill] sm:$0xff]  ;;  %v16889_v42 = vld [vmem:[#allocation105_spill] sm:$0xff] }
 0x1eb   : > { %16882 = vst [vmem:[#allocation100_spill] sm:$0xff] %v11000_v34  ;;  %16883 = vst [vmem:[#allocation101_spill] sm:$0xff] %v11004_v24  ;;  %v8297_v29 = vpop.eup %8296  ;;  %v2777_v33 = vmul.f32 %v8295_v39, %v9964_v26  ;;  %8316 = vtanh.f32 %v10704_v51  ;;  %v11012_v21 = vmul.f32 %v16863_v45, %v9861_v62  ;;  %v11016_v34 = vmul.f32 %v16865_v60, %v16686_v38 }
 0x1ec   : > { %v8299_v24 = vpop.eup %8298  ;;  %3324 = vadd.xlane.f32.xlu0 %v3323_v44  ;;  %v3337_v32 = vadd.f32 %v3336_v54, %v2783_v37  ;;  %v2778_v49 = vmul.f32 %v8297_v29, %v9967_v35  ;;  %8318 = vtanh.f32 %v16887_v23  ;;  %v11022_v55 = vmul.f32 %v16857_v40, %v9883_v10 }
 0x1ed   : > { %16885 = vst [vmem:[#allocation102_spill] sm:$0xff] %v11012_v21  ;;  %16886 = vst [vmem:[#allocation103_spill] sm:$0xff] %v11016_v34  ;;  %v8301_v51 = vpop.eup %8300  ;;  %v2779_v22 = vmul.f32 %v8299_v24, %v16678_v50  ;;  %8320 = vtanh.f32 %v16889_v42  ;;  %v11028_v39 = vmul.f32 %v16860_v1, %v9887_v12  ;;  %v11032_v37 = vmul.f32 %v16863_v45, %v9885_v11  ;;  %v16892_v34 = vld [vmem:[#allocation106_spill] sm:$0xff]  ;;  %v16893_v21 = vld [vmem:[#allocation49_spill] sm:$0xff] }
 0x1ee   : > { %16888 = vst [vmem:[#allocation123_spill] sm:$0xff] %v11022_v55  ;;  %v8303_v29 = vpop.eup %8302  ;;  %v3338_v44 = vadd.f32 %v3337_v32, %v2784_v46  ;;  %v2780_v54 = vmul.f32 %v8301_v51, %v16681_v36  ;;  %v3331_v23 = vadd.f32 %v2778_v49, %v2777_v33  ;;  %8322 = vtanh.f32 %v16892_v34  ;;  %v16896_v49 = vld [vmem:[#allocation117_spill] sm:$0xff] }
 0x1ef   : > { %16890 = vst [vmem:[#allocation104_spill] sm:$0xff] %v11028_v39  ;;  %16891 = vst [vmem:[#allocation105_spill] sm:$0xff] %v11032_v37  ;;  %v8305_v55 = vpop.eup %8304  ;;  %v2789_v24 = vmul.f32 %v8303_v29, %v9964_v26  ;;  %8324 = vtanh.f32 %v16893_v21  ;;  %v11040_v42 = vmul.f32 %v16865_v60, %v9889_v13  ;;  %v11044_v39 = vmul.f32 %v16857_v40, %v9875_v6 }
 0x1f0   : > { %v8307_v37 = vpop.eup %8306  ;;  %3339 = vadd.xlane.f32.xlu1 %v3338_v44  ;;  %v3332_v46 = vadd.f32 %v3331_v23, %v2779_v22  ;;  %v2790_v33 = vmul.f32 %v8305_v55, %v9967_v35  ;;  %8326 = vtanh.f32 %v10732_v43  ;;  %v11050_v34 = vmul.f32 %v16860_v1, %v9879_v8  ;;  %v16899_v23 = vld [vmem:[#allocation107_spill] sm:$0xff] }
 0x1f1   : > { %16894 = vst [vmem:[#allocation106_spill] sm:$0xff] %v11044_v39  ;;  %v8309_v21 = vpop.eup %8308  ;;  %v2791_v32 = vmul.f32 %v8307_v37, %v16678_v50  ;;  %8328 = vtanh.f32 %v16896_v49  ;;  %v11056_v51 = vmul.f32 %v16863_v45, %v9877_v7  ;;  %v11060_v22 = vmul.f32 %v16865_v60, %v9881_v9  ;;  %v16900_v39 = vld [vmem:[#allocation50_spill] sm:$0xff] }
 0x1f2   : > { %16895 = vst [vmem:[#allocation49_spill] sm:$0xff] %v11050_v34  ;;  %v8311_v55 = vpop.eup %8310  ;;  %v3333_v29 = vadd.f32 %v3332_v46, %v2780_v54  ;;  %v2792_v43 = vmul.f32 %v8309_v21, %v16681_v36  ;;  %v3346_v44 = vadd.f32 %v2790_v33, %v2789_v24  ;;  %8330 = vtanh.f32 %v16899_v23  ;;  %v16901_v46 = vld [vmem:[#allocation51_spill] sm:$0xff] }
 0x1f3   : > { %16897 = vst [vmem:[#allocation117_spill] sm:$0xff] %v11056_v51  ;;  %16898 = vst [vmem:[#allocation128_spill] sm:$0xff] %v11060_v22  ;;  %v8313_v34 = vpop.eup %8312  ;;  %v2785_v37 = vmul.f32 %v8311_v55, %v9964_v26  ;;  %8332 = vtanh.f32 %v16900_v39  ;;  %v11068_v49 = vmul.f32 %v16857_v40, %v9899_v18  ;;  %v11072_v51 = vmul.f32 %v16860_v1, %v9903_v19 }
 0x1f4   : > { %v8315_v22 = vpop.eup %8314  ;;  %3334 = vadd.xlane.f32.xlu0 %v3333_v29  ;;  %v3347_v54 = vadd.f32 %v3346_v44, %v2791_v32  ;;  %v2786_v24 = vmul.f32 %v8313_v34, %v9967_v35  ;;  %8334 = vtanh.f32 %v16901_v46  ;;  %v11078_v33 = vmul.f32 %v16863_v45, %v9901_v3 }
 0x1f5   : > { %v8317_v39 = vpop.eup %8316  ;;  %v2787_v21 = vmul.f32 %v8315_v22, %v16678_v50  ;;  %8336 = vtanh.f32 %v10760_v47  ;;  %v11084_v55 = vmul.f32 %v16865_v60, %v9905_v20  ;;  %v11088_v32 = vmul.f32 %v16857_v40, %v9891_v14 }
 0x1f6   : > { %16902 = vst [vmem:[#allocation107_spill] sm:$0xff] %v11078_v33  ;;  %v8319_v34 = vpop.eup %8318  ;;  %v3348_v29 = vadd.f32 %v3347_v54, %v2792_v43  ;;  %v2788_v44 = vmul.f32 %v8317_v39, %v16681_v36  ;;  %v3341_v23 = vadd.f32 %v2786_v24, %v2785_v37  ;;  %8338 = vtanh.f32 %v10764_v31  ;;  %v16904_v33 = vld [vmem:[#allocation108_spill] sm:$0xff]  ;;  %v16906_v54 = vld [vmem:[#allocation109_spill] sm:$0xff] }
 0x1f7   : > { %16903 = vst [vmem:[#allocation50_spill] sm:$0xff] %v11088_v32  ;;  %v8321_v46 = vpop.eup %8320  ;;  %v2797_v22 = vmul.f32 %v8319_v34, %v9964_v26  ;;  %8340 = vtanh.f32 %v16904_v33  ;;  %v11096_v47 = vmul.f32 %v16860_v1, %v9895_v16  ;;  %v11100_v40 = vmul.f32 %v16863_v45, %v9893_v15  ;;  %v16908_v1 = vld [vmem:[#allocation52_spill] sm:$0xff]  ;;  %v16909_v39 = vld [vmem:[#allocation69_spill] sm:$0xff]  ;;  %v16911_v34 = vld [vmem:[#allocation70_spill] sm:$0xff] }
 0x1f8   : > { %v8323_v32 = vpop.eup %8322  ;;  %3349 = vadd.xlane.f32.xlu1 %v3348_v29  ;;  %v3342_v43 = vadd.f32 %v3341_v23, %v2787_v21  ;;  %v2798_v37 = vmul.f32 %v8321_v46, %v9967_v35  ;;  %8342 = vtanh.f32 %v16906_v54  ;;  %v11106_v31 = vmul.f32 %v16865_v60, %v9897_v17 }
 0x1f9   : > { %16905 = vst [vmem:[#allocation51_spill] sm:$0xff] %v11100_v40  ;;  %v8325_v24 = vpop.eup %8324  ;;  %v2799_v33 = vmul.f32 %v8323_v32, %v16678_v50  ;;  %8344 = vtanh.f32 %v16908_v1  ;;  %v11112_v45 = vmul.f32 %v16909_v39, %v9851_v57  ;;  %v11116_v21 = vmul.f32 %v16911_v34, %v9855_v59  ;;  %v16913_v1 = vld [vmem:[#allocation71_spill] sm:$0xff] }
 0x1fa   : > { %16907 = vst [vmem:[#allocation108_spill] sm:$0xff] %v11106_v31  ;;  %v8327_v29 = vpop.eup %8326  ;;  %v3343_v23 = vadd.f32 %v3342_v43, %v2788_v44  ;;  %v2800_v46 = vmul.f32 %v8325_v24, %v16681_v36  ;;  %v3356_v54 = vadd.f32 %v2798_v37, %v2797_v22  ;;  %8346 = vtanh.f32 %v10788_v48  ;;  %v16917_v37 = vld [vmem:[#allocation53_spill] sm:$0xff] }
 0x1fb   : > { %16910 = vst [vmem:[#allocation109_spill] sm:$0xff] %v11112_v45  ;;  %16912 = vst [vmem:[#allocation52_spill] sm:$0xff] %v11116_v21  ;;  %v8329_v60 = vpop.eup %8328  ;;  %v2793_v32 = vmul.f32 %v8327_v29, %v9964_v26  ;;  %8348 = vtanh.f32 %v10792_v25  ;;  %v11124_v31 = vmul.f32 %v16913_v1, %v9853_v58  ;;  %v16914_v45 = vld [vmem:[#allocation72_spill] sm:$0xff]  ;;  %v11134_v48 = vmul.f32 %v16909_v39, %v9843_v53 }
 0x1fc   : > { %v11128_v40 = vmul.f32 %v16914_v45, %v16705_v52  ;;  %v8331_v21 = vpop.eup %8330  ;;  %3344 = vadd.xlane.f32.xlu0 %v3343_v23  ;;  %v3357_v44 = vadd.f32 %v3356_v54, %v2799_v33  ;;  %v2794_v22 = vmul.f32 %v8329_v60, %v9967_v35  ;;  %8350 = vtanh.f32 %v10798_v27  ;;  %v16920_v60 = vld [vmem:[#allocation54_spill] sm:$0xff] }
 0x1fd   : > { %16916 = vst [vmem:[#allocation70_spill] sm:$0xff] %v11134_v48  ;;  %v8333_v25 = vpop.eup %8332  ;;  %v2795_v43 = vmul.f32 %v8331_v21, %v16678_v50  ;;  %8352 = vtanh.f32 %v16917_v37  ;;  %v11140_v24 = vmul.f32 %v16911_v34, %v16711_v0  ;;  %v11144_v33 = vmul.f32 %v16913_v1, %v16761_v28 }
 0x1fe   : > { %16915 = vst [vmem:[#allocation69_spill] sm:$0xff] %v11128_v40  ;;  %v8335_v29 = vpop.eup %8334  ;;  %v3358_v23 = vadd.f32 %v3357_v44, %v2800_v46  ;;  %v2796_v27 = vmul.f32 %v8333_v25, %v16681_v36  ;;  %v3351_v54 = vadd.f32 %v2794_v22, %v2793_v32  ;;  %8354 = vtanh.f32 %v16920_v60  ;;  %v16921_v40 = vld [vmem:[#allocation110_spill] sm:$0xff]  ;;  %v16924_v44 = vld [vmem:[#allocation111_spill] sm:$0xff] }
 0x1ff   : > { %16918 = vst [vmem:[#allocation71_spill] sm:$0xff] %v11140_v24  ;;  %16919 = vst [vmem:[#allocation72_spill] sm:$0xff] %v11144_v33  ;;  %v8337_v48 = vpop.eup %8336  ;;  %v2677_v21 = vmul.f32 %v8335_v29, %v9964_v26  ;;  %8356 = vtanh.f32 %v16921_v40  ;;  %v11152_v37 = vmul.f32 %v16914_v45, %v16763_v56  ;;  %v11156_v24 = vmul.f32 %v16909_v39, %v16718_v30  ;;  %v16926_v29 = vld [vmem:[#allocation112_spill] sm:$0xff] }
 0x200   : > { %v8339_v33 = vpop.eup %8338  ;;  %3359 = vadd.xlane.f32.xlu1 %v3358_v23  ;;  %v3352_v46 = vadd.f32 %v3351_v54, %v2795_v43  ;;  %v2678_v32 = vmul.f32 %v8337_v48, %v9967_v35  ;;  %8358 = vtanh.f32 %v16924_v44  ;;  %v11162_v22 = vmul.f32 %v16911_v34, %v9871_v4 }
 0x201   : > { %16922 = vst [vmem:[#allocation53_spill] sm:$0xff] %v11152_v37  ;;  %16923 = vst [vmem:[#allocation54_spill] sm:$0xff] %v11156_v24  ;;  %v8341_v40 = vpop.eup %8340  ;;  %v2679_v25 = vmul.f32 %v8339_v33, %v16678_v50  ;;  %8360 = vtanh.f32 %v16926_v29  ;;  %v11168_v60 = vmul.f32 %v16913_v1, %v9869_v2  ;;  %v11172_v43 = vmul.f32 %v16914_v45, %v9873_v5  ;;  %v16929_v24 = vld [vmem:[#allocation118_spill] sm:$0xff]  ;;  %v16930_v37 = vld [vmem:[#allocation124_spill] sm:$0xff] }
 0x202   : > { %16925 = vst [vmem:[#allocation110_spill] sm:$0xff] %v11162_v22  ;;  %v8343_v48 = vpop.eup %8342  ;;  %v3353_v23 = vadd.f32 %v3352_v46, %v2796_v27  ;;  %v2680_v54 = vmul.f32 %v8341_v40, %v16681_v36  ;;  %v3206_v44 = vadd.f32 %v2678_v32, %v2677_v21  ;;  %8362 = vtanh.f32 %v16929_v24  ;;  %v16933_v46 = vld [vmem:[#allocation119_spill] sm:$0xff]  ;;  %v16935_v40 = vld [vmem:[#allocation120_spill] sm:$0xff] }
 0x203   : > { %16927 = vst [vmem:[#allocation111_spill] sm:$0xff] %v11168_v60  ;;  %16928 = vst [vmem:[#allocation112_spill] sm:$0xff] %v11172_v43  ;;  %v8345_v22 = vpop.eup %8344  ;;  %v2673_v33 = vmul.f32 %v8343_v48, %v9964_v26  ;;  %8364 = vtanh.f32 %v16930_v37  ;;  %v11180_v29 = vmul.f32 %v16909_v39, %v9859_v61  ;;  %v11184_v60 = vmul.f32 %v16911_v34, %v9863_v63 }
 0x204   : > { %v8347_v43 = vpop.eup %8346  ;;  %3354 = vadd.xlane.f32.xlu0 %v3353_v23  ;;  %v3207_v27 = vadd.f32 %v3206_v44, %v2679_v25  ;;  %v2674_v21 = vmul.f32 %v8345_v22, %v9967_v35  ;;  %8366 = vtanh.f32 %v16933_v46  ;;  %v11190_v24 = vmul.f32 %v16913_v1, %v9861_v62 }
 0x205   : > { %16931 = vst [vmem:[#allocation118_spill] sm:$0xff] %v11180_v29  ;;  %16932 = vst [vmem:[#allocation124_spill] sm:$0xff] %v11184_v60  ;;  %v8349_v37 = vpop.eup %8348  ;;  %v2675_v32 = vmul.f32 %v8347_v43, %v16678_v50  ;;  %8368 = vtanh.f32 %v16935_v40  ;;  %v11196_v48 = vmul.f32 %v16914_v45, %v16686_v38  ;;  %v11200_v25 = vmul.f32 %v16909_v39, %v9883_v10  ;;  %v16938_v60 = vld [vmem:[#allocation65_spill] sm:$0xff] }
 0x206   : > { %16934 = vst [vmem:[#allocation119_spill] sm:$0xff] %v11190_v24  ;;  %v8351_v22 = vpop.eup %8350  ;;  %v3208_v23 = vadd.f32 %v3207_v27, %v2680_v54  ;;  %v2676_v44 = vmul.f32 %v8349_v37, %v16681_v36  ;;  %v3201_v46 = vadd.f32 %v2674_v21, %v2673_v33  ;;  %8370 = vtanh.f32 %v16938_v60  ;;  %v16939_v29 = vld [vmem:[#allocation113_spill] sm:$0xff]  ;;  %v16944_v37 = vld [vmem:[#allocation66_spill] sm:$0xff] }
 0x207   : > { %16936 = vst [vmem:[#allocation120_spill] sm:$0xff] %v11196_v48  ;;  %16937 = vst [vmem:[#allocation129_spill] sm:$0xff] %v11200_v25  ;;  %v8353_v24 = vpop.eup %8352  ;;  %v2685_v43 = vmul.f32 %v8351_v22, %v9964_v26  ;;  %8372 = vtanh.f32 %v16939_v29  ;;  %v11208_v40 = vmul.f32 %v16911_v34, %v9887_v12  ;;  %v11212_v48 = vmul.f32 %v16913_v1, %v9885_v11  ;;  %v16942_v27 = vld [vmem:[#allocation125_spill] sm:$0xff] }
 0x208   : > { %v8355_v25 = vpop.eup %8354  ;;  %3209 = vadd.xlane.f32.xlu1 %v3208_v23  ;;  %v3202_v54 = vadd.f32 %v3201_v46, %v2675_v32  ;;  %v2686_v33 = vmul.f32 %v8353_v24, %v9967_v35  ;;  %8374 = vtanh.f32 %v16942_v27  ;;  %v11218_v60 = vmul.f32 %v16914_v45, %v9889_v13 }
 0x209   : > { %16940 = vst [vmem:[#allocation65_spill] sm:$0xff] %v11208_v40  ;;  %16941 = vst [vmem:[#allocation113_spill] sm:$0xff] %v11212_v48  ;;  %v8357_v29 = vpop.eup %8356  ;;  %v2687_v21 = vmul.f32 %v8355_v25, %v16678_v50  ;;  %8376 = vtanh.f32 %v16944_v37  ;;  %v11224_v22 = vmul.f32 %v16909_v39, %v9875_v6  ;;  %v11228_v32 = vmul.f32 %v16911_v34, %v9879_v8  ;;  %v16947_v48 = vld [vmem:[#allocation67_spill] sm:$0xff]  ;;  %v16948_v40 = vld [vmem:[#allocation114_spill] sm:$0xff] }
 0x20a   : > { %16943 = vst [vmem:[#allocation125_spill] sm:$0xff] %v11218_v60  ;;  %v8359_v24 = vpop.eup %8358  ;;  %v3203_v23 = vadd.f32 %v3202_v54, %v2676_v44  ;;  %v2688_v46 = vmul.f32 %v8357_v29, %v16681_v36  ;;  %v3216_v27 = vadd.f32 %v2686_v33, %v2685_v43  ;;  %8378 = vtanh.f32 %v16947_v48  ;;  %v16951_v54 = vld [vmem:[#allocation68_spill] sm:$0xff]  ;;  %v16953_v29 = vld [vmem:[#allocation126_spill] sm:$0xff] }
 0x20b   : > { %16945 = vst [vmem:[#allocation66_spill] sm:$0xff] %v11224_v22  ;;  %16946 = vst [vmem:[#allocation130_spill] sm:$0xff] %v11228_v32  ;;  %v8361_v60 = vpop.eup %8360  ;;  %v2681_v25 = vmul.f32 %v8359_v24, %v9964_v26  ;;  %8380 = vtanh.f32 %v16948_v40  ;;  %v11236_v37 = vmul.f32 %v16913_v1, %v9877_v7  ;;  %v11240_v22 = vmul.f32 %v16914_v45, %v9881_v9 }
 0x20c   : > { %v8363_v32 = vpop.eup %8362  ;;  %3204 = vadd.xlane.f32.xlu0 %v3203_v23  ;;  %v3217_v44 = vadd.f32 %v3216_v27, %v2687_v21  ;;  %v2682_v43 = vmul.f32 %v8361_v60, %v9967_v35  ;;  %8382 = vtanh.f32 %v16951_v54  ;;  %v11246_v48 = vmul.f32 %v16909_v39, %v9899_v18 }
 0x20d   : > { %16949 = vst [vmem:[#allocation67_spill] sm:$0xff] %v11236_v37  ;;  %16950 = vst [vmem:[#allocation114_spill] sm:$0xff] %v11240_v22  ;;  %v8365_v40 = vpop.eup %8364  ;;  %v2683_v33 = vmul.f32 %v8363_v32, %v16678_v50  ;;  %8384 = vtanh.f32 %v16953_v29  ;;  %v11252_v24 = vmul.f32 %v16911_v34, %v9903_v19  ;;  %v11256_v21 = vmul.f32 %v16913_v1, %v9901_v3  ;;  %v16956_v22 = vld [vmem:[#allocation96_spill] sm:$0xff]  ;;  %v16957_v37 = vld [vmem:[#allocation97_spill] sm:$0xff] }
 0x20e   : > { %16952 = vst [vmem:[#allocation68_spill] sm:$0xff] %v11246_v48  ;;  %v8367_v60 = vpop.eup %8366  ;;  %v3218_v23 = vadd.f32 %v3217_v44, %v2688_v46  ;;  %v2684_v27 = vmul.f32 %v8365_v40, %v16681_v36  ;;  %v3211_v54 = vadd.f32 %v2682_v43, %v2681_v25  ;;  %8386 = vtanh.f32 %v16956_v22  ;;  %v16960_v44 = vld [vmem:[#allocation115_spill] sm:$0xff]  ;;  %v16962_v40 = vld [vmem:[#allocation116_spill] sm:$0xff] }
 0x20f   : > { %16954 = vst [vmem:[#allocation126_spill] sm:$0xff] %v11252_v24  ;;  %16955 = vst [vmem:[#allocation131_spill] sm:$0xff] %v11256_v21  ;;  %v8369_v48 = vpop.eup %8368  ;;  %v2693_v32 = vmul.f32 %v8367_v60, %v9964_v26  ;;  %8388 = vtanh.f32 %v16957_v37  ;;  %v11264_v29 = vmul.f32 %v16914_v45, %v9905_v20  ;;  %v11268_v24 = vmul.f32 %v16909_v39, %v9891_v14 }
 0x210   : > { %v8371_v21 = vpop.eup %8370  ;;  %3219 = vadd.xlane.f32.xlu1 %v3218_v23  ;;  %v3212_v46 = vadd.f32 %v3211_v54, %v2683_v33  ;;  %v2694_v25 = vmul.f32 %v8369_v48, %v9967_v35  ;;  %8390 = vtanh.f32 %v16960_v44  ;;  %v11274_v22 = vmul.f32 %v16911_v34, %v9895_v16  ;;  %v16965_v34 = vld [vmem:[#allocation127_spill] sm:$0xff] }
 0x211   : > { %16958 = vst [vmem:[#allocation96_spill] sm:$0xff] %v11264_v29  ;;  %16959 = vst [vmem:[#allocation97_spill] sm:$0xff] %v11268_v24  ;;  %v8373_v37 = vpop.eup %8372  ;;  %v2695_v43 = vmul.f32 %v8371_v21, %v16678_v50  ;;  %8392 = vtanh.f32 %v16962_v40  ;;  %v11280_v39 = vmul.f32 %v16913_v1, %v9893_v15  ;;  %v11284_v33 = vmul.f32 %v16914_v45, %v9897_v17  ;;  %v16967_v40 = vld [vmem:[#allocation73_spill] sm:$0xff]  ;;  %v16979_v29 = vld [vmem:[#allocation56_spill] sm:$0xff] }
 0x212   : > { %16961 = vst [vmem:[#allocation115_spill] sm:$0xff] %v11274_v22  ;;  %v8375_v48 = vpop.eup %8374  ;;  %v3213_v60 = vadd.f32 %v3212_v46, %v2684_v27  ;;  %v2696_v23 = vmul.f32 %v8373_v37, %v16681_v36  ;;  %v3226_v54 = vadd.f32 %v2694_v25, %v2693_v32  ;;  %8394 = vtanh.f32 %v16965_v34  ;;  %v16966_v22 = vld [vmem:[#allocation59_spill] sm:$0xff]  ;;  %v16971_v46 = vld [vmem:[#allocation62_spill] sm:$0xff] }
 0x213   : > { %16963 = vst [vmem:[#allocation116_spill] sm:$0xff] %v11280_v39  ;;  %16964 = vst [vmem:[#allocation132_spill] sm:$0xff] %v11284_v33  ;;  %v8377_v44 = vpop.eup %8376  ;;  %v2689_v21 = vmul.f32 %v8375_v48, %v9964_v26  ;;  %8396 = vtanh.f32 %v16966_v22  ;;  %v11292_v1 = vmul.f32 %v16967_v40, %v9851_v57  ;;  %v16969_v39 = vld [vmem:[#allocation74_spill] sm:$0xff]  ;;  %v16972_v25 = vld [vmem:[#allocation75_spill] sm:$0xff] }
 0x214   : > { %v11296_v45 = vmul.f32 %v16969_v39, %v9855_v59  ;;  %v8379_v33 = vpop.eup %8378  ;;  %3214 = vadd.xlane.f32.xlu0 %v3213_v60  ;;  %v3227_v27 = vadd.f32 %v3226_v54, %v2695_v43  ;;  %v2690_v32 = vmul.f32 %v8377_v44, %v9967_v35  ;;  %8398 = vtanh.f32 %v16971_v46  ;;  %v16974_v34 = vld [vmem:[#allocation55_spill] sm:$0xff] }
 0x215   : > { %16968 = vst [vmem:[#allocation127_spill] sm:$0xff] %v11292_v1  ;;  %v11302_v37 = vmul.f32 %v16972_v25, %v9853_v58  ;;  %v8381_v22 = vpop.eup %8380  ;;  %v2691_v48 = vmul.f32 %v8379_v33, %v16678_v50  ;;  %8400 = vtanh.f32 %v16974_v34  ;;  %v16975_v1 = vld [vmem:[#allocation76_spill] sm:$0xff]  ;;  %v11312_v43 = vmul.f32 %v16967_v40, %v9843_v53 }
 0x216   : > { %16970 = vst [vmem:[#allocation59_spill] sm:$0xff] %v11296_v45  ;;  %v11308_v24 = vmul.f32 %v16975_v1, %v16705_v52  ;;  %v8383_v60 = vpop.eup %8382  ;;  %v3228_v54 = vadd.f32 %v3227_v27, %v2696_v23  ;;  %v2692_v44 = vmul.f32 %v8381_v22, %v16681_v36  ;;  %v3221_v46 = vadd.f32 %v2690_v32, %v2689_v21  ;;  %v16978_v45 = vld [vmem:[#allocation121_spill] sm:$0xff]  ;;  %v16982_v27 = vld [vmem:[#allocation98_spill] sm:$0xff] }
 0x217   : > { %16973 = vst [vmem:[#allocation73_spill] sm:$0xff] %v11302_v37  ;;  %16977 = vst [vmem:[#allocation62_spill] sm:$0xff] %v11312_v43  ;;  %8402 = vtanh.f32 %v16978_v45  ;;  %v8385_v37 = vpop.eup %8384  ;;  %v2701_v33 = vmul.f32 %v8383_v60, %v9964_v26  ;;  %v11320_v34 = vmul.f32 %v16969_v39, %v16711_v0  ;;  %v11330_v45 = vmul.f32 %v16975_v1, %v16763_v56  ;;  %v16984_v22 = vld [vmem:[#allocation57_spill] sm:$0xff] }
 0x218   : > { %16976 = vst [vmem:[#allocation74_spill] sm:$0xff] %v11308_v24  ;;  %8404 = vtanh.f32 %v16979_v29  ;;  %v11324_v24 = vmul.f32 %v16972_v25, %v16761_v28  ;;  %v8387_v43 = vpop.eup %8386  ;;  %3229 = vadd.xlane.f32.xlu1 %v3228_v54  ;;  %v3222_v23 = vadd.f32 %v3221_v46, %v2691_v48  ;;  %v2702_v21 = vmul.f32 %v8385_v37, %v9967_v35 }
 0x219   : > { %16980 = vst [vmem:[#allocation75_spill] sm:$0xff] %v11320_v34  ;;  %8406 = vtanh.f32 %v16982_v27  ;;  %16983 = vst [vmem:[#allocation76_spill] sm:$0xff] %v11330_v45  ;;  %v8389_v29 = vpop.eup %8388  ;;  %v2703_v32 = vmul.f32 %v8387_v43, %v16678_v50  ;;  %v11336_v60 = vmul.f32 %v16967_v40, %v16718_v30  ;;  %v11340_v48 = vmul.f32 %v16969_v39, %v9871_v4  ;;  %v16988_v34 = vld [vmem:[#allocation63_spill] sm:$0xff] }
 0x21a   : > { %16981 = vst [vmem:[#allocation55_spill] sm:$0xff] %v11324_v24  ;;  %8408 = vtanh.f32 %v16984_v22  ;;  %v8391_v37 = vpop.eup %8390  ;;  %v3223_v54 = vadd.f32 %v3222_v23, %v2692_v44  ;;  %v2704_v46 = vmul.f32 %v8389_v29, %v16681_v36  ;;  %v3236_v27 = vadd.f32 %v2702_v21, %v2701_v33  ;;  %v16987_v24 = vld [vmem:[#allocation58_spill] sm:$0xff]  ;;  %v16990_v23 = vld [vmem:[#allocation99_spill] sm:$0xff] }
 0x21b   : > { %16985 = vst [vmem:[#allocation121_spill] sm:$0xff] %v11336_v60  ;;  %16986 = vst [vmem:[#allocation56_spill] sm:$0xff] %v11340_v48  ;;  %8410 = vtanh.f32 %v16987_v24  ;;  %v8393_v45 = vpop.eup %8392  ;;  %v2697_v43 = vmul.f32 %v8391_v37, %v9964_v26  ;;  %v11348_v22 = vmul.f32 %v16972_v25, %v9869_v2  ;;  %v11352_v60 = vmul.f32 %v16975_v1, %v9873_v5 }
 0x21c   : > { %8412 = vtanh.f32 %v16988_v34  ;;  %v8395_v48 = vpop.eup %8394  ;;  %3224 = vadd.xlane.f32.xlu0 %v3223_v54  ;;  %v3237_v44 = vadd.f32 %v3236_v27, %v2703_v32  ;;  %v2698_v33 = vmul.f32 %v8393_v45, %v9967_v35  ;;  %v11358_v24 = vmul.f32 %v16967_v40, %v9859_v61 }
 0x21d   : > { %16989 = vst [vmem:[#allocation98_spill] sm:$0xff] %v11352_v60  ;;  %8414 = vtanh.f32 %v16990_v23  ;;  %v8397_v34 = vpop.eup %8396  ;;  %v2699_v21 = vmul.f32 %v8395_v48, %v16678_v50  ;;  %v11364_v29 = vmul.f32 %v16969_v39, %v9863_v63  ;;  %v11368_v32 = vmul.f32 %v16972_v25, %v9861_v62  ;;  %v16994_v23 = vld [vmem:[#allocation64_spill] sm:$0xff]  ;;  %v16995_v60 = vld [vmem:[#allocation122_spill] sm:$0xff] }
 0x21e   : > { %16991 = vst [vmem:[#allocation57_spill] sm:$0xff] %v11358_v24  ;;  %8416 = vtanh.f32 %v10984_v41  ;;  %v8399_v45 = vpop.eup %8398  ;;  %v3238_v37 = vadd.f32 %v3237_v44, %v2704_v46  ;;  %v2700_v54 = vmul.f32 %v8397_v34, %v16681_v36  ;;  %v3231_v27 = vadd.f32 %v2698_v33, %v2697_v43  ;;  %v16998_v44 = vld [vmem:[#allocation100_spill] sm:$0xff] }
 0x21f   : > { %16992 = vst [vmem:[#allocation58_spill] sm:$0xff] %v11364_v29  ;;  %16993 = vst [vmem:[#allocation63_spill] sm:$0xff] %v11368_v32  ;;  %8418 = vtanh.f32 %v16994_v23  ;;  %v8401_v24 = vpop.eup %8400  ;;  %v2709_v48 = vmul.f32 %v8399_v45, %v9964_v26  ;;  %v11376_v41 = vmul.f32 %v16975_v1, %v16686_v38  ;;  %v11380_v29 = vmul.f32 %v16967_v40, %v9883_v10  ;;  %v17000_v45 = vld [vmem:[#allocation101_spill] sm:$0xff] }
 0x220   : > { %8420 = vtanh.f32 %v16995_v60  ;;  %3239 = vadd.xlane.f32.xlu1 %v3238_v37  ;;  %v3232_v46 = vadd.f32 %v3231_v27, %v2699_v21  ;;  %v2710_v43 = vmul.f32 %v8401_v24, %v9967_v35  ;;  %v11386_v33 = vmul.f32 %v16969_v39, %v9887_v12 }
 0x221   : > { %16996 = vst [vmem:[#allocation99_spill] sm:$0xff] %v11376_v41  ;;  %16997 = vst [vmem:[#allocation64_spill] sm:$0xff] %v11380_v29  ;;  %v8403_v32 = vpop.eup %8402  ;;  %8422 = vtanh.f32 %v16998_v44  ;;  %v11392_v23 = vmul.f32 %v16972_v25, %v9885_v11  ;;  %v11396_v21 = vmul.f32 %v16975_v1, %v9889_v13  ;;  %v17003_v29 = vld [vmem:[#allocation102_spill] sm:$0xff]  ;;  %v17004_v41 = vld [vmem:[#allocation103_spill] sm:$0xff] }
 0x222   : > { %16999 = vst [vmem:[#allocation122_spill] sm:$0xff] %v11386_v33  ;;  %v8405_v60 = vpop.eup %8404  ;;  %v2711_v34 = vmul.f32 %v8403_v32, %v16678_v50  ;;  %8424 = vtanh.f32 %v17000_v45  ;;  %v3233_v37 = vadd.f32 %v3232_v46, %v2700_v54  ;;  %v3246_v44 = vadd.f32 %v2710_v43, %v2709_v48  ;;  %v17006_v46 = vld [vmem:[#allocation123_spill] sm:$0xff] }
 0x223   : > { %17001 = vst [vmem:[#allocation100_spill] sm:$0xff] %v11392_v23  ;;  %17002 = vst [vmem:[#allocation101_spill] sm:$0xff] %v11396_v21  ;;  %v8407_v24 = vpop.eup %8406  ;;  %v2712_v27 = vmul.f32 %v8405_v60, %v16681_v36  ;;  %8426 = vtanh.f32 %v17003_v29  ;;  %v11404_v45 = vmul.f32 %v16967_v40, %v9875_v6  ;;  %v11408_v23 = vmul.f32 %v16969_v39, %v9879_v8  ;;  %v17008_v60 = vld [vmem:[#allocation104_spill] sm:$0xff] }
 0x224   : > { %v8409_v33 = vpop.eup %8408  ;;  %v2705_v32 = vmul.f32 %v8407_v24, %v9964_v26  ;;  %8428 = vtanh.f32 %v17004_v41  ;;  %3234 = vadd.xlane.f32.xlu0 %v3233_v37  ;;  %v3247_v54 = vadd.f32 %v3246_v44, %v2711_v34  ;;  %v11414_v29 = vmul.f32 %v16972_v25, %v9877_v7 }
 0x225   : > { %17005 = vst [vmem:[#allocation102_spill] sm:$0xff] %v11408_v23  ;;  %v8411_v21 = vpop.eup %8410  ;;  %v2706_v48 = vmul.f32 %v8409_v33, %v9967_v35  ;;  %8430 = vtanh.f32 %v17006_v46  ;;  %v11420_v24 = vmul.f32 %v16975_v1, %v9881_v9  ;;  %v11424_v34 = vmul.f32 %v16967_v40, %v9899_v18  ;;  %v17011_v23 = vld [vmem:[#allocation105_spill] sm:$0xff] }
 0x226   : > { %17007 = vst [vmem:[#allocation103_spill] sm:$0xff] %v11414_v29  ;;  %v8413_v41 = vpop.eup %8412  ;;  %v2707_v43 = vmul.f32 %v8411_v21, %v16678_v50  ;;  %8432 = vtanh.f32 %v17008_v60  ;;  %v3248_v37 = vadd.f32 %v3247_v54, %v2712_v27  ;;  %v11432_v60 = vmul.f32 %v16969_v39, %v9903_v19  ;;  %v17014_v54 = vld [vmem:[#allocation106_spill] sm:$0xff] }
 0x227   : > { %17009 = vst [vmem:[#allocation123_spill] sm:$0xff] %v11420_v24  ;;  %17010 = vst [vmem:[#allocation104_spill] sm:$0xff] %v11424_v34  ;;  %v8415_v33 = vpop.eup %8414  ;;  %v2708_v44 = vmul.f32 %v8413_v41, %v16681_v36  ;;  %v3241_v46 = vadd.f32 %v2706_v48, %v2705_v32  ;;  %8434 = vtanh.f32 %v17011_v23  ;;  %v11436_v24 = vmul.f32 %v16972_v25, %v9901_v3  ;;  %v17016_v41 = vld [vmem:[#allocation49_spill] sm:$0xff] }
 0x228   : > { %v8417_v29 = vpop.eup %8416  ;;  %v2717_v21 = vmul.f32 %v8415_v33, %v9964_v26  ;;  %8436 = vtanh.f32 %v11040_v42  ;;  %17012 = vst [vmem:[#allocation105_spill] sm:$0xff] %v11432_v60  ;;  %3249 = vadd.xlane.f32.xlu1 %v3248_v37  ;;  %v11442_v23 = vmul.f32 %v16975_v1, %v9905_v20  ;;  %v11448_v33 = vmul.f32 %v16967_v40, %v9891_v14  ;;  %v17018_v60 = vld [vmem:[#allocation128_spill] sm:$0xff] }
 0x229   : > { %17013 = vst [vmem:[#allocation133_spill] sm:$0xff] %v11436_v24  ;;  %v8419_v34 = vpop.eup %8418  ;;  %v3242_v27 = vadd.f32 %v3241_v46, %v2707_v43  ;;  %v2718_v32 = vmul.f32 %v8417_v29, %v9967_v35  ;;  %8438 = vtanh.f32 %v17014_v54  ;;  %v11452_v43 = vmul.f32 %v16969_v39, %v9895_v16  ;;  %v17017_v24 = vld [vmem:[#allocation117_spill] sm:$0xff] }
 0x22a   : > { %17015 = vst [vmem:[#allocation106_spill] sm:$0xff] %v11442_v23  ;;  %v8421_v42 = vpop.eup %8420  ;;  %v2719_v48 = vmul.f32 %v8419_v34, %v16678_v50  ;;  %8440 = vtanh.f32 %v17016_v41  ;;  %v11460_v40 = vmul.f32 %v16972_v25, %v9893_v15  ;;  %v11464_v39 = vmul.f32 %v16975_v1, %v9897_v17  ;;  %v17022_v25 = vld [vmem:[#allocation80_spill] sm:$0xff] }
 0x22b   : > { %v8423_v29 = vpop.eup %8422  ;;  %v3243_v37 = vadd.f32 %v3242_v27, %v2708_v44  ;;  %v2720_v46 = vmul.f32 %v8421_v42, %v16681_v36  ;;  %v3256_v54 = vadd.f32 %v2718_v32, %v2717_v21  ;;  %8442 = vtanh.f32 %v17017_v24  ;;  %v17020_v24 = vld [vmem:[#allocation79_spill] sm:$0xff]  ;;  %v17024_v42 = vld [vmem:[#allocation81_spill] sm:$0xff] }
 0x22c   : > { %v8425_v23 = vpop.eup %8424  ;;  %v2713_v34 = vmul.f32 %v8423_v29, %v9964_v26  ;;  %8444 = vtanh.f32 %v17018_v60  ;;  %17019 = vst [vmem:[#allocation49_spill] sm:$0xff] %v11464_v39  ;;  %v11470_v27 = vmul.f32 %v17020_v24, %v9851_v57  ;;  %v11476_v1 = vmul.f32 %v17022_v25, %v9855_v59 }
 0x22d   : > { %v8427_v41 = vpop.eup %8426  ;;  %3244 = vadd.xlane.f32.xlu0 %v3243_v37  ;;  %v3257_v44 = vadd.f32 %v3256_v54, %v2719_v48  ;;  %v2714_v21 = vmul.f32 %v8425_v23, %v9967_v35  ;;  %8446 = vtanh.f32 %v11068_v49  ;;  %v11480_v48 = vmul.f32 %v17024_v42, %v9853_v58  ;;  %v17026_v54 = vld [vmem:[#allocation107_spill] sm:$0xff] }
 0x22e   : > { %17021 = vst [vmem:[#allocation117_spill] sm:$0xff] %v11470_v27  ;;  %v8429_v60 = vpop.eup %8428  ;;  %v2715_v32 = vmul.f32 %v8427_v41, %v16678_v50  ;;  %8448 = vtanh.f32 %v11072_v51  ;;  %17023 = vst [vmem:[#allocation128_spill] sm:$0xff] %v11476_v1  ;;  %v17027_v51 = vld [vmem:[#allocation82_spill] sm:$0xff]  ;;  %v11492_v1 = vmul.f32 %v17020_v24, %v9843_v53 }
 0x22f   : > { %17025 = vst [vmem:[#allocation79_spill] sm:$0xff] %v11480_v48  ;;  %v8431_v23 = vpop.eup %8430  ;;  %v3258_v29 = vadd.f32 %v3257_v44, %v2720_v46  ;;  %v2716_v49 = vmul.f32 %v8429_v60, %v16681_v36  ;;  %v3251_v37 = vadd.f32 %v2714_v21, %v2713_v34  ;;  %8450 = vtanh.f32 %v17026_v54  ;;  %v17030_v44 = vld [vmem:[#allocation50_spill] sm:$0xff] }
 0x230   : > { %v8433_v27 = vpop.eup %8432  ;;  %v2725_v41 = vmul.f32 %v8431_v23, %v9964_v26  ;;  %8452 = vtanh.f32 %v11084_v55  ;;  %v11488_v39 = vmul.f32 %v17027_v51, %v16705_v52  ;;  %17029 = vst [vmem:[#allocation81_spill] sm:$0xff] %v11492_v1  ;;  %v11498_v21 = vmul.f32 %v17022_v25, %v16711_v0  ;;  %v17035_v1 = vld [vmem:[#allocation108_spill] sm:$0xff] }
 0x231   : > { %v8435_v48 = vpop.eup %8434  ;;  %3259 = vadd.xlane.f32.xlu1 %v3258_v29  ;;  %v3252_v46 = vadd.f32 %v3251_v37, %v2715_v32  ;;  %v2726_v34 = vmul.f32 %v8433_v27, %v9967_v35  ;;  %8454 = vtanh.f32 %v17030_v44  ;;  %v11504_v23 = vmul.f32 %v17024_v42, %v16761_v28  ;;  %v17034_v44 = vld [vmem:[#allocation51_spill] sm:$0xff] }
 0x232   : > { %17028 = vst [vmem:[#allocation80_spill] sm:$0xff] %v11488_v39  ;;  %17031 = vst [vmem:[#allocation107_spill] sm:$0xff] %v11498_v21  ;;  %v8437_v55 = vpop.eup %8436  ;;  %v2727_v60 = vmul.f32 %v8435_v48, %v16678_v50  ;;  %8456 = vtanh.f32 %v11096_v47  ;;  %v11508_v32 = vmul.f32 %v17027_v51, %v16763_v56  ;;  %v11516_v47 = vmul.f32 %v17020_v24, %v16718_v30  ;;  %v17096_v39 = vld [vmem:[#allocation114_spill] sm:$0xff] }
 0x233   : > { %17032 = vst [vmem:[#allocation82_spill] sm:$0xff] %v11504_v23  ;;  %v8439_v27 = vpop.eup %8438  ;;  %v3253_v29 = vadd.f32 %v3252_v46, %v2716_v49  ;;  %v2728_v37 = vmul.f32 %v8437_v55, %v16681_v36  ;;  %v3266_v54 = vadd.f32 %v2726_v34, %v2725_v41  ;;  %8458 = vtanh.f32 %v17034_v44  ;;  %v17038_v46 = vld [vmem:[#allocation109_spill] sm:$0xff] }
 0x234   : > { %17033 = vst [vmem:[#allocation50_spill] sm:$0xff] %v11508_v32  ;;  %v8441_v21 = vpop.eup %8440  ;;  %v2721_v48 = vmul.f32 %v8439_v27, %v9964_v26  ;;  %8460 = vtanh.f32 %v17035_v1  ;;  %17036 = vst [vmem:[#allocation51_spill] sm:$0xff] %v11516_v47  ;;  %v11520_v23 = vmul.f32 %v17022_v25, %v9871_v4  ;;  %v11526_v34 = vmul.f32 %v17024_v42, %v9869_v2  ;;  %v17040_v27 = vld [vmem:[#allocation52_spill] sm:$0xff] }
 0x235   : > { %v8443_v32 = vpop.eup %8442  ;;  %3254 = vadd.xlane.f32.xlu0 %v3253_v29  ;;  %v3267_v49 = vadd.f32 %v3266_v54, %v2727_v60  ;;  %v2722_v41 = vmul.f32 %v8441_v21, %v9967_v35  ;;  %8462 = vtanh.f32 %v17038_v46  ;;  %v11532_v44 = vmul.f32 %v17027_v51, %v9873_v5 }
 0x236   : > { %17037 = vst [vmem:[#allocation108_spill] sm:$0xff] %v11520_v23  ;;  %17039 = vst [vmem:[#allocation109_spill] sm:$0xff] %v11526_v34  ;;  %v8445_v1 = vpop.eup %8444  ;;  %v2723_v55 = vmul.f32 %v8443_v32, %v16678_v50  ;;  %8464 = vtanh.f32 %v17040_v27  ;;  %v11536_v60 = vmul.f32 %v17020_v24, %v9859_v61  ;;  %v17043_v23 = vld [vmem:[#allocation69_spill] sm:$0xff]  ;;  %v11544_v27 = vmul.f32 %v17022_v25, %v9863_v63 }
 0x237   : > { %17041 = vst [vmem:[#allocation52_spill] sm:$0xff] %v11532_v44  ;;  %v8447_v21 = vpop.eup %8446  ;;  %v3268_v29 = vadd.f32 %v3267_v49, %v2728_v37  ;;  %v2724_v54 = vmul.f32 %v8445_v1, %v16681_v36  ;;  %v3261_v46 = vadd.f32 %v2722_v41, %v2721_v48  ;;  %8466 = vtanh.f32 %v11124_v31  ;;  %v17046_v49 = vld [vmem:[#allocation70_spill] sm:$0xff]  ;;  %v17048_v1 = vld [vmem:[#allocation71_spill] sm:$0xff] }
 0x238   : > { %17042 = vst [vmem:[#allocation134_spill] sm:$0xff] %v11536_v60  ;;  %v8449_v34 = vpop.eup %8448  ;;  %v2733_v32 = vmul.f32 %v8447_v21, %v9964_v26  ;;  %8468 = vtanh.f32 %v17043_v23  ;;  %17044 = vst [vmem:[#allocation69_spill] sm:$0xff] %v11544_v27  ;;  %v11548_v44 = vmul.f32 %v17024_v42, %v9861_v62  ;;  %v11554_v31 = vmul.f32 %v17027_v51, %v16686_v38  ;;  %v17052_v27 = vld [vmem:[#allocation53_spill] sm:$0xff] }
 0x239   : > { %v8451_v60 = vpop.eup %8450  ;;  %3269 = vadd.xlane.f32.xlu1 %v3268_v29  ;;  %v3262_v37 = vadd.f32 %v3261_v46, %v2723_v55  ;;  %v2734_v48 = vmul.f32 %v8449_v34, %v9967_v35  ;;  %8470 = vtanh.f32 %v17046_v49  ;;  %v11560_v21 = vmul.f32 %v17020_v24, %v9883_v10 }
 0x23a   : > { %17045 = vst [vmem:[#allocation135_spill] sm:$0xff] %v11548_v44  ;;  %17047 = vst [vmem:[#allocation70_spill] sm:$0xff] %v11554_v31  ;;  %v8453_v23 = vpop.eup %8452  ;;  %v2735_v41 = vmul.f32 %v8451_v60, %v16678_v50  ;;  %8472 = vtanh.f32 %v17048_v1  ;;  %v11564_v55 = vmul.f32 %v17022_v25, %v9887_v12  ;;  %v17051_v44 = vld [vmem:[#allocation72_spill] sm:$0xff]  ;;  %v11572_v1 = vmul.f32 %v17024_v42, %v9885_v11 }
 0x23b   : > { %17049 = vst [vmem:[#allocation71_spill] sm:$0xff] %v11560_v21  ;;  %v8455_v34 = vpop.eup %8454  ;;  %v3263_v29 = vadd.f32 %v3262_v37, %v2724_v54  ;;  %v2736_v46 = vmul.f32 %v8453_v23, %v16681_v36  ;;  %v3276_v49 = vadd.f32 %v2734_v48, %v2733_v32  ;;  %8474 = vtanh.f32 %v17051_v44  ;;  %v17055_v37 = vld [vmem:[#allocation54_spill] sm:$0xff] }
 0x23c   : > { %17050 = vst [vmem:[#allocation136_spill] sm:$0xff] %v11564_v55  ;;  %v8457_v31 = vpop.eup %8456  ;;  %v2729_v60 = vmul.f32 %v8455_v34, %v9964_v26  ;;  %8476 = vtanh.f32 %v17052_v27  ;;  %17053 = vst [vmem:[#allocation72_spill] sm:$0xff] %v11572_v1  ;;  %v11576_v21 = vmul.f32 %v17027_v51, %v9889_v13  ;;  %v11582_v44 = vmul.f32 %v17020_v24, %v9875_v6  ;;  %v17057_v23 = vld [vmem:[#allocation110_spill] sm:$0xff]  ;;  %v17061_v1 = vld [vmem:[#allocation112_spill] sm:$0xff] }
 0x23d   : > { %v8459_v55 = vpop.eup %8458  ;;  %3264 = vadd.xlane.f32.xlu0 %v3263_v29  ;;  %v3277_v54 = vadd.f32 %v3276_v49, %v2735_v41  ;;  %v2730_v32 = vmul.f32 %v8457_v31, %v9967_v35  ;;  %8478 = vtanh.f32 %v17055_v37  ;;  %v11588_v34 = vmul.f32 %v17022_v25, %v9879_v8 }
 0x23e   : > { %17054 = vst [vmem:[#allocation53_spill] sm:$0xff] %v11576_v21  ;;  %17056 = vst [vmem:[#allocation54_spill] sm:$0xff] %v11582_v44  ;;  %v8461_v27 = vpop.eup %8460  ;;  %v2731_v48 = vmul.f32 %v8459_v55, %v16678_v50  ;;  %8480 = vtanh.f32 %v17057_v23  ;;  %v11592_v41 = vmul.f32 %v17024_v42, %v9877_v7  ;;  %v17060_v21 = vld [vmem:[#allocation111_spill] sm:$0xff]  ;;  %v11600_v23 = vmul.f32 %v17027_v51, %v9881_v9 }
 0x23f   : > { %17058 = vst [vmem:[#allocation110_spill] sm:$0xff] %v11588_v34  ;;  %v8463_v31 = vpop.eup %8462  ;;  %v3278_v29 = vadd.f32 %v3277_v54, %v2736_v46  ;;  %v2732_v49 = vmul.f32 %v8461_v27, %v16681_v36  ;;  %v3271_v37 = vadd.f32 %v2730_v32, %v2729_v60  ;;  %8482 = vtanh.f32 %v17060_v21  ;;  %v17064_v54 = vld [vmem:[#allocation118_spill] sm:$0xff]  ;;  %v17066_v27 = vld [vmem:[#allocation124_spill] sm:$0xff] }
 0x240   : > { %17059 = vst [vmem:[#allocation137_spill] sm:$0xff] %v11592_v41  ;;  %v8465_v44 = vpop.eup %8464  ;;  %v2805_v55 = vmul.f32 %v8463_v31, %v9964_v26  ;;  %8484 = vtanh.f32 %v17061_v1  ;;  %17062 = vst [vmem:[#allocation111_spill] sm:$0xff] %v11600_v23  ;;  %v11604_v34 = vmul.f32 %v17020_v24, %v9899_v18  ;;  %v11610_v21 = vmul.f32 %v17022_v25, %v9903_v19  ;;  %v17070_v23 = vld [vmem:[#allocation120_spill] sm:$0xff] }
 0x241   : > { %v8467_v41 = vpop.eup %8466  ;;  %3279 = vadd.xlane.f32.xlu1 %v3278_v29  ;;  %v3272_v46 = vadd.f32 %v3271_v37, %v2731_v48  ;;  %v2806_v60 = vmul.f32 %v8465_v44, %v9967_v35  ;;  %8486 = vtanh.f32 %v17064_v54  ;;  %v11616_v31 = vmul.f32 %v17024_v42, %v9901_v3 }
 0x242   : > { %17063 = vst [vmem:[#allocation112_spill] sm:$0xff] %v11604_v34  ;;  %17065 = vst [vmem:[#allocation118_spill] sm:$0xff] %v11610_v21  ;;  %v8469_v1 = vpop.eup %8468  ;;  %v2807_v32 = vmul.f32 %v8467_v41, %v16678_v50  ;;  %8488 = vtanh.f32 %v17066_v27  ;;  %v11620_v48 = vmul.f32 %v17027_v51, %v9905_v20  ;;  %v17069_v34 = vld [vmem:[#allocation119_spill] sm:$0xff]  ;;  %v11628_v27 = vmul.f32 %v17020_v24, %v9891_v14 }
 0x243   : > { %17067 = vst [vmem:[#allocation124_spill] sm:$0xff] %v11616_v31  ;;  %v8471_v44 = vpop.eup %8470  ;;  %v3273_v29 = vadd.f32 %v3272_v46, %v2732_v49  ;;  %v2808_v37 = vmul.f32 %v8469_v1, %v16681_v36  ;;  %v3366_v54 = vadd.f32 %v2806_v60, %v2805_v55  ;;  %8490 = vtanh.f32 %v17069_v34  ;;  %v17073_v46 = vld [vmem:[#allocation129_spill] sm:$0xff]  ;;  %v17075_v60 = vld [vmem:[#allocation43_spill] sm:$0xff]  ;;  %v17076_v1 = vld [vmem:[#allocation60_spill] sm:$0xff] }
 0x244   : > { %17068 = vst [vmem:[#allocation138_spill] sm:$0xff] %v11620_v48  ;;  %v8473_v21 = vpop.eup %8472  ;;  %v2801_v41 = vmul.f32 %v8471_v44, %v9964_v26  ;;  %8492 = vtanh.f32 %v17070_v23  ;;  %17071 = vst [vmem:[#allocation119_spill] sm:$0xff] %v11628_v27  ;;  %v11632_v31 = vmul.f32 %v17022_v25, %v9895_v16  ;;  %v11638_v34 = vmul.f32 %v17024_v42, %v9893_v15  ;;  %v17078_v44 = vld [vmem:[#allocation44_spill] sm:$0xff]  ;;  %v17083_v27 = vld [vmem:[#allocation45_spill] sm:$0xff] }
 0x245   : > { %v8475_v48 = vpop.eup %8474  ;;  %3274 = vadd.xlane.f32.xlu0 %v3273_v29  ;;  %v3367_v49 = vadd.f32 %v3366_v54, %v2807_v32  ;;  %v2802_v55 = vmul.f32 %v8473_v21, %v9967_v35  ;;  %8494 = vtanh.f32 %v17073_v46  ;;  %v11642_v24 = vrot.slane %v17076_v1, %v17075_v60  ;;  %v17082_v46 = vld [vmem:[#allocation113_spill] sm:$0xff] }
 0x246   : > { %17072 = vst [vmem:[#allocation120_spill] sm:$0xff] %v11632_v31  ;;  %17074 = vst [vmem:[#allocation129_spill] sm:$0xff] %v11638_v34  ;;  %v8477_v23 = vpop.eup %8476  ;;  %v11646_v25 = vrot.slane %v17076_v1, %v17078_v44  ;;  %v17080_v31 = vld [vmem:[#allocation65_spill] sm:$0xff]  ;;  %v11651_v21 = vmul.f32 %v17027_v51, %v9897_v17  ;;  %v2803_v42 = vmul.f32 %v8475_v48, %v16678_v50  ;;  %v17086_v48 = vld [vmem:[#allocation66_spill] sm:$0xff] }
 0x247   : > { %17077 = vst [vmem:[#allocation60_spill] sm:$0xff] %v11642_v24  ;;  %8496 = vtanh.f32 %v17080_v31  ;;  %v8479_v32 = vpop.eup %8478  ;;  %v3368_v29 = vadd.f32 %v3367_v49, %v2808_v37  ;;  %v3361_v54 = vadd.f32 %v2802_v55, %v2801_v41  ;;  %v11657_v47 = vrot.slane %v17076_v1, %v17083_v27  ;;  %v17085_v24 = vld [vmem:[#allocation125_spill] sm:$0xff]  ;;  %v17087_v41 = vld [vmem:[#allocation83_spill] sm:$0xff] }
 0x248   : > { %17079 = vst [vmem:[#allocation139_spill] sm:$0xff] %v11646_v25  ;;  %17081 = vst [vmem:[#allocation65_spill] sm:$0xff] %v11651_v21  ;;  %8498 = vtanh.f32 %v17082_v46  ;;  %v8481_v34 = vpop.eup %8480  ;;  %v2804_v25 = vmul.f32 %v8477_v23, %v16681_v36  ;;  %v2813_v31 = vmul.f32 %v8479_v32, %v9964_v26  ;;  %v11666_v49 = vmul.f32 %v17087_v41, %v9851_v57  ;;  %v17089_v1 = vld [vmem:[#allocation41_spill] sm:$0xff]  ;;  %v17092_v32 = vld [vmem:[#allocation130_spill] sm:$0xff] }
 0x249   : > { %17084 = vst [vmem:[#allocation113_spill] sm:$0xff] %v11657_v47  ;;  %8500 = vtanh.f32 %v17085_v24  ;;  %v8483_v51 = vpop.eup %8482  ;;  %3369 = vadd.xlane.f32.xlu1 %v3368_v29  ;;  %v3362_v21 = vadd.f32 %v3361_v54, %v2803_v42  ;;  %v2814_v37 = vmul.f32 %v8481_v34, %v9967_v35  ;;  %v17090_v46 = vld [vmem:[#allocation61_spill] sm:$0xff]  ;;  %v17093_v24 = vld [vmem:[#allocation84_spill] sm:$0xff]  ;;  %v17095_v57 = vld [vmem:[#allocation67_spill] sm:$0xff] }
 0x24a   : > { %8502 = vtanh.f32 %v17086_v48  ;;  %17088 = vst [vmem:[#allocation125_spill] sm:$0xff] %v11666_v49  ;;  %v8485_v55 = vpop.eup %8484  ;;  %v11670_v47 = vrot.slane %v17090_v46, %v17089_v1  ;;  %v2815_v23 = vmul.f32 %v8483_v51, %v16678_v50  ;;  %v11676_v29 = vmul.f32 %v17093_v24, %v9855_v59  ;;  %v17097_v51 = vld [vmem:[#allocation85_spill] sm:$0xff] }
 0x24b   : > { %8504 = vtanh.f32 %v17092_v32  ;;  %v8487_v34 = vpop.eup %8486  ;;  %v3363_v42 = vadd.f32 %v3362_v21, %v2804_v25  ;;  %v2816_v54 = vmul.f32 %v8485_v55, %v16681_v36  ;;  %v3376_v48 = vadd.f32 %v2814_v37, %v2813_v31  ;;  %v17099_v32 = vld [vmem:[#allocation86_spill] sm:$0xff]  ;;  %v17101_v31 = vld [vmem:[#allocation68_spill] sm:$0xff] }
 0x24c   : > { %17091 = vst [vmem:[#allocation66_spill] sm:$0xff] %v11670_v47  ;;  %17094 = vst [vmem:[#allocation83_spill] sm:$0xff] %v11676_v29  ;;  %8506 = vtanh.f32 %v17095_v57  ;;  %v8489_v49 = vpop.eup %8488  ;;  %v2809_v17 = vmul.f32 %v8487_v34, %v9964_v26  ;;  %v11684_v47 = vmul.f32 %v17097_v51, %v9853_v58  ;;  %v11688_v59 = vmul.f32 %v17099_v32, %v16705_v52  ;;  %v17104_v55 = vld [vmem:[#allocation126_spill] sm:$0xff] }
 0x24d   : > { %8508 = vtanh.f32 %v17096_v39  ;;  %v8491_v29 = vpop.eup %8490  ;;  %3364 = vadd.xlane.f32.xlu0 %v3363_v42  ;;  %v3377_v25 = vadd.f32 %v3376_v48, %v2815_v23  ;;  %v2810_v21 = vmul.f32 %v8489_v49, %v9967_v35  ;;  %v11694_v57 = vmul.f32 %v17087_v41, %v9843_v53 }
 0x24e   : > { %17098 = vst [vmem:[#allocation61_spill] sm:$0xff] %v11684_v47  ;;  %17100 = vst [vmem:[#allocation130_spill] sm:$0xff] %v11688_v59  ;;  %8510 = vtanh.f32 %v17101_v31  ;;  %v8493_v39 = vpop.eup %8492  ;;  %v11698_v37 = vrot.slane %v17090_v46, %v17075_v60  ;;  %v11703_v34 = vmul.f32 %v17093_v24, %v16711_v0  ;;  %v11707_v49 = vmul.f32 %v17097_v51, %v16761_v28  ;;  %v17109_v47 = vld [vmem:[#allocation96_spill] sm:$0xff] }
 0x24f   : > { %17102 = vst [vmem:[#allocation84_spill] sm:$0xff] %v11694_v57  ;;  %8512 = vtanh.f32 %v17104_v55  ;;  %v8495_v23 = vpop.eup %8494  ;;  %v3378_v42 = vadd.f32 %v3377_v25, %v2816_v54  ;;  %v2811_v48 = vmul.f32 %v8491_v29, %v16678_v50  ;;  %v3371_v31 = vadd.f32 %v2810_v21, %v2809_v17  ;;  %v17107_v57 = vld [vmem:[#allocation131_spill] sm:$0xff]  ;;  %v17111_v25 = vld [vmem:[#allocation97_spill] sm:$0xff] }
 0x250   : > { %17103 = vst [vmem:[#allocation67_spill] sm:$0xff] %v11698_v37  ;;  %17105 = vst [vmem:[#allocation114_spill] sm:$0xff] %v11703_v34  ;;  %8514 = vtanh.f32 %v17107_v57  ;;  %v11713_v37 = vrot.slane %v17090_v46, %v17078_v44  ;;  %v2821_v55 = vmul.f32 %v8495_v23, %v9964_v26  ;;  %v11719_v34 = vmul.f32 %v17099_v32, %v16763_v56  ;;  %v17118_v56 = vld [vmem:[#allocation132_spill] sm:$0xff] }
 0x251   : > { %17106 = vst [vmem:[#allocation85_spill] sm:$0xff] %v11707_v49  ;;  %v8497_v59 = vpop.eup %8496  ;;  %8516 = vtanh.f32 %v17109_v47  ;;  %3379 = vadd.xlane.f32.xlu1 %v3378_v42  ;;  %v2812_v29 = vmul.f32 %v8493_v39, %v16681_v36  ;;  %v3372_v17 = vadd.f32 %v3371_v31, %v2811_v48  ;;  %v11726_v57 = vrot.slane %v17090_v46, %v17083_v27  ;;  %v17113_v47 = vld [vmem:[#allocation77_spill] sm:$0xff]  ;;  %v17116_v42 = vld [vmem:[#allocation115_spill] sm:$0xff]  ;;  %v11737_v48 = vpop.permute.xlu0 %3768 }
 0x252   : > { %17108 = vst [vmem:[#allocation86_spill] sm:$0xff] %v11713_v37  ;;  %17110 = vst [vmem:[#allocation68_spill] sm:$0xff] %v11719_v34  ;;  %v8499_v49 = vpop.eup %8498  ;;  %v2822_v54 = vmul.f32 %v8497_v59, %v9967_v35  ;;  %8518 = vtanh.f32 %v17111_v25  ;;  %v11730_v23 = vrot.slane %v17113_v47, %v17089_v1  ;;  %v11734_v37 = vrot.slane %v17113_v47, %v17075_v60  ;;  %v17117_v34 = vld [vmem:[#allocation116_spill] sm:$0xff] }
 0x253   : > { %v8501_v21 = vpop.eup %8500  ;;  %17112 = vst [vmem:[#allocation126_spill] sm:$0xff] %v11726_v57  ;;  %8520 = vtanh.f32 %v17116_v42  ;;  %v3373_v59 = vadd.f32 %v3372_v17, %v2812_v29  ;;  %v2823_v31 = vmul.f32 %v8499_v49, %v16678_v50  ;;  %v17120_v49 = vld [vmem:[#allocation127_spill] sm:$0xff]  ;;  %v11756_v17 = vrot.slane %v17113_v47, %v17078_v44 }
 0x254   : > { %17114 = vst [vmem:[#allocation131_spill] sm:$0xff] %v11730_v23  ;;  %17115 = vst [vmem:[#allocation96_spill] sm:$0xff] %v11734_v37  ;;  %v8503_v39 = vpop.eup %8502  ;;  %v3386_v25 = vadd.f32 %v2822_v54, %v2821_v55  ;;  %8522 = vtanh.f32 %v17117_v34  ;;  %v2824_v57 = vmul.f32 %v8501_v21, %v16681_v36  ;;  %v11746_v37 = vmul.f32 %v17087_v41, %v16718_v30  ;;  %v17124_v54 = vld [vmem:[#allocation59_spill] sm:$0xff] }
 0x255   : > { %v8505_v46 = vpop.eup %8504  ;;  %v2817_v23 = vmul.f32 %v8503_v39, %v9964_v26  ;;  %8524 = vtanh.f32 %v17118_v56  ;;  %3374 = vadd.xlane.f32.xlu0 %v3373_v59  ;;  %v11752_v34 = vmul.f32 %v17093_v24, %v9871_v4  ;;  %17122 = vst [vmem:[#allocation115_spill] sm:$0xff] %v11756_v17  ;;  %v11760_v56 = vrot.slane %v17113_v47, %v17083_v27 }
 0x256   : > { %17119 = vst [vmem:[#allocation97_spill] sm:$0xff] %v11746_v37  ;;  %v8507_v42 = vpop.eup %8506  ;;  %v3387_v28 = vadd.f32 %v3386_v25, %v2823_v31  ;;  %v2818_v29 = vmul.f32 %v8505_v46, %v9967_v35  ;;  %8526 = vtanh.f32 %v17120_v49  ;;  %v11765_v21 = vmul.f32 %v17097_v51, %v9869_v2  ;;  %v17126_v46 = vld [vmem:[#allocation73_spill] sm:$0xff]  ;;  %v3135_v49 = vpop.xlane.xlu1 %3134  ;;  %v17127_v37 = vld [vmem:[#allocation78_spill] sm:$0xff] }
 0x257   : > { %17121 = vst [vmem:[#allocation77_spill] sm:$0xff] %v11752_v34  ;;  %v8509_v55 = vpop.eup %8508  ;;  %17123 = vst [vmem:[#allocation116_spill] sm:$0xff] %v11760_v56  ;;  %8528 = vtanh.f32 %v17124_v54  ;;  %v2819_v31 = vmul.f32 %v8507_v42, %v16678_v50  ;;  %v3125_v34 = vpop.xlane.xlu0 %3124  ;;  %v11771_v47 = vrot.slane %v17127_v37, %v17089_v1  ;;  %v17129_v56 = vld [vmem:[#allocation74_spill] sm:$0xff]  ;;  %v17132_v1 = vld [vmem:[#allocation75_spill] sm:$0xff] }
 0x258   : > { %17125 = vst [vmem:[#allocation132_spill] sm:$0xff] %v11765_v21  ;;  %v8511_v39 = vpop.eup %8510  ;;  %v3388_v59 = vadd.f32 %v3387_v28, %v2824_v57  ;;  %v3381_v25 = vadd.f32 %v2818_v29, %v2817_v23  ;;  %8530 = vtanh.f32 %v17126_v46  ;;  %v11777_v21 = vmul.f32 %v17099_v32, %v9873_v5  ;;  %v17131_v29 = vld [vmem:[#allocation62_spill] sm:$0xff] }
 0x259   : > { %v8513_v17 = vpop.eup %8512  ;;  %17128 = vst [vmem:[#allocation127_spill] sm:$0xff] %v11771_v47  ;;  %v2829_v54 = vmul.f32 %v8511_v39, %v9964_v26  ;;  %8532 = vtanh.f32 %v17129_v56  ;;  %v2820_v57 = vmul.f32 %v8509_v55, %v16681_v36  ;;  %v11784_v39 = vadd.f32 %v11737_v48, %v3125_v34  ;;  %v17137_v34 = vld [vmem:[#allocation76_spill] sm:$0xff] }
 0x25a   : > { %17130 = vst [vmem:[#allocation59_spill] sm:$0xff] %v11777_v21  ;;  %v8515_v28 = vpop.eup %8514  ;;  %3389 = vadd.xlane.f32.xlu1 %v3388_v59  ;;  %v3382_v23 = vadd.f32 %v3381_v25, %v2819_v31  ;;  %v2830_v42 = vmul.f32 %v8513_v17, %v9967_v35  ;;  %8534 = vtanh.f32 %v17131_v29  ;;  %v11788_v56 = vmul.f32 %v17087_v41, %v9859_v61  ;;  %v17136_v29 = vld [vmem:[#allocation55_spill] sm:$0xff] }
 0x25b   : > { %v8517_v46 = vpop.eup %8516  ;;  %8536 = vtanh.f32 %v17132_v1  ;;  %17133 = vst [vmem:[#allocation73_spill] sm:$0xff] %v11784_v39  ;;  %v11792_v59 = vmul.f32 %v17093_v24, %v9863_v63  ;;  %v2831_v17 = vmul.f32 %v8515_v28, %v16678_v50  ;;  %v11800_v21 = vmul.f32 %v17097_v51, %v9861_v62 }
 0x25c   : > { %17134 = vst [vmem:[#allocation78_spill] sm:$0xff] %v11788_v56  ;;  %v8519_v55 = vpop.eup %8518  ;;  %v3383_v31 = vadd.f32 %v3382_v23, %v2820_v57  ;;  %v3396_v25 = vadd.f32 %v2830_v42, %v2829_v54  ;;  %8538 = vtanh.f32 %v17136_v29  ;;  %v11804_v56 = vmul.f32 %v17099_v32, %v16686_v38  ;;  %v17140_v23 = vld [vmem:[#allocation121_spill] sm:$0xff]  ;;  %v3140_v42 = vpop.xlane.xlu1 %3139 }
 0x25d   : > { %17135 = vst [vmem:[#allocation74_spill] sm:$0xff] %v11792_v59  ;;  %v8521_v47 = vpop.eup %8520  ;;  %v2825_v1 = vmul.f32 %v8519_v55, %v9964_v26  ;;  %8540 = vtanh.f32 %v17137_v34  ;;  %17138 = vst [vmem:[#allocation62_spill] sm:$0xff] %v11800_v21  ;;  %v2832_v28 = vmul.f32 %v8517_v46, %v16681_v36  ;;  %v11811_v29 = vrot.slane %v17127_v37, %v17075_v60  ;;  %v17142_v34 = vld [vmem:[#allocation56_spill] sm:$0xff] }
 0x25e   : > { %17139 = vst [vmem:[#allocation75_spill] sm:$0xff] %v11804_v56  ;;  %v8523_v59 = vpop.eup %8522  ;;  %3384 = vadd.xlane.f32.xlu0 %v3383_v31  ;;  %v3397_v54 = vadd.f32 %v3396_v25, %v2831_v17  ;;  %v2826_v57 = vmul.f32 %v8521_v47, %v9967_v35  ;;  %8542 = vtanh.f32 %v17140_v23  ;;  %v11815_v21 = vadd.f32 %v11737_v48, %v3135_v49  ;;  %v17144_v56 = vld [vmem:[#allocation37_spill] sm:$0xff]  ;;  %v3130_v23 = vpop.xlane.xlu0 %3129 }
 0x25f   : > { %v8525_v55 = vpop.eup %8524  ;;  %17141 = vst [vmem:[#allocation55_spill] sm:$0xff] %v11811_v29  ;;  %8544 = vtanh.f32 %v17142_v34  ;;  %v2827_v47 = vmul.f32 %v8523_v59, %v16678_v50  ;;  %v17145_v29 = vld [vmem:[#allocation98_spill] sm:$0xff]  ;;  %v11824_v34 = vadd.f32 %v11737_v48, %v3140_v42  ;;  %v11835_v42 = vmul.f32 %v17087_v41, %v9883_v10 }
 0x260   : > { %17143 = vst [vmem:[#allocation76_spill] sm:$0xff] %v11815_v21  ;;  %v8527_v46 = vpop.eup %8526  ;;  %v3398_v17 = vadd.f32 %v3397_v54, %v2832_v28  ;;  %v3391_v25 = vadd.f32 %v2826_v57, %v2825_v1  ;;  %8546 = vtanh.f32 %v11348_v22  ;;  %v2828_v31 = vmul.f32 %v8525_v55, %v16681_v36  ;;  %v17147_v1 = vld [vmem:[#allocation57_spill] sm:$0xff]  ;;  %v17148_v54 = vld [vmem:[#allocation58_spill] sm:$0xff] }
 0x261   : > { %v8529_v38 = vpop.eup %8528  ;;  %v2837_v60 = vmul.f32 %v8527_v46, %v9964_v26  ;;  %8548 = vtanh.f32 %v17145_v29  ;;  %17146 = vst [vmem:[#allocation121_spill] sm:$0xff] %v11824_v34  ;;  %v11831_v57 = vadd.f32 %v11737_v48, %v3130_v23  ;;  %17150 = vst [vmem:[#allocation98_spill] sm:$0xff] %v11835_v42  ;;  %v11839_v29 = vmul.f32 %v17093_v24, %v9887_v12 }
 0x262   : > { %v8531_v49 = vpop.eup %8530  ;;  %3399 = vadd.xlane.f32.xlu1 %v3398_v17  ;;  %v3392_v28 = vadd.f32 %v3391_v25, %v2827_v47  ;;  %v2838_v59 = vmul.f32 %v8529_v38, %v9967_v35  ;;  %8550 = vtanh.f32 %v17147_v1  ;;  %v17152_v47 = vld [vmem:[#allocation63_spill] sm:$0xff]  ;;  %v11848_v42 = vmul.f32 %v17097_v51, %v9885_v11 }
 0x263   : > { %v8533_v22 = vpop.eup %8532  ;;  %8552 = vtanh.f32 %v17148_v54  ;;  %17149 = vst [vmem:[#allocation56_spill] sm:$0xff] %v11831_v57  ;;  %17151 = vst [vmem:[#allocation57_spill] sm:$0xff] %v11839_v29  ;;  %v2839_v38 = vmul.f32 %v8531_v49, %v16678_v50  ;;  %v17153_v54 = vld [vmem:[#allocation99_spill] sm:$0xff]  ;;  %v17155_v49 = vld [vmem:[#allocation64_spill] sm:$0xff] }
 0x264   : > { %v8535_v55 = vpop.eup %8534  ;;  %v3393_v46 = vadd.f32 %v3392_v28, %v2828_v31  ;;  %v3406_v17 = vadd.f32 %v2838_v59, %v2837_v60  ;;  %8554 = vtanh.f32 %v17152_v47  ;;  %v2840_v1 = vmul.f32 %v8533_v22, %v16681_v36  ;;  %17154 = vst [vmem:[#allocation58_spill] sm:$0xff] %v11848_v42  ;;  %v17157_v22 = vld [vmem:[#allocation122_spill] sm:$0xff] }
 0x265   : > { %v8537_v25 = vpop.eup %8536  ;;  %v2833_v23 = vmul.f32 %v8535_v55, %v9964_v26  ;;  %8556 = vtanh.f32 %v17153_v54  ;;  %v11854_v60 = vmul.f32 %v17099_v32, %v9889_v13  ;;  %v17158_v55 = vld [vmem:[#allocation38_spill] sm:$0xff] }
 0x266   : > { %v8539_v12 = vpop.eup %8538  ;;  %3394 = vadd.xlane.f32.xlu0 %v3393_v46  ;;  %v3407_v29 = vadd.f32 %v3406_v17, %v2839_v38  ;;  %v2834_v31 = vmul.f32 %v8537_v25, %v9967_v35  ;;  %8558 = vtanh.f32 %v17155_v49  ;;  %v4037_v47 = vrot.slane %v11831_v57, %v17158_v55  ;;  %v17160_v49 = vld [vmem:[#allocation100_spill] sm:$0xff] }
 0x267   : > { %17156 = vst [vmem:[#allocation63_spill] sm:$0xff] %v11854_v60  ;;  %v8541_v28 = vpop.eup %8540  ;;  %v2835_v59 = vmul.f32 %v8539_v12, %v16678_v50  ;;  %8560 = vtanh.f32 %v17157_v22  ;;  %v11862_v46 = vmul.f32 %v17087_v41, %v9875_v6  ;;  %v17161_v12 = vld [vmem:[#allocation101_spill] sm:$0xff]  ;;  %v11870_v22 = vmul.f32 %v17093_v24, %v9879_v8 }
 0x268   : > { %v8543_v38 = vpop.eup %8542  ;;  %v3408_v17 = vadd.f32 %v3407_v29, %v2840_v1  ;;  %v2836_v25 = vmul.f32 %v8541_v28, %v16681_v36  ;;  %v3401_v54 = vadd.f32 %v2834_v31, %v2833_v23  ;;  %8562 = vtanh.f32 %v17160_v49 }
 0x269   : > { %17159 = vst [vmem:[#allocation99_spill] sm:$0xff] %v11862_v46  ;;  %v8545_v60 = vpop.eup %8544  ;;  %v2845_v42 = vmul.f32 %v8543_v38, %v9964_v26  ;;  %8564 = vtanh.f32 %v17161_v12  ;;  %17162 = vst [vmem:[#allocation64_spill] sm:$0xff] %v11870_v22  ;;  %v11874_v57 = vmul.f32 %v17097_v51, %v9877_v7  ;;  %v11880_v23 = vmul.f32 %v17099_v32, %v9881_v9  ;;  %v17166_v38 = vld [vmem:[#allocation102_spill] sm:$0xff]  ;;  %v17168_v12 = vld [vmem:[#allocation103_spill] sm:$0xff] }
 0x26a   : > { %v8547_v46 = vpop.eup %8546  ;;  %3409 = vadd.xlane.f32.xlu1 %v3408_v17  ;;  %v3402_v29 = vadd.f32 %v3401_v54, %v2835_v59  ;;  %v2846_v1 = vmul.f32 %v8545_v60, %v9967_v35  ;;  %8566 = vtanh.f32 %v11404_v45  ;;  %v11884_v28 = vrot.slane %v17127_v37, %v17078_v44  ;;  %v17171_v9 = vld [vmem:[#allocation40_spill] sm:$0xff] }
 0x26b   : > { %17163 = vst [vmem:[#allocation122_spill] sm:$0xff] %v11874_v57  ;;  %17164 = vst [vmem:[#allocation100_spill] sm:$0xff] %v11880_v23  ;;  %v8549_v31 = vpop.eup %8548  ;;  %8568 = vtanh.f32 %v17166_v38  ;;  %v17167_v17 = vrot.slane %v11784_v39, %v17144_v56  ;;  %v2847_v45 = vmul.f32 %v8547_v46, %v16678_v50  ;;  %v3150_v23 = vpop.xlane.xlu1 %3149  ;;  %v17170_v38 = vld [vmem:[#allocation39_spill] sm:$0xff]  ;;  %v4051_v39 = vrot.slane %v11824_v34, %v17171_v9 }
 0x26c   : > { %17165 = vst [vmem:[#allocation101_spill] sm:$0xff] %v11884_v28  ;;  %v8551_v60 = vpop.eup %8550  ;;  %v3403_v54 = vadd.f32 %v3402_v29, %v2836_v25  ;;  %v3416_v49 = vadd.f32 %v2846_v1, %v2845_v42  ;;  %8570 = vtanh.f32 %v17168_v12  ;;  %v17169_v28 = vld [vmem:[#allocation123_spill] sm:$0xff]  ;;  %v4044_v22 = vrot.slane %v11815_v21, %v17170_v38  ;;  %v17172_v29 = vld [vmem:[#allocation104_spill] sm:$0xff] }
 0x26d   : > { %v4039_v59 = vsel %vm4038_vm0, %v4037_v47, %v17167_v17  ;;  %v8553_v57 = vpop.eup %8552  ;;  %v2841_v44 = vmul.f32 %v8551_v60, %v9964_v26  ;;  %8572 = vtanh.f32 %v17169_v28  ;;  %v2848_v25 = vmul.f32 %v8549_v31, %v16681_v36  ;;  %v17173_v17 = vld [vmem:[#allocation105_spill] sm:$0xff] }
 0x26e   : > { %v8555_v47 = vpop.eup %8554  ;;  %3404 = vadd.xlane.f32.xlu0 %v3403_v54  ;;  %v3417_v46 = vadd.f32 %v3416_v49, %v2847_v45  ;;  %v2842_v42 = vmul.f32 %v8553_v57, %v9967_v35  ;;  %8574 = vtanh.f32 %v17172_v29  ;;  %v4046_v28 = vsel %vm4045_vm1, %v4044_v22, %v4039_v59  ;;  %v17175_v31 = vld [vmem:[#allocation133_spill] sm:$0xff]  ;;  %v3145_v57 = vpop.xlane.xlu0 %3144 }
 0x26f   : > { %v8557_v1 = vpop.eup %8556  ;;  %8576 = vtanh.f32 %v17173_v17  ;;  %v11905_v60 = vadd.f32 %v11737_v48, %v3150_v23  ;;  %v2843_v54 = vmul.f32 %v8555_v47, %v16678_v50  ;;  %v17176_v17 = vld [vmem:[#allocation106_spill] sm:$0xff]  ;;  %v11914_v22 = vmul.f32 %v17087_v41, %v9899_v18 }
 0x270   : > { %v8559_v12 = vpop.eup %8558  ;;  %v3418_v34 = vadd.f32 %v3417_v46, %v2848_v25  ;;  %v3411_v21 = vadd.f32 %v2842_v42, %v2841_v44  ;;  %8578 = vtanh.f32 %v17175_v31  ;;  %v2844_v49 = vmul.f32 %v8557_v1, %v16681_v36 }
 0x271   : > { %17174 = vst [vmem:[#allocation102_spill] sm:$0xff] %v11905_v60  ;;  %v8561_v45 = vpop.eup %8560  ;;  %v2853_v29 = vmul.f32 %v8559_v12, %v9964_v26  ;;  %8580 = vtanh.f32 %v17176_v17  ;;  %17177 = vst [vmem:[#allocation103_spill] sm:$0xff] %v11914_v22  ;;  %v11920_v47 = vmul.f32 %v17093_v24, %v9903_v19  ;;  %v4053_v46 = vsel %vm4052_vm2, %v4051_v39, %v4046_v28  ;;  %v17181_v39 = vld [vmem:[#allocation49_spill] sm:$0xff]  ;;  %v17212_v22 = vld [vmem:[#allocation52_spill] sm:$0xff] }
 0x272   : > { %v8563_v23 = vpop.eup %8562  ;;  %3419 = vadd.xlane.f32.xlu1 %v3418_v34  ;;  %v3412_v59 = vadd.f32 %v3411_v21, %v2843_v54  ;;  %v2854_v44 = vmul.f32 %v8561_v45, %v9967_v35  ;;  %8582 = vtanh.f32 %v11448_v33  ;;  %v11925_v42 = vadd.f32 %v11737_v48, %v3145_v57  ;;  %v17183_v17 = vld [vmem:[#allocation117_spill] sm:$0xff] }
 0x273   : > { %17178 = vst [vmem:[#allocation123_spill] sm:$0xff] %v11920_v47  ;;  %v8565_v25 = vpop.eup %8564  ;;  %8584 = vtanh.f32 %v11452_v43  ;;  %v11929_v34 = vmul.f32 %v17097_v51, %v9901_v3  ;;  %v2855_v33 = vmul.f32 %v8563_v23, %v16678_v50  ;;  %v11938_v28 = vmul.f32 %v17099_v32, %v9905_v20  ;;  %v17185_v23 = vld [vmem:[#allocation128_spill] sm:$0xff] }
 0x274   : > { %17179 = vst [vmem:[#allocation40_spill] sm:$0xff] %v11925_v42  ;;  %v8567_v21 = vpop.eup %8566  ;;  %v3413_v1 = vadd.f32 %v3412_v59, %v2844_v49  ;;  %v3426_v12 = vadd.f32 %v2854_v44, %v2853_v29  ;;  %8586 = vtanh.f32 %v11460_v40  ;;  %v2856_v31 = vmul.f32 %v8565_v25, %v16681_v36  ;;  %v17186_v59 = vld [vmem:[#allocation42_spill] sm:$0xff] }
 0x275   : > { %17180 = vst [vmem:[#allocation104_spill] sm:$0xff] %v11929_v34  ;;  %v8569_v54 = vpop.eup %8568  ;;  %v2849_v43 = vmul.f32 %v8567_v21, %v9964_v26  ;;  %8588 = vtanh.f32 %v17181_v39  ;;  %17182 = vst [vmem:[#allocation105_spill] sm:$0xff] %v11938_v28  ;;  %v11944_v40 = vmul.f32 %v17087_v41, %v9891_v14  ;;  %v4058_v44 = vrot.slane %v11925_v42, %v17186_v59  ;;  %v3160_v39 = vpop.xlane.xlu1 %3159  ;;  %v17190_v42 = vld [vmem:[#allocation80_spill] sm:$0xff] }
 0x276   : > { %v8571_v57 = vpop.eup %8570  ;;  %3414 = vadd.xlane.f32.xlu0 %v3413_v1  ;;  %v3427_v45 = vadd.f32 %v3426_v12, %v2855_v33  ;;  %v2850_v49 = vmul.f32 %v8569_v54, %v9967_v35  ;;  %8590 = vtanh.f32 %v17183_v17  ;;  %v11951_v25 = vmul.f32 %v17093_v24, %v9895_v16  ;;  %v17189_v54 = vld [vmem:[#allocation79_spill] sm:$0xff]  ;;  %v17197_v24 = vld [vmem:[#allocation10_spill] sm:$0xff] }
 0x277   : > { %17184 = vst [vmem:[#allocation133_spill] sm:$0xff] %v11944_v40  ;;  %v8573_v29 = vpop.eup %8572  ;;  %8592 = vtanh.f32 %v17185_v23  ;;  %v11955_v21 = vmul.f32 %v17097_v51, %v9893_v15  ;;  %v2851_v12 = vmul.f32 %v8571_v57, %v16678_v50  ;;  %v17191_v40 = vld [vmem:[#allocation46_spill] sm:$0xff] }
 0x278   : > { %17187 = vst [vmem:[#allocation106_spill] sm:$0xff] %v11951_v25  ;;  %v8575_v1 = vpop.eup %8574  ;;  %v3428_v33 = vadd.f32 %v3427_v45, %v2856_v31  ;;  %v3421_v41 = vadd.f32 %v2850_v49, %v2849_v43  ;;  %8594 = vtanh.f32 %v17189_v54  ;;  %v17192_v25 = vld [vmem:[#allocation33_spill] sm:$0xff]  ;;  %v2852_v31 = vmul.f32 %v8573_v29, %v16681_v36 }
 0x279   : > { %17188 = vst [vmem:[#allocation49_spill] sm:$0xff] %v11955_v21  ;;  %v8577_v17 = vpop.eup %8576  ;;  %v2861_v23 = vmul.f32 %v8575_v1, %v9964_v26  ;;  %8596 = vtanh.f32 %v17190_v42  ;;  %v11965_v51 = vmul.f32 %v17099_v32, %v17192_v25  ;;  %v17194_v45 = vld [vmem:[#allocation81_spill] sm:$0xff]  ;;  %v17195_v1 = vld [vmem:[#allocation107_spill] sm:$0xff]  ;;  %v4060_v42 = vsel %vm4059_vm3, %v4058_v44, %v4053_v46  ;;  %v17201_v46 = vld [vmem:[#allocation50_spill] sm:$0xff] }
 0x27a   : > { %v8579_v21 = vpop.eup %8578  ;;  %3429 = vadd.xlane.f32.xlu1 %v3428_v33  ;;  %v3422_v43 = vadd.f32 %v3421_v41, %v2851_v12  ;;  %v2862_v57 = vmul.f32 %v8577_v17, %v9967_v35  ;;  %8598 = vtanh.f32 %v17194_v45  ;;  %v11973_v54 = vadd.f32 %v11737_v48, %v3160_v39  ;;  %v17198_v32 = vld [vmem:[#allocation95_spill] sm:$0xff]  ;;  %v17200_v41 = vld [vmem:[#allocation82_spill] sm:$0xff]  ;;  %v17202_v44 = vld [vmem:[#allocation12_spill] sm:$0xff] }
 0x27b   : > { %17193 = vst [vmem:[#allocation117_spill] sm:$0xff] %v11965_v51  ;;  %v8581_v49 = vpop.eup %8580  ;;  %8600 = vtanh.f32 %v17195_v1  ;;  %v11977_v51 = vmul.f32 %v17198_v32, %v17197_v24  ;;  %v2863_v29 = vmul.f32 %v8579_v21, %v16678_v50  ;;  %v17203_v39 = vld [vmem:[#allocation60_spill] sm:$0xff]  ;;  %v17205_v21 = vld [vmem:[#allocation51_spill] sm:$0xff] }
 0x27c   : > { %17196 = vst [vmem:[#allocation128_spill] sm:$0xff] %v11973_v54  ;;  %v8583_v33 = vpop.eup %8582  ;;  %v3423_v28 = vadd.f32 %v3422_v43, %v2852_v31  ;;  %v3436_v12 = vadd.f32 %v2862_v57, %v2861_v23  ;;  %8602 = vtanh.f32 %v17200_v41  ;;  %v2864_v45 = vmul.f32 %v8581_v49, %v16681_v36  ;;  %v17206_v23 = vld [vmem:[#allocation139_spill] sm:$0xff]  ;;  %v17209_v41 = vld [vmem:[#allocation113_spill] sm:$0xff] }
 0x27d   : > { %17199 = vst [vmem:[#allocation79_spill] sm:$0xff] %v11977_v51  ;;  %v8585_v17 = vpop.eup %8584  ;;  %v2857_v1 = vmul.f32 %v8583_v33, %v9964_v26  ;;  %8604 = vtanh.f32 %v17201_v46  ;;  %v11986_v34 = vmul.f32 %v17203_v39, %v17202_v44  ;;  %v11992_v43 = vmul.f32 %v17206_v23, %v9853_v58  ;;  %v17208_v33 = vld [vmem:[#allocation108_spill] sm:$0xff] }
 0x27e   : > { %v8587_v47 = vpop.eup %8586  ;;  %3424 = vadd.xlane.f32.xlu0 %v3423_v28  ;;  %v3437_v51 = vadd.f32 %v3436_v12, %v2863_v29  ;;  %v2858_v31 = vmul.f32 %v8585_v17, %v9967_v35  ;;  %8606 = vtanh.f32 %v17205_v21  ;;  %v11998_v46 = vmul.f32 %v17209_v41, %v16705_v52  ;;  %v17211_v21 = vld [vmem:[#allocation109_spill] sm:$0xff] }
 0x27f   : > { %17204 = vst [vmem:[#allocation80_spill] sm:$0xff] %v11986_v34  ;;  %17207 = vst [vmem:[#allocation81_spill] sm:$0xff] %v11992_v43  ;;  %v8589_v57 = vpop.eup %8588  ;;  %v2859_v49 = vmul.f32 %v8587_v47, %v16678_v50  ;;  %8608 = vtanh.f32 %v17208_v33  ;;  %v12006_v47 = vmul.f32 %v17198_v32, %v9843_v53  ;;  %v12010_v33 = vmul.f32 %v17203_v39, %v16711_v0  ;;  %v3170_v53 = vpop.xlane.xlu1 %3169 }
 0x280   : > { %17210 = vst [vmem:[#allocation107_spill] sm:$0xff] %v11998_v46  ;;  %v8591_v28 = vpop.eup %8590  ;;  %v3438_v29 = vadd.f32 %v3437_v51, %v2864_v45  ;;  %v2860_v12 = vmul.f32 %v8589_v57, %v16681_v36  ;;  %v3431_v17 = vadd.f32 %v2858_v31, %v2857_v1  ;;  %8610 = vtanh.f32 %v17211_v21  ;;  %v17215_v1 = vld [vmem:[#allocation134_spill] sm:$0xff]  ;;  %v3155_v31 = vpop.xlane.xlu0 %3154  ;;  %v17216_v57 = vld [vmem:[#allocation7_spill] sm:$0xff] }
 0x281   : > { %v8593_v34 = vpop.eup %8592  ;;  %v2869_v43 = vmul.f32 %v8591_v28, %v9964_v26  ;;  %8612 = vtanh.f32 %v17212_v22  ;;  %17213 = vst [vmem:[#allocation95_spill] sm:$0xff] %v12006_v47  ;;  %17214 = vst [vmem:[#allocation82_spill] sm:$0xff] %v12010_v33  ;;  %v12016_v28 = vmul.f32 %v17206_v23, %v17216_v57  ;;  %v12020_v21 = vrot.slane %v17127_v37, %v17083_v27  ;;  %v17219_v47 = vld [vmem:[#allocation69_spill] sm:$0xff]  ;;  %v17220_v33 = vld [vmem:[#allocation48_spill] sm:$0xff] }
 0x282   : > { %v8595_v46 = vpop.eup %8594  ;;  %3439 = vadd.xlane.f32.xlu1 %v3438_v29  ;;  %v3432_v51 = vadd.f32 %v3431_v17, %v2859_v49  ;;  %v2870_v45 = vmul.f32 %v8593_v34, %v9967_v35  ;;  %8614 = vtanh.f32 %v17215_v1  ;;  %v17221_v49 = vld [vmem:[#allocation9_spill] sm:$0xff]  ;;  %v17224_v27 = vld [vmem:[#allocation70_spill] sm:$0xff]  ;;  %v17225_v29 = vrot.slane %v11905_v60, %v17191_v40 }
 0x283   : > { %17217 = vst [vmem:[#allocation50_spill] sm:$0xff] %v12016_v28  ;;  %v8597_v22 = vpop.eup %8596  ;;  %17218 = vst [vmem:[#allocation60_spill] sm:$0xff] %v12020_v21  ;;  %8616 = vtanh.f32 %v17219_v47  ;;  %v12027_v34 = vmul.f32 %v17209_v41, %v17221_v49  ;;  %v2871_v0 = vmul.f32 %v8595_v46, %v16678_v50  ;;  %v17223_v28 = vld [vmem:[#allocation135_spill] sm:$0xff] }
 0x284   : > { %v8599_v17 = vpop.eup %8598  ;;  %v3433_v1 = vadd.f32 %v3432_v51, %v2860_v12  ;;  %v3446_v57 = vadd.f32 %v2870_v45, %v2869_v43  ;;  %8618 = vtanh.f32 %v17223_v28  ;;  %v2872_v37 = vmul.f32 %v8597_v22, %v16681_v36  ;;  %v17226_v51 = vld [vmem:[#allocation71_spill] sm:$0xff]  ;;  %v17228_v22 = vld [vmem:[#allocation136_spill] sm:$0xff] }
 0x285   : > { %17222 = vst [vmem:[#allocation51_spill] sm:$0xff] %v12027_v34  ;;  %v8601_v52 = vpop.eup %8600  ;;  %v2865_v47 = vmul.f32 %v8599_v17, %v9964_v26  ;;  %8620 = vtanh.f32 %v17224_v27  ;;  %v12038_v21 = vsel %vm4066_vm4, %v17225_v29, %v4060_v42  ;;  %v12044_v45 = vmul.f32 %v17198_v32, %v16718_v30 }
 0x286   : > { %v8603_v12 = vpop.eup %8602  ;;  %3434 = vadd.xlane.f32.xlu0 %v3433_v1  ;;  %v3447_v46 = vadd.f32 %v3446_v57, %v2871_v0  ;;  %v2866_v43 = vmul.f32 %v8601_v52, %v9967_v35  ;;  %8622 = vtanh.f32 %v17226_v51  ;;  %v12048_v27 = vadd.f32 %v11737_v48, %v3155_v31  ;;  %v17232_v1 = vld [vmem:[#allocation72_spill] sm:$0xff]  ;;  %v3165_v51 = vpop.xlane.xlu0 %3164 }
 0x287   : > { %17227 = vst [vmem:[#allocation139_spill] sm:$0xff] %v12044_v45  ;;  %v8605_v28 = vpop.eup %8604  ;;  %8624 = vtanh.f32 %v17228_v22  ;;  %v12051_v42 = vadd.f32 %v11737_v48, %v3170_v53  ;;  %v12055_v0 = vmul.f32 %v17203_v39, %v9871_v4  ;;  %v2867_v29 = vmul.f32 %v8603_v12, %v16678_v50  ;;  %v17233_v45 = vld [vmem:[#allocation53_spill] sm:$0xff] }
 0x288   : > { %17229 = vst [vmem:[#allocation108_spill] sm:$0xff] %v12048_v27  ;;  %v8607_v52 = vpop.eup %8606  ;;  %v3448_v57 = vadd.f32 %v3447_v46, %v2872_v37  ;;  %v3441_v17 = vadd.f32 %v2866_v43, %v2865_v47  ;;  %8626 = vtanh.f32 %v17232_v1  ;;  %v2868_v22 = vmul.f32 %v8605_v28, %v16681_v36  ;;  %v17235_v47 = vld [vmem:[#allocation54_spill] sm:$0xff] }
 0x289   : > { %17230 = vst [vmem:[#allocation113_spill] sm:$0xff] %v12051_v42  ;;  %17231 = vst [vmem:[#allocation109_spill] sm:$0xff] %v12055_v0  ;;  %v8609_v60 = vpop.eup %8608  ;;  %v2877_v31 = vmul.f32 %v8607_v52, %v9964_v26  ;;  %8628 = vtanh.f32 %v17233_v45  ;;  %v12064_v53 = vmul.f32 %v17206_v23, %v9869_v2  ;;  %v12070_v46 = vmul.f32 %v17209_v41, %v9873_v5  ;;  %v17237_v28 = vld [vmem:[#allocation110_spill] sm:$0xff] }
 0x28a   : > { %v8611_v0 = vpop.eup %8610  ;;  %3449 = vadd.xlane.f32.xlu1 %v3448_v57  ;;  %v3442_v37 = vadd.f32 %v3441_v17, %v2867_v29  ;;  %v2878_v12 = vmul.f32 %v8609_v60, %v9967_v35  ;;  %8630 = vtanh.f32 %v17235_v47  ;;  %v12074_v45 = vadd.f32 %v11737_v48, %v3165_v51  ;;  %v17241_v47 = vld [vmem:[#allocation137_spill] sm:$0xff]  ;;  %v17242_v51 = vld [vmem:[#allocation111_spill] sm:$0xff] }
 0x28b   : > { %17234 = vst [vmem:[#allocation52_spill] sm:$0xff] %v12064_v53  ;;  %17236 = vst [vmem:[#allocation134_spill] sm:$0xff] %v12070_v46  ;;  %v8613_v43 = vpop.eup %8612  ;;  %8632 = vtanh.f32 %v17237_v28  ;;  %v12078_v52 = vmul.f32 %v17198_v32, %v9859_v61  ;;  %v12082_v57 = vmul.f32 %v17203_v39, %v9863_v63  ;;  %v2879_v17 = vmul.f32 %v8611_v0, %v16678_v50 }
 0x28c   : > { %17238 = vst [vmem:[#allocation69_spill] sm:$0xff] %v12074_v45  ;;  %v8615_v60 = vpop.eup %8614  ;;  %v3443_v29 = vadd.f32 %v3442_v37, %v2868_v22  ;;  %v3456_v1 = vadd.f32 %v2878_v12, %v2877_v31  ;;  %8634 = vtanh.f32 %v17241_v47  ;;  %v12090_v53 = vmul.f32 %v17206_v23, %v9861_v62  ;;  %v17246_v37 = vld [vmem:[#allocation112_spill] sm:$0xff]  ;;  %v17248_v47 = vld [vmem:[#allocation47_spill] sm:$0xff]  ;;  %v17250_v62 = vld [vmem:[#allocation138_spill] sm:$0xff] }
 0x28d   : > { %17239 = vst [vmem:[#allocation135_spill] sm:$0xff] %v12078_v52  ;;  %17240 = vst [vmem:[#allocation70_spill] sm:$0xff] %v12082_v57  ;;  %v8617_v46 = vpop.eup %8616  ;;  %v2873_v28 = vmul.f32 %v8615_v60, %v9964_v26  ;;  %8636 = vtanh.f32 %v17242_v51  ;;  %v17244_v52 = vld [vmem:[#allocation17_spill] sm:$0xff]  ;;  %v2880_v0 = vmul.f32 %v8613_v43, %v16681_v36  ;;  %v17247_v60 = vld [vmem:[#allocation118_spill] sm:$0xff]  ;;  %v4072_v51 = vrot.slane %v12048_v27, %v17248_v47 }
 0x28e   : > { %17243 = vst [vmem:[#allocation71_spill] sm:$0xff] %v12090_v53  ;;  %v12094_v34 = vmul.f32 %v17209_v41, %v17244_v52  ;;  %v8619_v57 = vpop.eup %8618  ;;  %3444 = vadd.xlane.f32.xlu0 %v3443_v29  ;;  %v3457_v22 = vadd.f32 %v3456_v1, %v2879_v17  ;;  %v2874_v31 = vmul.f32 %v8617_v46, %v9967_v35  ;;  %8638 = vtanh.f32 %v17246_v37  ;;  %v17249_v17 = vld [vmem:[#allocation124_spill] sm:$0xff]  ;;  %v3180_v46 = vpop.xlane.xlu1 %3179 }
 0x28f   : > { %v8621_v12 = vpop.eup %8620  ;;  %8640 = vtanh.f32 %v17247_v60  ;;  %v2875_v29 = vmul.f32 %v8619_v57, %v16678_v50  ;;  %v4085_v27 = vrot.slane %v12074_v45, %v17144_v56  ;;  %v17251_v57 = vld [vmem:[#allocation119_spill] sm:$0xff]  ;;  %v3175_v45 = vpop.xlane.xlu0 %3174 }
 0x290   : > { %17245 = vst [vmem:[#allocation136_spill] sm:$0xff] %v12094_v34  ;;  %v8623_v34 = vpop.eup %8622  ;;  %v3458_v52 = vadd.f32 %v3457_v22, %v2880_v0  ;;  %v3451_v43 = vadd.f32 %v2874_v31, %v2873_v28  ;;  %8642 = vtanh.f32 %v17249_v17  ;;  %v2876_v37 = vmul.f32 %v8621_v12, %v16681_v36  ;;  %v17255_v12 = vld [vmem:[#allocation28_spill] sm:$0xff] }
 0x291   : > { %v8625_v1 = vpop.eup %8624  ;;  %v2885_v60 = vmul.f32 %v8623_v34, %v9964_v26  ;;  %8644 = vtanh.f32 %v17250_v62  ;;  %v12115_v28 = vmul.f32 %v17198_v32, %v9883_v10  ;;  %v17253_v34 = vld [vmem:[#allocation120_spill] sm:$0xff]  ;;  %v12120_v62 = vadd.f32 %v11737_v48, %v3180_v46  ;;  %v17258_v10 = vld [vmem:[#allocation65_spill] sm:$0xff] }
 0x292   : > { %v8627_v63 = vpop.eup %8626  ;;  %3459 = vadd.xlane.f32.xlu1 %v3458_v52  ;;  %v3452_v53 = vadd.f32 %v3451_v43, %v2875_v29  ;;  %v2886_v0 = vmul.f32 %v8625_v1, %v9967_v35  ;;  %8646 = vtanh.f32 %v17251_v57  ;;  %v12124_v52 = vmul.f32 %v17203_v39, %v17255_v12  ;;  %v17257_v57 = vld [vmem:[#allocation129_spill] sm:$0xff] }
 0x293   : > { %17252 = vst [vmem:[#allocation72_spill] sm:$0xff] %v12115_v28  ;;  %v8629_v22 = vpop.eup %8628  ;;  %v2887_v31 = vmul.f32 %v8627_v63, %v16678_v50  ;;  %8648 = vtanh.f32 %v17253_v34  ;;  %17254 = vst [vmem:[#allocation53_spill] sm:$0xff] %v12120_v62  ;;  %v12132_v46 = vmul.f32 %v17206_v23, %v9885_v11  ;;  %v12136_v34 = vmul.f32 %v17209_v41, %v9889_v13 }
 0x294   : > { %17256 = vst [vmem:[#allocation54_spill] sm:$0xff] %v12124_v52  ;;  %v8631_v29 = vpop.eup %8630  ;;  %v3453_v43 = vadd.f32 %v3452_v53, %v2876_v37  ;;  %v2888_v17 = vmul.f32 %v8629_v22, %v16681_v36  ;;  %v3466_v1 = vadd.f32 %v2886_v0, %v2885_v60  ;;  %8650 = vtanh.f32 %v17257_v57  ;;  %v17261_v0 = vld [vmem:[#allocation125_spill] sm:$0xff] }
 0x295   : > { %v8633_v28 = vpop.eup %8632  ;;  %v2881_v63 = vmul.f32 %v8631_v29, %v9964_v26  ;;  %8652 = vtanh.f32 %v17258_v10  ;;  %17259 = vst [vmem:[#allocation110_spill] sm:$0xff] %v12132_v46  ;;  %17260 = vst [vmem:[#allocation137_spill] sm:$0xff] %v12136_v34  ;;  %v12142_v22 = vmul.f32 %v17198_v32, %v9875_v6  ;;  %v17263_v29 = vld [vmem:[#allocation83_spill] sm:$0xff]  ;;  %v12146_v57 = vadd.f32 %v11737_v48, %v3175_v45  ;;  %v17268_v45 = vld [vmem:[#allocation130_spill] sm:$0xff] }
 0x296   : > { %v8635_v53 = vpop.eup %8634  ;;  %3454 = vadd.xlane.f32.xlu0 %v3453_v43  ;;  %v3467_v37 = vadd.f32 %v3466_v1, %v2887_v31  ;;  %v2882_v60 = vmul.f32 %v8633_v28, %v9967_v35  ;;  %8654 = vtanh.f32 %v17261_v0  ;;  %v12150_v34 = vmul.f32 %v17203_v39, %v9879_v8 }
 0x297   : > { %17262 = vst [vmem:[#allocation111_spill] sm:$0xff] %v12142_v22  ;;  %v8637_v10 = vpop.eup %8636  ;;  %8656 = vtanh.f32 %v17263_v29  ;;  %17264 = vst [vmem:[#allocation112_spill] sm:$0xff] %v12146_v57  ;;  %v12154_v31 = vmul.f32 %v17206_v23, %v9877_v7  ;;  %v2883_v1 = vmul.f32 %v8635_v53, %v16678_v50  ;;  %v17267_v22 = vld [vmem:[#allocation61_spill] sm:$0xff]  ;;  %v12162_v52 = vsel %vm4073_vm5, %v4072_v51, %v12038_v21 }
 0x298   : > { %17265 = vst [vmem:[#allocation118_spill] sm:$0xff] %v12150_v34  ;;  %v8639_v28 = vpop.eup %8638  ;;  %v3468_v43 = vadd.f32 %v3467_v37, %v2888_v17  ;;  %v3461_v0 = vadd.f32 %v2882_v60, %v2881_v63  ;;  %8658 = vtanh.f32 %v17267_v22  ;;  %v17269_v34 = vld [vmem:[#allocation25_spill] sm:$0xff]  ;;  %v2884_v17 = vmul.f32 %v8637_v10, %v16681_v36  ;;  %v17271_v37 = vld [vmem:[#allocation84_spill] sm:$0xff]  ;;  %v17272_v22 = vld [vmem:[#allocation114_spill] sm:$0xff] }
 0x299   : > { %17266 = vst [vmem:[#allocation124_spill] sm:$0xff] %v12154_v31  ;;  %v8641_v46 = vpop.eup %8640  ;;  %v2893_v29 = vmul.f32 %v8639_v28, %v9964_v26  ;;  %8660 = vtanh.f32 %v17268_v45  ;;  %v12166_v7 = vmul.f32 %v17209_v41, %v17269_v34  ;;  %v17273_v21 = vrot.slane %v12051_v42, %v17158_v55  ;;  %v17274_v45 = vld [vmem:[#allocation85_spill] sm:$0xff] }
 0x29a   : > { %v8643_v31 = vpop.eup %8642  ;;  %3469 = vadd.xlane.f32.xlu1 %v3468_v43  ;;  %v3462_v63 = vadd.f32 %v3461_v0, %v2883_v1  ;;  %v2894_v53 = vmul.f32 %v8641_v46, %v9967_v35  ;;  %8662 = vtanh.f32 %v17271_v37  ;;  %v4094_v43 = vrot.slane %v12146_v57, %v17170_v38  ;;  %v3185_v37 = vpop.xlane.xlu0 %3184 }
 0x29b   : > { %17270 = vst [vmem:[#allocation138_spill] sm:$0xff] %v12166_v7  ;;  %v8645_v60 = vpop.eup %8644  ;;  %8664 = vtanh.f32 %v17272_v22  ;;  %v4090_v51 = vsel %vm4038_vm0, %v17273_v21, %v4085_v27  ;;  %v2895_v46 = vmul.f32 %v8643_v31, %v16678_v50  ;;  %v17275_v21 = vld [vmem:[#allocation68_spill] sm:$0xff]  ;;  %v12187_v28 = vmul.f32 %v17198_v32, %v9899_v18 }
 0x29c   : > { %v8647_v10 = vpop.eup %8646  ;;  %v3463_v1 = vadd.f32 %v3462_v63, %v2884_v17  ;;  %v3476_v0 = vadd.f32 %v2894_v53, %v2893_v29  ;;  %8666 = vtanh.f32 %v17274_v45  ;;  %v2896_v42 = vmul.f32 %v8645_v60, %v16681_v36  ;;  %v17277_v29 = vld [vmem:[#allocation97_spill] sm:$0xff]  ;;  %v3190_v63 = vpop.xlane.xlu1 %3189 }
 0x29d   : > { %v8649_v22 = vpop.eup %8648  ;;  %v2889_v27 = vmul.f32 %v8647_v10, %v9964_v26  ;;  %8668 = vtanh.f32 %v17275_v21  ;;  %17276 = vst [vmem:[#allocation119_spill] sm:$0xff] %v12187_v28  ;;  %v12193_v53 = vmul.f32 %v17203_v39, %v9903_v19  ;;  %v17279_v10 = vld [vmem:[#allocation77_spill] sm:$0xff]  ;;  %v4095_v45 = vsel %vm4045_vm1, %v4094_v43, %v4090_v51  ;;  %v17281_v28 = vld [vmem:[#allocation132_spill] sm:$0xff] }
 0x29e   : > { %v8651_v57 = vpop.eup %8650  ;;  %3464 = vadd.xlane.f32.xlu0 %v3463_v1  ;;  %v3477_v17 = vadd.f32 %v3476_v0, %v2895_v46  ;;  %v2890_v31 = vmul.f32 %v8649_v22, %v9967_v35  ;;  %8670 = vtanh.f32 %v17277_v29  ;;  %v12198_v21 = vadd.f32 %v11737_v48, %v3185_v37 }
 0x29f   : > { %17278 = vst [vmem:[#allocation120_spill] sm:$0xff] %v12193_v53  ;;  %v8653_v60 = vpop.eup %8652  ;;  %8672 = vtanh.f32 %v17279_v10  ;;  %v12202_v1 = vmul.f32 %v17206_v23, %v9901_v3  ;;  %v2891_v22 = vmul.f32 %v8651_v57, %v16678_v50  ;;  %v17282_v10 = vld [vmem:[#allocation59_spill] sm:$0xff]  ;;  %v12209_v51 = vadd.f32 %v11737_v48, %v3190_v63 }
 0x2a0   : > { %17280 = vst [vmem:[#allocation129_spill] sm:$0xff] %v12198_v21  ;;  %v8655_v46 = vpop.eup %8654  ;;  %v3478_v0 = vadd.f32 %v3477_v17, %v2896_v42  ;;  %v3471_v29 = vadd.f32 %v2890_v31, %v2889_v27  ;;  %8674 = vtanh.f32 %v17281_v28  ;;  %v12213_v43 = vmul.f32 %v17209_v41, %v9905_v20  ;;  %v17285_v28 = vld [vmem:[#allocation78_spill] sm:$0xff] }
 0x2a1   : > { %v8657_v53 = vpop.eup %8656  ;;  %v2901_v7 = vmul.f32 %v8655_v46, %v9964_v26  ;;  %8676 = vtanh.f32 %v17282_v10  ;;  %17283 = vst [vmem:[#allocation65_spill] sm:$0xff] %v12209_v51  ;;  %v2892_v42 = vmul.f32 %v8653_v60, %v16681_v36  ;;  %v17286_v46 = vld [vmem:[#allocation74_spill] sm:$0xff]  ;;  %v4104_v63 = vrot.slane %v12198_v21, %v17186_v59 }
 0x2a2   : > { %17284 = vst [vmem:[#allocation125_spill] sm:$0xff] %v12213_v43  ;;  %v8659_v37 = vpop.eup %8658  ;;  %3479 = vadd.xlane.f32.xlu1 %v3478_v0  ;;  %v3472_v57 = vadd.f32 %v3471_v29, %v2891_v22  ;;  %v2902_v27 = vmul.f32 %v8657_v53, %v9967_v35  ;;  %8678 = vtanh.f32 %v17285_v28  ;;  %v12224_v10 = vmul.f32 %v17198_v32, %v9891_v14  ;;  %v17287_v53 = vld [vmem:[#allocation62_spill] sm:$0xff] }
 0x2a3   : > { %v8661_v17 = vpop.eup %8660  ;;  %v2903_v31 = vmul.f32 %v8659_v37, %v16678_v50  ;;  %8680 = vtanh.f32 %v17286_v46  ;;  %v17288_v37 = vld [vmem:[#allocation75_spill] sm:$0xff]  ;;  %v12232_v46 = vmul.f32 %v17203_v39, %v9895_v16  ;;  %v12236_v32 = vmul.f32 %v17206_v23, %v9893_v15 }
 0x2a4   : > { %v8663_v0 = vpop.eup %8662  ;;  %v3473_v43 = vadd.f32 %v3472_v57, %v2892_v42  ;;  %v2904_v60 = vmul.f32 %v8661_v17, %v16681_v36  ;;  %v3486_v22 = vadd.f32 %v2902_v27, %v2901_v7  ;;  %8682 = vtanh.f32 %v17287_v53  ;;  %v17290_v57 = vld [vmem:[#allocation98_spill] sm:$0xff] }
 0x2a5   : > { %v8665_v29 = vpop.eup %8664  ;;  %v2897_v28 = vmul.f32 %v8663_v0, %v9964_v26  ;;  %8684 = vtanh.f32 %v17288_v37  ;;  %17289 = vst [vmem:[#allocation83_spill] sm:$0xff] %v12236_v32  ;;  %v12242_v27 = vmul.f32 %v17209_v41, %v17192_v25  ;;  %v17292_v0 = vld [vmem:[#allocation57_spill] sm:$0xff]  ;;  %v17293_v39 = vrot.slane %v11973_v54, %v17220_v33 }
 0x2a6   : > { %v8667_v21 = vpop.eup %8666  ;;  %3474 = vadd.xlane.f32.xlu0 %v3473_v43  ;;  %v3487_v42 = vadd.f32 %v3486_v22, %v2903_v31  ;;  %v2898_v7 = vmul.f32 %v8665_v29, %v9967_v35  ;;  %8686 = vtanh.f32 %v17290_v57  ;;  %v4109_v43 = vrot.slane %v12209_v51, %v17191_v40  ;;  %v17295_v57 = vld [vmem:[#allocation58_spill] sm:$0xff]  ;;  %v17321_v32 = vld [vmem:[#allocation105_spill] sm:$0xff] }
 0x2a7   : > { %17291 = vst [vmem:[#allocation61_spill] sm:$0xff] %v12242_v27  ;;  %v8669_v17 = vpop.eup %8668  ;;  %8688 = vtanh.f32 %v17292_v0  ;;  %v12250_v23 = vsel %vm4080_vm6, %v17293_v39, %v12162_v52  ;;  %v17294_v31 = vrot.slane %v12120_v62, %v17171_v9  ;;  %v2899_v29 = vmul.f32 %v8667_v21, %v16678_v50  ;;  %v3200_v0 = vpop.xlane.xlu1 %3199  ;;  %v17296_v27 = vld [vmem:[#allocation63_spill] sm:$0xff]  ;;  %v17298_v21 = vld [vmem:[#allocation66_spill] sm:$0xff] }
 0x2a8   : > { %v8671_v41 = vpop.eup %8670  ;;  %v3488_v53 = vadd.f32 %v3487_v42, %v2904_v60  ;;  %v3481_v37 = vadd.f32 %v2898_v7, %v2897_v28  ;;  %8690 = vtanh.f32 %v17295_v57  ;;  %v2900_v52 = vmul.f32 %v8669_v17, %v16681_v36  ;;  %v17297_v42 = vld [vmem:[#allocation99_spill] sm:$0xff]  ;;  %v3195_v57 = vpop.xlane.xlu0 %3194 }
 0x2a9   : > { %v4100_v22 = vsel %vm4052_vm2, %v17294_v31, %v4095_v45  ;;  %v8673_v54 = vpop.eup %8672  ;;  %v2909_v39 = vmul.f32 %v8671_v41, %v9964_v26  ;;  %8692 = vtanh.f32 %v17296_v27  ;;  %v12268_v28 = vmul.f32 %v17298_v21, %v17197_v24  ;;  %v17300_v31 = vld [vmem:[#allocation64_spill] sm:$0xff] }
 0x2aa   : > { %v4105_v51 = vsel %vm4059_vm3, %v4104_v63, %v4100_v22  ;;  %v8675_v62 = vpop.eup %8674  ;;  %3489 = vadd.xlane.f32.xlu1 %v3488_v53  ;;  %v3482_v45 = vadd.f32 %v3481_v37, %v2899_v29  ;;  %v2910_v60 = vmul.f32 %v8673_v54, %v9967_v35  ;;  %8694 = vtanh.f32 %v17297_v42  ;;  %v17302_v63 = vld [vmem:[#allocation67_spill] sm:$0xff]  ;;  %v17304_v37 = vld [vmem:[#allocation122_spill] sm:$0xff]  ;;  %v17305_v24 = vld [vmem:[#allocation100_spill] sm:$0xff] }
 0x2ab   : > { %17299 = vst [vmem:[#allocation130_spill] sm:$0xff] %v12268_v28  ;;  %v8677_v7 = vpop.eup %8676  ;;  %v2911_v17 = vmul.f32 %v8675_v62, %v16678_v50  ;;  %8696 = vtanh.f32 %v17300_v31  ;;  %v12273_v27 = vadd.f32 %v11737_v48, %v3200_v0  ;;  %v12277_v22 = vmul.f32 %v17302_v63, %v17202_v44  ;;  %v17306_v0 = vld [vmem:[#allocation86_spill] sm:$0xff]  ;;  %v17308_v28 = vld [vmem:[#allocation13_spill] sm:$0xff] }
 0x2ac   : > { %v8679_v41 = vpop.eup %8678  ;;  %v3483_v54 = vadd.f32 %v3482_v45, %v2900_v52  ;;  %v2912_v53 = vmul.f32 %v8677_v7, %v16681_v36  ;;  %v3496_v29 = vadd.f32 %v2910_v60, %v2909_v39  ;;  %8698 = vtanh.f32 %v17304_v37  ;;  %v17309_v44 = vld [vmem:[#allocation126_spill] sm:$0xff]  ;;  %v17311_v60 = vld [vmem:[#allocation103_spill] sm:$0xff] }
 0x2ad   : > { %17301 = vst [vmem:[#allocation84_spill] sm:$0xff] %v12273_v27  ;;  %17303 = vst [vmem:[#allocation114_spill] sm:$0xff] %v12277_v22  ;;  %v8681_v42 = vpop.eup %8680  ;;  %v2905_v62 = vmul.f32 %v8679_v41, %v9964_v26  ;;  %8700 = vtanh.f32 %v17305_v24  ;;  %v12285_v31 = vmul.f32 %v17306_v0, %v9853_v58  ;;  %v12289_v22 = vmul.f32 %v17309_v44, %v17308_v28  ;;  %v17312_v7 = vld [vmem:[#allocation6_spill] sm:$0xff]  ;;  %v17314_v37 = vld [vmem:[#allocation123_spill] sm:$0xff] }
 0x2ae   : > { %v8683_v52 = vpop.eup %8682  ;;  %3484 = vadd.xlane.f32.xlu0 %v3483_v54  ;;  %v3497_v45 = vadd.f32 %v3496_v29, %v2911_v17  ;;  %v2906_v39 = vmul.f32 %v8681_v42, %v9967_v35  ;;  %8702 = vtanh.f32 %v17311_v60  ;;  %v12295_v41 = vmul.f32 %v17298_v21, %v17312_v7  ;;  %v17318_v54 = vld [vmem:[#allocation7_spill] sm:$0xff] }
 0x2af   : > { %17307 = vst [vmem:[#allocation85_spill] sm:$0xff] %v12285_v31  ;;  %17310 = vst [vmem:[#allocation68_spill] sm:$0xff] %v12289_v22  ;;  %v8685_v24 = vpop.eup %8684  ;;  %8704 = vtanh.f32 %v17314_v37  ;;  %v12299_v58 = vadd.f32 %v11737_v48, %v3195_v57  ;;  %v17316_v31 = vld [vmem:[#allocation8_spill] sm:$0xff]  ;;  %v12307_v17 = vmul.f32 %v17306_v0, %v17318_v54  ;;  %v2907_v60 = vmul.f32 %v8683_v52, %v16678_v50  ;;  %v3290_v22 = vpop.xlane.xlu1 %3289 }
 0x2b0   : > { %17313 = vst [vmem:[#allocation97_spill] sm:$0xff] %v12295_v41  ;;  %v12303_v28 = vmul.f32 %v17302_v63, %v17316_v31  ;;  %v8687_v29 = vpop.eup %8686  ;;  %v3498_v42 = vadd.f32 %v3497_v45, %v2912_v53  ;;  %v3491_v7 = vadd.f32 %v2906_v39, %v2905_v62  ;;  %v17320_v41 = vld [vmem:[#allocation104_spill] sm:$0xff]  ;;  %v4110_v31 = vsel %vm4066_vm4, %v4109_v43, %v4105_v51  ;;  %v17322_v45 = vld [vmem:[#allocation133_spill] sm:$0xff] }
 0x2b1   : > { %17315 = vst [vmem:[#allocation77_spill] sm:$0xff] %v12299_v58  ;;  %17319 = vst [vmem:[#allocation59_spill] sm:$0xff] %v12307_v17  ;;  %8706 = vtanh.f32 %v17320_v41  ;;  %v8689_v37 = vpop.eup %8688  ;;  %v2917_v57 = vmul.f32 %v8687_v29, %v9964_v26  ;;  %v2908_v53 = vmul.f32 %v8685_v24, %v16681_v36  ;;  %v17323_v41 = vld [vmem:[#allocation106_spill] sm:$0xff]  ;;  %v12325_v51 = vadd.f32 %v11737_v48, %v3290_v22 }
 0x2b2   : > { %17317 = vst [vmem:[#allocation132_spill] sm:$0xff] %v12303_v28  ;;  %8708 = vtanh.f32 %v17321_v32  ;;  %v12316_v28 = vmul.f32 %v17309_v44, %v17221_v49  ;;  %v8691_v17 = vpop.eup %8690  ;;  %3499 = vadd.xlane.f32.xlu1 %v3498_v42  ;;  %v3492_v52 = vadd.f32 %v3491_v7, %v2907_v60  ;;  %v2918_v62 = vmul.f32 %v8689_v37, %v9967_v35  ;;  %v17325_v60 = vld [vmem:[#allocation49_spill] sm:$0xff]  ;;  %v3285_v37 = vpop.xlane.xlu0 %3284 }
 0x2b3   : > { %8710 = vtanh.f32 %v17322_v45  ;;  %v8693_v39 = vpop.eup %8692  ;;  %v4114_v32 = vrot.slane %v12299_v58, %v17248_v47  ;;  %17324 = vst [vmem:[#allocation78_spill] sm:$0xff] %v12325_v51  ;;  %v12329_v43 = vmul.f32 %v17298_v21, %v16718_v30  ;;  %v2919_v7 = vmul.f32 %v8691_v17, %v16678_v50  ;;  %v17326_v47 = vld [vmem:[#allocation117_spill] sm:$0xff] }
 0x2b4   : > { %8712 = vtanh.f32 %v17323_v41  ;;  %v8695_v29 = vpop.eup %8694  ;;  %v3493_v24 = vadd.f32 %v3492_v52, %v2908_v53  ;;  %v3506_v42 = vadd.f32 %v2918_v62, %v2917_v57  ;;  %v2920_v41 = vmul.f32 %v8693_v39, %v16681_v36  ;;  %v17327_v57 = vld [vmem:[#allocation79_spill] sm:$0xff] }
 0x2b5   : > { %8714 = vtanh.f32 %v17325_v60  ;;  %v8697_v45 = vpop.eup %8696  ;;  %v2913_v58 = vmul.f32 %v8695_v29, %v9964_v26  ;;  %v12338_v22 = vmul.f32 %v17302_v63, %v9871_v4  ;;  %v12344_v52 = vmul.f32 %v17306_v0, %v9869_v2  ;;  %v17328_v29 = vld [vmem:[#allocation80_spill] sm:$0xff] }
 0x2b6   : > { %8716 = vtanh.f32 %v17326_v47  ;;  %v8699_v30 = vpop.eup %8698  ;;  %3494 = vadd.xlane.f32.xlu0 %v3493_v24  ;;  %v3507_v53 = vadd.f32 %v3506_v42, %v2919_v7  ;;  %v2914_v17 = vmul.f32 %v8697_v45, %v9967_v35  ;;  %v12349_v47 = vadd.f32 %v11737_v48, %v3285_v37 }
 0x2b7   : > { %8718 = vtanh.f32 %v17327_v57  ;;  %v8701_v62 = vpop.eup %8700  ;;  %v2915_v39 = vmul.f32 %v8699_v30, %v16678_v50  ;;  %v12353_v24 = vmul.f32 %v17309_v44, %v9873_v5  ;;  %v17331_v57 = vld [vmem:[#allocation81_spill] sm:$0xff]  ;;  %v17332_v30 = vld [vmem:[#allocation107_spill] sm:$0xff]  ;;  %v12361_v37 = vmul.f32 %v17298_v21, %v9859_v61 }
 0x2b8   : > { %8720 = vtanh.f32 %v17328_v29  ;;  %17329 = vst [vmem:[#allocation74_spill] sm:$0xff] %v12349_v47  ;;  %v8703_v7 = vpop.eup %8702  ;;  %v3508_v42 = vadd.f32 %v3507_v53, %v2920_v41  ;;  %v2916_v60 = vmul.f32 %v8701_v62, %v16681_v36  ;;  %v3501_v45 = vadd.f32 %v2914_v17, %v2913_v58  ;;  %v17334_v29 = vld [vmem:[#allocation16_spill] sm:$0xff]  ;;  %v17336_v53 = vld [vmem:[#allocation95_spill] sm:$0xff]  ;;  %v17340_v61 = vld [vmem:[#allocation17_spill] sm:$0xff] }
 0x2b9   : > { %17330 = vst [vmem:[#allocation62_spill] sm:$0xff] %v12353_v24  ;;  %8722 = vtanh.f32 %v17331_v57  ;;  %v8705_v2 = vpop.eup %8704  ;;  %v2925_v4 = vmul.f32 %v8703_v7, %v9964_v26  ;;  %17333 = vst [vmem:[#allocation75_spill] sm:$0xff] %v12361_v37  ;;  %v12365_v5 = vmul.f32 %v17302_v63, %v17334_v29  ;;  %v17337_v17 = vld [vmem:[#allocation15_spill] sm:$0xff]  ;;  %v17339_v57 = vld [vmem:[#allocation82_spill] sm:$0xff]  ;;  %v12377_v29 = vsel %vm4073_vm5, %v4114_v32, %v4110_v31 }
 0x2ba   : > { %8724 = vtanh.f32 %v17332_v30  ;;  %3509 = vadd.xlane.f32.xlu1 %v3508_v42  ;;  %v3502_v41 = vadd.f32 %v3501_v45, %v2915_v39  ;;  %v2926_v58 = vmul.f32 %v8705_v2, %v9967_v35  ;;  %v12371_v62 = vmul.f32 %v17306_v0, %v17337_v17  ;;  %v17341_v17 = vld [vmem:[#allocation50_spill] sm:$0xff]  ;;  %v17342_v37 = vld [vmem:[#allocation51_spill] sm:$0xff] }
 0x2bb   : > { %17335 = vst [vmem:[#allocation98_spill] sm:$0xff] %v12365_v5  ;;  %v8707_v24 = vpop.eup %8706  ;;  %8726 = vtanh.f32 %v17336_v53  ;;  %v12381_v39 = vmul.f32 %v17309_v44, %v17340_v61  ;;  %v4206_v31 = vrot.slane %v12325_v51, %v17158_v55  ;;  %v4202_v32 = vrot.slane %v12349_v47, %v17144_v56  ;;  %v3295_v47 = vpop.xlane.xlu0 %3294  ;;  %v17348_v55 = vld [vmem:[#allocation134_spill] sm:$0xff] }
 0x2bc   : > { %17338 = vst [vmem:[#allocation57_spill] sm:$0xff] %v12371_v62  ;;  %v8709_v7 = vpop.eup %8708  ;;  %8728 = vtanh.f32 %v17339_v57  ;;  %v3503_v42 = vadd.f32 %v3502_v41, %v2916_v60  ;;  %v2927_v45 = vmul.f32 %v8707_v24, %v16678_v50  ;;  %v3516_v53 = vadd.f32 %v2926_v58, %v2925_v4  ;;  %v3300_v62 = vpop.xlane.xlu1 %3299  ;;  %v17343_v41 = vld [vmem:[#allocation139_spill] sm:$0xff] }
 0x2bd   : > { %v8711_v2 = vpop.eup %8710  ;;  %8730 = vtanh.f32 %v17341_v17  ;;  %v2928_v60 = vmul.f32 %v8709_v7, %v16681_v36  ;;  %v17344_v17 = vld [vmem:[#allocation109_spill] sm:$0xff] }
 0x2be   : > { %v8713_v5 = vpop.eup %8712  ;;  %v2921_v57 = vmul.f32 %v8711_v2, %v9964_v26  ;;  %8732 = vtanh.f32 %v17342_v37  ;;  %3504 = vadd.xlane.f32.xlu0 %v3503_v42  ;;  %v3517_v24 = vadd.f32 %v3516_v53, %v2927_v45  ;;  %v12396_v37 = vadd.f32 %v11737_v48, %v3300_v62  ;;  %v17346_v2 = vld [vmem:[#allocation26_spill] sm:$0xff] }
 0x2bf   : > { %v8715_v30 = vpop.eup %8714  ;;  %v2922_v4 = vmul.f32 %v8713_v5, %v9967_v35  ;;  %8734 = vtanh.f32 %v17343_v41  ;;  %v12400_v51 = vmul.f32 %v17298_v21, %v17346_v2  ;;  %v12404_v42 = vmul.f32 %v17302_v63, %v17255_v12  ;;  %v17347_v41 = vld [vmem:[#allocation52_spill] sm:$0xff] }
 0x2c0   : > { %v8717_v58 = vpop.eup %8716  ;;  %8736 = vtanh.f32 %v17344_v17  ;;  %17345 = vst [vmem:[#allocation58_spill] sm:$0xff] %v12396_v37  ;;  %v3518_v45 = vadd.f32 %v3517_v24, %v2928_v60  ;;  %v2923_v5 = vmul.f32 %v8715_v30, %v16678_v50  ;;  %v12413_v2 = vmul.f32 %v17306_v0, %v9885_v11 }
 0x2c1   : > { %v8719_v7 = vpop.eup %8718  ;;  %v3511_v53 = vadd.f32 %v2922_v4, %v2921_v57  ;;  %8738 = vtanh.f32 %v17347_v41  ;;  %v2924_v62 = vmul.f32 %v8717_v58, %v16681_v36  ;;  %v17349_v57 = vld [vmem:[#allocation135_spill] sm:$0xff]  ;;  %v12419_v24 = vmul.f32 %v17309_v44, %v9889_v13 }
 0x2c2   : > { %v8721_v17 = vpop.eup %8720  ;;  %v2997_v56 = vmul.f32 %v8719_v7, %v9964_v26  ;;  %8740 = vtanh.f32 %v17348_v55  ;;  %3519 = vadd.xlane.f32.xlu1 %v3518_v45  ;;  %v17350_v7 = vld [vmem:[#allocation70_spill] sm:$0xff]  ;;  %v12424_v55 = vadd.f32 %v11737_v48, %v3295_v47  ;;  %v12428_v45 = vmul.f32 %v17298_v21, %v9875_v6 }
 0x2c3   : > { %v8723_v12 = vpop.eup %8722  ;;  %v3512_v60 = vadd.f32 %v3511_v53, %v2923_v5  ;;  %v2998_v30 = vmul.f32 %v8721_v17, %v9967_v35  ;;  %8742 = vtanh.f32 %v17349_v57  ;;  %v17353_v57 = vld [vmem:[#allocation71_spill] sm:$0xff]  ;;  %v12436_v47 = vmul.f32 %v17302_v63, %v9879_v8 }
 0x2c4   : > { %v8725_v4 = vpop.eup %8724  ;;  %v2999_v58 = vmul.f32 %v8723_v12, %v16678_v50  ;;  %8744 = vtanh.f32 %v17350_v7  ;;  %17351 = vst [vmem:[#allocation63_spill] sm:$0xff] %v12424_v55  ;;  %17352 = vst [vmem:[#allocation99_spill] sm:$0xff] %v12428_v45  ;;  %v17354_v12 = vld [vmem:[#allocation136_spill] sm:$0xff]  ;;  %v17355_v7 = vld [vmem:[#allocation23_spill] sm:$0xff] }
 0x2c5   : > { %v8727_v5 = vpop.eup %8726  ;;  %v3513_v53 = vadd.f32 %v3512_v60, %v2924_v62  ;;  %v3000_v41 = vmul.f32 %v8725_v4, %v16681_v36  ;;  %v3606_v17 = vadd.f32 %v2998_v30, %v2997_v56  ;;  %8746 = vtanh.f32 %v17353_v57  ;;  %v17356_v60 = vld [vmem:[#allocation72_spill] sm:$0xff] }
 0x2c6   : > { %v8729_v13 = vpop.eup %8728  ;;  %v2993_v11 = vmul.f32 %v8727_v5, %v9964_v26  ;;  %8748 = vtanh.f32 %v17354_v12  ;;  %v12440_v6 = vmul.f32 %v17306_v0, %v17355_v7  ;;  %v12446_v30 = vmul.f32 %v17309_v44, %v17269_v34  ;;  %v17357_v5 = vld [vmem:[#allocation54_spill] sm:$0xff] }
 0x2c7   : > { %v8731_v45 = vpop.eup %8730  ;;  %3514 = vadd.xlane.f32.xlu0 %v3513_v53  ;;  %v3607_v62 = vadd.f32 %v3606_v17, %v2999_v58  ;;  %v2994_v56 = vmul.f32 %v8729_v13, %v9967_v35  ;;  %8750 = vtanh.f32 %v17356_v60  ;;  %v17358_v57 = vrot.slane %v12273_v27, %v17220_v33  ;;  %v17359_v7 = vld [vmem:[#allocation110_spill] sm:$0xff] }
 0x2c8   : > { %v8733_v4 = vpop.eup %8732  ;;  %8752 = vtanh.f32 %v17357_v5  ;;  %v4207_v58 = vsel %vm4038_vm0, %v4206_v31, %v4202_v32  ;;  %v4211_v13 = vrot.slane %v12424_v55, %v17170_v38  ;;  %v2995_v60 = vmul.f32 %v8731_v45, %v16678_v50  ;;  %v3310_v5 = vpop.xlane.xlu1 %3309  ;;  %v17364_v31 = vld [vmem:[#allocation124_spill] sm:$0xff] }
 0x2c9   : > { %v12454_v12 = vsel %vm4080_vm6, %v17358_v57, %v12377_v29  ;;  %v8735_v53 = vpop.eup %8734  ;;  %v3608_v17 = vadd.f32 %v3607_v62, %v3000_v41  ;;  %v3601_v34 = vadd.f32 %v2994_v56, %v2993_v11  ;;  %8754 = vtanh.f32 %v17359_v7  ;;  %v17360_v57 = vld [vmem:[#allocation137_spill] sm:$0xff]  ;;  %v17361_v11 = vld [vmem:[#allocation111_spill] sm:$0xff]  ;;  %v3305_v7 = vpop.xlane.xlu0 %3304 }
 0x2ca   : > { %v8737_v8 = vpop.eup %8736  ;;  %v2996_v27 = vmul.f32 %v8733_v4, %v16681_v36  ;;  %v3005_v29 = vmul.f32 %v8735_v53, %v9964_v26  ;;  %8756 = vtanh.f32 %v17360_v57  ;;  %v12470_v62 = vmul.f32 %v17298_v21, %v9899_v18  ;;  %v17362_v4 = vld [vmem:[#allocation118_spill] sm:$0xff] }
 0x2cb   : > { %v8739_v32 = vpop.eup %8738  ;;  %3609 = vadd.xlane.f32.xlu1 %v3608_v17  ;;  %v3602_v41 = vadd.f32 %v3601_v34, %v2995_v60  ;;  %v3006_v45 = vmul.f32 %v8737_v8, %v9967_v35  ;;  %8758 = vtanh.f32 %v17361_v11  ;;  %v4212_v53 = vsel %vm4045_vm1, %v4211_v13, %v4207_v58 }
 0x2cc   : > { %v8741_v56 = vpop.eup %8740  ;;  %8760 = vtanh.f32 %v17362_v4  ;;  %v12475_v57 = vadd.f32 %v11737_v48, %v3310_v5  ;;  %v12479_v34 = vmul.f32 %v17302_v63, %v9903_v19  ;;  %v3007_v60 = vmul.f32 %v8739_v32, %v16678_v50  ;;  %v17365_v4 = vld [vmem:[#allocation138_spill] sm:$0xff] }
 0x2cd   : > { %v8743_v8 = vpop.eup %8742  ;;  %v3603_v17 = vadd.f32 %v3602_v41, %v2996_v27  ;;  %v3616_v11 = vadd.f32 %v3006_v45, %v3005_v29  ;;  %8762 = vtanh.f32 %v17364_v31  ;;  %v12486_v58 = vadd.f32 %v11737_v48, %v3305_v7  ;;  %v17367_v31 = vld [vmem:[#allocation119_spill] sm:$0xff] }
 0x2ce   : > { %17363 = vst [vmem:[#allocation66_spill] sm:$0xff] %v12475_v57  ;;  %v8745_v55 = vpop.eup %8744  ;;  %v3001_v18 = vmul.f32 %v8743_v8, %v9964_v26  ;;  %8764 = vtanh.f32 %v17365_v4  ;;  %v12490_v13 = vmul.f32 %v17306_v0, %v9901_v3  ;;  %v3008_v27 = vmul.f32 %v8741_v56, %v16681_v36  ;;  %v17368_v8 = vld [vmem:[#allocation120_spill] sm:$0xff] }
 0x2cf   : > { %17366 = vst [vmem:[#allocation64_spill] sm:$0xff] %v12486_v58  ;;  %v8747_v5 = vpop.eup %8746  ;;  %3604 = vadd.xlane.f32.xlu0 %v3603_v17  ;;  %v3617_v32 = vadd.f32 %v3616_v11, %v3007_v60  ;;  %v3002_v29 = vmul.f32 %v8745_v55, %v9967_v35  ;;  %8766 = vtanh.f32 %v17367_v31  ;;  %v12499_v7 = vmul.f32 %v17309_v44, %v9905_v20  ;;  %v17369_v31 = vld [vmem:[#allocation125_spill] sm:$0xff] }
 0x2d0   : > { %v8749_v41 = vpop.eup %8748  ;;  %v3003_v45 = vmul.f32 %v8747_v5, %v16678_v50  ;;  %8768 = vtanh.f32 %v17368_v8  ;;  %v12503_v4 = vmul.f32 %v17298_v21, %v9891_v14  ;;  %v12511_v8 = vmul.f32 %v17302_v63, %v9895_v16 }
 0x2d1   : > { %v8751_v17 = vpop.eup %8750  ;;  %v3618_v56 = vadd.f32 %v3617_v32, %v3008_v27  ;;  %v3004_v60 = vmul.f32 %v8749_v41, %v16681_v36  ;;  %v3611_v55 = vadd.f32 %v3002_v29, %v3001_v18  ;;  %8770 = vtanh.f32 %v12202_v1 }
 0x2d2   : > { %v8753_v11 = vpop.eup %8752  ;;  %v3013_v5 = vmul.f32 %v8751_v17, %v9964_v26  ;;  %8772 = vtanh.f32 %v17369_v31  ;;  %v12515_v21 = vmul.f32 %v17306_v0, %v9893_v15  ;;  %v12521_v1 = vmul.f32 %v17309_v44, %v17192_v25  ;;  %v17371_v17 = vld [vmem:[#allocation83_spill] sm:$0xff]  ;;  %v17388_v15 = vld [vmem:[#allocation132_spill] sm:$0xff] }
 0x2d3   : > { %v8755_v14 = vpop.eup %8754  ;;  %3619 = vadd.xlane.f32.xlu1 %v3618_v56  ;;  %v3612_v27 = vadd.f32 %v3611_v55, %v3003_v45  ;;  %v3014_v18 = vmul.f32 %v8753_v11, %v9967_v35  ;;  %8774 = vtanh.f32 %v12224_v10  ;;  %v12526_v63 = vsel %vm4667_vm7, %v12454_v12, %v12250_v23  ;;  %v17372_v12 = vld [vmem:[#allocation61_spill] sm:$0xff] }
 0x2d4   : > { %v8757_v32 = vpop.eup %8756  ;;  %17370 = vst [vmem:[#allocation67_spill] sm:$0xff] %v12526_v63  ;;  %8776 = vtanh.f32 %v12232_v46  ;;  %v4221_v29 = vrot.slane %v12486_v58, %v17186_v59  ;;  %v3015_v45 = vmul.f32 %v8755_v14, %v16678_v50  ;;  %v17373_v46 = vrot.slane %v12396_v37, %v17171_v9  ;;  %v17378_v37 = vld [vmem:[#allocation12_spill] sm:$0xff]  ;;  %v3315_v58 = vpop.xlane.xlu0 %3314 }
 0x2d5   : > { %v8759_v41 = vpop.eup %8758  ;;  %v3613_v10 = vadd.f32 %v3612_v27, %v3004_v60  ;;  %v3626_v44 = vadd.f32 %v3014_v18, %v3013_v5  ;;  %8778 = vtanh.f32 %v17371_v17  ;;  %v3016_v55 = vmul.f32 %v8757_v32, %v16681_v36  ;;  %v17374_v5 = vld [vmem:[#allocation130_spill] sm:$0xff]  ;;  %v17376_v18 = vld [vmem:[#allocation87_spill] sm:$0xff] }
 0x2d6   : > { %v8761_v56 = vpop.eup %8760  ;;  %v3009_v23 = vmul.f32 %v8759_v41, %v9964_v26  ;;  %8780 = vtanh.f32 %v17372_v12  ;;  %v4217_v11 = vsel %vm4052_vm2, %v17373_v46, %v4212_v53  ;;  %v17375_v27 = vld [vmem:[#allocation10_spill] sm:$0xff]  ;;  %v17379_v53 = vld [vmem:[#allocation88_spill] sm:$0xff] }
 0x2d7   : > { %v8763_v31 = vpop.eup %8762  ;;  %3614 = vadd.xlane.f32.xlu0 %v3613_v10  ;;  %v3627_v60 = vadd.f32 %v3626_v44, %v3015_v45  ;;  %v3010_v14 = vmul.f32 %v8761_v56, %v9967_v35  ;;  %8782 = vtanh.f32 %v17374_v5  ;;  %v12546_v17 = vmul.f32 %v17376_v18, %v17375_v27  ;;  %v17377_v12 = vld [vmem:[#allocation114_spill] sm:$0xff]  ;;  %v17380_v5 = vld [vmem:[#allocation85_spill] sm:$0xff] }
 0x2d8   : > { %v8765_v32 = vpop.eup %8764  ;;  %v3011_v41 = vmul.f32 %v8763_v31, %v16678_v50  ;;  %8784 = vtanh.f32 %v17377_v12  ;;  %v4222_v0 = vsel %vm4059_vm3, %v4221_v29, %v4217_v11  ;;  %v12553_v46 = vmul.f32 %v17379_v53, %v17378_v37  ;;  %v17381_v31 = vld [vmem:[#allocation68_spill] sm:$0xff]  ;;  %v17382_v12 = vld [vmem:[#allocation11_spill] sm:$0xff]  ;;  %v17383_v27 = vld [vmem:[#allocation89_spill] sm:$0xff] }
 0x2d9   : > { %v8767_v10 = vpop.eup %8766  ;;  %v3628_v45 = vadd.f32 %v3627_v60, %v3016_v55  ;;  %v3012_v44 = vmul.f32 %v8765_v32, %v16681_v36  ;;  %v3621_v56 = vadd.f32 %v3010_v14, %v3009_v23  ;;  %8786 = vtanh.f32 %v17380_v5  ;;  %v17384_v11 = vld [vmem:[#allocation13_spill] sm:$0xff]  ;;  %v17385_v37 = vld [vmem:[#allocation90_spill] sm:$0xff]  ;;  %v3320_v32 = vpop.xlane.xlu1 %3319 }
 0x2da   : > { %v8769_v63 = vpop.eup %8768  ;;  %v3021_v59 = vmul.f32 %v8767_v10, %v9964_v26  ;;  %8788 = vtanh.f32 %v17381_v31  ;;  %v12561_v29 = vmul.f32 %v17383_v27, %v17382_v12  ;;  %v12565_v25 = vmul.f32 %v17385_v37, %v17384_v11  ;;  %v17386_v14 = vld [vmem:[#allocation97_spill] sm:$0xff]  ;;  %v17387_v5 = vld [vmem:[#allocation6_spill] sm:$0xff]  ;;  %v17390_v11 = vld [vmem:[#allocation8_spill] sm:$0xff] }
 0x2db   : > { %v8771_v55 = vpop.eup %8770  ;;  %3629 = vadd.xlane.f32.xlu1 %v3628_v45  ;;  %v3622_v60 = vadd.f32 %v3621_v56, %v3011_v41  ;;  %v3022_v23 = vmul.f32 %v8769_v63, %v9967_v35  ;;  %8790 = vtanh.f32 %v17386_v14  ;;  %v12571_v10 = vmul.f32 %v17376_v18, %v17387_v5  ;;  %v17391_v5 = vld [vmem:[#allocation59_spill] sm:$0xff] }
 0x2dc   : > { %v8773_v31 = vpop.eup %8772  ;;  %8792 = vtanh.f32 %v17388_v15  ;;  %v12575_v12 = vadd.f32 %v11737_v48, %v3315_v58  ;;  %v12579_v16 = vmul.f32 %v17379_v53, %v17390_v11  ;;  %v12583_v63 = vmul.f32 %v17383_v27, %v17318_v54 }
 0x2dd   : > { %v8775_v41 = vpop.eup %8774  ;;  %v3623_v45 = vadd.f32 %v3622_v60, %v3012_v44  ;;  %v3023_v56 = vmul.f32 %v8771_v55, %v16678_v50  ;;  %v3636_v14 = vadd.f32 %v3022_v23, %v3021_v59  ;;  %8794 = vtanh.f32 %v17391_v5 }
 0x2de   : > { %17389 = vst [vmem:[#allocation122_spill] sm:$0xff] %v12575_v12  ;;  %v8777_v20 = vpop.eup %8776  ;;  %v3017_v15 = vmul.f32 %v8775_v41, %v9964_v26  ;;  %8796 = vtanh.f32 %v12316_v28  ;;  %v12590_v58 = vadd.f32 %v11737_v48, %v3320_v32  ;;  %v12594_v11 = vmul.f32 %v17385_v37, %v17221_v49  ;;  %v17394_v32 = vld [vmem:[#allocation47_spill] sm:$0xff]  ;;  %v17395_v41 = vld [vmem:[#allocation18_spill] sm:$0xff]  ;;  %v17404_v49 = vld [vmem:[#allocation57_spill] sm:$0xff] }
 0x2df   : > { %v8779_v54 = vpop.eup %8778  ;;  %3624 = vadd.xlane.f32.xlu0 %v3623_v45  ;;  %v3024_v44 = vmul.f32 %v8773_v31, %v16681_v36  ;;  %v3637_v55 = vadd.f32 %v3636_v14, %v3023_v56  ;;  %v3018_v59 = vmul.f32 %v8777_v20, %v9967_v35  ;;  %8798 = vtanh.f32 %v12329_v43 }
 0x2e0   : > { %17392 = vst [vmem:[#allocation100_spill] sm:$0xff] %v12590_v58  ;;  %v8781_v60 = vpop.eup %8780  ;;  %8800 = vtanh.f32 %v12338_v22  ;;  %v17393_v28 = vrot.slane %v12475_v57, %v17191_v40  ;;  %v4231_v5 = vrot.slane %v12575_v12, %v17394_v32  ;;  %v12608_v45 = vmul.f32 %v17376_v18, %v17395_v41  ;;  %v3330_v22 = vpop.xlane.xlu1 %3329  ;;  %v17397_v12 = vld [vmem:[#allocation20_spill] sm:$0xff] }
 0x2e1   : > { %v8783_v31 = vpop.eup %8782  ;;  %v3638_v56 = vadd.f32 %v3637_v55, %v3024_v44  ;;  %v3019_v20 = vmul.f32 %v8779_v54, %v16678_v50  ;;  %v3631_v43 = vadd.f32 %v3018_v59, %v3017_v15  ;;  %8802 = vtanh.f32 %v12344_v52  ;;  %v17398_v15 = vld [vmem:[#allocation75_spill] sm:$0xff]  ;;  %v17406_v40 = vld [vmem:[#allocation16_spill] sm:$0xff] }
 0x2e2   : > { %v4227_v23 = vsel %vm4066_vm4, %v17393_v28, %v4222_v0  ;;  %v8785_v14 = vpop.eup %8784  ;;  %v3020_v57 = vmul.f32 %v8781_v60, %v16681_v36  ;;  %v3029_v0 = vmul.f32 %v8783_v31, %v9964_v26  ;;  %v17396_v28 = vld [vmem:[#allocation62_spill] sm:$0xff]  ;;  %v12617_v32 = vmul.f32 %v17379_v53, %v17397_v12  ;;  %v17399_v52 = vld [vmem:[#allocation19_spill] sm:$0xff]  ;;  %v17403_v12 = vld [vmem:[#allocation21_spill] sm:$0xff] }
 0x2e3   : > { %8804 = vtanh.f32 %v17396_v28  ;;  %v8787_v41 = vpop.eup %8786  ;;  %3639 = vadd.xlane.f32.xlu1 %v3638_v56  ;;  %v3632_v44 = vadd.f32 %v3631_v43, %v3019_v20  ;;  %v3030_v54 = vmul.f32 %v8785_v14, %v9967_v35  ;;  %v12623_v55 = vmul.f32 %v17383_v27, %v17399_v52  ;;  %v17401_v31 = vld [vmem:[#allocation98_spill] sm:$0xff]  ;;  %v3325_v52 = vpop.xlane.xlu0 %3324 }
 0x2e4   : > { %8806 = vtanh.f32 %v17398_v15  ;;  %v8789_v59 = vpop.eup %8788  ;;  %v3031_v60 = vmul.f32 %v8787_v41, %v16678_v50  ;;  %v12628_v28 = vadd.f32 %v11737_v48, %v3330_v22  ;;  %v12632_v56 = vmul.f32 %v17385_v37, %v17403_v12 }
 0x2e5   : > { %17400 = vst [vmem:[#allocation86_spill] sm:$0xff] %v12623_v55  ;;  %8808 = vtanh.f32 %v17401_v31  ;;  %v8791_v20 = vpop.eup %8790  ;;  %v3633_v43 = vadd.f32 %v3632_v44, %v3020_v57  ;;  %v3032_v14 = vmul.f32 %v8789_v59, %v16681_v36  ;;  %v3646_v15 = vadd.f32 %v3030_v54, %v3029_v0  ;;  %v17405_v31 = vld [vmem:[#allocation14_spill] sm:$0xff] }
 0x2e6   : > { %17402 = vst [vmem:[#allocation126_spill] sm:$0xff] %v12628_v28  ;;  %8810 = vtanh.f32 %v17404_v49  ;;  %v8793_v55 = vpop.eup %8792  ;;  %v3025_v41 = vmul.f32 %v8791_v20, %v9964_v26  ;;  %v12640_v22 = vmul.f32 %v17376_v18, %v17405_v31  ;;  %v12644_v12 = vmul.f32 %v17379_v53, %v17406_v40  ;;  %v17407_v49 = vld [vmem:[#allocation15_spill] sm:$0xff] }
 0x2e7   : > { %8812 = vtanh.f32 %v12381_v39  ;;  %v8795_v57 = vpop.eup %8794  ;;  %3634 = vadd.xlane.f32.xlu0 %v3633_v43  ;;  %v3647_v44 = vadd.f32 %v3646_v15, %v3031_v60  ;;  %v3026_v0 = vmul.f32 %v8793_v55, %v9967_v35  ;;  %v12650_v54 = vmul.f32 %v17383_v27, %v17407_v49 }
 0x2e8   : > { %8814 = vtanh.f32 %v12400_v51  ;;  %v8797_v39 = vpop.eup %8796  ;;  %v12656_v20 = vadd.f32 %v11737_v48, %v3325_v52  ;;  %v12660_v60 = vmul.f32 %v17385_v37, %v17340_v61  ;;  %v3027_v51 = vmul.f32 %v8795_v57, %v16678_v50  ;;  %v17409_v52 = vld [vmem:[#allocation38_spill] sm:$0xff] }
 0x2e9   : > { %8816 = vtanh.f32 %v12404_v42  ;;  %v8799_v55 = vpop.eup %8798  ;;  %v3648_v43 = vadd.f32 %v3647_v44, %v3032_v14  ;;  %v3641_v15 = vadd.f32 %v3026_v0, %v3025_v41  ;;  %v4232_v59 = vsel %vm4073_vm5, %v4231_v5, %v4227_v23  ;;  %v17410_v41 = vld [vmem:[#allocation99_spill] sm:$0xff]  ;;  %v3335_v44 = vpop.xlane.xlu0 %3334  ;;  %v17412_v5 = vld [vmem:[#allocation26_spill] sm:$0xff] }
 0x2ea   : > { %17408 = vst [vmem:[#allocation103_spill] sm:$0xff] %v12656_v20  ;;  %8818 = vtanh.f32 %v12413_v2  ;;  %v8801_v49 = vpop.eup %8800  ;;  %v3037_v42 = vmul.f32 %v8799_v55, %v9964_v26  ;;  %v3028_v61 = vmul.f32 %v8797_v39, %v16681_v36  ;;  %v3340_v2 = vpop.xlane.xlu1 %3339  ;;  %v12677_v55 = vmul.f32 %v17376_v18, %v17412_v5  ;;  %v17415_v5 = vld [vmem:[#allocation27_spill] sm:$0xff] }
 0x2eb   : > { %8820 = vtanh.f32 %v12419_v24  ;;  %v8803_v31 = vpop.eup %8802  ;;  %3649 = vadd.xlane.f32.xlu1 %v3648_v43  ;;  %v3642_v14 = vadd.f32 %v3641_v15, %v3027_v51  ;;  %v3038_v57 = vmul.f32 %v8801_v49, %v9967_v35  ;;  %v17411_v24 = vld [vmem:[#allocation37_spill] sm:$0xff]  ;;  %v17413_v43 = vld [vmem:[#allocation28_spill] sm:$0xff] }
 0x2ec   : > { %8822 = vtanh.f32 %v17410_v41  ;;  %v4241_v23 = vrot.slane %v12656_v20, %v17411_v24  ;;  %v12681_v39 = vmul.f32 %v17379_v53, %v17413_v43  ;;  %v3039_v15 = vmul.f32 %v8803_v31, %v16678_v50  ;;  %v17416_v31 = vld [vmem:[#allocation29_spill] sm:$0xff] }
 0x2ed   : > { %v8805_v0 = vpop.eup %8804  ;;  %8824 = vtanh.f32 %v12436_v47  ;;  %v3643_v49 = vadd.f32 %v3642_v14, %v3028_v61  ;;  %v3656_v41 = vadd.f32 %v3038_v57, %v3037_v42  ;;  %v12690_v24 = vmul.f32 %v17383_v27, %v17415_v5  ;;  %v17418_v57 = vld [vmem:[#allocation22_spill] sm:$0xff] }
 0x2ee   : > { %17414 = vst [vmem:[#allocation123_spill] sm:$0xff] %v12681_v39  ;;  %v8807_v51 = vpop.eup %8806  ;;  %8826 = vtanh.f32 %v12440_v6  ;;  %v3040_v47 = vmul.f32 %v8805_v0, %v16681_v36  ;;  %v12696_v6 = vmul.f32 %v17385_v37, %v17416_v31  ;;  %v12705_v0 = vmul.f32 %v17376_v18, %v17418_v57  ;;  %v17420_v57 = vld [vmem:[#allocation23_spill] sm:$0xff] }
 0x2ef   : > { %v8809_v40 = vpop.eup %8808  ;;  %v3033_v20 = vmul.f32 %v8807_v51, %v9964_v26  ;;  %8828 = vtanh.f32 %v12446_v30  ;;  %3644 = vadd.xlane.f32.xlu0 %v3643_v49  ;;  %v3657_v39 = vadd.f32 %v3656_v41, %v3039_v15  ;;  %v12701_v30 = vadd.f32 %v11737_v48, %v3335_v44  ;;  %v3350_v15 = vpop.xlane.xlu1 %3349  ;;  %v17419_v44 = vld [vmem:[#allocation24_spill] sm:$0xff] }
 0x2f0   : > { %v8811_v43 = vpop.eup %8810  ;;  %v3034_v61 = vmul.f32 %v8809_v40, %v9967_v35  ;;  %8830 = vtanh.f32 %v12470_v62  ;;  %v12709_v41 = vpop.xlane.xlu0 %3344  ;;  %v12715_v31 = vmul.f32 %v17379_v53, %v17419_v44 }
 0x2f1   : > { %v8813_v42 = vpop.eup %8812  ;;  %v3035_v14 = vmul.f32 %v8811_v43, %v16678_v50  ;;  %8832 = vtanh.f32 %v12479_v34  ;;  %17417 = vst [vmem:[#allocation104_spill] sm:$0xff] %v12701_v30  ;;  %v3658_v40 = vadd.f32 %v3657_v39, %v3040_v47  ;;  %v12719_v39 = vmul.f32 %v17383_v27, %v17420_v57 }
 0x2f2   : > { %v8815_v51 = vpop.eup %8814  ;;  %v3036_v62 = vmul.f32 %v8813_v42, %v16681_v36  ;;  %v3651_v49 = vadd.f32 %v3034_v61, %v3033_v20  ;;  %8834 = vtanh.f32 %v12490_v13  ;;  %v17421_v61 = vld [vmem:[#allocation25_spill] sm:$0xff] }
 0x2f3   : > { %v8817_v43 = vpop.eup %8816  ;;  %v3045_v34 = vmul.f32 %v8815_v51, %v9964_v26  ;;  %8836 = vtanh.f32 %v12499_v7  ;;  %3659 = vadd.xlane.f32.xlu1 %v3658_v40  ;;  %v12725_v42 = vmul.f32 %v17385_v37, %v17421_v61  ;;  %v17422_v51 = vrot.slane %v12590_v58, %v17220_v33 }
 0x2f4   : > { %v8819_v47 = vpop.eup %8818  ;;  %v3652_v20 = vadd.f32 %v3651_v49, %v3035_v14  ;;  %v3046_v13 = vmul.f32 %v8817_v43, %v9967_v35  ;;  %8838 = vtanh.f32 %v12503_v4  ;;  %v12735_v40 = vadd.f32 %v11737_v48, %v3340_v2 }
 0x2f5   : > { %v8821_v7 = vpop.eup %8820  ;;  %v12731_v44 = vsel %vm4080_vm6, %v17422_v51, %v4232_v59  ;;  %8840 = vtanh.f32 %v12511_v8  ;;  %v4250_v14 = vrot.slane %v12701_v30, %v17170_v38  ;;  %v3047_v43 = vmul.f32 %v8819_v47, %v16678_v50  ;;  %v17432_v30 = vld [vmem:[#allocation33_spill] sm:$0xff] }
 0x2f6   : > { %17423 = vst [vmem:[#allocation105_spill] sm:$0xff] %v12731_v44  ;;  %17424 = vst [vmem:[#allocation133_spill] sm:$0xff] %v12735_v40  ;;  %v8823_v4 = vpop.eup %8822  ;;  %v3653_v49 = vadd.f32 %v3652_v20, %v3036_v62  ;;  %v3666_v61 = vadd.f32 %v3046_v13, %v3045_v34  ;;  %8842 = vtanh.f32 %v12515_v21  ;;  %v3048_v58 = vmul.f32 %v8821_v7, %v16681_v36  ;;  %v12750_v21 = vpop.xlane.xlu1 %3359  ;;  %v17426_v20 = vld [vmem:[#allocation34_spill] sm:$0xff]  ;;  %v17436_v44 = vld [vmem:[#allocation91_spill] sm:$0xff] }
 0x2f7   : > { %v8825_v57 = vpop.eup %8824  ;;  %v3041_v59 = vmul.f32 %v8823_v4, %v9964_v26  ;;  %8844 = vtanh.f32 %v12521_v1  ;;  %v17425_v8 = vrot.slane %v12628_v28, %v17409_v52  ;;  %v12752_v34 = vpop.xlane.xlu0 %3354  ;;  %v12756_v13 = vmul.f32 %v17376_v18, %v17426_v20 }
 0x2f8   : > { %v8827_v51 = vpop.eup %8826  ;;  %3654 = vadd.xlane.f32.xlu0 %v3653_v49  ;;  %v3667_v62 = vadd.f32 %v3666_v61, %v3047_v43  ;;  %v3042_v47 = vmul.f32 %v8825_v57, %v9967_v35  ;;  %8846 = vtanh.f32 %v12546_v17  ;;  %v12764_v57 = vmul.f32 %v17379_v53, %v9903_v19 }
 0x2f9   : > { %v4246_v2 = vsel %vm4038_vm0, %v17425_v8, %v4241_v23  ;;  %v8829_v1 = vpop.eup %8828  ;;  %8848 = vtanh.f32 %v12553_v46  ;;  %v4255_v23 = vrot.slane %v12735_v40, %v17171_v9  ;;  %v3043_v4 = vmul.f32 %v8827_v51, %v16678_v50 }
 0x2fa   : > { %v4251_v61 = vsel %vm4045_vm1, %v4250_v14, %v4246_v2  ;;  %v8831_v17 = vpop.eup %8830  ;;  %v3668_v7 = vadd.f32 %v3667_v62, %v3048_v58  ;;  %v3661_v49 = vadd.f32 %v3042_v47, %v3041_v59  ;;  %8850 = vtanh.f32 %v12561_v29  ;;  %v17427_v59 = vld [vmem:[#allocation35_spill] sm:$0xff]  ;;  %v17429_v62 = vld [vmem:[#allocation30_spill] sm:$0xff] }
 0x2fb   : > { %v8833_v43 = vpop.eup %8832  ;;  %v3044_v8 = vmul.f32 %v8829_v1, %v16681_v36  ;;  %v3053_v46 = vmul.f32 %v8831_v17, %v9964_v26  ;;  %8852 = vtanh.f32 %v12565_v25  ;;  %v12773_v14 = vmul.f32 %v17383_v27, %v9901_v3  ;;  %v17430_v1 = vld [vmem:[#allocation32_spill] sm:$0xff] }
 0x2fc   : > { %v8835_v2 = vpop.eup %8834  ;;  %3669 = vadd.xlane.f32.xlu1 %v3668_v7  ;;  %v3662_v40 = vadd.f32 %v3661_v49, %v3043_v4  ;;  %v3054_v58 = vmul.f32 %v8833_v43, %v9967_v35  ;;  %8854 = vtanh.f32 %v12571_v10  ;;  %v12779_v29 = vmul.f32 %v17385_v37, %v17427_v59  ;;  %v12795_v43 = vpop.xlane.xlu1 %3209 }
 0x2fd   : > { %v8837_v51 = vpop.eup %8836  ;;  %8856 = vtanh.f32 %v12579_v16  ;;  %v12783_v25 = vadd.f32 %v11737_v48, %v3350_v15  ;;  %v12787_v47 = vmul.f32 %v17376_v18, %v17429_v62  ;;  %v12791_v17 = vmul.f32 %v17379_v53, %v17430_v1  ;;  %v12797_v16 = vpop.xlane.xlu0 %3204  ;;  %v17431_v18 = vld [vmem:[#allocation31_spill] sm:$0xff] }
 0x2fe   : > { %v8839_v7 = vpop.eup %8838  ;;  %v3663_v10 = vadd.f32 %v3662_v40, %v3044_v8  ;;  %v3055_v4 = vmul.f32 %v8835_v2, %v16678_v50  ;;  %v3676_v49 = vadd.f32 %v3054_v58, %v3053_v46  ;;  %8858 = vtanh.f32 %v12583_v63 }
 0x2ff   : > { %17428 = vst [vmem:[#allocation106_spill] sm:$0xff] %v12783_v25  ;;  %v8841_v15 = vpop.eup %8840  ;;  %v3049_v28 = vmul.f32 %v8839_v7, %v9964_v26  ;;  %8860 = vtanh.f32 %v12594_v11  ;;  %v12803_v53 = vmul.f32 %v17383_v27, %v17431_v18  ;;  %v12807_v40 = vmul.f32 %v17385_v37, %v17432_v30  ;;  %v17433_v11 = vld [vmem:[#allocation46_spill] sm:$0xff] }
 0x300   : > { %v8843_v8 = vpop.eup %8842  ;;  %3664 = vadd.xlane.f32.xlu0 %v3663_v10  ;;  %v3056_v63 = vmul.f32 %v8837_v51, %v16681_v36  ;;  %v3677_v46 = vadd.f32 %v3676_v49, %v3055_v4  ;;  %v3050_v2 = vmul.f32 %v8841_v15, %v9967_v35  ;;  %8862 = vtanh.f32 %v12608_v45  ;;  %v17435_v37 = vld [vmem:[#allocation10_spill] sm:$0xff] }
 0x301   : > { %v8845_v58 = vpop.eup %8844  ;;  %8864 = vtanh.f32 %v12617_v32  ;;  %v12817_v7 = vadd.f32 %v11737_v48, %v12709_v41  ;;  %v12821_v10 = vmul.f32 %v17436_v44, %v17435_v37  ;;  %v3051_v49 = vmul.f32 %v8843_v8, %v16678_v50  ;;  %v17437_v45 = vld [vmem:[#allocation86_spill] sm:$0xff]  ;;  %v17438_v8 = vld [vmem:[#allocation12_spill] sm:$0xff] }
 0x302   : > { %v8847_v51 = vpop.eup %8846  ;;  %v3678_v4 = vadd.f32 %v3677_v46, %v3056_v63  ;;  %v3671_v15 = vadd.f32 %v3050_v2, %v3049_v28  ;;  %8866 = vtanh.f32 %v17437_v45  ;;  %v3052_v32 = vmul.f32 %v8845_v58, %v16681_v36  ;;  %v17439_v28 = vld [vmem:[#allocation92_spill] sm:$0xff]  ;;  %v12835_v46 = vpop.xlane.xlu1 %3219 }
 0x303   : > { %17434 = vst [vmem:[#allocation49_spill] sm:$0xff] %v12817_v7  ;;  %v8849_v30 = vpop.eup %8848  ;;  %v2933_v27 = vmul.f32 %v8847_v51, %v9964_v26  ;;  %8868 = vtanh.f32 %v12632_v56  ;;  %v4256_v41 = vsel %vm4052_vm2, %v4255_v23, %v4251_v61  ;;  %v12833_v63 = vmul.f32 %v17439_v28, %v17438_v8  ;;  %v12837_v2 = vpop.xlane.xlu0 %3214  ;;  %v17440_v23 = vld [vmem:[#allocation42_spill] sm:$0xff]  ;;  %v17441_v51 = vld [vmem:[#allocation11_spill] sm:$0xff] }
 0x304   : > { %v8851_v18 = vpop.eup %8850  ;;  %3679 = vadd.xlane.f32.xlu1 %v3678_v4  ;;  %v3672_v37 = vadd.f32 %v3671_v15, %v3051_v49  ;;  %v2934_v1 = vmul.f32 %v8849_v30, %v9967_v35  ;;  %8870 = vtanh.f32 %v12640_v22  ;;  %v4260_v61 = vrot.slane %v12817_v7, %v17440_v23  ;;  %v17442_v30 = vld [vmem:[#allocation93_spill] sm:$0xff]  ;;  %v17445_v7 = vld [vmem:[#allocation6_spill] sm:$0xff] }
 0x305   : > { %v8853_v58 = vpop.eup %8852  ;;  %v2935_v56 = vmul.f32 %v8851_v18, %v16678_v50  ;;  %8872 = vtanh.f32 %v12644_v12  ;;  %v12845_v4 = vmul.f32 %v17442_v30, %v17441_v51  ;;  %v17443_v12 = vld [vmem:[#allocation13_spill] sm:$0xff]  ;;  %v17444_v18 = vld [vmem:[#allocation94_spill] sm:$0xff]  ;;  %v12857_v51 = vmul.f32 %v17436_v44, %v17445_v7 }
 0x306   : > { %v8855_v22 = vpop.eup %8854  ;;  %v3673_v49 = vadd.f32 %v3672_v37, %v3052_v32  ;;  %v2936_v15 = vmul.f32 %v8853_v58, %v16681_v36  ;;  %v3526_v45 = vadd.f32 %v2934_v1, %v2933_v27  ;;  %8874 = vtanh.f32 %v12650_v54  ;;  %v17446_v54 = vld [vmem:[#allocation8_spill] sm:$0xff]  ;;  %v17447_v58 = vld [vmem:[#allocation123_spill] sm:$0xff] }
 0x307   : > { %v8857_v8 = vpop.eup %8856  ;;  %v2929_v62 = vmul.f32 %v8855_v22, %v9964_v26  ;;  %8876 = vtanh.f32 %v12660_v60  ;;  %v12853_v59 = vmul.f32 %v17444_v18, %v17443_v12  ;;  %v12863_v27 = vmul.f32 %v17439_v28, %v17446_v54  ;;  %v17448_v22 = vld [vmem:[#allocation7_spill] sm:$0xff]  ;;  %v17449_v12 = vld [vmem:[#allocation9_spill] sm:$0xff]  ;;  %v12877_v54 = vpop.xlane.xlu1 %3229 }
 0x308   : > { %v8859_v23 = vpop.eup %8858  ;;  %3674 = vadd.xlane.f32.xlu0 %v3673_v49  ;;  %v3527_v37 = vadd.f32 %v3526_v45, %v2935_v56  ;;  %v2930_v1 = vmul.f32 %v8857_v8, %v9967_v35  ;;  %8878 = vtanh.f32 %v12677_v55  ;;  %v4261_v32 = vsel %vm4059_vm3, %v4260_v61, %v4256_v41  ;;  %v12879_v41 = vpop.xlane.xlu0 %3224 }
 0x309   : > { %v8861_v60 = vpop.eup %8860  ;;  %8880 = vtanh.f32 %v17447_v58  ;;  %v12869_v7 = vmul.f32 %v17442_v30, %v17448_v22  ;;  %v12873_v56 = vmul.f32 %v17444_v18, %v17449_v12  ;;  %v2931_v55 = vmul.f32 %v8859_v23, %v16678_v50  ;;  %v17451_v23 = vld [vmem:[#allocation18_spill] sm:$0xff] }
 0x30a   : > { %v8863_v8 = vpop.eup %8862  ;;  %v3528_v49 = vadd.f32 %v3527_v37, %v2936_v15  ;;  %v3521_v45 = vadd.f32 %v2930_v1, %v2929_v62  ;;  %8882 = vtanh.f32 %v12690_v24  ;;  %v2932_v58 = vmul.f32 %v8861_v60, %v16681_v36 }
 0x30b   : > { %v8865_v61 = vpop.eup %8864  ;;  %v2941_v22 = vmul.f32 %v8863_v8, %v9964_v26  ;;  %8884 = vtanh.f32 %v12696_v6  ;;  %v12886_v12 = vadd.f32 %v11737_v48, %v12750_v21  ;;  %v12892_v37 = vmul.f32 %v17436_v44, %v17451_v23 }
 0x30c   : > { %v8867_v15 = vpop.eup %8866  ;;  %3529 = vadd.xlane.f32.xlu1 %v3528_v49  ;;  %v3522_v62 = vadd.f32 %v3521_v45, %v2931_v55  ;;  %v2942_v24 = vmul.f32 %v8865_v61, %v9967_v35  ;;  %8886 = vtanh.f32 %v12705_v0  ;;  %v17452_v6 = vrot.slane %v12783_v25, %v17433_v11 }
 0x30d   : > { %17450 = vst [vmem:[#allocation117_spill] sm:$0xff] %v12886_v12  ;;  %v8869_v1 = vpop.eup %8868  ;;  %8888 = vtanh.f32 %v12715_v31  ;;  %v12903_v60 = vadd.f32 %v11737_v48, %v12795_v43  ;;  %v12907_v0 = vadd.f32 %v11737_v48, %v12797_v16  ;;  %v2943_v55 = vmul.f32 %v8867_v15, %v16678_v50  ;;  %v17456_v43 = vld [vmem:[#allocation20_spill] sm:$0xff]  ;;  %v12924_v15 = vpop.xlane.xlu1 %3239 }
 0x30e   : > { %v12899_v21 = vsel %vm4066_vm4, %v17452_v6, %v4261_v32  ;;  %v8871_v8 = vpop.eup %8870  ;;  %v3523_v49 = vadd.f32 %v3522_v62, %v2932_v58  ;;  %v3536_v45 = vadd.f32 %v2942_v24, %v2941_v22  ;;  %8890 = vtanh.f32 %v12719_v39  ;;  %v17457_v22 = vld [vmem:[#allocation19_spill] sm:$0xff]  ;;  %v12926_v62 = vpop.xlane.xlu0 %3234 }
 0x30f   : > { %17453 = vst [vmem:[#allocation79_spill] sm:$0xff] %v12899_v21  ;;  %17454 = vst [vmem:[#allocation80_spill] sm:$0xff] %v12903_v60  ;;  %v8873_v31 = vpop.eup %8872  ;;  %v2944_v61 = vmul.f32 %v8869_v1, %v16681_v36  ;;  %v2937_v32 = vmul.f32 %v8871_v8, %v9964_v26  ;;  %8892 = vtanh.f32 %v12725_v42  ;;  %v12916_v6 = vmul.f32 %v17439_v28, %v17456_v43  ;;  %v17458_v1 = vld [vmem:[#allocation21_spill] sm:$0xff]  ;;  %v17461_v43 = vld [vmem:[#allocation15_spill] sm:$0xff] }
 0x310   : > { %17455 = vst [vmem:[#allocation81_spill] sm:$0xff] %v12907_v0  ;;  %v8875_v16 = vpop.eup %8874  ;;  %3524 = vadd.xlane.f32.xlu0 %v3523_v49  ;;  %v3537_v25 = vadd.f32 %v3536_v45, %v2943_v55  ;;  %v2938_v58 = vmul.f32 %v8873_v31, %v9967_v35  ;;  %8894 = vtanh.f32 %v12756_v13  ;;  %v12922_v39 = vmul.f32 %v17442_v30, %v17457_v22  ;;  %v17459_v49 = vld [vmem:[#allocation14_spill] sm:$0xff] }
 0x311   : > { %v8877_v42 = vpop.eup %8876  ;;  %v2939_v24 = vmul.f32 %v8875_v16, %v16678_v50  ;;  %8896 = vtanh.f32 %v12764_v57  ;;  %v12932_v8 = vmul.f32 %v17444_v18, %v17458_v1  ;;  %v12936_v13 = vmul.f32 %v17436_v44, %v17459_v49  ;;  %v17460_v57 = vld [vmem:[#allocation16_spill] sm:$0xff] }
 0x312   : > { %v8879_v55 = vpop.eup %8878  ;;  %v3538_v45 = vadd.f32 %v3537_v25, %v2944_v61  ;;  %v2940_v31 = vmul.f32 %v8877_v42, %v16681_v36  ;;  %v3531_v21 = vadd.f32 %v2938_v58, %v2937_v32  ;;  %8898 = vtanh.f32 %v12773_v14  ;;  %v17462_v14 = vld [vmem:[#allocation17_spill] sm:$0xff] }
 0x313   : > { %v8881_v22 = vpop.eup %8880  ;;  %v2949_v16 = vmul.f32 %v8879_v55, %v9964_v26  ;;  %8900 = vtanh.f32 %v12779_v29  ;;  %v12944_v1 = vmul.f32 %v17439_v28, %v17460_v57  ;;  %v12948_v49 = vmul.f32 %v17442_v30, %v17461_v43 }
 0x314   : > { %v8883_v23 = vpop.eup %8882  ;;  %3539 = vadd.xlane.f32.xlu1 %v3538_v45  ;;  %v3532_v25 = vadd.f32 %v3531_v21, %v2939_v24  ;;  %v2950_v61 = vmul.f32 %v8881_v22, %v9967_v35  ;;  %8902 = vtanh.f32 %v12787_v47  ;;  %v12954_v32 = vmul.f32 %v17444_v18, %v17462_v14  ;;  %v12967_v45 = vpop.xlane.xlu1 %3249 }
 0x315   : > { %v8885_v29 = vpop.eup %8884  ;;  %v12960_v42 = vadd.f32 %v11737_v48, %v12752_v34  ;;  %8904 = vtanh.f32 %v12791_v17  ;;  %v2951_v47 = vmul.f32 %v8883_v23, %v16678_v50  ;;  %v12969_v14 = vpop.xlane.xlu0 %3244  ;;  %v17464_v17 = vld [vmem:[#allocation37_spill] sm:$0xff] }
 0x316   : > { %v8887_v22 = vpop.eup %8886  ;;  %v3533_v24 = vadd.f32 %v3532_v25, %v2940_v31  ;;  %v3546_v55 = vadd.f32 %v2950_v61, %v2949_v16  ;;  %8906 = vtanh.f32 %v12803_v53  ;;  %v2952_v34 = vmul.f32 %v8885_v29, %v16681_v36  ;;  %v17465_v53 = vld [vmem:[#allocation26_spill] sm:$0xff] }
 0x317   : > { %17463 = vst [vmem:[#allocation107_spill] sm:$0xff] %v12960_v42  ;;  %v8889_v58 = vpop.eup %8888  ;;  %v2945_v12 = vmul.f32 %v8887_v22, %v9964_v26  ;;  %8908 = vtanh.f32 %v12807_v40  ;;  %v4124_v21 = vrot.slane %v12907_v0, %v17464_v17  ;;  %v12980_v25 = vmul.f32 %v17436_v44, %v17465_v53  ;;  %v17468_v22 = vld [vmem:[#allocation28_spill] sm:$0xff] }
 0x318   : > { %v8891_v31 = vpop.eup %8890  ;;  %3534 = vadd.xlane.f32.xlu0 %v3533_v24  ;;  %v3547_v23 = vadd.f32 %v3546_v55, %v2951_v47  ;;  %v2946_v16 = vmul.f32 %v8889_v58, %v9967_v35  ;;  %8910 = vtanh.f32 %v12821_v10  ;;  %v12985_v40 = vadd.f32 %v11737_v48, %v12835_v46 }
 0x319   : > { %v8893_v61 = vpop.eup %8892  ;;  %8912 = vtanh.f32 %v12833_v63  ;;  %v12989_v29 = vadd.f32 %v11737_v48, %v12837_v2  ;;  %v12993_v58 = vmul.f32 %v17439_v28, %v17468_v22  ;;  %v2947_v47 = vmul.f32 %v8891_v31, %v16678_v50  ;;  %v13010_v31 = vpop.xlane.xlu1 %3259 }
 0x31a   : > { %17466 = vst [vmem:[#allocation95_spill] sm:$0xff] %v12985_v40  ;;  %v8895_v10 = vpop.eup %8894  ;;  %v3548_v24 = vadd.f32 %v3547_v23, %v2952_v34  ;;  %v3541_v55 = vadd.f32 %v2946_v16, %v2945_v12  ;;  %8914 = vtanh.f32 %v12845_v4  ;;  %v2948_v0 = vmul.f32 %v8893_v61, %v16681_v36  ;;  %v17469_v12 = vld [vmem:[#allocation29_spill] sm:$0xff]  ;;  %v13012_v23 = vpop.xlane.xlu0 %3254  ;;  %v17471_v61 = vld [vmem:[#allocation22_spill] sm:$0xff] }
 0x31b   : > { %17467 = vst [vmem:[#allocation82_spill] sm:$0xff] %v12989_v29  ;;  %v8897_v63 = vpop.eup %8896  ;;  %v2957_v46 = vmul.f32 %v8895_v10, %v9964_v26  ;;  %8916 = vtanh.f32 %v12853_v59  ;;  %v13002_v2 = vmul.f32 %v17442_v30, %v17415_v5  ;;  %v13008_v4 = vmul.f32 %v17444_v18, %v17469_v12  ;;  %17470 = vst [vmem:[#allocation50_spill] sm:$0xff] %v13012_v23 }
 0x31c   : > { %v8899_v22 = vpop.eup %8898  ;;  %3549 = vadd.xlane.f32.xlu1 %v3548_v24  ;;  %v3542_v53 = vadd.f32 %v3541_v55, %v2947_v47  ;;  %v2958_v34 = vmul.f32 %v8897_v63, %v9967_v35  ;;  %8918 = vtanh.f32 %v12857_v51  ;;  %v4133_v16 = vrot.slane %v12989_v29, %v17170_v38  ;;  %v17472_v24 = vld [vmem:[#allocation24_spill] sm:$0xff]  ;;  %v17473_v29 = vld [vmem:[#allocation23_spill] sm:$0xff]  ;;  %v17474_v38 = vld [vmem:[#allocation25_spill] sm:$0xff] }
 0x31d   : > { %v8901_v59 = vpop.eup %8900  ;;  %8920 = vtanh.f32 %v12863_v27  ;;  %v13019_v10 = vmul.f32 %v17436_v44, %v17471_v61  ;;  %v13023_v51 = vmul.f32 %v17439_v28, %v17472_v24  ;;  %v2959_v63 = vmul.f32 %v8899_v22, %v16678_v50 }
 0x31e   : > { %v8903_v47 = vpop.eup %8902  ;;  %v3543_v55 = vadd.f32 %v3542_v53, %v2948_v0  ;;  %v3556_v12 = vadd.f32 %v2958_v34, %v2957_v46  ;;  %8922 = vtanh.f32 %v12869_v7  ;;  %v13031_v61 = vmul.f32 %v17442_v30, %v17473_v29  ;;  %v17475_v46 = vld [vmem:[#allocation47_spill] sm:$0xff] }
 0x31f   : > { %v8905_v5 = vpop.eup %8904  ;;  %v2953_v27 = vmul.f32 %v8903_v47, %v9964_v26  ;;  %8924 = vtanh.f32 %v12873_v56  ;;  %v13035_v24 = vmul.f32 %v17444_v18, %v17474_v38  ;;  %v2960_v0 = vmul.f32 %v8901_v59, %v16681_v36 }
 0x320   : > { %v8907_v23 = vpop.eup %8906  ;;  %3544 = vadd.xlane.f32.xlu0 %v3543_v55  ;;  %v3557_v53 = vadd.f32 %v3556_v12, %v2959_v63  ;;  %v2954_v7 = vmul.f32 %v8905_v5, %v9967_v35  ;;  %8926 = vtanh.f32 %v12892_v37  ;;  %v17476_v34 = vrot.slane %v12903_v60, %v17409_v52  ;;  %v13051_v37 = vpop.xlane.xlu1 %3269 }
 0x321   : > { %v8909_v22 = vpop.eup %8908  ;;  %v4138_v38 = vrot.slane %v12985_v40, %v17171_v9  ;;  %8928 = vtanh.f32 %v12916_v6  ;;  %v2955_v5 = vmul.f32 %v8907_v23, %v16678_v50  ;;  %v13053_v63 = vpop.xlane.xlu0 %3264 }
 0x322   : > { %v4129_v47 = vsel %vm4038_vm0, %v17476_v34, %v4124_v21  ;;  %v8911_v59 = vpop.eup %8910  ;;  %v3558_v12 = vadd.f32 %v3557_v53, %v2960_v0  ;;  %v3551_v55 = vadd.f32 %v2954_v7, %v2953_v27  ;;  %8930 = vtanh.f32 %v12922_v39 }
 0x323   : > { %v8913_v56 = vpop.eup %8912  ;;  %v2956_v60 = vmul.f32 %v8909_v22, %v16681_v36  ;;  %v2965_v21 = vmul.f32 %v8911_v59, %v9964_v26  ;;  %v4134_v34 = vsel %vm4045_vm1, %v4133_v16, %v4129_v47  ;;  %8932 = vtanh.f32 %v12932_v8 }
 0x324   : > { %v8915_v6 = vpop.eup %8914  ;;  %3559 = vadd.xlane.f32.xlu1 %v3558_v12  ;;  %v3552_v0 = vadd.f32 %v3551_v55, %v2955_v5  ;;  %v2966_v23 = vmul.f32 %v8913_v56, %v9967_v35  ;;  %8934 = vtanh.f32 %v12936_v13  ;;  %v13063_v39 = vmul.f32 %v17436_v44, %v17426_v20 }
 0x325   : > { %v8917_v27 = vpop.eup %8916  ;;  %8936 = vtanh.f32 %v12944_v1  ;;  %v13068_v53 = vadd.f32 %v11737_v48, %v12877_v54  ;;  %v13072_v8 = vadd.f32 %v11737_v48, %v12879_v41  ;;  %v13076_v16 = vmul.f32 %v17439_v28, %v9903_v19  ;;  %v13090_v55 = vpop.xlane.xlu0 %3274 }
 0x326   : > { %v8919_v13 = vpop.eup %8918  ;;  %v3553_v7 = vadd.f32 %v3552_v0, %v2956_v60  ;;  %v2967_v22 = vmul.f32 %v8915_v6, %v16678_v50  ;;  %v3566_v56 = vadd.f32 %v2966_v23, %v2965_v21  ;;  %8938 = vtanh.f32 %v12948_v49  ;;  %v13088_v49 = vpop.xlane.xlu1 %3279  ;;  %17479 = vst [vmem:[#allocation109_spill] sm:$0xff] %v13090_v55  ;;  %v17481_v6 = vld [vmem:[#allocation35_spill] sm:$0xff] }
 0x327   : > { %17477 = vst [vmem:[#allocation51_spill] sm:$0xff] %v13068_v53  ;;  %17478 = vst [vmem:[#allocation139_spill] sm:$0xff] %v13072_v8  ;;  %v8921_v1 = vpop.eup %8920  ;;  %v2961_v47 = vmul.f32 %v8919_v13, %v9964_v26  ;;  %8940 = vtanh.f32 %v12954_v32  ;;  %v4139_v54 = vsel %vm4052_vm2, %v4138_v38, %v4134_v34  ;;  %v1945_v41 = vmul.f32 %v17442_v30, %v9901_v3  ;;  %v17480_v38 = vld [vmem:[#allocation42_spill] sm:$0xff] }
 0x328   : > { %v8923_v59 = vpop.eup %8922  ;;  %3554 = vadd.xlane.f32.xlu0 %v3553_v7  ;;  %v2968_v12 = vmul.f32 %v8917_v27, %v16681_v36  ;;  %v3567_v60 = vadd.f32 %v3566_v56, %v2967_v22  ;;  %v2962_v5 = vmul.f32 %v8921_v1, %v9967_v35  ;;  %8942 = vtanh.f32 %v12980_v25  ;;  %v17482_v56 = vld [vmem:[#allocation30_spill] sm:$0xff] }
 0x329   : > { %v8925_v21 = vpop.eup %8924  ;;  %v2963_v32 = vmul.f32 %v8923_v59, %v16678_v50  ;;  %v4143_v34 = vrot.slane %v13072_v8, %v17480_v38  ;;  %8944 = vtanh.f32 %v12993_v58  ;;  %v1946_v0 = vmul.f32 %v17444_v18, %v17481_v6  ;;  %v17483_v59 = vld [vmem:[#allocation32_spill] sm:$0xff] }
 0x32a   : > { %v8927_v23 = vpop.eup %8926  ;;  %v3568_v27 = vadd.f32 %v3567_v60, %v2968_v12  ;;  %v2964_v13 = vmul.f32 %v8925_v21, %v16681_v36  ;;  %v3561_v25 = vadd.f32 %v2962_v5, %v2961_v47  ;;  %8946 = vtanh.f32 %v13002_v2  ;;  %v17484_v47 = vld [vmem:[#allocation31_spill] sm:$0xff] }
 0x32b   : > { %v8929_v7 = vpop.eup %8928  ;;  %v2973_v22 = vmul.f32 %v8927_v23, %v9964_v26  ;;  %8948 = vtanh.f32 %v13008_v4  ;;  %v1939_v1 = vmul.f32 %v17436_v44, %v17482_v56  ;;  %v1940_v58 = vmul.f32 %v17439_v28, %v17483_v59  ;;  %v17485_v44 = vld [vmem:[#allocation33_spill] sm:$0xff] }
 0x32c   : > { %v8931_v40 = vpop.eup %8930  ;;  %3569 = vadd.xlane.f32.xlu1 %v3568_v27  ;;  %v3562_v8 = vadd.f32 %v3561_v25, %v2963_v32  ;;  %v2974_v12 = vmul.f32 %v8929_v7, %v9967_v35  ;;  %8950 = vtanh.f32 %v13019_v10  ;;  %v1941_v2 = vmul.f32 %v17442_v30, %v17484_v47  ;;  %v13118_v10 = vpop.xlane.xlu1 %3369 }
 0x32d   : > { %v8933_v60 = vpop.eup %8932  ;;  %v4148_v4 = vrot.slane %v13068_v53, %v17433_v11  ;;  %v4144_v5 = vsel %vm4059_vm3, %v4143_v34, %v4139_v54  ;;  %8952 = vtanh.f32 %v13023_v51  ;;  %v1942_v28 = vmul.f32 %v17444_v18, %v17485_v44  ;;  %v13120_v30 = vpop.xlane.xlu0 %3364  ;;  %v17489_v34 = vld [vmem:[#allocation131_spill] sm:$0xff] }
 0x32e   : > { %v8935_v21 = vpop.eup %8934  ;;  %v3563_v32 = vadd.f32 %v3562_v8, %v2964_v13  ;;  %v2975_v23 = vmul.f32 %v8931_v40, %v16678_v50  ;;  %v3576_v27 = vadd.f32 %v2974_v12, %v2973_v22  ;;  %8954 = vtanh.f32 %v13031_v61  ;;  %17486 = vst [vmem:[#allocation52_spill] sm:$0xff] %v13120_v30  ;;  %v17488_v8 = vld [vmem:[#allocation10_spill] sm:$0xff] }
 0x32f   : > { %v8937_v25 = vpop.eup %8936  ;;  %v2976_v7 = vmul.f32 %v8933_v60, %v16681_v36  ;;  %v2969_v54 = vmul.f32 %v8935_v21, %v9964_v26  ;;  %8956 = vtanh.f32 %v13035_v24  ;;  %v13127_v18 = vadd.f32 %v11737_v48, %v12924_v15  ;;  %v17491_v15 = vld [vmem:[#allocation12_spill] sm:$0xff] }
 0x330   : > { %v8939_v51 = vpop.eup %8938  ;;  %3564 = vadd.xlane.f32.xlu0 %v3563_v32  ;;  %v3577_v40 = vadd.f32 %v3576_v27, %v2975_v23  ;;  %v2970_v61 = vmul.f32 %v8937_v25, %v9967_v35  ;;  %8958 = vtanh.f32 %v13063_v39  ;;  %v2015_v13 = vmul.f32 %v17489_v34, %v17488_v8  ;;  %v17492_v60 = vld [vmem:[#allocation96_spill] sm:$0xff] }
 0x331   : > { %17487 = vst [vmem:[#allocation134_spill] sm:$0xff] %v13127_v18  ;;  %v8941_v22 = vpop.eup %8940  ;;  %v4149_v12 = vsel %vm4066_vm4, %v4148_v4, %v4144_v5  ;;  %v13136_v24 = vadd.f32 %v11737_v48, %v12926_v62  ;;  %8960 = vtanh.f32 %v13076_v16  ;;  %v2016_v21 = vmul.f32 %v17492_v60, %v17491_v15  ;;  %v17493_v5 = vld [vmem:[#allocation11_spill] sm:$0xff] }
 0x332   : > { %v8943_v32 = vpop.eup %8942  ;;  %v3578_v23 = vadd.f32 %v3577_v40, %v2976_v7  ;;  %v2971_v27 = vmul.f32 %v8939_v51, %v16678_v50  ;;  %v3571_v39 = vadd.f32 %v2970_v61, %v2969_v54  ;;  %8962 = vtanh.f32 %v1945_v41  ;;  %v17494_v62 = vld [vmem:[#allocation115_spill] sm:$0xff]  ;;  %v17495_v7 = vld [vmem:[#allocation13_spill] sm:$0xff]  ;;  %v17496_v40 = vld [vmem:[#allocation116_spill] sm:$0xff]  ;;  %v13149_v54 = vpop.xlane.xlu1 %3379 }
 0x333   : > { %17490 = vst [vmem:[#allocation135_spill] sm:$0xff] %v13136_v24  ;;  %v8945_v25 = vpop.eup %8944  ;;  %v2972_v53 = vmul.f32 %v8941_v22, %v16681_v36  ;;  %v2981_v4 = vmul.f32 %v8943_v32, %v9964_v26  ;;  %8964 = vtanh.f32 %v1946_v0  ;;  %v2017_v42 = vmul.f32 %v17494_v62, %v17493_v5  ;;  %17497 = vst [vmem:[#allocation70_spill] sm:$0xff] %v13149_v54  ;;  %v13151_v41 = vpop.xlane.xlu0 %3374  ;;  %v17499_v22 = vld [vmem:[#allocation6_spill] sm:$0xff]  ;;  %v17501_v5 = vld [vmem:[#allocation7_spill] sm:$0xff] }
 0x334   : > { %v8947_v55 = vpop.eup %8946  ;;  %3579 = vadd.xlane.f32.xlu1 %v3578_v23  ;;  %v3572_v16 = vadd.f32 %v3571_v39, %v2971_v27  ;;  %v2982_v15 = vmul.f32 %v8945_v25, %v9967_v35  ;;  %8966 = vtanh.f32 %v1939_v1  ;;  %v2018_v51 = vmul.f32 %v17496_v40, %v17495_v7  ;;  %17498 = vst [vmem:[#allocation71_spill] sm:$0xff] %v13151_v41  ;;  %v17500_v23 = vld [vmem:[#allocation8_spill] sm:$0xff] }
 0x335   : > { %v8949_v61 = vpop.eup %8948  ;;  %v4153_v0 = vrot.slane %v13136_v24, %v17475_v46  ;;  %8968 = vtanh.f32 %v1940_v58  ;;  %v2011_v32 = vmul.f32 %v17489_v34, %v17499_v22  ;;  %v2012_v27 = vmul.f32 %v17492_v60, %v17500_v23  ;;  %v17502_v58 = vld [vmem:[#allocation9_spill] sm:$0xff] }
 0x336   : > { %v8951_v39 = vpop.eup %8950  ;;  %v3573_v1 = vadd.f32 %v3572_v16, %v2972_v53  ;;  %v2983_v25 = vmul.f32 %v8947_v55, %v16678_v50  ;;  %v3586_v7 = vadd.f32 %v2982_v15, %v2981_v4  ;;  %8970 = vtanh.f32 %v1941_v2  ;;  %v17503_v15 = vld [vmem:[#allocation18_spill] sm:$0xff] }
 0x337   : > { %v8953_v54 = vpop.eup %8952  ;;  %v2977_v41 = vmul.f32 %v8951_v39, %v9964_v26  ;;  %8972 = vtanh.f32 %v1942_v28  ;;  %v2013_v24 = vmul.f32 %v17494_v62, %v17501_v5  ;;  %v2014_v46 = vmul.f32 %v17496_v40, %v17502_v58 }
 0x338   : > { %v8955_v22 = vpop.eup %8954  ;;  %3574 = vadd.xlane.f32.xlu0 %v3573_v1  ;;  %v2984_v23 = vmul.f32 %v8949_v61, %v16681_v36  ;;  %v3587_v30 = vadd.f32 %v3586_v7, %v2983_v25  ;;  %v2978_v53 = vmul.f32 %v8953_v54, %v9967_v35  ;;  %8974 = vtanh.f32 %v2015_v13  ;;  %v13173_v7 = vpop.xlane.xlu1 %3389 }
 0x339   : > { %v8957_v55 = vpop.eup %8956  ;;  %v4158_v2 = vrot.slane %v13127_v18, %v17220_v33  ;;  %v4154_v28 = vsel %vm4073_vm5, %v4153_v0, %v4149_v12  ;;  %8976 = vtanh.f32 %v2016_v21  ;;  %v2023_v4 = vmul.f32 %v17489_v34, %v17503_v15  ;;  %17504 = vst [vmem:[#allocation136_spill] sm:$0xff] %v13173_v7  ;;  %v13175_v54 = vpop.xlane.xlu0 %3384  ;;  %v17511_v18 = vld [vmem:[#allocation14_spill] sm:$0xff] }
 0x33a   : > { %v8959_v16 = vpop.eup %8958  ;;  %v3588_v39 = vadd.f32 %v3587_v30, %v2984_v23  ;;  %v2979_v1 = vmul.f32 %v8955_v22, %v16678_v50  ;;  %v3581_v58 = vadd.f32 %v2978_v53, %v2977_v41  ;;  %8978 = vtanh.f32 %v2017_v42  ;;  %17505 = vst [vmem:[#allocation72_spill] sm:$0xff] %v13175_v54  ;;  %v17507_v42 = vld [vmem:[#allocation20_spill] sm:$0xff] }
 0x33b   : > { %v8961_v13 = vpop.eup %8960  ;;  %v2980_v61 = vmul.f32 %v8957_v55, %v16681_v36  ;;  %v2989_v25 = vmul.f32 %v8959_v16, %v9964_v26  ;;  %v13181_v12 = vadd.f32 %v11737_v48, %v12967_v45  ;;  %8980 = vtanh.f32 %v2018_v51  ;;  %v17509_v45 = vld [vmem:[#allocation19_spill] sm:$0xff] }
 0x33c   : > { %v8963_v21 = vpop.eup %8962  ;;  %3589 = vadd.xlane.f32.xlu1 %v3588_v39  ;;  %v3582_v30 = vadd.f32 %v3581_v58, %v2979_v1  ;;  %v2990_v41 = vmul.f32 %v8961_v13, %v9967_v35  ;;  %8982 = vtanh.f32 %v2011_v32  ;;  %v2024_v0 = vmul.f32 %v17492_v60, %v17507_v42  ;;  %v17510_v13 = vld [vmem:[#allocation21_spill] sm:$0xff] }
 0x33d   : > { %17506 = vst [vmem:[#allocation54_spill] sm:$0xff] %v13181_v12  ;;  %v8965_v22 = vpop.eup %8964  ;;  %v2991_v23 = vmul.f32 %v8963_v21, %v16678_v50  ;;  %v13189_v53 = vadd.f32 %v11737_v48, %v12969_v14  ;;  %8984 = vtanh.f32 %v2012_v27  ;;  %v2025_v51 = vmul.f32 %v17494_v62, %v17509_v45 }
 0x33e   : > { %v8967_v55 = vpop.eup %8966  ;;  %v3583_v16 = vadd.f32 %v3582_v30, %v2980_v61  ;;  %v2992_v58 = vmul.f32 %v8965_v22, %v16681_v36  ;;  %v3596_v39 = vadd.f32 %v2990_v41, %v2989_v25  ;;  %8986 = vtanh.f32 %v2013_v24  ;;  %v13202_v24 = vpop.xlane.xlu1 %3399  ;;  %v17515_v22 = vld [vmem:[#allocation17_spill] sm:$0xff] }
 0x33f   : > { %17508 = vst [vmem:[#allocation110_spill] sm:$0xff] %v13189_v53  ;;  %v8969_v32 = vpop.eup %8968  ;;  %v2985_v1 = vmul.f32 %v8967_v55, %v9964_v26  ;;  %8988 = vtanh.f32 %v2014_v46  ;;  %v2026_v21 = vmul.f32 %v17496_v40, %v17510_v13  ;;  %v2019_v14 = vmul.f32 %v17489_v34, %v17511_v18  ;;  %17512 = vst [vmem:[#allocation137_spill] sm:$0xff] %v13202_v24  ;;  %v13204_v25 = vpop.xlane.xlu0 %3394 }
 0x340   : > { %v8971_v27 = vpop.eup %8970  ;;  %3584 = vadd.xlane.f32.xlu0 %v3583_v16  ;;  %v3597_v54 = vadd.f32 %v3596_v39, %v2991_v23  ;;  %v2986_v33 = vmul.f32 %v8969_v32, %v9967_v35  ;;  %8990 = vtanh.f32 %v2023_v4  ;;  %v2020_v61 = vmul.f32 %v17492_v60, %v17460_v57  ;;  %17513 = vst [vmem:[#allocation111_spill] sm:$0xff] %v13204_v25 }
 0x341   : > { %v8973_v46 = vpop.eup %8972  ;;  %v13207_v30 = vsel %vm4080_vm6, %v4158_v2, %v4154_v28  ;;  %8992 = vtanh.f32 %v2024_v0  ;;  %v2021_v41 = vmul.f32 %v17494_v62, %v17461_v43  ;;  %v2022_v23 = vmul.f32 %v17496_v40, %v17515_v22 }
 0x342   : > { %17514 = vst [vmem:[#allocation118_spill] sm:$0xff] %v13207_v30  ;;  %v8975_v55 = vpop.eup %8974  ;;  %v3598_v4 = vadd.f32 %v3597_v54, %v2992_v58  ;;  %v2987_v16 = vmul.f32 %v8971_v27, %v16678_v50  ;;  %v3591_v39 = vadd.f32 %v2986_v33, %v2985_v1  ;;  %8994 = vtanh.f32 %v2025_v51  ;;  %v17517_v58 = vld [vmem:[#allocation50_spill] sm:$0xff] }
 0x343   : > { %v8977_v32 = vpop.eup %8976  ;;  %v4167_v24 = vrot.slane %v13181_v12, %v17409_v52  ;;  %v4163_v2 = vrot.slane %v13189_v53, %v17464_v17  ;;  %v3061_v28 = vmul.f32 %v8975_v55, %v9964_v26  ;;  %8996 = vtanh.f32 %v2026_v21  ;;  %v17519_v27 = vld [vmem:[#allocation26_spill] sm:$0xff] }
 0x344   : > { %v8979_v0 = vpop.eup %8978  ;;  %3599 = vadd.xlane.f32.xlu1 %v3598_v4  ;;  %v2988_v30 = vmul.f32 %v8973_v46, %v16681_v36  ;;  %v3592_v25 = vadd.f32 %v3591_v39, %v2987_v16  ;;  %v3062_v54 = vmul.f32 %v8977_v32, %v9967_v35  ;;  %8998 = vtanh.f32 %v2019_v14  ;;  %v13232_v14 = vpop.xlane.xlu1 %3409 }
 0x345   : > { %v8981_v33 = vpop.eup %8980  ;;  %v13223_v51 = vadd.f32 %v11737_v48, %v13010_v31  ;;  %v13227_v1 = vadd.f32 %v11737_v48, %v17517_v58  ;;  %9000 = vtanh.f32 %v2020_v61  ;;  %v2031_v21 = vmul.f32 %v17489_v34, %v17519_v27  ;;  %17520 = vst [vmem:[#allocation119_spill] sm:$0xff] %v13232_v14  ;;  %v13234_v39 = vpop.xlane.xlu0 %3404  ;;  %v17522_v61 = vld [vmem:[#allocation28_spill] sm:$0xff]  ;;  %v17525_v14 = vld [vmem:[#allocation39_spill] sm:$0xff] }
 0x346   : > { %v8983_v55 = vpop.eup %8982  ;;  %v3593_v4 = vadd.f32 %v3592_v25, %v2988_v30  ;;  %v3063_v46 = vmul.f32 %v8979_v0, %v16678_v50  ;;  %v3686_v16 = vadd.f32 %v3062_v54, %v3061_v28  ;;  %9002 = vtanh.f32 %v2021_v41  ;;  %17521 = vst [vmem:[#allocation120_spill] sm:$0xff] %v13234_v39  ;;  %v17523_v28 = vld [vmem:[#allocation27_spill] sm:$0xff]  ;;  %v17524_v0 = vld [vmem:[#allocation29_spill] sm:$0xff] }
 0x347   : > { %17516 = vst [vmem:[#allocation124_spill] sm:$0xff] %v13223_v51  ;;  %17518 = vst [vmem:[#allocation138_spill] sm:$0xff] %v13227_v1  ;;  %v8985_v31 = vpop.eup %8984  ;;  %v3064_v32 = vmul.f32 %v8981_v33, %v16681_v36  ;;  %v3057_v58 = vmul.f32 %v8983_v55, %v9964_v26  ;;  %9004 = vtanh.f32 %v2022_v23  ;;  %v2032_v12 = vmul.f32 %v17492_v60, %v17522_v61  ;;  %v17526_v55 = vld [vmem:[#allocation22_spill] sm:$0xff] }
 0x348   : > { %v8987_v53 = vpop.eup %8986  ;;  %3594 = vadd.xlane.f32.xlu0 %v3593_v4  ;;  %v3687_v25 = vadd.f32 %v3686_v16, %v3063_v46  ;;  %v3058_v30 = vmul.f32 %v8985_v31, %v9967_v35  ;;  %v2033_v41 = vmul.f32 %v17494_v62, %v17523_v28  ;;  %v2034_v54 = vmul.f32 %v17496_v40, %v17524_v0  ;;  %v17527_v0 = vld [vmem:[#allocation24_spill] sm:$0xff] }
 0x349   : > { %v8989_v39 = vpop.eup %8988  ;;  %v3059_v33 = vmul.f32 %v8987_v53, %v16678_v50  ;;  %v4172_v23 = vrot.slane %v13227_v1, %v17525_v14  ;;  %9006 = vtanh.f32 %v2031_v21  ;;  %v2027_v7 = vmul.f32 %v17489_v34, %v17526_v55 }
 0x34a   : > { %v8991_v4 = vpop.eup %8990  ;;  %v3688_v46 = vadd.f32 %v3687_v25, %v3064_v32  ;;  %v3060_v16 = vmul.f32 %v8989_v39, %v16681_v36  ;;  %v3681_v31 = vadd.f32 %v3058_v30, %v3057_v58  ;;  %9008 = vtanh.f32 %v2032_v12  ;;  %v17528_v32 = vld [vmem:[#allocation25_spill] sm:$0xff]  ;;  %v13259_v12 = vpop.xlane.xlu1 %3419 }
 0x34b   : > { %v8993_v28 = vpop.eup %8992  ;;  %v3069_v61 = vmul.f32 %v8991_v4, %v9964_v26  ;;  %9010 = vtanh.f32 %v2033_v41  ;;  %v2028_v53 = vmul.f32 %v17492_v60, %v17527_v0  ;;  %v2029_v1 = vmul.f32 %v17494_v62, %v17473_v29  ;;  %17529 = vst [vmem:[#allocation125_spill] sm:$0xff] %v13259_v12  ;;  %v13261_v58 = vpop.xlane.xlu0 %3414 }
 0x34c   : > { %v8995_v21 = vpop.eup %8994  ;;  %3689 = vadd.xlane.f32.xlu1 %v3688_v46  ;;  %v3682_v27 = vadd.f32 %v3681_v31, %v3059_v33  ;;  %v3070_v55 = vmul.f32 %v8993_v28, %v9967_v35  ;;  %9012 = vtanh.f32 %v2034_v54  ;;  %v2030_v39 = vmul.f32 %v17496_v40, %v17528_v32  ;;  %17530 = vst [vmem:[#allocation83_spill] sm:$0xff] %v13261_v58 }
 0x34d   : > { %v8997_v25 = vpop.eup %8996  ;;  %v4168_v30 = vsel %vm4038_vm0, %v4167_v24, %v4163_v2  ;;  %v4177_v41 = vrot.slane %v13223_v51, %v17171_v9  ;;  %v13268_v4 = vadd.f32 %v11737_v48, %v13053_v63  ;;  %9014 = vtanh.f32 %v2027_v7 }
 0x34e   : > { %v8999_v28 = vpop.eup %8998  ;;  %v3683_v54 = vadd.f32 %v3682_v27, %v3060_v16  ;;  %v3071_v33 = vmul.f32 %v8995_v21, %v16678_v50  ;;  %v3696_v46 = vadd.f32 %v3070_v55, %v3069_v61  ;;  %9016 = vtanh.f32 %v2028_v53 }
 0x34f   : > { %17531 = vst [vmem:[#allocation61_spill] sm:$0xff] %v13268_v4  ;;  %v9001_v31 = vpop.eup %9000  ;;  %v4173_v58 = vsel %vm4045_vm1, %v4172_v23, %v4168_v30  ;;  %v3072_v12 = vmul.f32 %v8997_v25, %v16681_v36  ;;  %v3065_v24 = vmul.f32 %v8999_v28, %v9964_v26  ;;  %9018 = vtanh.f32 %v2029_v1  ;;  %v13290_v25 = vpop.xlane.xlu1 %3429 }
 0x350   : > { %v9003_v2 = vpop.eup %9002  ;;  %3684 = vadd.xlane.f32.xlu0 %v3683_v54  ;;  %v3697_v51 = vadd.f32 %v3696_v46, %v3071_v33  ;;  %v3066_v63 = vmul.f32 %v9001_v31, %v9967_v35  ;;  %9020 = vtanh.f32 %v2030_v39  ;;  %v2039_v7 = vmul.f32 %v17489_v34, %v17426_v20 }
 0x351   : > { %v9005_v27 = vpop.eup %9004  ;;  %v13279_v61 = vadd.f32 %v11737_v48, %v13051_v37  ;;  %v4182_v23 = vrot.slane %v13268_v4, %v17480_v38  ;;  %v2040_v1 = vmul.f32 %v17492_v60, %v9903_v19  ;;  %v2041_v55 = vmul.f32 %v17494_v62, %v9901_v3  ;;  %v13292_v37 = vpop.xlane.xlu0 %3424  ;;  %v17547_v4 = vld [vmem:[#allocation8_spill] sm:$0xff] }
 0x352   : > { %v3698_v16 = vadd.f32 %v3697_v51, %v3072_v12  ;;  %v3067_v53 = vmul.f32 %v9003_v2, %v16678_v50  ;;  %v3691_v21 = vadd.f32 %v3066_v63, %v3065_v24  ;;  %v2042_v39 = vmul.f32 %v17496_v40, %v17481_v6 }
 0x353   : > { %17532 = vst [vmem:[#allocation130_spill] sm:$0xff] %v13279_v61  ;;  %v9007_v30 = vpop.eup %9006  ;;  %v4178_v28 = vsel %vm4052_vm2, %v4177_v41, %v4173_v58  ;;  %9022 = vtanh.f32 %v2039_v7  ;;  %v2035_v54 = vmul.f32 %v17489_v34, %v17482_v56  ;;  %v2036_v51 = vmul.f32 %v17492_v60, %v17483_v59 }
 0x354   : > { %v9009_v12 = vpop.eup %9008  ;;  %3699 = vadd.xlane.f32.xlu1 %v3698_v16  ;;  %v3068_v33 = vmul.f32 %v9005_v27, %v16681_v36  ;;  %v3692_v46 = vadd.f32 %v3691_v21, %v3067_v53  ;;  %v3077_v31 = vmul.f32 %v9007_v30, %v9964_v26  ;;  %9024 = vtanh.f32 %v2040_v1 }
 0x355   : > { %v9011_v24 = vpop.eup %9010  ;;  %v3078_v2 = vmul.f32 %v9009_v12, %v9967_v35  ;;  %9026 = vtanh.f32 %v2041_v55  ;;  %v2037_v58 = vmul.f32 %v17494_v62, %v17484_v47  ;;  %v2038_v34 = vmul.f32 %v17496_v40, %v17485_v44  ;;  %v13323_v30 = vpop.xlane.xlu0 %3434 }
 0x356   : > { %v9013_v41 = vpop.eup %9012  ;;  %v3693_v60 = vadd.f32 %v3692_v46, %v3068_v33  ;;  %v4187_v63 = vrot.slane %v13279_v61, %v17433_v11  ;;  %v4183_v7 = vsel %vm4059_vm3, %v4182_v23, %v4178_v28  ;;  %9028 = vtanh.f32 %v2042_v39  ;;  %v17535_v23 = vld [vmem:[#allocation127_spill] sm:$0xff]  ;;  %v13321_v39 = vpop.xlane.xlu1 %3439  ;;  %17537 = vst [vmem:[#allocation85_spill] sm:$0xff] %v13323_v30  ;;  %v17540_v46 = vld [vmem:[#allocation12_spill] sm:$0xff] }
 0x357   : > { %v9015_v27 = vpop.eup %9014  ;;  %v3079_v1 = vmul.f32 %v9011_v24, %v16678_v50  ;;  %v3706_v16 = vadd.f32 %v3078_v2, %v3077_v31  ;;  %v13312_v55 = vadd.f32 %v11737_v48, %v13088_v49  ;;  %9030 = vtanh.f32 %v2035_v54  ;;  %17536 = vst [vmem:[#allocation88_spill] sm:$0xff] %v13321_v39  ;;  %v17541_v31 = vld [vmem:[#allocation55_spill] sm:$0xff]  ;;  %v17543_v2 = vld [vmem:[#allocation101_spill] sm:$0xff] }
 0x358   : > { %v9017_v62 = vpop.eup %9016  ;;  %3694 = vadd.xlane.f32.xlu0 %v3693_v60  ;;  %v3073_v40 = vmul.f32 %v9015_v27, %v9964_v26  ;;  %9032 = vtanh.f32 %v2036_v51  ;;  %v13317_v53 = vadd.f32 %v11737_v48, %v13118_v10  ;;  %v2047_v21 = vmul.f32 %v17535_v23, %v17488_v8  ;;  %v17538_v51 = vld [vmem:[#allocation52_spill] sm:$0xff]  ;;  %v17542_v24 = vld [vmem:[#allocation11_spill] sm:$0xff] }
 0x359   : > { %17533 = vst [vmem:[#allocation87_spill] sm:$0xff] %v13312_v55  ;;  %v9019_v28 = vpop.eup %9018  ;;  %v3080_v49 = vmul.f32 %v9013_v41, %v16681_v36  ;;  %v3707_v54 = vadd.f32 %v3706_v16, %v3079_v1  ;;  %v3074_v12 = vmul.f32 %v9017_v62, %v9967_v35  ;;  %9034 = vtanh.f32 %v2037_v58  ;;  %v17544_v16 = vld [vmem:[#allocation13_spill] sm:$0xff]  ;;  %v17545_v58 = vld [vmem:[#allocation60_spill] sm:$0xff] }
 0x35a   : > { %17534 = vst [vmem:[#allocation114_spill] sm:$0xff] %v13317_v53  ;;  %v9021_v33 = vpop.eup %9020  ;;  %9036 = vtanh.f32 %v2038_v34  ;;  %v13329_v10 = vadd.f32 %v11737_v48, %v17538_v51  ;;  %v2048_v8 = vmul.f32 %v17541_v31, %v17540_v46  ;;  %v2049_v60 = vmul.f32 %v17543_v2, %v17542_v24  ;;  %v17546_v34 = vld [vmem:[#allocation6_spill] sm:$0xff]  ;;  %v13355_v24 = vpop.xlane.xlu1 %3449 }
 0x35b   : > { %v3708_v27 = vadd.f32 %v3707_v54, %v3080_v49  ;;  %v3075_v61 = vmul.f32 %v9019_v28, %v16678_v50  ;;  %v3076_v41 = vmul.f32 %v9021_v33, %v16681_v36  ;;  %v3701_v1 = vadd.f32 %v3074_v12, %v3073_v40  ;;  %v17548_v49 = vld [vmem:[#allocation9_spill] sm:$0xff] }
 0x35c   : > { %17539 = vst [vmem:[#allocation68_spill] sm:$0xff] %v13329_v10  ;;  %v2050_v62 = vmul.f32 %v17545_v58, %v17544_v16  ;;  %9038 = vtanh.f32 %v2047_v21  ;;  %v2043_v51 = vmul.f32 %v17535_v23, %v17546_v34  ;;  %v2044_v39 = vmul.f32 %v17541_v31, %v17547_v4  ;;  %v17549_v21 = vld [vmem:[#allocation109_spill] sm:$0xff] }
 0x35d   : > { %v9023_v46 = vpop.eup %9022  ;;  %3709 = vadd.xlane.f32.xlu1 %v3708_v27  ;;  %v3702_v30 = vadd.f32 %v3701_v1, %v3075_v61  ;;  %9040 = vtanh.f32 %v2048_v8  ;;  %v2045_v28 = vmul.f32 %v17543_v2, %v17501_v5  ;;  %v2046_v40 = vmul.f32 %v17545_v58, %v17548_v49  ;;  %v13357_v61 = vpop.xlane.xlu0 %3444 }
 0x35e   : > { %v9025_v54 = vpop.eup %9024  ;;  %v13348_v12 = vsel %vm4066_vm4, %v4187_v63, %v4183_v7  ;;  %v13352_v33 = vadd.f32 %v11737_v48, %v17549_v21  ;;  %v3085_v4 = vmul.f32 %v9023_v46, %v9964_v26  ;;  %9042 = vtanh.f32 %v2049_v60  ;;  %v17551_v60 = vld [vmem:[#allocation71_spill] sm:$0xff] }
 0x35f   : > { %v9027_v8 = vpop.eup %9026  ;;  %v3703_v5 = vadd.f32 %v3702_v30, %v3076_v41  ;;  %v3086_v27 = vmul.f32 %v9025_v54, %v9967_v35  ;;  %9044 = vtanh.f32 %v2050_v62  ;;  %v2055_v63 = vmul.f32 %v17535_v23, %v17503_v15 }
 0x360   : > { %17550 = vst [vmem:[#allocation89_spill] sm:$0xff] %v13352_v33  ;;  %v9029_v7 = vpop.eup %9028  ;;  %v4284_v1 = vrot.slane %v13317_v53, %v17409_v52  ;;  %v4280_v16 = vrot.slane %v13329_v10, %v17464_v17  ;;  %9046 = vtanh.f32 %v2043_v51  ;;  %v13368_v34 = vadd.f32 %v11737_v48, %v17551_v60 }
 0x361   : > { %v9031_v46 = vpop.eup %9030  ;;  %3704 = vadd.xlane.f32.xlu0 %v3703_v5  ;;  %v3087_v30 = vmul.f32 %v9027_v8, %v16678_v50  ;;  %v3716_v41 = vadd.f32 %v3086_v27, %v3085_v4  ;;  %9048 = vtanh.f32 %v2044_v39  ;;  %v2056_v15 = vmul.f32 %v17541_v31, %v17507_v42  ;;  %v17553_v8 = vld [vmem:[#allocation70_spill] sm:$0xff]  ;;  %v13388_v27 = vpop.xlane.xlu1 %3459 }
 0x362   : > { %17552 = vst [vmem:[#allocation90_spill] sm:$0xff] %v13368_v34  ;;  %v9033_v62 = vpop.eup %9032  ;;  %v3088_v49 = vmul.f32 %v9029_v7, %v16681_v36  ;;  %v3081_v54 = vmul.f32 %v9031_v46, %v9964_v26  ;;  %9050 = vtanh.f32 %v2045_v28  ;;  %v2057_v51 = vmul.f32 %v17543_v2, %v17509_v45  ;;  %v13390_v7 = vpop.xlane.xlu0 %3454 }
 0x363   : > { %v9035_v21 = vpop.eup %9034  ;;  %v3717_v60 = vadd.f32 %v3716_v41, %v3087_v30  ;;  %v3082_v5 = vmul.f32 %v9033_v62, %v9967_v35  ;;  %9052 = vtanh.f32 %v2046_v40  ;;  %v2058_v39 = vmul.f32 %v17545_v58, %v17510_v13 }
 0x364   : > { %v9037_v4 = vpop.eup %9036  ;;  %v13382_v42 = vadd.f32 %v11737_v48, %v17553_v8  ;;  %9054 = vtanh.f32 %v2055_v63  ;;  %v2051_v28 = vmul.f32 %v17535_v23, %v17511_v18  ;;  %v2052_v45 = vmul.f32 %v17541_v31, %v17460_v57 }
 0x365   : > { %v3718_v40 = vadd.f32 %v3717_v60, %v3088_v49  ;;  %v3083_v46 = vmul.f32 %v9035_v21, %v16678_v50  ;;  %v3711_v13 = vadd.f32 %v3082_v5, %v3081_v54  ;;  %9056 = vtanh.f32 %v2056_v15  ;;  %v17555_v54 = vld [vmem:[#allocation47_spill] sm:$0xff] }
 0x366   : > { %17554 = vst [vmem:[#allocation97_spill] sm:$0xff] %v13382_v42  ;;  %v9039_v30 = vpop.eup %9038  ;;  %v4289_v41 = vrot.slane %v13368_v34, %v17525_v14  ;;  %9058 = vtanh.f32 %v2057_v51  ;;  %v2053_v18 = vmul.f32 %v17543_v2, %v17461_v43  ;;  %v2054_v57 = vmul.f32 %v17545_v58, %v17515_v22 }
 0x367   : > { %v9041_v63 = vpop.eup %9040  ;;  %3719 = vadd.xlane.f32.xlu1 %v3718_v40  ;;  %v3084_v62 = vmul.f32 %v9037_v4, %v16681_v36  ;;  %v3712_v49 = vadd.f32 %v3711_v13, %v3083_v46  ;;  %v3093_v21 = vmul.f32 %v9039_v30, %v9964_v26  ;;  %9060 = vtanh.f32 %v2058_v39  ;;  %v17556_v4 = vld [vmem:[#allocation26_spill] sm:$0xff] }
 0x368   : > { %v9043_v15 = vpop.eup %9042  ;;  %v4192_v60 = vrot.slane %v13352_v33, %v17555_v54  ;;  %v4285_v51 = vsel %vm4038_vm0, %v4284_v1, %v4280_v16  ;;  %v3094_v5 = vmul.f32 %v9041_v63, %v9967_v35  ;;  %9062 = vtanh.f32 %v2051_v28  ;;  %v13411_v1 = vpop.xlane.xlu1 %3469 }
 0x369   : > { %v9045_v43 = vpop.eup %9044  ;;  %v3713_v8 = vadd.f32 %v3712_v49, %v3084_v62  ;;  %v4294_v22 = vrot.slane %v13382_v42, %v17171_v9  ;;  %9064 = vtanh.f32 %v2052_v45  ;;  %v2063_v40 = vmul.f32 %v17535_v23, %v17556_v4  ;;  %v13413_v16 = vpop.xlane.xlu0 %3464  ;;  %v17557_v45 = vld [vmem:[#allocation28_spill] sm:$0xff]  ;;  %v17558_v49 = vld [vmem:[#allocation27_spill] sm:$0xff] }
 0x36a   : > { %v9047_v46 = vpop.eup %9046  ;;  %v3095_v39 = vmul.f32 %v9043_v15, %v16678_v50  ;;  %v3726_v13 = vadd.f32 %v3094_v5, %v3093_v21  ;;  %v4290_v30 = vsel %vm4045_vm1, %v4289_v41, %v4285_v51  ;;  %9066 = vtanh.f32 %v2053_v18  ;;  %v17559_v51 = vld [vmem:[#allocation29_spill] sm:$0xff] }
 0x36b   : > { %v9049_v28 = vpop.eup %9048  ;;  %3714 = vadd.xlane.f32.xlu0 %v3713_v8  ;;  %v3089_v63 = vmul.f32 %v9047_v46, %v9964_v26  ;;  %9068 = vtanh.f32 %v2054_v57  ;;  %v2064_v62 = vmul.f32 %v17541_v31, %v17557_v45  ;;  %v2065_v4 = vmul.f32 %v17543_v2, %v17558_v49  ;;  %v17560_v8 = vld [vmem:[#allocation136_spill] sm:$0xff]  ;;  %v17562_v57 = vld [vmem:[#allocation22_spill] sm:$0xff] }
 0x36c   : > { %v9051_v15 = vpop.eup %9050  ;;  %v3096_v21 = vmul.f32 %v9045_v43, %v16681_v36  ;;  %v3727_v41 = vadd.f32 %v3726_v13, %v3095_v39  ;;  %v3090_v18 = vmul.f32 %v9049_v28, %v9967_v35  ;;  %v2066_v5 = vmul.f32 %v17545_v58, %v17559_v51 }
 0x36d   : > { %v9053_v42 = vpop.eup %9052  ;;  %v13426_v46 = vadd.f32 %v11737_v48, %v17560_v8  ;;  %9070 = vtanh.f32 %v2063_v40  ;;  %v2059_v45 = vmul.f32 %v17535_v23, %v17562_v57  ;;  %v2060_v49 = vmul.f32 %v17541_v31, %v17527_v0 }
 0x36e   : > { %v9055_v53 = vpop.eup %9054  ;;  %v3728_v43 = vadd.f32 %v3727_v41, %v3096_v21  ;;  %v3091_v39 = vmul.f32 %v9051_v15, %v16678_v50  ;;  %v3721_v13 = vadd.f32 %v3090_v18, %v3089_v63  ;;  %9072 = vtanh.f32 %v2064_v62  ;;  %v13440_v63 = vpop.xlane.xlu1 %3479  ;;  %v17587_v15 = vld [vmem:[#allocation67_spill] sm:$0xff] }
 0x36f   : > { %17561 = vst [vmem:[#allocation132_spill] sm:$0xff] %v13426_v46  ;;  %v9057_v28 = vpop.eup %9056  ;;  %v3101_v51 = vmul.f32 %v9055_v53, %v9964_v26  ;;  %9074 = vtanh.f32 %v2065_v4  ;;  %v2061_v8 = vmul.f32 %v17543_v2, %v17473_v29  ;;  %v2062_v40 = vmul.f32 %v17545_v58, %v17528_v32  ;;  %v13442_v62 = vpop.xlane.xlu0 %3474  ;;  %v17563_v4 = vld [vmem:[#allocation48_spill] sm:$0xff] }
 0x370   : > { %v9059_v57 = vpop.eup %9058  ;;  %3729 = vadd.xlane.f32.xlu1 %v3728_v43  ;;  %v3092_v0 = vmul.f32 %v9053_v42, %v16681_v36  ;;  %v3722_v34 = vadd.f32 %v3721_v13, %v3091_v39  ;;  %v3102_v21 = vmul.f32 %v9057_v28, %v9967_v35  ;;  %9076 = vtanh.f32 %v2066_v5  ;;  %v17588_v28 = vld [vmem:[#allocation118_spill] sm:$0xff] }
 0x371   : > { %v9061_v53 = vpop.eup %9060  ;;  %v13448_v29 = vsel %vm4073_vm5, %v4192_v60, %v13348_v12  ;;  %v13451_v32 = vsel %vm4052_vm2, %v4294_v22, %v4290_v30  ;;  %9078 = vtanh.f32 %v2059_v45  ;;  %v3103_v18 = vmul.f32 %v9059_v57, %v16678_v50 }
 0x372   : > { %v9063_v42 = vpop.eup %9062  ;;  %v3723_v41 = vadd.f32 %v3722_v34, %v3092_v0  ;;  %v3736_v5 = vadd.f32 %v3102_v21, %v3101_v51  ;;  %9080 = vtanh.f32 %v2060_v49  ;;  %v3104_v39 = vmul.f32 %v9061_v53, %v16681_v36  ;;  %v17564_v49 = vld [vmem:[#allocation72_spill] sm:$0xff]  ;;  %v13473_v53 = vpop.xlane.xlu1 %3489 }
 0x373   : > { %v9065_v43 = vpop.eup %9064  ;;  %v3097_v13 = vmul.f32 %v9063_v42, %v9964_v26  ;;  %9082 = vtanh.f32 %v2061_v8  ;;  %v2071_v34 = vmul.f32 %v17535_v23, %v17426_v20  ;;  %v13464_v51 = vadd.f32 %v11737_v48, %v17564_v49  ;;  %v13475_v42 = vpop.xlane.xlu0 %3484 }
 0x374   : > { %v9067_v12 = vpop.eup %9066  ;;  %3724 = vadd.xlane.f32.xlu0 %v3723_v41  ;;  %v3737_v60 = vadd.f32 %v3736_v5, %v3103_v18  ;;  %v3098_v22 = vmul.f32 %v9065_v43, %v9967_v35  ;;  %9084 = vtanh.f32 %v2062_v40  ;;  %v2072_v57 = vmul.f32 %v17541_v31, %v9903_v19 }
 0x375   : > { %v9069_v30 = vpop.eup %9068  ;;  %v3099_v45 = vmul.f32 %v9067_v12, %v16678_v50  ;;  %17565 = vst [vmem:[#allocation59_spill] sm:$0xff] %v13464_v51  ;;  %v2073_v8 = vmul.f32 %v17543_v2, %v9901_v3  ;;  %v2074_v20 = vmul.f32 %v17545_v58, %v17481_v6  ;;  %9086 = vtanh.f32 %v2071_v34 }
 0x376   : > { %v3738_v0 = vadd.f32 %v3737_v60, %v3104_v39  ;;  %v3100_v21 = vmul.f32 %v9069_v30, %v16681_v36  ;;  %v3731_v40 = vadd.f32 %v3098_v22, %v3097_v13  ;;  %v2067_v18 = vmul.f32 %v17535_v23, %v17482_v56  ;;  %v17566_v56 = vld [vmem:[#allocation119_spill] sm:$0xff]  ;;  %v17568_v23 = vld [vmem:[#allocation120_spill] sm:$0xff] }
 0x377   : > { %v9071_v41 = vpop.eup %9070  ;;  %v2068_v19 = vmul.f32 %v17541_v31, %v17483_v59  ;;  %v2069_v3 = vmul.f32 %v17543_v2, %v17484_v47  ;;  %9088 = vtanh.f32 %v2072_v57  ;;  %v2070_v39 = vmul.f32 %v17545_v58, %v17485_v44  ;;  %v17570_v44 = vld [vmem:[#allocation125_spill] sm:$0xff] }
 0x378   : > { %v9073_v5 = vpop.eup %9072  ;;  %3739 = vadd.xlane.f32.xlu1 %v3738_v0  ;;  %v3732_v43 = vadd.f32 %v3731_v40, %v3099_v45  ;;  %v3109_v6 = vmul.f32 %v9071_v41, %v9964_v26  ;;  %9090 = vtanh.f32 %v2073_v8  ;;  %v13489_v59 = vadd.f32 %v11737_v48, %v17566_v56  ;;  %v13510_v40 = vpop.xlane.xlu0 %3494 }
 0x379   : > { %v9075_v13 = vpop.eup %9074  ;;  %v3110_v12 = vmul.f32 %v9073_v5, %v9967_v35  ;;  %v13493_v47 = vadd.f32 %v11737_v48, %v17568_v23  ;;  %v4299_v60 = vrot.slane %v13464_v51, %v17480_v38  ;;  %9092 = vtanh.f32 %v2074_v20 }
 0x37a   : > { %17567 = vst [vmem:[#allocation62_spill] sm:$0xff] %v13489_v59  ;;  %v9077_v31 = vpop.eup %9076  ;;  %v3733_v2 = vadd.f32 %v3732_v43, %v3100_v21  ;;  %v13499_v58 = vadd.f32 %v11737_v48, %v17570_v44  ;;  %v3111_v34 = vmul.f32 %v9075_v13, %v16678_v50  ;;  %9094 = vtanh.f32 %v2067_v18  ;;  %v13508_v21 = vpop.xlane.xlu1 %3499  ;;  %v17572_v18 = vld [vmem:[#allocation83_spill] sm:$0xff] }
 0x37b   : > { %17569 = vst [vmem:[#allocation75_spill] sm:$0xff] %v13493_v47  ;;  %v9079_v22 = vpop.eup %9078  ;;  %v3112_v30 = vmul.f32 %v9077_v31, %v16681_v36  ;;  %v3746_v45 = vadd.f32 %v3110_v12, %v3109_v6  ;;  %9096 = vtanh.f32 %v2068_v19  ;;  %v4323_v8 = vrot.slane %v13489_v59, %v17409_v52  ;;  %v17574_v13 = vld [vmem:[#allocation111_spill] sm:$0xff] }
 0x37c   : > { %17571 = vst [vmem:[#allocation98_spill] sm:$0xff] %v13499_v58  ;;  %v9081_v49 = vpop.eup %9080  ;;  %3734 = vadd.xlane.f32.xlu0 %v3733_v2  ;;  %v3105_v57 = vmul.f32 %v9079_v22, %v9964_v26  ;;  %v4319_v0 = vrot.slane %v13493_v47, %v17464_v17  ;;  %9098 = vtanh.f32 %v2069_v3  ;;  %v13515_v43 = vadd.f32 %v11737_v48, %v17572_v18 }
 0x37d   : > { %v9083_v20 = vpop.eup %9082  ;;  %v3747_v41 = vadd.f32 %v3746_v45, %v3111_v34  ;;  %v3106_v5 = vmul.f32 %v9081_v49, %v9967_v35  ;;  %v13520_v12 = vadd.f32 %v11737_v48, %v17574_v13  ;;  %9100 = vtanh.f32 %v2070_v39  ;;  %v17578_v34 = vld [vmem:[#allocation85_spill] sm:$0xff] }
 0x37e   : > { %17573 = vst [vmem:[#allocation57_spill] sm:$0xff] %v13515_v43  ;;  %v9085_v19 = vpop.eup %9084  ;;  %v3107_v6 = vmul.f32 %v9083_v20, %v16678_v50  ;;  %v4333_v56 = vrot.slane %v13499_v58, %v17171_v9  ;;  %v4328_v3 = vrot.slane %v13515_v43, %v17525_v14  ;;  %v13528_v2 = vadd.f32 %v11737_v48, %v13290_v25  ;;  %v17580_v25 = vld [vmem:[#allocation137_spill] sm:$0xff]  ;;  %v13556_v18 = vpop.xlane.xlu1 %3509 }
 0x37f   : > { %17575 = vst [vmem:[#allocation99_spill] sm:$0xff] %v13520_v12  ;;  %v3748_v23 = vadd.f32 %v3747_v41, %v3112_v30  ;;  %v3741_v31 = vadd.f32 %v3106_v5, %v3105_v57  ;;  %v4300_v44 = vsel %vm4059_vm3, %v4299_v60, %v13451_v32  ;;  %v4324_v22 = vsel %vm4038_vm0, %v4323_v8, %v4319_v0  ;;  %v9087_v45 = vpop.eup %9086  ;;  %v17582_v41 = vld [vmem:[#allocation88_spill] sm:$0xff] }
 0x380   : > { %17576 = vst [vmem:[#allocation34_spill] sm:$0xff] %v13528_v2  ;;  %v13535_v39 = vadd.f32 %v11737_v48, %v13292_v37  ;;  %v13539_v30 = vadd.f32 %v11737_v48, %v17578_v34  ;;  %v3108_v49 = vmul.f32 %v9085_v19, %v16681_v36  ;;  %v13544_v20 = vadd.f32 %v11737_v48, %v17580_v25  ;;  %v13558_v19 = vpop.xlane.xlu0 %3504  ;;  %v17584_v34 = vld [vmem:[#allocation79_spill] sm:$0xff] }
 0x381   : > { %3749 = vadd.xlane.f32.xlu1 %v3748_v23  ;;  %v3742_v57 = vadd.f32 %v3741_v31, %v3107_v6  ;;  %v4329_v32 = vsel %vm4045_vm1, %v4328_v3, %v4324_v22  ;;  %v9089_v60 = vpop.eup %9088  ;;  %v4309_v37 = vrot.slane %v13520_v12, %v17555_v54  ;;  %v3117_v8 = vmul.f32 %v9087_v45, %v9964_v26  ;;  %v17585_v45 = vld [vmem:[#allocation107_spill] sm:$0xff] }
 0x382   : > { %17577 = vst [vmem:[#allocation91_spill] sm:$0xff] %v13535_v39  ;;  %17579 = vst [vmem:[#allocation86_spill] sm:$0xff] %v13539_v30  ;;  %v4338_v0 = vrot.slane %v13535_v39, %v17480_v38  ;;  %v13554_v5 = vadd.f32 %v11737_v48, %v17582_v41  ;;  %v9091_v6 = vpop.eup %9090  ;;  %v3118_v23 = vmul.f32 %v9089_v60, %v9967_v35 }
 0x383   : > { %17581 = vst [vmem:[#allocation92_spill] sm:$0xff] %v13544_v20  ;;  %v3743_v13 = vadd.f32 %v3742_v57, %v3108_v49  ;;  %v4343_v31 = vrot.slane %v13528_v2, %v17433_v11  ;;  %v4334_v3 = vsel %vm4052_vm2, %v4333_v56, %v4329_v32  ;;  %v9093_v22 = vpop.eup %9092  ;;  %v17586_v25 = vrot.slane %v17585_v45, %v17555_v54 }
 0x384   : > { %17583 = vst [vmem:[#allocation93_spill] sm:$0xff] %v13554_v5  ;;  %v4670_v58 = vsel %vm4669_vm8, %v17588_v28, %v17587_v15  ;;  %v4339_v49 = vsel %vm4059_vm3, %v4338_v0, %v4334_v3  ;;  %v4348_v57 = vrot.slane %v13539_v30, %v17555_v54  ;;  %v9095_v60 = vpop.eup %9094  ;;  %v4314_v56 = vrot.slane %v13544_v20, %v17563_v4 }
 0x385   : > { %v4271_v41 = vsel %vm4073_vm5, %v17586_v25, %v17584_v34  ;;  %3744 = vadd.xlane.f32.xlu0 %v3743_v13  ;;  %v17589_v32 = vrot.slane %v13426_v46, %v17433_v11  ;;  %v3119_v34 = vmul.f32 %v9091_v6, %v16678_v50  ;;  %v3756_v25 = vadd.f32 %v3118_v23, %v3117_v8  ;;  %v9097_v59 = vpop.eup %9096  ;;  %v17591_v46 = vld [vmem:[#allocation117_spill] sm:$0xff] }
 0x386   : > { %v17590_v15 = vrot.slane %v13312_v55, %v17563_v4  ;;  %v3113_v13 = vmul.f32 %v9095_v60, %v9964_v26  ;;  %v4353_v3 = vrot.slane %v13554_v5, %v17563_v4  ;;  %v9099_v20 = vpop.eup %9098  ;;  %v3114_v8 = vmul.f32 %v9097_v59, %v9967_v35  ;;  %v13599_v26 = vpop.xlane.xlu1 %3519 }
 0x387   : > { %v4305_v2 = vsel %vm4066_vm4, %v17589_v32, %v4300_v44  ;;  %v3120_v44 = vmul.f32 %v9093_v22, %v16681_v36  ;;  %v3757_v32 = vadd.f32 %v3756_v25, %v3119_v34  ;;  %v4344_v6 = vsel %vm4066_vm4, %v4343_v31, %v4339_v49  ;;  %v9101_v23 = vpop.eup %9100 }
 0x388   : > { %v4198_v28 = vsel %vm4080_vm6, %v17590_v15, %v13448_v29  ;;  %v4310_v0 = vsel %vm4073_vm5, %v4309_v37, %v4305_v2  ;;  %v17592_v30 = vrot.slane %v17591_v46, %v17563_v4  ;;  %v4349_v2 = vsel %vm4073_vm5, %v4348_v57, %v4344_v6  ;;  %v13601_v37 = vpop.xlane.xlu0 %3514  ;;  %v17593_v57 = vld [vmem:[#allocation105_spill] sm:$0xff] }
 0x389   : > { %v3758_v22 = vadd.f32 %v3757_v32, %v3120_v44  ;;  %v3115_v60 = vmul.f32 %v9099_v20, %v16678_v50  ;;  %v3751_v35 = vadd.f32 %v3114_v8, %v3113_v13  ;;  %v4315_v59 = vsel %vm4080_vm6, %v4314_v56, %v4310_v0 }
 0x38a   : > { %v4276_v29 = vsel %vm4080_vm6, %v17592_v30, %v4271_v41  ;;  %v3116_v31 = vmul.f32 %v9101_v23, %v16681_v36  ;;  %v4672_v49 = vsel %vm4671_vm9, %v4198_v28, %v4670_v58  ;;  %v4354_v41 = vsel %vm4080_vm6, %v4353_v3, %v4349_v2  ;;  %v13613_v56 = vpop.xlane.xlu1 %3609 }
 0x38b   : > { %3759 = vadd.xlane.f32.xlu1 %v3758_v22  ;;  %v3752_v30 = vadd.f32 %v3751_v35, %v3115_v60  ;;  %v4674_v34 = vsel %vm4673_vm10, %v17593_v57, %v4672_v49  ;;  %v13680_v47 = vadd.f32 %v11737_v48, %v13473_v53  ;;  %v13684_v12 = vadd.f32 %v11737_v48, %v13475_v42 }
 0x38c   : > { %v4676_v25 = vsel %vm4675_vm11, %v4276_v29, %v4674_v34  ;;  %v13615_v58 = vpop.xlane.xlu0 %3604  ;;  %v13688_v51 = vadd.f32 %v11737_v48, %v13510_v40  ;;  %v13692_v10 = vadd.f32 %v11737_v48, %v13355_v24  ;;  %v13696_v45 = vadd.f32 %v11737_v48, %v13357_v61 }
 0x38d   : > { %v3753_v50 = vadd.f32 %v3752_v30, %v3116_v31  ;;  %v4678_v20 = vsel %vm4677_vm12, %v4315_v59, %v4676_v25  ;;  %17596 = vst [vmem:[#allocation16_spill] sm:$0xff] %v13680_v47  ;;  %17597 = vst [vmem:[#allocation15_spill] sm:$0xff] %v13684_v12  ;;  %v13700_v53 = vadd.f32 %v11737_v48, %v13390_v7 }
 0x38e   : > { %v4680_v36 = vsel %vm4679_vm13, %v4354_v41, %v4678_v20  ;;  %v13618_v28 = vpop.xlane.xlu1 %3619  ;;  %17598 = vst [vmem:[#allocation23_spill] sm:$0xff] %v13688_v51  ;;  %17599 = vst [vmem:[#allocation35_spill] sm:$0xff] %v13692_v10  ;;  %v4401_v42 = vrot.slane %v13680_v47, %v17409_v52  ;;  %v4397_v55 = vrot.slane %v13684_v12, %v17464_v17 }
 0x38f   : > { %3754 = vadd.xlane.f32.xlu0 %v3753_v50  ;;  %v4691_v15 = vsel %vm4690_vm14, %v4680_v36, -inf  ;;  %17600 = vst [vmem:[#allocation30_spill] sm:$0xff] %v13696_v45  ;;  %17601 = vst [vmem:[#allocation32_spill] sm:$0xff] %v13700_v53  ;;  %v13708_v40 = vadd.f32 %v11737_v48, %v13508_v21  ;;  %v4406_v61 = vrot.slane %v13688_v51, %v17525_v14 }
 0x390   : > { %4692 = vmax.xlane.f32.xlu1 %v4691_v15  ;;  %v13620_v0 = vpop.xlane.xlu0 %3614  ;;  %v13718_v7 = vadd.f32 %v11737_v48, %v13558_v19  ;;  %v4362_v47 = vrot.slane %v13692_v10, %v17409_v52  ;;  %v4358_v12 = vrot.slane %v13696_v45, %v17464_v17  ;;  %v13726_v21 = vadd.f32 %v11737_v48, %v13388_v27 }
 0x391   : > { %17602 = vst [vmem:[#allocation31_spill] sm:$0xff] %v13708_v40  ;;  %v13732_v51 = vadd.f32 %v11737_v48, %v13413_v16  ;;  %v4402_v19 = vsel %vm4038_vm0, %v4401_v42, %v4397_v55  ;;  %v13739_v10 = vadd.f32 %v11737_v48, %v13556_v18  ;;  %v13753_v42 = vadd.f32 %v11737_v48, %v13411_v1 }
 0x392   : > { %v13622_v13 = vpop.xlane.xlu1 %3629  ;;  %17603 = vst [vmem:[#allocation33_spill] sm:$0xff] %v13718_v7  ;;  %v4407_v45 = vsel %vm4045_vm1, %v4406_v61, %v4402_v19  ;;  %v4416_v27 = vrot.slane %v13718_v7, %v17480_v38  ;;  %v4363_v16 = vsel %vm4038_vm0, %v4362_v47, %v4358_v12  ;;  %v4372_v55 = vrot.slane %v13726_v21, %v17171_v9 }
 0x393   : > { %17604 = vst [vmem:[#allocation10_spill] sm:$0xff] %v13739_v10  ;;  %v4377_v19 = vrot.slane %v13732_v51, %v17480_v38  ;;  %v13768_v47 = vadd.f32 %v11737_v48, %v13599_v26  ;;  %v4421_v1 = vrot.slane %v13739_v10, %v17433_v11  ;;  %v13775_v7 = vadd.f32 %v11737_v48, %v13613_v56 }
 0x394   : > { %v13624_v3 = vpop.xlane.xlu0 %3624  ;;  %v13786_v26 = vadd.f32 %v11737_v48, %v13620_v0  ;;  %v13793_v56 = vadd.f32 %v11737_v48, %v13440_v63  ;;  %v13807_v63 = vadd.f32 %v11737_v48, %v13618_v28 }
 0x395   : > { %17606 = vst [vmem:[#allocation96_spill] sm:$0xff] %v13768_v47  ;;  %17607 = vst [vmem:[#allocation115_spill] sm:$0xff] %v13775_v7 }
 0x396   : > { %v13626_v44 = vpop.xlane.xlu1 %3639  ;;  %17609 = vst [vmem:[#allocation7_spill] sm:$0xff] %v13786_v26  ;;  %17610 = vst [vmem:[#allocation18_spill] sm:$0xff] %v13807_v63 }
 0x398   : > { %v13628_v32 = vpop.xlane.xlu0 %3634 }
 0x39a   : > { %v13630_v8 = vpop.xlane.xlu1 %3649 }
 0x39c   : > { %v13632_v6 = vpop.xlane.xlu0 %3644 }
 0x39e   : > { %v13634_v23 = vpop.xlane.xlu1 %3659 }
 0x3a0   : > { %v13636_v29 = vpop.xlane.xlu0 %3654 }
 0x3a2   : > { %v13638_v2 = vpop.xlane.xlu1 %3669 }
 0x3a4   : > { %v13640_v22 = vpop.xlane.xlu0 %3664 }
 0x3a6   : > { %v13642_v60 = vpop.xlane.xlu1 %3679 }
 0x3a8   : > { %v13644_v35 = vpop.xlane.xlu0 %3674 }
 0x3a9   : > { %17594 = vst [vmem:[#allocation94_spill] sm:$0xff] %v13644_v35  ;;  %v4367_v35 = vrot.slane %v13700_v53, %v17525_v14  ;;  %v13746_v53 = vadd.f32 %v11737_v48, %v13601_v37  ;;  %v13764_v37 = vadd.f32 %v11737_v48, %v13442_v62 }
 0x3aa   : > { %v13646_v59 = vpop.xlane.xlu1 %3529 }
 0x3ab   : > { %17605 = vst [vmem:[#allocation131_spill] sm:$0xff] %v13746_v53  ;;  %v4368_v61 = vsel %vm4045_vm1, %v4367_v35, %v4363_v16  ;;  %v13779_v35 = vadd.f32 %v11737_v48, %v13615_v58  ;;  %v4426_v16 = vrot.slane %v13746_v53, %v17555_v54  ;;  %v4518_v53 = vrot.slane %v13775_v7, %v17409_v52 }
 0x3ac   : > { %v13648_v31 = vpop.xlane.xlu0 %3524 }
 0x3ad   : > { %17608 = vst [vmem:[#allocation116_spill] sm:$0xff] %v13779_v35 }
 0x3ae   : > { %v13650_v49 = vpop.xlane.xlu1 %3539 }
 0x3b0   : > { %v13652_v30 = vpop.xlane.xlu0 %3534 }
 0x3b2   : > { %v13654_v41 = vpop.xlane.xlu1 %3549 }
 0x3b4   : > { %v13656_v57 = vpop.xlane.xlu0 %3544 }
 0x3b6   : > { %v13658_v34 = vpop.xlane.xlu1 %3559 }
 0x3b8   : > { %v13660_v25 = vpop.xlane.xlu0 %3554 }
 0x3ba   : > { %v13662_v50 = vpop.xlane.xlu1 %3569 }
 0x3bd   : > { %v13664_v20 = vpop.xlane.xlu0 %3564 }
 0x3c1   : > { %v13666_v36 = vpop.xlane.xlu1 %3579 }
 0x3c5   : > { %v13668_v15 = vpop.xlane.xlu0 %3574 }
 0x3c9   : > { %v13670_v5 = vpop.xlane.xlu1 %3589 }
 0x3cd   : > { %v13672_v46 = vpop.xlane.xlu0 %3584 }
 0x3d1   : > { %v13674_v39 = vpop.xlane.xlu1 %3599 }
 0x3d2   : > { %17595 = vst [vmem:[#allocation123_spill] sm:$0xff] %v13674_v39  ;;  %v4411_v39 = vrot.slane %v13708_v40, %v17171_v9 }
 0x3d4   : > { %v4412_v12 = vsel %vm4052_vm2, %v4411_v39, %v4407_v45  ;;  %v4382_v39 = vrot.slane %v13753_v42, %v17433_v11  ;;  %v4373_v45 = vsel %vm4052_vm2, %v4372_v55, %v4368_v61  ;;  %v4514_v55 = vrot.slane %v13779_v35, %v17464_v17 }
 0x3d5   : > { %v13676_v43 = vpop.xlane.xlu0 %3594  ;;  %v4417_v62 = vsel %vm4059_vm3, %v4416_v27, %v4412_v12  ;;  %v4378_v58 = vsel %vm4059_vm3, %v4377_v19, %v4373_v45  ;;  %v4387_v27 = vrot.slane %v13764_v37, %v17555_v54  ;;  %v4431_v12 = vrot.slane %v13768_v47, %v17563_v4 }
 0x3d6   : > { %v4422_v0 = vsel %vm4066_vm4, %v4421_v1, %v4417_v62  ;;  %v4523_v47 = vrot.slane %v13786_v26, %v17525_v14  ;;  %v13818_v1 = vadd.f32 %v11737_v48, %v13624_v3  ;;  %v4392_v62 = vrot.slane %v13793_v56, %v17563_v4 }
 0x3d7   : > { %v4427_v45 = vsel %vm4073_vm5, %v4426_v16, %v4422_v0  ;;  %v4383_v7 = vsel %vm4066_vm4, %v4382_v39, %v4378_v58  ;;  %v13826_v35 = vadd.f32 %v11737_v48, %v13622_v13  ;;  %v4519_v0 = vsel %vm4038_vm0, %v4518_v53, %v4514_v55 }
 0x3d8   : > { %17611 = vst [vmem:[#allocation20_spill] sm:$0xff] %v13818_v1  ;;  %v4388_v28 = vsel %vm4073_vm5, %v4387_v27, %v4383_v7  ;;  %v4432_v16 = vsel %vm4080_vm6, %v4431_v12, %v4427_v45  ;;  %v4528_v26 = vrot.slane %v13807_v63, %v17171_v9  ;;  %v13834_v3 = vadd.f32 %v11737_v48, %v13626_v44 }
 0x3d9   : > { %v13710_v24 = vpop.xlane.xlu1 %3689  ;;  %17612 = vst [vmem:[#allocation19_spill] sm:$0xff] %v13826_v35  ;;  %v4524_v10 = vsel %vm4045_vm1, %v4523_v47, %v4519_v0  ;;  %v4533_v7 = vrot.slane %v13818_v1, %v17480_v38  ;;  %v13841_v13 = vadd.f32 %v11737_v48, %v13646_v59  ;;  %v13845_v39 = vadd.f32 %v11737_v48, %v13648_v31 }
 0x3da   : > { %v4393_v53 = vsel %vm4080_vm6, %v4392_v62, %v4388_v28  ;;  %v13850_v58 = vadd.f32 %v11737_v48, %v13628_v32  ;;  %v13854_v44 = vadd.f32 %v11737_v48, %v13630_v8  ;;  %v13858_v47 = vadd.f32 %v11737_v48, %v13652_v30 }
 0x3db   : > { %v13865_v31 = vsel %vm4667_vm7, %v4432_v16, %v4393_v53  ;;  %v4538_v12 = vrot.slane %v13826_v35, %v17433_v11  ;;  %v13871_v32 = vadd.f32 %v11737_v48, %v13662_v50  ;;  %v13875_v8 = vadd.f32 %v11737_v48, %v13664_v20 }
 0x3dc   : > { %17613 = vst [vmem:[#allocation21_spill] sm:$0xff] %v13854_v44  ;;  %v4529_v30 = vsel %vm4052_vm2, %v4528_v26, %v4524_v10  ;;  %v13882_v45 = vadd.f32 %v11737_v48, %v13632_v6  ;;  %v13886_v62 = vadd.f32 %v11737_v48, %v13668_v15  ;;  %v4440_v28 = vrot.slane %v13841_v13, %v17409_v52 }
 0x3dd   : > { %v13712_v33 = vpop.xlane.xlu0 %3684  ;;  %v4534_v50 = vsel %vm4059_vm3, %v4533_v7, %v4529_v30  ;;  %v4436_v20 = vrot.slane %v13845_v39, %v17464_v17  ;;  %v13895_v10 = vadd.f32 %v11737_v48, %v13650_v49  ;;  %v4557_v26 = vrot.slane %v13854_v44, %v17409_v52 }
 0x3de   : > { %17614 = vst [vmem:[#allocation14_spill] sm:$0xff] %v13882_v45  ;;  %v4445_v15 = vrot.slane %v13858_v47, %v17525_v14  ;;  %v13905_v16 = vadd.f32 %v11737_v48, %v13656_v57  ;;  %v13909_v0 = vadd.f32 %v11737_v48, %v13634_v23  ;;  %v4479_v49 = vrot.slane %v13871_v32, %v17409_v52 }
 0x3df   : > { %v4475_v7 = vrot.slane %v13875_v8, %v17464_v17  ;;  %v13917_v53 = vadd.f32 %v11737_v48, %v13666_v36  ;;  %v13920_v30 = vsel %vm4066_vm4, %v4538_v12, %v4534_v50  ;;  %v13924_v57 = vadd.f32 %v11737_v48, %v13636_v29 }
 0x3e0   : > { %17615 = vst [vmem:[#allocation17_spill] sm:$0xff] %v13909_v0  ;;  %v13928_v23 = vadd.f32 %v11737_v48, %v13638_v2  ;;  %v4484_v55 = vrot.slane %v13886_v62, %v17525_v14  ;;  %v4553_v36 = vrot.slane %v13882_v45, %v17464_v17  ;;  %v4441_v35 = vsel %vm4038_vm0, %v4440_v28, %v4436_v20 }
 0x3e1   : > { %v13755_v18 = vpop.xlane.xlu1 %3699  ;;  %17616 = vst [vmem:[#allocation50_spill] sm:$0xff] %v13917_v53  ;;  %17617 = vst [vmem:[#allocation24_spill] sm:$0xff] %v13924_v57  ;;  %v4450_v12 = vrot.slane %v13895_v10, %v17171_v9  ;;  %v13939_v29 = vadd.f32 %v11737_v48, %v13672_v46  ;;  %v13943_v2 = vadd.f32 %v11737_v48, %v13640_v22 }
 0x3e2   : > { %v4446_v50 = vsel %vm4045_vm1, %v4445_v15, %v4441_v35  ;;  %v13948_v1 = vadd.f32 %v11737_v48, %v13654_v41  ;;  %v4455_v28 = vrot.slane %v13905_v16, %v17480_v38  ;;  %v13954_v20 = vadd.f32 %v11737_v48, %v13660_v25 }
 0x3e3   : > { %17618 = vst [vmem:[#allocation25_spill] sm:$0xff] %v13939_v29  ;;  %v4480_v46 = vsel %vm4038_vm0, %v4479_v49, %v4475_v7  ;;  %v4489_v45 = vrot.slane %v13917_v53, %v17171_v9  ;;  %v13961_v22 = vadd.f32 %v11737_v48, %v13670_v5  ;;  %v13965_v41 = vadd.f32 %v11737_v48, %v13642_v60 }
 0x3e4   : > { %v4485_v35 = vsel %vm4045_vm1, %v4484_v55, %v4480_v46  ;;  %v13970_v15 = vadd.f32 %v11737_v48, %v13710_v24  ;;  %v13974_v25 = vadd.f32 %v11737_v48, %v13712_v33  ;;  %v4451_v49 = vsel %vm4052_vm2, %v4450_v12, %v4446_v50 }
 0x3e5   : > { %v13757_v40 = vpop.xlane.xlu0 %3694  ;;  %17619 = vst [vmem:[#allocation127_spill] sm:$0xff] %v13961_v22  ;;  %v4494_v5 = vrot.slane %v13939_v29, %v17480_v38  ;;  %v13981_v7 = vadd.f32 %v11737_v48, %v13676_v43  ;;  %v4567_v24 = vrot.slane %v13909_v0, %v17171_v9  ;;  %v4562_v33 = vrot.slane %v13924_v57, %v17525_v14  ;;  %v17623_v57 = vld [vmem:[#allocation123_spill] sm:$0xff] }
 0x3e6   : > { %17620 = vst [vmem:[#allocation52_spill] sm:$0xff] %v13970_v15  ;;  %17621 = vst [vmem:[#allocation12_spill] sm:$0xff] %v13974_v25  ;;  %v13985_v60 = vadd.f32 %v11737_v48, %v13757_v40  ;;  %v4460_v55 = vrot.slane %v13948_v1, %v17433_v11  ;;  %v4456_v12 = vsel %vm4059_vm3, %v4455_v28, %v4451_v49 }
 0x3e7   : > { %v13996_v43 = vadd.f32 %v11737_v48, %v13658_v34  ;;  %v4465_v40 = vrot.slane %v13954_v20, %v17555_v54  ;;  %v4499_v0 = vrot.slane %v13961_v22, %v17433_v11  ;;  %v4490_v63 = vsel %vm4052_vm2, %v4489_v45, %v4485_v35 }
 0x3e8   : > { %17622 = vst [vmem:[#allocation55_spill] sm:$0xff] %v13985_v60  ;;  %v14005_v29 = vadd.f32 %v11737_v48, %v17623_v57  ;;  %v4596_v28 = vrot.slane %v13970_v15, %v17409_v52  ;;  %v4592_v49 = vrot.slane %v13974_v25, %v17464_v17  ;;  %v14013_v34 = vadd.f32 %v11737_v48, %v13755_v18 }
 0x3e9   : > { %v4495_v53 = vsel %vm4059_vm3, %v4494_v5, %v4490_v63  ;;  %v4504_v22 = vrot.slane %v13981_v7, %v17555_v54  ;;  %v4601_v45 = vrot.slane %v13985_v60, %v17525_v14  ;;  %v4558_v35 = vsel %vm4038_vm0, %v4557_v26, %v4553_v36 }
 0x3ea   : > { %v13809_v61 = vpop.xlane.xlu1 %3709  ;;  %v4461_v15 = vsel %vm4066_vm4, %v4460_v55, %v4456_v12  ;;  %v4563_v63 = vsel %vm4045_vm1, %v4562_v33, %v4558_v35  ;;  %v4470_v5 = vrot.slane %v13996_v43, %v17563_v4  ;;  %v4509_v26 = vrot.slane %v14005_v29, %v17563_v4 }
 0x3eb   : > { %v4466_v60 = vsel %vm4073_vm5, %v4465_v40, %v4461_v15  ;;  %v4500_v36 = vsel %vm4066_vm4, %v4499_v0, %v4495_v53  ;;  %v14049_v15 = vadd.f32 %v11737_v48, %v13809_v61  ;;  %v4572_v61 = vrot.slane %v13943_v2, %v17480_v38 }
 0x3ec   : > { %v4505_v12 = vsel %vm4073_vm5, %v4504_v22, %v4500_v36  ;;  %v4577_v36 = vrot.slane %v13928_v23, %v17433_v11 }
 0x3ee   : > { %v13811_v19 = vpop.xlane.xlu0 %3704 }
 0x3ef   : > { %v14022_v57 = vadd.f32 %v11737_v48, %v13811_v19 }
 0x3f4   : > { %v13860_v59 = vpop.xlane.xlu1 %3719 }
 0x3f8   : > { %v13862_v27 = vpop.xlane.xlu0 %3714 }
 0x3f9   : > { %v14055_v0 = vadd.f32 %v11737_v48, %v13862_v27 }
 0x3fd   : > { %v3730_v6 = vpop.xlane.xlu1 %3729 }
 0x3fe   : > { %v14027_v25 = vadd.f32 %v11737_v48, %v3730_v6  ;;  %v4597_v6 = vsel %vm4038_vm0, %v4596_v28, %v4592_v49  ;;  %v17625_v28 = vld [vmem:[#allocation94_spill] sm:$0xff] }
 0x3ff   : > { %v4602_v35 = vsel %vm4045_vm1, %v4601_v45, %v4597_v6  ;;  %v14068_v49 = vadd.f32 %v11737_v48, %v17625_v28  ;;  %v4568_v6 = vsel %vm4052_vm2, %v4567_v24, %v4563_v63  ;;  %v4616_v28 = vrot.slane %v14049_v15, %v17433_v11 }
 0x400   : > { %17624 = vst [vmem:[#allocation11_spill] sm:$0xff] %v14027_v25  ;;  %v4635_v53 = vrot.slane %v14027_v25, %v17409_v52  ;;  %v4510_v52 = vsel %vm4080_vm6, %v4509_v26, %v4505_v12  ;;  %v4573_v26 = vsel %vm4059_vm3, %v4572_v61, %v4568_v6  ;;  %v17626_v12 = vrot.slane %v13850_v58, %v17555_v54 }
 0x401   : > { %v3725_v44 = vpop.xlane.xlu0 %3724  ;;  %v4578_v6 = vsel %vm4066_vm4, %v4577_v36, %v4573_v26 }
 0x402   : > { %v14030_v18 = vadd.f32 %v11737_v48, %v3725_v44  ;;  %v4606_v44 = vrot.slane %v14013_v34, %v17171_v9 }
 0x404   : > { %v4631_v40 = vrot.slane %v14030_v18, %v17464_v17  ;;  %v4607_v17 = vsel %vm4052_vm2, %v4606_v44, %v4602_v35  ;;  %v4544_v35 = vsel %vm4073_vm5, %v17626_v12, %v13920_v30 }
 0x405   : > { %v3740_v50 = vpop.xlane.xlu1 %3739 }
 0x406   : > { %v14062_v22 = vadd.f32 %v11737_v48, %v3740_v50  ;;  %v4471_v50 = vsel %vm4080_vm6, %v4470_v5, %v4466_v60  ;;  %v4636_v24 = vsel %vm4038_vm0, %v4635_v53, %v4631_v40  ;;  %v4587_v53 = vrot.slane %v13965_v41, %v17563_v4 }
 0x408   : > { %v4645_v60 = vrot.slane %v14062_v22, %v17171_v9 }
 0x409   : > { %v3735_v46 = vpop.xlane.xlu0 %3734 }
 0x40a   : > { %v14037_v19 = vadd.f32 %v11737_v48, %v3735_v46  ;;  %v4611_v46 = vrot.slane %v14022_v57, %v17480_v38 }
 0x40c   : > { %v4640_v27 = vrot.slane %v14037_v19, %v17525_v14  ;;  %v4612_v25 = vsel %vm4059_vm3, %v4611_v46, %v4607_v17  ;;  %v4621_v14 = vrot.slane %v14055_v0, %v17555_v54  ;;  %v4582_v17 = vrot.slane %v14068_v49, %v17555_v54 }
 0x40d   : > { %v4617_v61 = vsel %vm4066_vm4, %v4616_v28, %v4612_v25 }
 0x40e   : > { %v3750_v55 = vpop.xlane.xlu1 %3749  ;;  %v4622_v30 = vsel %vm4073_vm5, %v4621_v14, %v4617_v61  ;;  %v17630_v61 = vld [vmem:[#allocation108_spill] sm:$0xff] }
 0x40f   : > { %v14094_v63 = vadd.f32 %v11737_v48, %v3750_v55  ;;  %v4682_v55 = vsel %vm4669_vm8, %v4471_v50, %v13865_v31 }
 0x411   : > { %v4655_v31 = vrot.slane %v14094_v63, %v17433_v11 }
 0x412   : > { %v3745_v33 = vpop.xlane.xlu0 %3744 }
 0x413   : > { %v14073_v45 = vadd.f32 %v11737_v48, %v3745_v33  ;;  %v14086_v33 = vadd.f32 %v11737_v48, %v13860_v59  ;;  %v4641_v59 = vsel %vm4045_vm1, %v4640_v27, %v4636_v24  ;;  %v4683_v27 = vsel %vm4671_vm9, %v4510_v52, %v4682_v55 }
 0x414   : > { %v4646_v50 = vsel %vm4052_vm2, %v4645_v60, %v4641_v59  ;;  %v17628_v60 = vld [vmem:[#allocation41_spill] sm:$0xff]  ;;  %v17629_v59 = vld [vmem:[#allocation43_spill] sm:$0xff] }
 0x415   : > { %v4650_v44 = vrot.slane %v14073_v45, %v17480_v38  ;;  %v4626_v40 = vrot.slane %v14086_v33, %v17563_v4  ;;  %v4583_v38 = vsel %vm4073_vm5, %v4582_v17, %v4578_v6  ;;  %v17631_v6 = vld [vmem:[#allocation69_spill] sm:$0xff] }
 0x417   : > { %v4651_v25 = vsel %vm4059_vm3, %v4650_v44, %v4646_v50  ;;  %v4588_v44 = vsel %vm4080_vm6, %v4587_v53, %v4583_v38 }
 0x418   : > { %v3760_v5 = vpop.xlane.xlu1 %3759  ;;  %v4656_v55 = vsel %vm4066_vm4, %v4655_v31, %v4651_v25  ;;  %v17633_v25 = vld [vmem:[#allocation112_spill] sm:$0xff] }
 0x419   : > { %v14110_v46 = vadd.f32 %v11737_v48, %v3760_v5  ;;  %v17627_v5 = vrot.slane %v13834_v3, %v17563_v4 }
 0x41b   : > { %v4549_v12 = vsel %vm4080_vm6, %v17627_v5, %v4544_v35  ;;  %v4665_v14 = vrot.slane %v14110_v46, %v17563_v4 }
 0x41c   : > { %v3755_v24 = vpop.xlane.xlu0 %3754  ;;  %v4684_v28 = vsel %vm4673_vm10, %v4549_v12, %v4683_v27  ;;  %v17632_v12 = vld [vmem:[#allocation73_spill] sm:$0xff] }
 0x41d   : > { %v14130_v52 = vadd.f32 %v11737_v48, %v3755_v24  ;;  %v14132_v36 = vpop.xlane.xlu1 %4692  ;;  %v4627_v48 = vsel %vm4080_vm6, %v4626_v40, %v4622_v30  ;;  %v4685_v5 = vsel %vm4675_vm11, %v4588_v44, %v4684_v28  ;;  %v17634_v28 = vld [vmem:[#allocation56_spill] sm:$0xff] }
 0x41e   : > { %v14139_v26 = vrot.slane %v14132_v36, %v17628_v60  ;;  %v14143_v35 = vrot.slane %v14132_v36, %v17629_v59  ;;  %v4686_v40 = vsel %vm4677_vm12, %v4627_v48, %v4685_v5 }
 0x41f   : > { %v4660_v17 = vrot.slane %v14130_v52, %v17555_v54 }
 0x420   : > { %v4785_v27 = vsub.f32 %v17630_v61, %v14139_v26  ;;  %v4787_v50 = vsub.f32 %v17631_v6, %v14143_v35  ;;  %v4779_v4 = vsub.f32 %v17632_v12, %v14139_v26  ;;  %v4789_v61 = vsub.f32 %v17633_v25, %v14143_v35  ;;  %v17641_v25 = vld [vmem:[#allocation81_spill] sm:$0xff] }
 0x421   : > { %v4661_v24 = vsel %vm4073_vm5, %v4660_v17, %v4656_v55  ;;  %v4780_v44 = vsub.f32 %v17634_v28, %v14139_v26 }
 0x422   : > { %v4666_v54 = vsel %vm4080_vm6, %v4665_v14, %v4661_v24  ;;  %v4919_v38 = vmul.f32 1.442695, %v4785_v27  ;;  %v4923_v31 = vmul.f32 1.442695, %v4787_v50  ;;  %v4907_v17 = vmul.f32 1.442695, %v4779_v4 }
 0x423   : > { %v4687_v53 = vsel %vm4679_vm13, %v4666_v54, %v4686_v40  ;;  %v4927_v55 = vmul.f32 1.442695, %v4789_v61  ;;  %v17635_v14 = vld [vmem:[#allocation129_spill] sm:$0xff]  ;;  %v4909_v27 = vmul.f32 1.442695, %v4780_v44  ;;  %v17636_v54 = vld [vmem:[#allocation76_spill] sm:$0xff] }
 0x424   : > { %v4694_v30 = vsel %vm4690_vm14, %v4687_v53, -inf  ;;  %9102 = vpow2.f32 %v4919_v38  ;;  %v4791_v48 = vsub.f32 %v17635_v14, %v14143_v35  ;;  %v4781_v6 = vsub.f32 %v17636_v54, %v14139_v26  ;;  %v17637_v24 = vld [vmem:[#allocation44_spill] sm:$0xff]  ;;  %v17638_v4 = vld [vmem:[#allocation77_spill] sm:$0xff] }
 0x425   : > { %4695 = vmax.xlane.f32.xlu1 %v4694_v30  ;;  %9104 = vpow2.f32 %v4923_v31  ;;  %v14172_v50 = vrot.slane %v14132_v36, %v17637_v24  ;;  %v4793_v12 = vsub.f32 %v17638_v4, %v14143_v35  ;;  %v17640_v53 = vld [vmem:[#allocation121_spill] sm:$0xff]  ;;  %v17647_v4 = vld [vmem:[#allocation102_spill] sm:$0xff] }
 0x426   : > { %9106 = vpow2.f32 %v4907_v17  ;;  %v4931_v5 = vmul.f32 1.442695, %v4791_v48  ;;  %v4911_v38 = vmul.f32 1.442695, %v4781_v6  ;;  %v4782_v30 = vsub.f32 %v17640_v53, %v14139_v26  ;;  %v17648_v53 = vld [vmem:[#allocation139_spill] sm:$0xff] }
 0x427   : > { %9108 = vpow2.f32 %v4927_v55  ;;  %v4935_v31 = vmul.f32 1.442695, %v4793_v12  ;;  %v4795_v61 = vsub.f32 %v17641_v25, %v14172_v50  ;;  %v17644_v55 = vld [vmem:[#allocation40_spill] sm:$0xff]  ;;  %v4784_v12 = vsub.f32 %v17647_v4, %v14139_v26 }
 0x428   : > { %9110 = vpow2.f32 %v4909_v27  ;;  %v4913_v44 = vmul.f32 1.442695, %v4782_v30  ;;  %v4783_v14 = vsub.f32 %v17644_v55, %v14139_v26  ;;  %v17645_v27 = vld [vmem:[#allocation82_spill] sm:$0xff]  ;;  %v4799_v30 = vsub.f32 %v17648_v53, %v14172_v50 }
 0x429   : > { %9112 = vpow2.f32 %v4931_v5  ;;  %v4939_v48 = vmul.f32 1.442695, %v4795_v61  ;;  %v4797_v54 = vsub.f32 %v17645_v27, %v14172_v50  ;;  %v4917_v61 = vmul.f32 1.442695, %v4784_v12 }
 0x42a   : > { %9114 = vpow2.f32 %v4911_v38  ;;  %v4915_v5 = vmul.f32 1.442695, %v4783_v14  ;;  %v17652_v14 = vld [vmem:[#allocation45_spill] sm:$0xff]  ;;  %v4947_v27 = vmul.f32 1.442695, %v4799_v30 }
 0x42b   : > { %9116 = vpow2.f32 %v4935_v31  ;;  %v4943_v38 = vmul.f32 1.442695, %v4797_v54  ;;  %v17653_v54 = vld [vmem:[#allocation135_spill] sm:$0xff] }
 0x42c   : > { %9118 = vpow2.f32 %v4913_v44  ;;  %v17651_v44 = vld [vmem:[#allocation128_spill] sm:$0xff]  ;;  %v4801_v4 = vsub.f32 %v17653_v54, %v14172_v50 }
 0x42d   : > { %9120 = vpow2.f32 %v4939_v48  ;;  %v4786_v55 = vsub.f32 %v17651_v44, %v14139_v26  ;;  %v14210_v48 = vrot.slane %v14132_v36, %v17652_v14  ;;  %v17656_v26 = vld [vmem:[#allocation113_spill] sm:$0xff] }
 0x42e   : > { %v14176_v40 = vpop.eup %9102  ;;  %9122 = vpow2.f32 %v4915_v5  ;;  %v4788_v12 = vsub.f32 %v17656_v26, %v14143_v35  ;;  %v4951_v44 = vmul.f32 1.442695, %v4801_v4 }
 0x42f   : > { %17639 = vst [vmem:[#allocation101_spill] sm:$0xff] %v14176_v40  ;;  %5310 = vperm.xlu0 %7932, %v14176_v40   ;;  %v14183_v17 = vpop.eup %9104  ;;  %9124 = vpow2.f32 %v4943_v38  ;;  %v4921_v5 = vmul.f32 1.442695, %v4786_v55  ;;  %v17657_v38 = vld [vmem:[#allocation110_spill] sm:$0xff]  ;;  %v17665_v40 = vld [vmem:[#allocation36_spill] sm:$0xff] }
 0x430   : > { %17642 = vst [vmem:[#allocation13_spill] sm:$0xff] %v14183_v17  ;;  %v14185_v28 = vpop.eup %9106  ;;  %9126 = vpow2.f32 %v4917_v61  ;;  %v4803_v30 = vsub.f32 %v17657_v38, %v14210_v48  ;;  %v17660_v61 = vld [vmem:[#allocation53_spill] sm:$0xff] }
 0x431   : > { %17643 = vst [vmem:[#allocation60_spill] sm:$0xff] %v14185_v28  ;;  %v14192_v6 = vpop.eup %9108  ;;  %9128 = vpow2.f32 %v4947_v27  ;;  %v4790_v55 = vsub.f32 %v17660_v61, %v14143_v35  ;;  %v17661_v27 = vld [vmem:[#allocation138_spill] sm:$0xff]  ;;  %v14243_v61 = vsub.s32 4, %v17665_v40 }
 0x432   : > { %17646 = vst [vmem:[#allocation6_spill] sm:$0xff] %v14192_v6  ;;  %v14200_v31 = vpop.eup %9110  ;;  %9130 = vpow2.f32 %v4921_v5  ;;  %v4955_v26 = vmul.f32 1.442695, %v4803_v30  ;;  %v4805_v4 = vsub.f32 %v17661_v27, %v14210_v48  ;;  %v17664_v5 = vld [vmem:[#allocation65_spill] sm:$0xff] }
 0x433   : > { %5316 = vperm.xlu0 %7932, %v14183_v17   ;;  %17649 = vst [vmem:[#allocation8_spill] sm:$0xff] %v14200_v31  ;;  %v14202_v25 = vpop.eup %9112  ;;  %9132 = vpow2.f32 %v4951_v44  ;;  %17666 = vst [vmem:[#allocation29_spill] sm:$0xff] %v14243_v61  ;;  %v17667_v30 = vld [vmem:[#allocation61_spill] sm:$0xff] }
 0x434   : > { %17650 = vst [vmem:[#allocation9_spill] sm:$0xff] %v14202_v25  ;;  %v14214_v53 = vpop.eup %9114  ;;  %v4959_v44 = vmul.f32 1.442695, %v4805_v4  ;;  %v4807_v27 = vsub.f32 %v17667_v30, %v14210_v48  ;;  %v17671_v30 = vld [vmem:[#allocation89_spill] sm:$0xff] }
 0x435   : > { %17654 = vst [vmem:[#allocation109_spill] sm:$0xff] %v14214_v53 }
 0x436   : > { %5292 = vperm.xlu1 %7933, %v14185_v28   ;;  %v4963_v4 = vmul.f32 1.442695, %v4807_v27 }
 0x437   : > { %5322 = vperm.xlu0 %7932, %v14192_v6   ;;  %v14216_v6 = vpop.eup %9116 }
 0x438   : > { %17655 = vst [vmem:[#allocation71_spill] sm:$0xff] %v14216_v6 }
 0x43a   : > { %5295 = vperm.xlu1 %7933, %v14200_v31  }
 0x43b   : > { %5328 = vperm.xlu0 %7932, %v14202_v25   ;;  %v14224_v25 = vpop.eup %9118 }
 0x43c   : > { %17658 = vst [vmem:[#allocation70_spill] sm:$0xff] %v14224_v25  ;;  %v14226_v54 = vpop.eup %9120 }
 0x43d   : > { %17659 = vst [vmem:[#allocation26_spill] sm:$0xff] %v14226_v54  ;;  %v14234_v17 = vpop.eup %9122 }
 0x43e   : > { %5298 = vperm.xlu1 %7933, %v14214_v53   ;;  %17662 = vst [vmem:[#allocation28_spill] sm:$0xff] %v14234_v17  ;;  %v14236_v38 = vpop.eup %9124 }
 0x43f   : > { %5334 = vperm.xlu0 %7932, %v14216_v6   ;;  %v4925_v6 = vmul.f32 1.442695, %v4788_v12  ;;  %17663 = vst [vmem:[#allocation27_spill] sm:$0xff] %v14236_v38  ;;  %v4792_v12 = vsub.f32 %v17664_v5, %v14143_v35  ;;  %v14247_v53 = vpop.eup %9126 }
 0x440   : > { %17668 = vst [vmem:[#allocation136_spill] sm:$0xff] %v14247_v53 }
 0x441   : > { %9134 = vpow2.f32 %v4925_v6  ;;  %v4933_v6 = vmul.f32 1.442695, %v4792_v12 }
 0x442   : > { %5301 = vperm.xlu1 %7933, %v14224_v25   ;;  %9136 = vpow2.f32 %v4955_v26  ;;  %v14249_v25 = vpop.eup %9128  ;;  %v14257_v26 = vrot.slane %v14132_v36, %v14243_v61 }
 0x443   : > { %5340 = vperm.xlu0 %7932, %v14226_v54   ;;  %v4929_v54 = vmul.f32 1.442695, %v4790_v55  ;;  %17669 = vst [vmem:[#allocation22_spill] sm:$0xff] %v14249_v25  ;;  %v17670_v55 = vld [vmem:[#allocation84_spill] sm:$0xff] }
 0x444   : > { %v4794_v5 = vsub.f32 %v17670_v55, %v14143_v35  ;;  %v17674_v35 = vld [vmem:[#allocation80_spill] sm:$0xff] }
 0x445   : > { %9138 = vpow2.f32 %v4929_v54  ;;  %v4796_v12 = vsub.f32 %v17674_v35, %v14172_v50 }
 0x446   : > { %5304 = vperm.xlu1 %7933, %v14234_v17   ;;  %9140 = vpow2.f32 %v4959_v44  ;;  %v14261_v17 = vpop.eup %9130  ;;  %v4937_v54 = vmul.f32 1.442695, %v4794_v5  ;;  %v17675_v44 = vld [vmem:[#allocation74_spill] sm:$0xff] }
 0x447   : > { %5346 = vperm.xlu0 %7932, %v14236_v38   ;;  %v4809_v38 = vsub.f32 %v17671_v30, %v14210_v48  ;;  %17672 = vst [vmem:[#allocation72_spill] sm:$0xff] %v14261_v17  ;;  %v14263_v28 = vpop.eup %9132  ;;  %9142 = vpow2.f32 %v4933_v6  ;;  %v4811_v27 = vsub.f32 %v17675_v44, %v14257_v26  ;;  %v17678_v6 = vld [vmem:[#allocation95_spill] sm:$0xff] }
 0x448   : > { %17673 = vst [vmem:[#allocation119_spill] sm:$0xff] %v14263_v28  ;;  %9144 = vpow2.f32 %v4963_v4  ;;  %v4798_v5 = vsub.f32 %v17678_v6, %v14172_v50  ;;  %v14290_v6 = vsub.s32 5, %v17665_v40 }
 0x449   : > { %v4967_v55 = vmul.f32 1.442695, %v4809_v38  ;;  %9146 = vpow2.f32 %v4937_v54  ;;  %v4971_v35 = vmul.f32 1.442695, %v4811_v27  ;;  %v17679_v38 = vld [vmem:[#allocation63_spill] sm:$0xff]  ;;  %v17684_v27 = vld [vmem:[#allocation64_spill] sm:$0xff] }
 0x44a   : > { %5307 = vperm.xlu1 %7933, %v14247_v53   ;;  %v4813_v4 = vsub.f32 %v17679_v38, %v14257_v26  ;;  %v17682_v54 = vld [vmem:[#allocation51_spill] sm:$0xff]  ;;  %17683 = vst [vmem:[#allocation85_spill] sm:$0xff] %v14290_v6  ;;  %v4815_v38 = vsub.f32 %v17684_v27, %v14257_v26  ;;  %v17688_v27 = vld [vmem:[#allocation122_spill] sm:$0xff] }
 0x44b   : > { %5352 = vperm.xlu0 %7932, %v14249_v25   ;;  %v14271_v25 = vpop.eup %9134  ;;  %9148 = vpow2.f32 %v4967_v55 }
 0x44c   : > { %17676 = vst [vmem:[#allocation120_spill] sm:$0xff] %v14271_v25  ;;  %v14273_v30 = vpop.eup %9136  ;;  %v4975_v55 = vmul.f32 1.442695, %v4813_v4  ;;  %v4979_v4 = vmul.f32 1.442695, %v4815_v38 }
 0x44d   : > { %17677 = vst [vmem:[#allocation125_spill] sm:$0xff] %v14273_v30 }
 0x44e   : > { %5313 = vperm.xlu1 %7933, %v14261_v17  }
 0x44f   : > { %5358 = vperm.xlu0 %7932, %v14263_v28   ;;  %v4941_v28 = vmul.f32 1.442695, %v4796_v12  ;;  %v14281_v17 = vpop.eup %9138  ;;  %v4800_v12 = vsub.f32 %v17682_v54, %v14172_v50 }
 0x450   : > { %17680 = vst [vmem:[#allocation83_spill] sm:$0xff] %v14281_v17  ;;  %v14283_v44 = vpop.eup %9140 }
 0x451   : > { %17681 = vst [vmem:[#allocation111_spill] sm:$0xff] %v14283_v44  ;;  %9150 = vpow2.f32 %v4941_v28  ;;  %v4949_v28 = vmul.f32 1.442695, %v4800_v12 }
 0x452   : > { %5319 = vperm.xlu1 %7933, %v14271_v25   ;;  %9152 = vpow2.f32 %v4971_v35  ;;  %v14294_v25 = vpop.eup %9142  ;;  %v14304_v35 = vrot.slane %v14132_v36, %v14290_v6 }
 0x453   : > { %5364 = vperm.xlu0 %7932, %v14273_v30   ;;  %v4945_v30 = vmul.f32 1.442695, %v4798_v5  ;;  %17685 = vst [vmem:[#allocation137_spill] sm:$0xff] %v14294_v25  ;;  %v14296_v53 = vpop.eup %9144  ;;  %v17687_v5 = vld [vmem:[#allocation134_spill] sm:$0xff] }
 0x454   : > { %17686 = vst [vmem:[#allocation88_spill] sm:$0xff] %v14296_v53  ;;  %v4802_v54 = vsub.f32 %v17687_v5, %v14172_v50  ;;  %v17691_v50 = vld [vmem:[#allocation54_spill] sm:$0xff] }
 0x455   : > { %9154 = vpow2.f32 %v4945_v30  ;;  %v4804_v12 = vsub.f32 %v17691_v50, %v14210_v48 }
 0x456   : > { %5325 = vperm.xlu1 %7933, %v14281_v17   ;;  %9156 = vpow2.f32 %v4975_v55  ;;  %v14308_v17 = vpop.eup %9146  ;;  %v4953_v30 = vmul.f32 1.442695, %v4802_v54  ;;  %v17692_v55 = vld [vmem:[#allocation103_spill] sm:$0xff] }
 0x457   : > { %5370 = vperm.xlu0 %7932, %v14283_v44   ;;  %v4817_v44 = vsub.f32 %v17688_v27, %v14257_v26  ;;  %17689 = vst [vmem:[#allocation79_spill] sm:$0xff] %v14308_v17  ;;  %v14310_v31 = vpop.eup %9148  ;;  %9158 = vpow2.f32 %v4949_v28  ;;  %v4819_v38 = vsub.f32 %v17692_v55, %v14304_v35  ;;  %v17695_v28 = vld [vmem:[#allocation124_spill] sm:$0xff] }
 0x458   : > { %17690 = vst [vmem:[#allocation67_spill] sm:$0xff] %v14310_v31  ;;  %9160 = vpow2.f32 %v4979_v4  ;;  %v4806_v54 = vsub.f32 %v17695_v28, %v14210_v48  ;;  %v14337_v28 = vsub.s32 6, %v17665_v40 }
 0x459   : > { %v4983_v5 = vmul.f32 1.442695, %v4817_v44  ;;  %9162 = vpow2.f32 %v4953_v30  ;;  %v4987_v50 = vmul.f32 1.442695, %v4819_v38  ;;  %v17696_v44 = vld [vmem:[#allocation104_spill] sm:$0xff]  ;;  %v17699_v30 = vld [vmem:[#allocation130_spill] sm:$0xff] }
 0x45a   : > { %5331 = vperm.xlu1 %7933, %v14294_v25   ;;  %v4821_v4 = vsub.f32 %v17696_v44, %v14304_v35  ;;  %17700 = vst [vmem:[#allocation108_spill] sm:$0xff] %v14337_v28  ;;  %v17701_v38 = vld [vmem:[#allocation49_spill] sm:$0xff] }
 0x45b   : > { %5376 = vperm.xlu0 %7932, %v14296_v53   ;;  %v14318_v53 = vpop.eup %9150  ;;  %9164 = vpow2.f32 %v4983_v5  ;;  %v4823_v44 = vsub.f32 %v17701_v38, %v14304_v35  ;;  %v17705_v38 = vld [vmem:[#allocation107_spill] sm:$0xff] }
 0x45c   : > { %17693 = vst [vmem:[#allocation118_spill] sm:$0xff] %v14318_v53  ;;  %v14320_v27 = vpop.eup %9152  ;;  %v4991_v5 = vmul.f32 1.442695, %v4821_v4 }
 0x45d   : > { %17694 = vst [vmem:[#allocation105_spill] sm:$0xff] %v14320_v27  ;;  %v4995_v4 = vmul.f32 1.442695, %v4823_v44 }
 0x45e   : > { %5337 = vperm.xlu1 %7933, %v14308_v17  }
 0x45f   : > { %5382 = vperm.xlu0 %7932, %v14310_v31   ;;  %v4957_v31 = vmul.f32 1.442695, %v4804_v12  ;;  %v14328_v17 = vpop.eup %9154  ;;  %v4808_v12 = vsub.f32 %v17699_v30, %v14210_v48 }
 0x460   : > { %17697 = vst [vmem:[#allocation123_spill] sm:$0xff] %v14328_v17  ;;  %v14330_v55 = vpop.eup %9156 }
 0x461   : > { %17698 = vst [vmem:[#allocation94_spill] sm:$0xff] %v14330_v55  ;;  %9166 = vpow2.f32 %v4957_v31  ;;  %v4965_v31 = vmul.f32 1.442695, %v4808_v12 }
 0x462   : > { %5343 = vperm.xlu1 %7933, %v14318_v53   ;;  %9168 = vpow2.f32 %v4987_v50  ;;  %v14341_v53 = vpop.eup %9158  ;;  %v14351_v50 = vrot.slane %v14132_v36, %v14337_v28 }
 0x463   : > { %5388 = vperm.xlu0 %7932, %v14320_v27   ;;  %v4961_v27 = vmul.f32 1.442695, %v4806_v54  ;;  %17702 = vst [vmem:[#allocation69_spill] sm:$0xff] %v14341_v53  ;;  %v14343_v25 = vpop.eup %9160  ;;  %v17704_v54 = vld [vmem:[#allocation87_spill] sm:$0xff] }
 0x464   : > { %17703 = vst [vmem:[#allocation73_spill] sm:$0xff] %v14343_v25  ;;  %v4810_v30 = vsub.f32 %v17704_v54, %v14210_v48  ;;  %v17708_v48 = vld [vmem:[#allocation78_spill] sm:$0xff] }
 0x465   : > { %9170 = vpow2.f32 %v4961_v27  ;;  %v4812_v12 = vsub.f32 %v17708_v48, %v14257_v26 }
 0x466   : > { %5349 = vperm.xlu1 %7933, %v14328_v17   ;;  %9172 = vpow2.f32 %v4991_v5  ;;  %v14355_v17 = vpop.eup %9162  ;;  %v4969_v27 = vmul.f32 1.442695, %v4810_v30  ;;  %v17709_v5 = vld [vmem:[#allocation68_spill] sm:$0xff] }
 0x467   : > { %5394 = vperm.xlu0 %7932, %v14330_v55   ;;  %v4825_v55 = vsub.f32 %v17705_v38, %v14304_v35  ;;  %17706 = vst [vmem:[#allocation112_spill] sm:$0xff] %v14355_v17  ;;  %v14357_v11 = vpop.eup %9164  ;;  %9174 = vpow2.f32 %v4965_v31  ;;  %v4827_v44 = vsub.f32 %v17709_v5, %v14351_v50  ;;  %v17712_v31 = vld [vmem:[#allocation58_spill] sm:$0xff] }
 0x468   : > { %17707 = vst [vmem:[#allocation56_spill] sm:$0xff] %v14357_v11  ;;  %9176 = vpow2.f32 %v4995_v4  ;;  %v4814_v30 = vsub.f32 %v17712_v31, %v14257_v26  ;;  %v14384_v31 = vsub.s32 7, %v17665_v40 }
 0x469   : > { %v4999_v54 = vmul.f32 1.442695, %v4825_v55  ;;  %9178 = vpow2.f32 %v4969_v27  ;;  %v5003_v48 = vmul.f32 1.442695, %v4827_v44  ;;  %v17713_v55 = vld [vmem:[#allocation90_spill] sm:$0xff]  ;;  %v17718_v44 = vld [vmem:[#allocation59_spill] sm:$0xff] }
 0x46a   : > { %5355 = vperm.xlu1 %7933, %v14341_v53   ;;  %v4829_v4 = vsub.f32 %v17713_v55, %v14351_v50  ;;  %v17716_v27 = vld [vmem:[#allocation66_spill] sm:$0xff]  ;;  %17717 = vst [vmem:[#allocation81_spill] sm:$0xff] %v14384_v31  ;;  %v4831_v55 = vsub.f32 %v17718_v44, %v14351_v50  ;;  %v14398_v40 = vrot.slane %v14132_v36, %v14384_v31 }
 0x46b   : > { %5400 = vperm.xlu0 %7932, %v14343_v25   ;;  %v14365_v25 = vpop.eup %9166  ;;  %9180 = vpow2.f32 %v4999_v54 }
 0x46c   : > { %17710 = vst [vmem:[#allocation129_spill] sm:$0xff] %v14365_v25  ;;  %v14367_v38 = vpop.eup %9168  ;;  %v5007_v54 = vmul.f32 1.442695, %v4829_v4  ;;  %v17722_v4 = vld [vmem:[#allocation99_spill] sm:$0xff] }
 0x46d   : > { %17711 = vst [vmem:[#allocation76_spill] sm:$0xff] %v14367_v38  ;;  %v4833_v44 = vsub.f32 %v17722_v4, %v14351_v50 }
 0x46e   : > { %5361 = vperm.xlu1 %7933, %v14355_v17  }
 0x46f   : > { %5406 = vperm.xlu0 %7932, %v14357_v11   ;;  %v4973_v11 = vmul.f32 1.442695, %v4812_v12  ;;  %v14375_v17 = vpop.eup %9170  ;;  %v4816_v12 = vsub.f32 %v17716_v27, %v14257_v26  ;;  %v5015_v36 = vmul.f32 1.442695, %v4833_v44 }
 0x470   : > { %17714 = vst [vmem:[#allocation77_spill] sm:$0xff] %v14375_v17  ;;  %v14377_v5 = vpop.eup %9172 }
 0x471   : > { %17715 = vst [vmem:[#allocation121_spill] sm:$0xff] %v14377_v5  ;;  %9182 = vpow2.f32 %v4973_v11  ;;  %v4981_v11 = vmul.f32 1.442695, %v4816_v12 }
 0x472   : > { %5367 = vperm.xlu1 %7933, %v14365_v25   ;;  %9184 = vpow2.f32 %v5003_v48  ;;  %v14388_v25 = vpop.eup %9174  ;;  %v5011_v48 = vmul.f32 1.442695, %v4831_v55 }
 0x473   : > { %5412 = vperm.xlu0 %7932, %v14367_v38   ;;  %v4977_v38 = vmul.f32 1.442695, %v4814_v30  ;;  %17719 = vst [vmem:[#allocation40_spill] sm:$0xff] %v14388_v25  ;;  %v14390_v53 = vpop.eup %9176  ;;  %v17721_v30 = vld [vmem:[#allocation100_spill] sm:$0xff] }
 0x474   : > { %17720 = vst [vmem:[#allocation82_spill] sm:$0xff] %v14390_v53  ;;  %v4818_v27 = vsub.f32 %v17721_v30, %v14257_v26  ;;  %v17725_v26 = vld [vmem:[#allocation126_spill] sm:$0xff] }
 0x475   : > { %9186 = vpow2.f32 %v4977_v38  ;;  %v4820_v12 = vsub.f32 %v17725_v26, %v14304_v35 }
 0x476   : > { %5373 = vperm.xlu1 %7933, %v14375_v17   ;;  %9188 = vpow2.f32 %v5007_v54  ;;  %v4985_v38 = vmul.f32 1.442695, %v4818_v27  ;;  %v17726_v54 = vld [vmem:[#allocation75_spill] sm:$0xff] }
 0x477   : > { %5418 = vperm.xlu0 %7932, %v14377_v5   ;;  %v14402_v5 = vpop.eup %9178  ;;  %9190 = vpow2.f32 %v4981_v11  ;;  %v4835_v55 = vsub.f32 %v17726_v54, %v14398_v40  ;;  %v17729_v11 = vld [vmem:[#allocation133_spill] sm:$0xff] }
 0x478   : > { %17723 = vst [vmem:[#allocation102_spill] sm:$0xff] %v14402_v5  ;;  %v14404_v17 = vpop.eup %9180  ;;  %9192 = vpow2.f32 %v5011_v48  ;;  %v4822_v27 = vsub.f32 %v17729_v11, %v14304_v35  ;;  %v17730_v48 = vld [vmem:[#allocation57_spill] sm:$0xff] }
 0x479   : > { %17724 = vst [vmem:[#allocation139_spill] sm:$0xff] %v14404_v17  ;;  %9194 = vpow2.f32 %v4985_v38  ;;  %v5019_v26 = vmul.f32 1.442695, %v4835_v55  ;;  %v4837_v44 = vsub.f32 %v17730_v48, %v14398_v40  ;;  %v17733_v38 = vld [vmem:[#allocation106_spill] sm:$0xff] }
 0x47a   : > { %5379 = vperm.xlu1 %7933, %v14388_v25   ;;  %9196 = vpow2.f32 %v5015_v36  ;;  %v17734_v36 = vld [vmem:[#allocation91_spill] sm:$0xff] }
 0x47b   : > { %5424 = vperm.xlu0 %7932, %v14390_v53   ;;  %v14412_v30 = vpop.eup %9182  ;;  %v5023_v11 = vmul.f32 1.442695, %v4837_v44  ;;  %v4839_v55 = vsub.f32 %v17734_v36, %v14398_v40 }
 0x47c   : > { %17727 = vst [vmem:[#allocation128_spill] sm:$0xff] %v14412_v30  ;;  %v14414_v4 = vpop.eup %9184 }
 0x47d   : > { %17728 = vst [vmem:[#allocation135_spill] sm:$0xff] %v14414_v4 }
 0x47e   : > { %5385 = vperm.xlu1 %7933, %v14402_v5  }
 0x47f   : > { %5430 = vperm.xlu0 %7932, %v14404_v17   ;;  %v4989_v17 = vmul.f32 1.442695, %v4820_v12  ;;  %v14422_v53 = vpop.eup %9186  ;;  %v4824_v12 = vsub.f32 %v17733_v38, %v14304_v35  ;;  %v5027_v38 = vmul.f32 1.442695, %v4839_v55 }
 0x480   : > { %17731 = vst [vmem:[#allocation113_spill] sm:$0xff] %v14422_v53  ;;  %v14424_v54 = vpop.eup %9188 }
 0x481   : > { %17732 = vst [vmem:[#allocation110_spill] sm:$0xff] %v14424_v54  ;;  %9198 = vpow2.f32 %v4989_v17  ;;  %v17737_v17 = vld [vmem:[#allocation117_spill] sm:$0xff] }
 0x482   : > { %5391 = vperm.xlu1 %7933, %v14412_v30   ;;  %9200 = vpow2.f32 %v5019_v26  ;;  %v14432_v30 = vpop.eup %9190  ;;  %v17738_v26 = vld [vmem:[#allocation86_spill] sm:$0xff] }
 0x483   : > { %5436 = vperm.xlu0 %7932, %v14414_v4   ;;  %v4993_v4 = vmul.f32 1.442695, %v4822_v27  ;;  %17735 = vst [vmem:[#allocation53_spill] sm:$0xff] %v14432_v30  ;;  %v14434_v48 = vpop.eup %9192  ;;  %v4826_v27 = vsub.f32 %v17737_v17, %v14304_v35  ;;  %v4841_v44 = vsub.f32 %v17738_v26, %v14398_v40  ;;  %v17744_v26 = vld [vmem:[#allocation97_spill] sm:$0xff] }
 0x484   : > { %17736 = vst [vmem:[#allocation138_spill] sm:$0xff] %v14434_v48 }
 0x485   : > { %9202 = vpow2.f32 %v4993_v4  ;;  %v17741_v4 = vld [vmem:[#allocation114_spill] sm:$0xff]  ;;  %v5031_v35 = vmul.f32 1.442695, %v4841_v44  ;;  %v17747_v44 = vld [vmem:[#allocation132_spill] sm:$0xff] }
 0x486   : > { %5397 = vperm.xlu1 %7933, %v14422_v53   ;;  %9204 = vpow2.f32 %v5023_v11  ;;  %v14442_v53 = vpop.eup %9194 }
 0x487   : > { %5442 = vperm.xlu0 %7932, %v14424_v54   ;;  %v4997_v54 = vmul.f32 1.442695, %v4824_v12  ;;  %17739 = vst [vmem:[#allocation65_spill] sm:$0xff] %v14442_v53  ;;  %v14444_v36 = vpop.eup %9196  ;;  %v4828_v12 = vsub.f32 %v17741_v4, %v14351_v50  ;;  %v4832_v4 = vsub.f32 %v17747_v44, %v14351_v50  ;;  %v17753_v44 = vld [vmem:[#allocation62_spill] sm:$0xff] }
 0x488   : > { %17740 = vst [vmem:[#allocation36_spill] sm:$0xff] %v14444_v36 }
 0x489   : > { %9206 = vpow2.f32 %v4997_v54  ;;  %v5005_v17 = vmul.f32 1.442695, %v4828_v12  ;;  %v5013_v12 = vmul.f32 1.442695, %v4832_v4 }
 0x48a   : > { %5403 = vperm.xlu1 %7933, %v14432_v30   ;;  %9208 = vpow2.f32 %v5027_v38 }
 0x48b   : > { %5448 = vperm.xlu0 %7932, %v14434_v48   ;;  %v5001_v48 = vmul.f32 1.442695, %v4826_v27  ;;  %v14450_v11 = vpop.eup %9198 }
 0x48c   : > { %17742 = vst [vmem:[#allocation61_spill] sm:$0xff] %v14450_v11  ;;  %v14452_v55 = vpop.eup %9200 }
 0x48d   : > { %17743 = vst [vmem:[#allocation84_spill] sm:$0xff] %v14452_v55  ;;  %9210 = vpow2.f32 %v5001_v48 }
 0x48e   : > { %5409 = vperm.xlu1 %7933, %v14442_v53   ;;  %9212 = vpow2.f32 %v5031_v35  ;;  %v17750_v35 = vld [vmem:[#allocation92_spill] sm:$0xff] }
 0x48f   : > { %5454 = vperm.xlu0 %7932, %v14444_v36   ;;  %v4830_v36 = vsub.f32 %v17744_v26, %v14351_v50  ;;  %v14458_v54 = vpop.eup %9202  ;;  %9214 = vpow2.f32 %v5005_v17  ;;  %v4834_v26 = vsub.f32 %v17750_v35, %v14351_v50  ;;  %v17755_v50 = vld [vmem:[#allocation98_spill] sm:$0xff] }
 0x490   : > { %17745 = vst [vmem:[#allocation89_spill] sm:$0xff] %v14458_v54  ;;  %v14460_v27 = vpop.eup %9204  ;;  %v4838_v4 = vsub.f32 %v17755_v50, %v14398_v40 }
 0x491   : > { %17746 = vst [vmem:[#allocation80_spill] sm:$0xff] %v14460_v27  ;;  %v5009_v38 = vmul.f32 1.442695, %v4830_v36  ;;  %v5017_v36 = vmul.f32 1.442695, %v4834_v26 }
 0x492   : > { %5415 = vperm.xlu1 %7933, %v14450_v11  }
 0x493   : > { %5460 = vperm.xlu0 %7932, %v14452_v55   ;;  %v14466_v55 = vpop.eup %9206  ;;  %9216 = vpow2.f32 %v5009_v38 }
 0x494   : > { %17748 = vst [vmem:[#allocation74_spill] sm:$0xff] %v14466_v55  ;;  %v14468_v48 = vpop.eup %9208  ;;  %9218 = vpow2.f32 %v5013_v12  ;;  %v17757_v12 = vld [vmem:[#allocation34_spill] sm:$0xff] }
 0x495   : > { %17749 = vst [vmem:[#allocation95_spill] sm:$0xff] %v14468_v48  ;;  %9220 = vpow2.f32 %v5017_v36  ;;  %v4840_v26 = vsub.f32 %v17757_v12, %v14398_v40 }
 0x496   : > { %5421 = vperm.xlu1 %7933, %v14458_v54  }
 0x497   : > { %5466 = vperm.xlu0 %7932, %v14460_v27   ;;  %v14474_v54 = vpop.eup %9210  ;;  %v4836_v27 = vsub.f32 %v17753_v44, %v14398_v40  ;;  %v5029_v44 = vmul.f32 1.442695, %v4840_v26  ;;  %v17764_v26 = vld [vmem:[#allocation30_spill] sm:$0xff] }
 0x498   : > { %17751 = vst [vmem:[#allocation63_spill] sm:$0xff] %v14474_v54  ;;  %v14476_v17 = vpop.eup %9212 }
 0x499   : > { %17752 = vst [vmem:[#allocation51_spill] sm:$0xff] %v14476_v17  ;;  %v5021_v38 = vmul.f32 1.442695, %v4836_v27  ;;  %v17759_v27 = vld [vmem:[#allocation93_spill] sm:$0xff] }
 0x49a   : > { %5427 = vperm.xlu1 %7933, %v14466_v55   ;;  %v14482_v55 = vpop.eup %9214  ;;  %v4842_v36 = vsub.f32 %v17759_v27, %v14398_v40 }
 0x49b   : > { %5472 = vperm.xlu0 %7932, %v14468_v48   ;;  %17754 = vst [vmem:[#allocation64_spill] sm:$0xff] %v14482_v55  ;;  %9222 = vpow2.f32 %v5021_v38 }
 0x49c   : > { %v5033_v38 = vmul.f32 1.442695, %v4842_v36 }
 0x49d   : > { %v14487_v35 = vpop.eup %9216 }
 0x49e   : > { %5433 = vperm.xlu1 %7933, %v14474_v54   ;;  %17756 = vst [vmem:[#allocation134_spill] sm:$0xff] %v14487_v35  ;;  %v14492_v48 = vpop.eup %9218  ;;  %v17766_v54 = vld [vmem:[#allocation35_spill] sm:$0xff] }
 0x49f   : > { %5478 = vperm.xlu0 %7932, %v14476_v17   ;;  %v5025_v17 = vmul.f32 1.442695, %v4838_v4  ;;  %17758 = vst [vmem:[#allocation122_spill] sm:$0xff] %v14492_v48 }
 0x4a1   : > { %9224 = vpow2.f32 %v5025_v17 }
 0x4a2   : > { %5439 = vperm.xlu1 %7933, %v14482_v55   ;;  %v14497_v55 = vpop.eup %9220  ;;  %9226 = vpow2.f32 %v5029_v44 }
 0x4a3   : > { %17760 = vst [vmem:[#allocation54_spill] sm:$0xff] %v14497_v55  ;;  %9228 = vpow2.f32 %v5033_v38 }
 0x4a5   : > { %v14502_v4 = vpop.eup %9222 }
 0x4a6   : > { %5445 = vperm.xlu1 %7933, %v14487_v35   ;;  %17762 = vst [vmem:[#allocation124_spill] sm:$0xff] %v14502_v4 }
 0x4aa   : > { %5451 = vperm.xlu1 %7933, %v14492_v48  }
 0x4ab   : > { %v14511_v40 = vpop.eup %9224 }
 0x4ac   : > { %17763 = vst [vmem:[#allocation104_spill] sm:$0xff] %v14511_v40  ;;  %v14522_v5 = vpop.eup %9226 }
 0x4ad   : > { %17767 = vst [vmem:[#allocation130_spill] sm:$0xff] %v14522_v5 }
 0x4ae   : > { %5457 = vperm.xlu1 %7933, %v14497_v55   ;;  %v14500_v50 = vpop.permute.xlu0 %5310  ;;  %v17765_v55 = vld [vmem:[#allocation32_spill] sm:$0xff] }
 0x4af   : > { %17761 = vst [vmem:[#allocation103_spill] sm:$0xff] %v14500_v50 }
 0x4b2   : > { %v14504_v12 = vpop.xlane.xlu1 %4695  ;;  %5463 = vperm.xlu1 %7933, %v14502_v4   ;;  %v14507_v48 = vpop.permute.xlu0 %5316 }
 0x4b3   : > { %v4734_v17 = vrot.slane %v14504_v12, %v17628_v60 }
 0x4b5   : > { %v4843_v27 = vsub.f32 %v17764_v26, %v4734_v17  ;;  %v4845_v35 = vsub.f32 %v17765_v55, %v4734_v17  ;;  %v4844_v4 = vsub.f32 %v17766_v54, %v4734_v17  ;;  %v4846_v30 = vsub.f32 %v13726_v21, %v4734_v17 }
 0x4b6   : > { %v14515_v44 = vpop.permute.xlu1 %5292  ;;  %5469 = vperm.xlu1 %7933, %v14511_v40   ;;  %v14518_v36 = vpop.permute.xlu0 %5322  ;;  %v4847_v26 = vsub.f32 %v13732_v51, %v4734_v17  ;;  %v4848_v54 = vsub.f32 %v13753_v42, %v4734_v17  ;;  %v14535_v21 = vrot.slane %v14504_v12, %v17629_v59  ;;  %v4849_v51 = vsub.f32 %v13764_v37, %v4734_v17 }
 0x4b7   : > { %v5035_v11 = vmul.f32 1.442695, %v4843_v27  ;;  %v5037_v53 = vmul.f32 1.442695, %v4844_v4  ;;  %v5039_v38 = vmul.f32 1.442695, %v4845_v35  ;;  %v14531_v27 = vpop.eup %9228  ;;  %v4850_v42 = vsub.f32 %v13793_v56, %v4734_v17 }
 0x4b8   : > { %v5041_v40 = vmul.f32 1.442695, %v4846_v30  ;;  %17769 = vst [vmem:[#allocation87_spill] sm:$0xff] %v14531_v27  ;;  %v5047_v30 = vmul.f32 1.442695, %v4849_v51  ;;  %v17774_v17 = vld [vmem:[#allocation23_spill] sm:$0xff] }
 0x4b9   : > { %9230 = vpow2.f32 %v5035_v11  ;;  %v5043_v11 = vmul.f32 1.442695, %v4847_v26  ;;  %v5049_v26 = vmul.f32 1.442695, %v4850_v42  ;;  %v17778_v42 = vld [vmem:[#allocation31_spill] sm:$0xff] }
 0x4ba   : > { %v14525_v25 = vpop.permute.xlu1 %5295  ;;  %5475 = vperm.xlu1 %7933, %v14522_v5   ;;  %v14528_v55 = vpop.permute.xlu0 %5328  ;;  %9232 = vpow2.f32 %v5037_v53  ;;  %v5045_v53 = vmul.f32 1.442695, %v4848_v54  ;;  %v17771_v5 = vld [vmem:[#allocation15_spill] sm:$0xff] }
 0x4bb   : > { %17768 = vst [vmem:[#allocation49_spill] sm:$0xff] %v14528_v55  ;;  %9234 = vpow2.f32 %v5039_v38  ;;  %v4851_v59 = vsub.f32 %v17771_v5, %v14535_v21 }
 0x4bc   : > { %9236 = vpow2.f32 %v5041_v40  ;;  %v17773_v40 = vld [vmem:[#allocation16_spill] sm:$0xff] }
 0x4bd   : > { %9238 = vpow2.f32 %v5043_v11  ;;  %v4852_v54 = vsub.f32 %v17773_v40, %v14535_v21  ;;  %v5051_v56 = vmul.f32 1.442695, %v4851_v59  ;;  %v4853_v11 = vsub.f32 %v17774_v17, %v14535_v21  ;;  %v17779_v40 = vld [vmem:[#allocation33_spill] sm:$0xff] }
 0x4be   : > { %v14538_v35 = vpop.permute.xlu1 %5298  ;;  %5481 = vperm.xlu1 %7933, %v14531_v27   ;;  %v14541_v4 = vpop.permute.xlu0 %5334  ;;  %9240 = vpow2.f32 %v5045_v53  ;;  %v4854_v59 = vsub.f32 %v17778_v42, %v14535_v21  ;;  %v4855_v17 = vsub.f32 %v17779_v40, %v14535_v21  ;;  %v17784_v40 = vld [vmem:[#allocation131_spill] sm:$0xff] }
 0x4bf   : > { %17770 = vst [vmem:[#allocation107_spill] sm:$0xff] %v14541_v4  ;;  %9242 = vpow2.f32 %v5047_v30  ;;  %v5053_v53 = vmul.f32 1.442695, %v4852_v54  ;;  %v5055_v30 = vmul.f32 1.442695, %v4853_v11  ;;  %v17783_v54 = vld [vmem:[#allocation10_spill] sm:$0xff]  ;;  %v14585_v11 = vrot.slane %v14504_v12, %v17637_v24 }
 0x4c0   : > { %9244 = vpow2.f32 %v5049_v26  ;;  %v5057_v26 = vmul.f32 1.442695, %v4854_v59  ;;  %v5059_v42 = vmul.f32 1.442695, %v4855_v17 }
 0x4c1   : > { %9246 = vpow2.f32 %v5051_v56  ;;  %v4856_v56 = vsub.f32 %v17783_v54, %v14535_v21 }
 0x4c2   : > { %v14546_v60 = vpop.permute.xlu1 %5301  ;;  %v14548_v38 = vpop.permute.xlu0 %5340  ;;  %9248 = vpow2.f32 %v5053_v53 }
 0x4c3   : > { %v14550_v37 = vpop.eup %9230  ;;  %9250 = vpow2.f32 %v5055_v30  ;;  %v5061_v59 = vmul.f32 1.442695, %v4856_v56  ;;  %v17789_v30 = vld [vmem:[#allocation96_spill] sm:$0xff] }
 0x4c4   : > { %17772 = vst [vmem:[#allocation78_spill] sm:$0xff] %v14550_v37  ;;  %5484 = vperm.xlu0 %7932, %v14550_v37   ;;  %v14557_v51 = vpop.eup %9232  ;;  %9252 = vpow2.f32 %v5057_v26  ;;  %v4858_v17 = vsub.f32 %v17789_v30, %v14535_v21 }
 0x4c5   : > { %17775 = vst [vmem:[#allocation68_spill] sm:$0xff] %v14557_v51  ;;  %v14563_v4 = vpop.eup %9234  ;;  %5487 = vperm.xlu1 %7933, %v14557_v51   ;;  %9254 = vpow2.f32 %v5059_v42 }
 0x4c6   : > { %v14559_v5 = vpop.permute.xlu1 %5304  ;;  %v14561_v27 = vpop.permute.xlu0 %5346  ;;  %17777 = vst [vmem:[#allocation90_spill] sm:$0xff] %v14563_v4  ;;  %9256 = vpow2.f32 %v5061_v59  ;;  %v5065_v26 = vmul.f32 1.442695, %v4858_v17 }
 0x4c7   : > { %17776 = vst [vmem:[#allocation58_spill] sm:$0xff] %v14561_v27  ;;  %v14571_v37 = vpop.eup %9236 }
 0x4c8   : > { %5490 = vperm.xlu0 %7932, %v14563_v4   ;;  %17780 = vst [vmem:[#allocation66_spill] sm:$0xff] %v14571_v37  ;;  %v14577_v27 = vpop.eup %9238  ;;  %v4857_v4 = vsub.f32 %v17784_v40, %v14535_v21  ;;  %v4859_v40 = vsub.f32 %v13845_v39, %v14585_v11  ;;  %v4860_v21 = vsub.f32 %v13841_v13, %v14585_v11 }
 0x4c9   : > { %17782 = vst [vmem:[#allocation100_spill] sm:$0xff] %v14577_v27  ;;  %5493 = vperm.xlu1 %7933, %v14571_v37   ;;  %v14589_v51 = vpop.eup %9240  ;;  %v4861_v39 = vsub.f32 %v13858_v47, %v14585_v11  ;;  %v4862_v13 = vsub.f32 %v13895_v10, %v14585_v11  ;;  %v4863_v47 = vsub.f32 %v13905_v16, %v14585_v11 }
 0x4ca   : > { %v14573_v50 = vpop.permute.xlu1 %5307  ;;  %v14575_v55 = vpop.permute.xlu0 %5352  ;;  %17785 = vst [vmem:[#allocation99_spill] sm:$0xff] %v14589_v51  ;;  %v5063_v54 = vmul.f32 1.442695, %v4857_v4  ;;  %v5067_v4 = vmul.f32 1.442695, %v4859_v40  ;;  %v4864_v10 = vsub.f32 %v13948_v1, %v14585_v11  ;;  %v14645_v16 = vrot.slane %v14504_v12, %v17652_v14 }
 0x4cb   : > { %17781 = vst [vmem:[#allocation59_spill] sm:$0xff] %v14575_v55  ;;  %v14595_v53 = vpop.eup %9242  ;;  %v5069_v59 = vmul.f32 1.442695, %v4860_v21  ;;  %v5071_v17 = vmul.f32 1.442695, %v4861_v39 }
 0x4cc   : > { %5496 = vperm.xlu0 %7932, %v14577_v27   ;;  %17788 = vst [vmem:[#allocation133_spill] sm:$0xff] %v14595_v53  ;;  %v14603_v27 = vpop.eup %9244  ;;  %9258 = vpow2.f32 %v5063_v54  ;;  %v5075_v21 = vmul.f32 1.442695, %v4863_v47  ;;  %v5077_v1 = vmul.f32 1.442695, %v4864_v10 }
 0x4cd   : > { %5499 = vperm.xlu1 %7933, %v14589_v51   ;;  %17790 = vst [vmem:[#allocation57_spill] sm:$0xff] %v14603_v27  ;;  %9260 = vpow2.f32 %v5065_v26  ;;  %v5073_v26 = vmul.f32 1.442695, %v4862_v13  ;;  %v4866_v13 = vsub.f32 %v13996_v43, %v14585_v11  ;;  %v4868_v43 = vsub.f32 %v13871_v32, %v14645_v16  ;;  %v17802_v32 = vld [vmem:[#allocation50_spill] sm:$0xff] }
 0x4ce   : > { %v14591_v55 = vpop.permute.xlu1 %5313  ;;  %v14593_v37 = vpop.permute.xlu0 %5358  ;;  %9262 = vpow2.f32 %v5067_v4  ;;  %v4865_v4 = vsub.f32 %v13954_v20, %v14585_v11  ;;  %v4867_v20 = vsub.f32 %v13875_v8, %v14645_v16  ;;  %v4869_v8 = vsub.f32 %v13886_v62, %v14645_v16 }
 0x4cf   : > { %17786 = vst [vmem:[#allocation126_spill] sm:$0xff] %v14591_v55  ;;  %17787 = vst [vmem:[#allocation75_spill] sm:$0xff] %v14593_v37  ;;  %v14609_v55 = vpop.eup %9246  ;;  %9264 = vpow2.f32 %v5069_v59 }
 0x4d0   : > { %5502 = vperm.xlu0 %7932, %v14595_v53   ;;  %17791 = vst [vmem:[#allocation106_spill] sm:$0xff] %v14609_v55  ;;  %v14617_v56 = vpop.eup %9248  ;;  %9266 = vpow2.f32 %v5071_v17  ;;  %v5079_v17 = vmul.f32 1.442695, %v4865_v4  ;;  %v5083_v11 = vmul.f32 1.442695, %v4867_v20  ;;  %v17803_v20 = vld [vmem:[#allocation25_spill] sm:$0xff] }
 0x4d1   : > { %5505 = vperm.xlu1 %7933, %v14603_v27   ;;  %17792 = vst [vmem:[#allocation91_spill] sm:$0xff] %v14617_v56  ;;  %v14623_v53 = vpop.eup %9250  ;;  %9268 = vpow2.f32 %v5073_v26  ;;  %v5081_v26 = vmul.f32 1.442695, %v4866_v13  ;;  %v4870_v13 = vsub.f32 %v17802_v32, %v14645_v16  ;;  %v4871_v62 = vsub.f32 %v17803_v20, %v14645_v16 }
 0x4d2   : > { %v14605_v24 = vpop.permute.xlu1 %5319  ;;  %v14607_v37 = vpop.permute.xlu0 %5364  ;;  %17793 = vst [vmem:[#allocation117_spill] sm:$0xff] %v14623_v53  ;;  %9270 = vpow2.f32 %v5075_v21  ;;  %v4873_v20 = vsub.f32 %v13981_v7, %v14645_v16  ;;  %v17811_v7 = vld [vmem:[#allocation116_spill] sm:$0xff] }
 0x4d3   : > { %v14631_v54 = vpop.eup %9252  ;;  %9272 = vpow2.f32 %v5077_v1  ;;  %v5085_v1 = vmul.f32 1.442695, %v4868_v43  ;;  %v17807_v43 = vld [vmem:[#allocation127_spill] sm:$0xff]  ;;  %v5091_v32 = vmul.f32 1.442695, %v4871_v62 }
 0x4d4   : > { %5508 = vperm.xlu0 %7932, %v14609_v55   ;;  %17794 = vst [vmem:[#allocation86_spill] sm:$0xff] %v14631_v54  ;;  %v14637_v27 = vpop.eup %9254  ;;  %9274 = vpow2.f32 %v5079_v17  ;;  %v5087_v17 = vmul.f32 1.442695, %v4869_v8  ;;  %v14703_v8 = vrot.slane %v14504_v12, %v14243_v61  ;;  %v5095_v62 = vmul.f32 1.442695, %v4873_v20 }
 0x4d5   : > { %5511 = vperm.xlu1 %7933, %v14617_v56   ;;  %17795 = vst [vmem:[#allocation114_spill] sm:$0xff] %v14637_v27  ;;  %v14649_v39 = vpop.eup %9256  ;;  %9276 = vpow2.f32 %v5081_v26  ;;  %v5089_v26 = vmul.f32 1.442695, %v4870_v13  ;;  %v4874_v13 = vsub.f32 %v14005_v29, %v14645_v16  ;;  %v17814_v29 = vld [vmem:[#allocation115_spill] sm:$0xff] }
 0x4d6   : > { %v14619_v42 = vpop.permute.xlu1 %5325  ;;  %v14621_v30 = vpop.permute.xlu0 %5370  ;;  %17796 = vst [vmem:[#allocation97_spill] sm:$0xff] %v14649_v39  ;;  %9278 = vpow2.f32 %v5083_v11  ;;  %v4872_v11 = vsub.f32 %v17807_v43, %v14645_v16  ;;  %v4875_v43 = vsub.f32 %v17811_v7, %v14703_v8  ;;  %v4876_v16 = vsub.f32 %v17814_v29, %v14703_v8  ;;  %v17819_v29 = vld [vmem:[#allocation20_spill] sm:$0xff] }
 0x4d7   : > { %9280 = vpow2.f32 %v5085_v1 }
 0x4d8   : > { %5514 = vperm.xlu0 %7932, %v14623_v53   ;;  %9282 = vpow2.f32 %v5087_v17  ;;  %v5093_v1 = vmul.f32 1.442695, %v4872_v11  ;;  %v5099_v11 = vmul.f32 1.442695, %v4875_v43 }
 0x4d9   : > { %5517 = vperm.xlu1 %7933, %v14631_v54   ;;  %v14653_v54 = vpop.eup %9258  ;;  %9284 = vpow2.f32 %v5089_v26  ;;  %v5097_v26 = vmul.f32 1.442695, %v4874_v13  ;;  %v17818_v13 = vld [vmem:[#allocation18_spill] sm:$0xff] }
 0x4da   : > { %v14633_v40 = vpop.permute.xlu1 %5331  ;;  %v14635_v55 = vpop.permute.xlu0 %5376  ;;  %17797 = vst [vmem:[#allocation132_spill] sm:$0xff] %v14653_v54  ;;  %9286 = vpow2.f32 %v5091_v32  ;;  %v17815_v32 = vld [vmem:[#allocation7_spill] sm:$0xff] }
 0x4db   : > { %v14663_v47 = vpop.eup %9260  ;;  %9288 = vpow2.f32 %v5093_v1  ;;  %v4877_v20 = vsub.f32 %v17815_v32, %v14703_v8  ;;  %v5101_v1 = vmul.f32 1.442695, %v4876_v16  ;;  %v4879_v32 = vsub.f32 %v17819_v29, %v14703_v8  ;;  %v17822_v16 = vld [vmem:[#allocation19_spill] sm:$0xff] }
 0x4dc   : > { %5520 = vperm.xlu0 %7932, %v14637_v27   ;;  %17798 = vst [vmem:[#allocation92_spill] sm:$0xff] %v14663_v47  ;;  %v14667_v56 = vpop.eup %9262  ;;  %9290 = vpow2.f32 %v5095_v62  ;;  %v4878_v62 = vsub.f32 %v17818_v13, %v14703_v8  ;;  %v4880_v13 = vsub.f32 %v17822_v16, %v14703_v8  ;;  %v4882_v16 = vsub.f32 %v13834_v3, %v14703_v8  ;;  %v17830_v3 = vld [vmem:[#allocation21_spill] sm:$0xff] }
 0x4dd   : > { %5523 = vperm.xlu1 %7933, %v14649_v39   ;;  %17799 = vst [vmem:[#allocation62_spill] sm:$0xff] %v14667_v56  ;;  %v14677_v21 = vpop.eup %9264  ;;  %9292 = vpow2.f32 %v5097_v26  ;;  %v5103_v43 = vmul.f32 1.442695, %v4877_v20  ;;  %v5107_v29 = vmul.f32 1.442695, %v4879_v32  ;;  %v17827_v32 = vld [vmem:[#allocation14_spill] sm:$0xff] }
 0x4de   : > { %v14651_v53 = vpop.permute.xlu1 %5337  ;;  %v14656_v59 = vpop.permute.xlu0 %5382  ;;  %17800 = vst [vmem:[#allocation98_spill] sm:$0xff] %v14677_v21  ;;  %9294 = vpow2.f32 %v5099_v11  ;;  %v5105_v26 = vmul.f32 1.442695, %v4878_v62  ;;  %v14759_v11 = vrot.slane %v14504_v12, %v14290_v6  ;;  %v5109_v62 = vmul.f32 1.442695, %v4880_v13  ;;  %v17831_v13 = vld [vmem:[#allocation24_spill] sm:$0xff] }
 0x4df   : > { %9296 = vpow2.f32 %v5101_v1 }
 0x4e0   : > { %5526 = vperm.xlu0 %7932, %v14653_v54   ;;  %v14681_v54 = vpop.eup %9266  ;;  %9298 = vpow2.f32 %v5103_v43 }
 0x4e1   : > { %5529 = vperm.xlu1 %7933, %v14663_v47   ;;  %17801 = vst [vmem:[#allocation34_spill] sm:$0xff] %v14681_v54 }
 0x4e2   : > { %v14665_v27 = vpop.permute.xlu1 %5343  ;;  %v14673_v10 = vpop.permute.xlu0 %5388 }
 0x4e4   : > { %5532 = vperm.xlu0 %7932, %v14667_v56   ;;  %v14689_v56 = vpop.eup %9268  ;;  %9300 = vpow2.f32 %v5105_v26  ;;  %v5113_v26 = vmul.f32 1.442695, %v4882_v16  ;;  %v17835_v16 = vld [vmem:[#allocation17_spill] sm:$0xff] }
 0x4e5   : > { %5535 = vperm.xlu1 %7933, %v14677_v21   ;;  %17804 = vst [vmem:[#allocation93_spill] sm:$0xff] %v14689_v56  ;;  %v14693_v39 = vpop.eup %9270  ;;  %9302 = vpow2.f32 %v5107_v29  ;;  %v4885_v29 = vsub.f32 %v17831_v13, %v14759_v11  ;;  %v4887_v13 = vsub.f32 %v13943_v2, %v14759_v11 }
 0x4e6   : > { %v14679_v4 = vpop.permute.xlu1 %5349  ;;  %17805 = vst [vmem:[#allocation30_spill] sm:$0xff] %v14693_v39  ;;  %v14696_v21 = vpop.permute.xlu0 %5394 }
 0x4e7   : > { %17806 = vst [vmem:[#allocation32_spill] sm:$0xff] %v14696_v21  ;;  %v5123_v2 = vmul.f32 1.442695, %v4887_v13 }
 0x4e8   : > { %5538 = vperm.xlu0 %7932, %v14681_v54   ;;  %v14707_v54 = vpop.eup %9272  ;;  %9304 = vpow2.f32 %v5109_v62 }
 0x4e9   : > { %5541 = vperm.xlu1 %7933, %v14689_v56   ;;  %17808 = vst [vmem:[#allocation35_spill] sm:$0xff] %v14707_v54  ;;  %v14711_v51 = vpop.eup %9274 }
 0x4ea   : > { %v14691_v47 = vpop.permute.xlu1 %5355  ;;  %17809 = vst [vmem:[#allocation15_spill] sm:$0xff] %v14711_v51  ;;  %v14717_v17 = vpop.permute.xlu0 %5400 }
 0x4eb   : > { %17810 = vst [vmem:[#allocation16_spill] sm:$0xff] %v14717_v17 }
 0x4ec   : > { %5544 = vperm.xlu0 %7932, %v14693_v39   ;;  %v14721_v39 = vpop.eup %9276 }
 0x4ed   : > { %5547 = vperm.xlu1 %7933, %v14707_v54   ;;  %17812 = vst [vmem:[#allocation23_spill] sm:$0xff] %v14721_v39  ;;  %v14725_v14 = vpop.eup %9278 }
 0x4ee   : > { %v14709_v56 = vpop.permute.xlu1 %5361  ;;  %17813 = vst [vmem:[#allocation31_spill] sm:$0xff] %v14725_v14  ;;  %v14733_v7 = vpop.eup %9280 }
 0x4ef   : > { %17816 = vst [vmem:[#allocation33_spill] sm:$0xff] %v14733_v7  ;;  %v14737_v54 = vpop.eup %9282 }
 0x4f0   : > { %5550 = vperm.xlu0 %7932, %v14711_v51   ;;  %17817 = vst [vmem:[#allocation10_spill] sm:$0xff] %v14737_v54 }
 0x4f1   : > { %5553 = vperm.xlu1 %7933, %v14721_v39   ;;  %v14740_v39 = vpop.permute.xlu0 %5406 }
 0x4f2   : > { %v14723_v61 = vpop.permute.xlu1 %5367 }
 0x4f4   : > { %5556 = vperm.xlu0 %7932, %v14725_v14   ;;  %v14747_v14 = vpop.eup %9284 }
 0x4f5   : > { %5559 = vperm.xlu1 %7933, %v14733_v7   ;;  %17820 = vst [vmem:[#allocation131_spill] sm:$0xff] %v14747_v14  ;;  %v14751_v21 = vpop.eup %9286  ;;  %v14761_v20 = vpop.permute.xlu0 %5412 }
 0x4f6   : > { %v14735_v51 = vpop.permute.xlu1 %5373  ;;  %17821 = vst [vmem:[#allocation96_spill] sm:$0xff] %v14751_v21  ;;  %17823 = vst [vmem:[#allocation50_spill] sm:$0xff] %v14761_v20  ;;  %v14765_v7 = vpop.eup %9288 }
 0x4f7   : > { %17824 = vst [vmem:[#allocation25_spill] sm:$0xff] %v14765_v7  ;;  %v14769_v1 = vpop.eup %9290 }
 0x4f8   : > { %5562 = vperm.xlu0 %7932, %v14737_v54   ;;  %v4881_v54 = vsub.f32 %v13850_v58, %v14703_v8  ;;  %17826 = vst [vmem:[#allocation116_spill] sm:$0xff] %v14769_v1  ;;  %v4883_v58 = vsub.f32 %v17827_v32, %v14759_v11 }
 0x4f9   : > { %5565 = vperm.xlu1 %7933, %v14747_v14   ;;  %v14783_v20 = vpop.permute.xlu0 %5418 }
 0x4fa   : > { %v14749_v17 = vpop.permute.xlu1 %5379  ;;  %v5111_v43 = vmul.f32 1.442695, %v4881_v54  ;;  %v4884_v54 = vsub.f32 %v17830_v3, %v14759_v11  ;;  %v5115_v8 = vmul.f32 1.442695, %v4883_v58  ;;  %v4886_v3 = vsub.f32 %v17835_v16, %v14759_v11 }
 0x4fb   : > { %v5119_v58 = vmul.f32 1.442695, %v4885_v29  ;;  %v4889_v29 = vsub.f32 %v14068_v49, %v14759_v11  ;;  %v17841_v49 = vld [vmem:[#allocation12_spill] sm:$0xff] }
 0x4fc   : > { %5568 = vperm.xlu0 %7932, %v14751_v21   ;;  %v14777_v21 = vpop.eup %9292  ;;  %9306 = vpow2.f32 %v5111_v43  ;;  %v5117_v62 = vmul.f32 1.442695, %v4884_v54  ;;  %v4888_v54 = vsub.f32 %v13928_v23, %v14759_v11 }
 0x4fd   : > { %5571 = vperm.xlu1 %7933, %v14765_v7   ;;  %17828 = vst [vmem:[#allocation115_spill] sm:$0xff] %v14777_v21  ;;  %9308 = vpow2.f32 %v5113_v26  ;;  %v14801_v43 = vpop.permute.xlu0 %5424  ;;  %v5121_v26 = vmul.f32 1.442695, %v4886_v3  ;;  %v4890_v3 = vsub.f32 %v13965_v41, %v14759_v11 }
 0x4fe   : > { %v14767_v14 = vpop.permute.xlu1 %5385  ;;  %9310 = vpow2.f32 %v5115_v8  ;;  %v14817_v8 = vrot.slane %v14504_v12, %v14337_v28  ;;  %v5125_v23 = vmul.f32 1.442695, %v4888_v54  ;;  %v17844_v54 = vld [vmem:[#allocation52_spill] sm:$0xff] }
 0x4ff   : > { %17825 = vst [vmem:[#allocation127_spill] sm:$0xff] %v14767_v14  ;;  %v14781_v14 = vpop.eup %9294  ;;  %9312 = vpow2.f32 %v5117_v62 }
 0x500   : > { %5574 = vperm.xlu0 %7932, %v14769_v1   ;;  %17829 = vst [vmem:[#allocation7_spill] sm:$0xff] %v14781_v14  ;;  %v14791_v32 = vpop.eup %9296  ;;  %9314 = vpow2.f32 %v5119_v58  ;;  %v5127_v58 = vmul.f32 1.442695, %v4889_v29  ;;  %v4891_v13 = vsub.f32 %v17841_v49, %v14817_v8  ;;  %v4892_v41 = vsub.f32 %v17844_v54, %v14817_v8  ;;  %v17845_v29 = vld [vmem:[#allocation55_spill] sm:$0xff] }
 0x501   : > { %5577 = vperm.xlu1 %7933, %v14777_v21   ;;  %17832 = vst [vmem:[#allocation18_spill] sm:$0xff] %v14791_v32  ;;  %v14795_v7 = vpop.eup %9298  ;;  %v14827_v62 = vpop.permute.xlu0 %5430  ;;  %9316 = vpow2.f32 %v5121_v26  ;;  %v5129_v26 = vmul.f32 1.442695, %v4890_v3  ;;  %v4893_v49 = vsub.f32 %v17845_v29, %v14817_v8  ;;  %v4894_v3 = vsub.f32 %v14013_v34, %v14817_v8 }
 0x502   : > { %v14779_v6 = vpop.permute.xlu1 %5391  ;;  %17834 = vst [vmem:[#allocation19_spill] sm:$0xff] %v14795_v7  ;;  %17840 = vst [vmem:[#allocation140_spill] sm:$0xff] %v14827_v62  ;;  %9318 = vpow2.f32 %v5123_v2  ;;  %v5131_v2 = vmul.f32 1.442695, %v4891_v13  ;;  %v4895_v13 = vsub.f32 %v14022_v57, %v14817_v8  ;;  %v4896_v34 = vsub.f32 %v14049_v15, %v14817_v8 }
 0x503   : > { %9320 = vpow2.f32 %v5125_v23  ;;  %v5133_v23 = vmul.f32 1.442695, %v4892_v41  ;;  %v14875_v57 = vrot.slane %v14504_v12, %v14384_v31  ;;  %v4898_v12 = vsub.f32 %v14086_v33, %v14817_v8  ;;  %v17854_v33 = vld [vmem:[#allocation11_spill] sm:$0xff] }
 0x504   : > { %5580 = vperm.xlu0 %7932, %v14781_v14   ;;  %v14805_v14 = vpop.eup %9300  ;;  %9322 = vpow2.f32 %v5127_v58  ;;  %v5135_v58 = vmul.f32 1.442695, %v4893_v49  ;;  %v5139_v41 = vmul.f32 1.442695, %v4895_v13  ;;  %v5141_v15 = vmul.f32 1.442695, %v4896_v34 }
 0x505   : > { %5583 = vperm.xlu1 %7933, %v14791_v32   ;;  %17836 = vst [vmem:[#allocation14_spill] sm:$0xff] %v14805_v14  ;;  %v14845_v11 = vpop.permute.xlu0 %5436  ;;  %9324 = vpow2.f32 %v5129_v26  ;;  %v5137_v26 = vmul.f32 1.442695, %v4894_v3 }
 0x506   : > { %v14793_v1 = vpop.permute.xlu1 %5397  ;;  %9326 = vpow2.f32 %v5131_v2  ;;  %v4897_v2 = vsub.f32 %v14055_v0, %v14817_v8  ;;  %v4899_v0 = vsub.f32 %v14030_v18, %v14875_v57  ;;  %v4900_v8 = vsub.f32 %v17854_v33, %v14875_v57 }
 0x507   : > { %17833 = vst [vmem:[#allocation20_spill] sm:$0xff] %v14793_v1  ;;  %v14809_v1 = vpop.eup %9302  ;;  %9328 = vpow2.f32 %v5133_v23  ;;  %v4901_v18 = vsub.f32 %v14037_v19, %v14875_v57  ;;  %v4903_v19 = vsub.f32 %v14073_v45, %v14875_v57  ;;  %v4905_v45 = vsub.f32 %v14130_v52, %v14875_v57 }
 0x508   : > { %5586 = vperm.xlu0 %7932, %v14795_v7   ;;  %17837 = vst [vmem:[#allocation21_spill] sm:$0xff] %v14809_v1  ;;  %v14821_v16 = vpop.eup %9304  ;;  %9330 = vpow2.f32 %v5135_v58  ;;  %v5143_v3 = vmul.f32 1.442695, %v4897_v2  ;;  %v5147_v34 = vmul.f32 1.442695, %v4899_v0 }
 0x509   : > { %5589 = vperm.xlu1 %7933, %v14805_v14   ;;  %17838 = vst [vmem:[#allocation24_spill] sm:$0xff] %v14821_v16  ;;  %v14825_v14 = vpop.eup %9306  ;;  %9332 = vpow2.f32 %v5137_v26  ;;  %v5145_v26 = vmul.f32 1.442695, %v4898_v12  ;;  %v4902_v12 = vsub.f32 %v14062_v22, %v14875_v57  ;;  %v4904_v22 = vsub.f32 %v14094_v63, %v14875_v57 }
 0x50a   : > { %v14807_v21 = vpop.permute.xlu1 %5403  ;;  %17839 = vst [vmem:[#allocation17_spill] sm:$0xff] %v14825_v14  ;;  %9334 = vpow2.f32 %v5139_v41  ;;  %v4906_v63 = vsub.f32 %v14110_v46, %v14875_v57 }
 0x50b   : > { %9336 = vpow2.f32 %v5141_v15  ;;  %v5149_v15 = vmul.f32 1.442695, %v4900_v8 }
 0x50c   : > { %5592 = vperm.xlu0 %7932, %v14809_v1   ;;  %v14835_v1 = vpop.eup %9308  ;;  %9338 = vpow2.f32 %v5143_v3  ;;  %v5151_v3 = vmul.f32 1.442695, %v4901_v18 }
 0x50d   : > { %5595 = vperm.xlu1 %7933, %v14821_v16   ;;  %17842 = vst [vmem:[#allocation12_spill] sm:$0xff] %v14835_v1  ;;  %v14839_v28 = vpop.eup %9310  ;;  %9340 = vpow2.f32 %v5145_v26  ;;  %v5153_v26 = vmul.f32 1.442695, %v4902_v12  ;;  %v5159_v12 = vmul.f32 1.442695, %v4905_v45 }
 0x50e   : > { %v14823_v7 = vpop.permute.xlu1 %5409  ;;  %17843 = vst [vmem:[#allocation141_spill] sm:$0xff] %v14839_v28  ;;  %9342 = vpow2.f32 %v5147_v34  ;;  %v5155_v34 = vmul.f32 1.442695, %v4903_v19 }
 0x510   : > { %5598 = vperm.xlu0 %7932, %v14825_v14   ;;  %v14849_v14 = vpop.eup %9312  ;;  %9344 = vpow2.f32 %v5149_v15  ;;  %v5157_v15 = vmul.f32 1.442695, %v4904_v22  ;;  %v17863_v22 = vld [vmem:[#allocation38_spill] sm:$0xff] }
 0x511   : > { %5601 = vperm.xlu1 %7933, %v14835_v1   ;;  %17846 = vst [vmem:[#allocation52_spill] sm:$0xff] %v14849_v14  ;;  %v14853_v62 = vpop.eup %9314  ;;  %v14867_v1 = vpop.permute.xlu0 %5442  ;;  %9346 = vpow2.f32 %v5151_v3  ;;  %v5682_v57 = vrot.slane %v14525_v25, %v17863_v22  ;;  %v5760_v25 = vrot.slane %v14665_v27, %v17863_v22 }
 0x512   : > { %v14837_v32 = vpop.permute.xlu1 %5415  ;;  %17847 = vst [vmem:[#allocation55_spill] sm:$0xff] %v14853_v62  ;;  %v14861_v54 = vpop.eup %9316  ;;  %9348 = vpow2.f32 %v5153_v26  ;;  %v5161_v26 = vmul.f32 1.442695, %v4906_v63  ;;  %v5692_v63 = vrot.slane %v14546_v60, %v17171_v9 }
 0x513   : > { %17848 = vst [vmem:[#allocation142_spill] sm:$0xff] %v14861_v54 }
 0x514   : > { %5604 = vperm.xlu0 %7932, %v14839_v28   ;;  %v14865_v28 = vpop.eup %9318  ;;  %9350 = vpow2.f32 %v5155_v34 }
 0x515   : > { %5607 = vperm.xlu1 %7933, %v14849_v14   ;;  %17849 = vst [vmem:[#allocation143_spill] sm:$0xff] %v14865_v28  ;;  %v14879_v49 = vpop.eup %9320  ;;  %v14889_v23 = vpop.permute.xlu0 %5448  ;;  %9352 = vpow2.f32 %v5157_v15 }
 0x516   : > { %v14851_v16 = vpop.permute.xlu1 %5421  ;;  %17850 = vst [vmem:[#allocation144_spill] sm:$0xff] %v14879_v49 }
 0x518   : > { %5610 = vperm.xlu0 %7932, %v14853_v62  }
 0x519   : > { %5613 = vperm.xlu1 %7933, %v14861_v54   ;;  %v14883_v54 = vpop.eup %9322  ;;  %9354 = vpow2.f32 %v5159_v12  ;;  %v17868_v12 = vld [vmem:[#allocation42_spill] sm:$0xff] }
 0x51a   : > { %v14863_v29 = vpop.permute.xlu1 %5427  ;;  %17851 = vst [vmem:[#allocation145_spill] sm:$0xff] %v14883_v54  ;;  %v14893_v58 = vpop.eup %9324  ;;  %9356 = vpow2.f32 %v5161_v26 }
 0x51b   : > { %17852 = vst [vmem:[#allocation146_spill] sm:$0xff] %v14893_v58 }
 0x51c   : > { %5616 = vperm.xlu0 %7932, %v14865_v28   ;;  %v14897_v28 = vpop.eup %9326 }
 0x51d   : > { %5619 = vperm.xlu1 %7933, %v14879_v49   ;;  %17853 = vst [vmem:[#allocation147_spill] sm:$0xff] %v14897_v28  ;;  %v14905_v41 = vpop.eup %9328  ;;  %v14911_v49 = vpop.permute.xlu0 %5454 }
 0x51e   : > { %v14881_v62 = vpop.permute.xlu1 %5433  ;;  %17855 = vst [vmem:[#allocation11_spill] sm:$0xff] %v14905_v41 }
 0x520   : > { %5622 = vperm.xlu0 %7932, %v14883_v54   ;;  %v14909_v54 = vpop.eup %9330 }
 0x521   : > { %5625 = vperm.xlu1 %7933, %v14893_v58   ;;  %17856 = vst [vmem:[#allocation148_spill] sm:$0xff] %v14909_v54  ;;  %v14919_v0 = vpop.eup %9332  ;;  %v14929_v8 = vpop.permute.xlu0 %5460 }
 0x522   : > { %v14895_v13 = vpop.permute.xlu1 %5439  ;;  %17857 = vst [vmem:[#allocation149_spill] sm:$0xff] %v14919_v0  ;;  %v14923_v58 = vpop.eup %9334 }
 0x523   : > { %17858 = vst [vmem:[#allocation150_spill] sm:$0xff] %v14923_v58  ;;  %v14933_v18 = vpop.eup %9336 }
 0x524   : > { %5628 = vperm.xlu0 %7932, %v14897_v28   ;;  %17859 = vst [vmem:[#allocation151_spill] sm:$0xff] %v14933_v18  ;;  %v17870_v28 = vld [vmem:[#allocation46_spill] sm:$0xff] }
 0x525   : > { %5631 = vperm.xlu1 %7933, %v14905_v41   ;;  %v5702_v26 = vrot.slane %v14573_v50, %v17870_v28  ;;  %v5770_v50 = vrot.slane %v14679_v4, %v17171_v9  ;;  %v17875_v4 = vld [vmem:[#allocation48_spill] sm:$0xff] }
 0x526   : > { %v14907_v2 = vpop.permute.xlu1 %5445 }
 0x528   : > { %5634 = vperm.xlu0 %7932, %v14909_v54   ;;  %v14937_v54 = vpop.eup %9338 }
 0x529   : > { %5637 = vperm.xlu1 %7933, %v14919_v0   ;;  %17860 = vst [vmem:[#allocation152_spill] sm:$0xff] %v14937_v54  ;;  %v14943_v3 = vpop.eup %9340  ;;  %v17867_v0 = vld [vmem:[#allocation39_spill] sm:$0xff] }
 0x52a   : > { %v14921_v33 = vpop.permute.xlu1 %5451  ;;  %17861 = vst [vmem:[#allocation153_spill] sm:$0xff] %v14943_v3  ;;  %v14947_v19 = vpop.eup %9342  ;;  %v5687_v15 = vrot.slane %v14538_v35, %v17867_v0  ;;  %v5731_v35 = vrot.slane %v14619_v42, %v17171_v9  ;;  %v5726_v27 = vrot.slane %v14518_v36, %v17867_v0 }
 0x52b   : > { %17862 = vst [vmem:[#allocation154_spill] sm:$0xff] %v14947_v19  ;;  %v14955_v46 = vpop.eup %9344 }
 0x52c   : > { %5640 = vperm.xlu0 %7932, %v14923_v58   ;;  %v14949_v58 = vpop.permute.xlu0 %5466  ;;  %17864 = vst [vmem:[#allocation38_spill] sm:$0xff] %v14955_v46  ;;  %v14961_v45 = vpop.eup %9346 }
 0x52d   : > { %5643 = vperm.xlu1 %7933, %v14933_v18   ;;  %17865 = vst [vmem:[#allocation155_spill] sm:$0xff] %v14961_v45  ;;  %v17866_v18 = vld [vmem:[#allocation37_spill] sm:$0xff] }
 0x52e   : > { %v14935_v41 = vpop.permute.xlu1 %5457 }
 0x530   : > { %5646 = vperm.xlu0 %7932, %v14937_v54   ;;  %v5721_v54 = vrot.slane %v14605_v24, %v17863_v22  ;;  %v5678_v24 = vrot.slane %v14515_v44, %v17866_v18  ;;  %v14982_v44 = vpop.eup %9348 }
 0x531   : > { %5649 = vperm.xlu1 %7933, %v14943_v3   ;;  %v5717_v3 = vrot.slane %v14507_v48, %v17866_v18  ;;  %v5697_v48 = vrot.slane %v14559_v5, %v17868_v12  ;;  %17869 = vst [vmem:[#allocation37_spill] sm:$0xff] %v14982_v44  ;;  %v5756_v5 = vrot.slane %v14548_v38, %v17866_v18 }
 0x532   : > { %v14945_v52 = vpop.permute.xlu1 %5463  ;;  %v5683_v60 = vsel %vm4038_vm0, %v5682_v57, %v5678_v24  ;;  %v17872_v24 = vld [vmem:[#allocation58_spill] sm:$0xff] }
 0x533   : > { %v5688_v42 = vsel %vm4045_vm1, %v5687_v15, %v5683_v60  ;;  %v5761_v36 = vsel %vm4038_vm0, %v5760_v25, %v5756_v5  ;;  %v5765_v14 = vrot.slane %v17872_v24, %v17867_v0  ;;  %v5741_v60 = vrot.slane %v14633_v40, %v17870_v28  ;;  %v17876_v5 = vld [vmem:[#allocation126_spill] sm:$0xff] }
 0x534   : > { %5652 = vperm.xlu0 %7932, %v14947_v19   ;;  %v5722_v19 = vsel %vm4038_vm0, %v5721_v54, %v5717_v3  ;;  %v14993_v54 = vpop.eup %9350  ;;  %v5693_v3 = vsel %vm4052_vm2, %v5692_v63, %v5688_v42  ;;  %v5712_v42 = vrot.slane %v17876_v5, %v17875_v4  ;;  %v5799_v40 = vrot.slane %v14723_v61, %v17863_v22 }
 0x535   : > { %5655 = vperm.xlu1 %7933, %v14955_v46   ;;  %v14980_v46 = vpop.permute.xlu0 %5472  ;;  %17871 = vst [vmem:[#allocation39_spill] sm:$0xff] %v14993_v54  ;;  %v5727_v57 = vsel %vm4045_vm1, %v5726_v27, %v5722_v19  ;;  %v5698_v38 = vsel %vm4059_vm3, %v5697_v48, %v5693_v3  ;;  %v15009_v63 = vpop.eup %9352  ;;  %v17874_v19 = vld [vmem:[#allocation49_spill] sm:$0xff]  ;;  %v17878_v48 = vld [vmem:[#allocation47_spill] sm:$0xff] }
 0x536   : > { %v14959_v34 = vpop.permute.xlu1 %5469  ;;  %v5732_v15 = vsel %vm4052_vm2, %v5731_v35, %v5727_v57  ;;  %17873 = vst [vmem:[#allocation42_spill] sm:$0xff] %v15009_v63  ;;  %v5736_v25 = vrot.slane %v17874_v19, %v17868_v12  ;;  %v5703_v27 = vsel %vm4066_vm4, %v5702_v26, %v5698_v38  ;;  %v17879_v3 = vld [vmem:[#allocation103_spill] sm:$0xff]  ;;  %v5766_v35 = vsel %vm4045_vm1, %v5765_v14, %v5761_v36 }
 0x537   : > { %v5707_v24 = vrot.slane %v17879_v3, %v17878_v48  ;;  %v17880_v19 = vld [vmem:[#allocation59_spill] sm:$0xff]  ;;  %v5771_v5 = vsel %vm4052_vm2, %v5770_v50, %v5766_v35  ;;  %v5795_v3 = vrot.slane %v14607_v37, %v17866_v18 }
 0x538   : > { %5658 = vperm.xlu0 %7932, %v14961_v45   ;;  %v5775_v26 = vrot.slane %v17880_v19, %v17868_v12  ;;  %v5737_v38 = vsel %vm4059_vm3, %v5736_v25, %v5732_v15  ;;  %v5751_v19 = vrot.slane %v14651_v53, %v17875_v4  ;;  %v17882_v50 = vld [vmem:[#allocation107_spill] sm:$0xff]  ;;  %v5809_v53 = vrot.slane %v14735_v51, %v17171_v9 }
 0x539   : > { %5661 = vperm.xlu1 %7933, %v14982_v44   ;;  %v15023_v57 = vpop.permute.xlu0 %5478  ;;  %v5780_v44 = vrot.slane %v14691_v47, %v17870_v28  ;;  %v5708_v61 = vsel %vm4073_vm5, %v5707_v24, %v5703_v27  ;;  %v5742_v36 = vsel %vm4066_vm4, %v5741_v60, %v5737_v38  ;;  %v5746_v25 = vrot.slane %v17882_v50, %v17878_v48  ;;  %v17883_v35 = vld [vmem:[#allocation75_spill] sm:$0xff] }
 0x53a   : > { %v14991_v45 = vpop.permute.xlu1 %5475  ;;  %v15046_v47 = vsel %vm4080_vm6, %v5712_v42, %v5708_v61  ;;  %v5804_v60 = vrot.slane %v14621_v30, %v17867_v0  ;;  %v5776_v27 = vsel %vm4059_vm3, %v5775_v26, %v5771_v5  ;;  %v5800_v37 = vsel %vm4038_vm0, %v5799_v40, %v5795_v3 }
 0x53b   : > { %v5747_v42 = vsel %vm4073_vm5, %v5746_v25, %v5742_v36  ;;  %v5814_v38 = vrot.slane %v14635_v55, %v17868_v12  ;;  %v5781_v61 = vsel %vm4066_vm4, %v5780_v44, %v5776_v27  ;;  %v5790_v30 = vrot.slane %v14709_v56, %v17875_v4  ;;  %v17884_v36 = vld [vmem:[#allocation32_spill] sm:$0xff] }
 0x53c   : > { %5664 = vperm.xlu0 %7932, %v14993_v54   ;;  %v15016_v54 = vpop.eup %9354  ;;  %v15066_v26 = vsel %vm4080_vm6, %v5751_v19, %v5747_v42  ;;  %v5824_v51 = vrot.slane %v14656_v59, %v17878_v48  ;;  %v5834_v40 = vrot.slane %v14673_v10, %v17866_v18  ;;  %v5838_v5 = vrot.slane %v14779_v6, %v17863_v22  ;;  %v17885_v44 = vld [vmem:[#allocation16_spill] sm:$0xff] }
 0x53d   : > { %17877 = vst [vmem:[#allocation46_spill] sm:$0xff] %v15016_v54  ;;  %5667 = vperm.xlu1 %7933, %v15009_v63   ;;  %v15041_v15 = vpop.eup %9356  ;;  %v5843_v55 = vrot.slane %v17884_v36, %v17867_v0  ;;  %v5853_v3 = vrot.slane %v17885_v44, %v17868_v12  ;;  %v5805_v56 = vsel %vm4045_vm1, %v5804_v60, %v5800_v37  ;;  %v17886_v60 = vld [vmem:[#allocation50_spill] sm:$0xff] }
 0x53e   : > { %v15033_v14 = vpop.permute.xlu1 %5481  ;;  %17881 = vst [vmem:[#allocation58_spill] sm:$0xff] %v15041_v15  ;;  %v5877_v19 = vrot.slane %v14837_v32, %v17863_v22  ;;  %v5810_v10 = vsel %vm4052_vm2, %v5809_v53, %v5805_v56  ;;  %v5819_v6 = vrot.slane %v14749_v17, %v17870_v28  ;;  %v5916_v25 = vrot.slane %v14895_v13, %v17863_v22  ;;  %v17887_v13 = vld [vmem:[#allocation20_spill] sm:$0xff] }
 0x53f   : > { %v5863_v32 = vrot.slane %v14740_v39, %v17878_v48  ;;  %v5873_v37 = vrot.slane %v17886_v60, %v17866_v18  ;;  %v5882_v17 = vrot.slane %v14783_v20, %v17867_v0  ;;  %v5839_v53 = vsel %vm4038_vm0, %v5838_v5, %v5834_v40  ;;  %v17888_v60 = vld [vmem:[#allocation127_spill] sm:$0xff] }
 0x540   : > { %5670 = vperm.xlu0 %7932, %v15016_v54   ;;  %v5785_v54 = vrot.slane %v17883_v35, %v17878_v48  ;;  %v5848_v42 = vrot.slane %v17887_v13, %v17171_v9  ;;  %v5887_v36 = vrot.slane %v14851_v16, %v17171_v9  ;;  %v5892_v40 = vrot.slane %v14801_v43, %v17868_v12 }
 0x541   : > { %5673 = vperm.xlu1 %7933, %v15041_v15   ;;  %v5878_v39 = vsel %vm4038_vm0, %v5877_v19, %v5873_v37  ;;  %v5844_v56 = vsel %vm4045_vm1, %v5843_v55, %v5839_v53  ;;  %v5921_v16 = vrot.slane %v14867_v1, %v17867_v0  ;;  %v5965_v19 = vrot.slane %v14959_v34, %v17171_v9 }
 0x542   : > { %v5786_v59 = vsel %vm4073_vm5, %v5785_v54, %v5781_v61  ;;  %v5955_v54 = vrot.slane %v14945_v52, %v17863_v22  ;;  %v5912_v61 = vrot.slane %v14845_v11, %v17866_v18  ;;  %v5951_v52 = vrot.slane %v14929_v8, %v17866_v18 }
 0x543   : > { %v15056_v24 = vpop.permute.xlu0 %5484  ;;  %v15092_v27 = vsel %vm4080_vm6, %v5790_v30, %v5786_v59  ;;  %v5815_v30 = vsel %vm4059_vm3, %v5814_v38, %v5810_v10  ;;  %v5926_v11 = vrot.slane %v14907_v2, %v17171_v9  ;;  %v5849_v59 = vsel %vm4052_vm2, %v5848_v42, %v5844_v56 }
 0x544   : > { %v15081_v50 = vpop.permute.xlu1 %5487  ;;  %v5820_v20 = vsel %vm4066_vm4, %v5819_v6, %v5815_v30  ;;  %v5917_v5 = vsel %vm4038_vm0, %v5916_v25, %v5912_v61  ;;  %v5956_v8 = vsel %vm4038_vm0, %v5955_v54, %v5951_v52  ;;  %v5858_v43 = vrot.slane %v14807_v21, %v17870_v28 }
 0x545   : > { %v5883_v10 = vsel %vm4045_vm1, %v5882_v17, %v5878_v39  ;;  %v5960_v2 = vrot.slane %v14949_v58, %v17867_v0  ;;  %v5825_v55 = vsel %vm4073_vm5, %v5824_v51, %v5820_v20  ;;  %v5897_v1 = vrot.slane %v14863_v29, %v17870_v28 }
 0x546   : > { %v5888_v6 = vsel %vm4052_vm2, %v5887_v36, %v5883_v10  ;;  %v5922_v25 = vsel %vm4045_vm1, %v5921_v16, %v5917_v5  ;;  %v5829_v37 = vrot.slane %v17888_v60, %v17875_v4  ;;  %v5936_v54 = vrot.slane %v14921_v33, %v17870_v28 }
 0x547   : > { %v15089_v35 = vpop.permute.xlu0 %5490  ;;  %v5927_v21 = vsel %vm4052_vm2, %v5926_v11, %v5922_v25  ;;  %v5961_v58 = vsel %vm4045_vm1, %v5960_v2, %v5956_v8  ;;  %v5854_v17 = vsel %vm4059_vm3, %v5853_v3, %v5849_v59  ;;  %v5931_v29 = vrot.slane %v14889_v23, %v17868_v12  ;;  %v17889_v3 = vld [vmem:[#allocation140_spill] sm:$0xff] }
 0x548   : > { %v15113_v44 = vpop.permute.xlu1 %5493  ;;  %v5966_v53 = vsel %vm4052_vm2, %v5965_v19, %v5961_v58  ;;  %v5975_v13 = vrot.slane %v14991_v45, %v17870_v28  ;;  %v5859_v42 = vsel %vm4066_vm4, %v5858_v43, %v5854_v17  ;;  %v5868_v61 = vrot.slane %v14823_v7, %v17875_v4 }
 0x549   : > { %v5893_v33 = vsel %vm4059_vm3, %v5892_v40, %v5888_v6  ;;  %v5970_v30 = vrot.slane %v14980_v46, %v17868_v12  ;;  %v5902_v39 = vrot.slane %v17889_v3, %v17878_v48  ;;  %v5907_v36 = vrot.slane %v14881_v62, %v17875_v4 }
 0x54a   : > { %v5898_v23 = vsel %vm4066_vm4, %v5897_v1, %v5893_v33  ;;  %v5932_v45 = vsel %vm4059_vm3, %v5931_v29, %v5927_v21  ;;  %v5830_v20 = vsel %vm4080_vm6, %v5829_v37, %v5825_v55  ;;  %v5946_v40 = vrot.slane %v14935_v41, %v17875_v4 }
 0x54b   : > { %v15121_v38 = vpop.permute.xlu0 %5496  ;;  %v5937_v7 = vsel %vm4066_vm4, %v5936_v54, %v5932_v45  ;;  %v5971_v46 = vsel %vm4059_vm3, %v5970_v30, %v5966_v53  ;;  %v5864_v11 = vsel %vm4073_vm5, %v5863_v32, %v5859_v42  ;;  %v5941_v62 = vrot.slane %v14911_v49, %v17878_v48 }
 0x54c   : > { %v15140_v34 = vpop.permute.xlu1 %5499  ;;  %v5976_v56 = vsel %vm4066_vm4, %v5975_v13, %v5971_v46  ;;  %v5985_v16 = vrot.slane %v15033_v14, %v17875_v4  ;;  %v6299_v8 = vsel %vm4667_vm7, %v15066_v26, %v15046_v47  ;;  %v5869_v41 = vsel %vm4080_vm6, %v5868_v61, %v5864_v11 }
 0x54d   : > { %v5903_v19 = vsel %vm4073_vm5, %v5902_v39, %v5898_v23  ;;  %v5980_v59 = vrot.slane %v15023_v57, %v17878_v48  ;;  %v6300_v32 = vsel %vm4669_vm8, %v15092_v27, %v6299_v8  ;;  %v5942_v43 = vsel %vm4073_vm5, %v5941_v62, %v5937_v7 }
 0x54e   : > { %v5908_v49 = vsel %vm4080_vm6, %v5907_v36, %v5903_v19  ;;  %v6301_v14 = vsel %vm4671_vm9, %v5830_v20, %v6300_v32  ;;  %v5947_v47 = vsel %vm4080_vm6, %v5946_v40, %v5942_v43 }
 0x54f   : > { %v15148_v51 = vpop.permute.xlu0 %5502  ;;  %v5981_v2 = vsel %vm4073_vm5, %v5980_v59, %v5976_v56  ;;  %v6302_v55 = vsel %vm4673_vm10, %v5869_v41, %v6301_v14 }
 0x550   : > { %v15168_v52 = vpop.permute.xlu1 %5505  ;;  %v5986_v57 = vsel %vm4080_vm6, %v5985_v16, %v5981_v2  ;;  %v6303_v27 = vsel %vm4675_vm11, %v5908_v49, %v6302_v55 }
 0x551   : > { %v6304_v6 = vsel %vm4677_vm12, %v5947_v47, %v6303_v27  ;;  %v5994_v47 = vrot.slane %v15081_v50, %v17863_v22 }
 0x552   : > { %v6305_v60 = vsel %vm4679_vm13, %v5986_v57, %v6304_v6  ;;  %v5990_v57 = vrot.slane %v15056_v24, %v17866_v18  ;;  %v6004_v6 = vrot.slane %v15113_v44, %v17171_v9  ;;  %v6014_v44 = vrot.slane %v15140_v34, %v17870_v28 }
 0x553   : > { %v15175_v5 = vpop.permute.xlu0 %5508  ;;  %v6315_v37 = vsel %vm4690_vm14, %v6305_v60, 0.0 }
 0x554   : > { %v15194_v10 = vpop.permute.xlu1 %5511  ;;  %v5995_v27 = vsel %vm4038_vm0, %v5994_v47, %v5990_v57  ;;  %v6029_v24 = vrot.slane %v15175_v5, %v17866_v18 }
 0x555   : > { %v6033_v50 = vrot.slane %v15194_v10, %v17863_v22  ;;  %v6009_v10 = vrot.slane %v15121_v38, %v17868_v12 }
 0x557   : > { %v15198_v26 = vpop.permute.xlu0 %5514 }
 0x558   : > { %v15205_v1 = vpop.permute.xlu1 %5517 }
 0x55b   : > { %v15207_v25 = vpop.permute.xlu0 %5520 }
 0x55c   : > { %v15211_v21 = vpop.permute.xlu1 %5523 }
 0x55f   : > { %6316 = vadd.xlane.f32.xlu0 %v6315_v37  ;;  %v15213_v54 = vpop.permute.xlu0 %5526  ;;  %v5999_v37 = vrot.slane %v15089_v35, %v17867_v0 }
 0x560   : > { %v15215_v58 = vpop.permute.xlu1 %5529 }
 0x561   : > { %v6000_v31 = vsel %vm4045_vm1, %v5999_v37, %v5995_v27  ;;  %v6043_v27 = vrot.slane %v15205_v1, %v17171_v9 }
 0x562   : > { %v6005_v47 = vsel %vm4052_vm2, %v6004_v6, %v6000_v31  ;;  %v6038_v31 = vrot.slane %v15198_v26, %v17867_v0 }
 0x563   : > { %v5533_v17 = vpop.permute.xlu0 %5532  ;;  %v6010_v6 = vsel %vm4059_vm3, %v6009_v10, %v6005_v47 }
 0x564   : > { %v5536_v29 = vpop.permute.xlu1 %5535  ;;  %v6068_v57 = vrot.slane %v5533_v17, %v17866_v18  ;;  %v6015_v37 = vsel %vm4066_vm4, %v6014_v44, %v6010_v6  ;;  %v6019_v44 = vrot.slane %v15148_v51, %v17878_v48 }
 0x565   : > { %v6072_v63 = vrot.slane %v5536_v29, %v17863_v22  ;;  %v6034_v29 = vsel %vm4038_vm0, %v6033_v50, %v6029_v24 }
 0x566   : > { %v6039_v1 = vsel %vm4045_vm1, %v6038_v31, %v6034_v29  ;;  %v6020_v29 = vsel %vm4073_vm5, %v6019_v44, %v6015_v37 }
 0x567   : > { %v15217_v53 = vpop.permute.xlu0 %5538  ;;  %v6073_v34 = vsel %vm4038_vm0, %v6072_v63, %v6068_v57 }
 0x568   : > { %v15219_v13 = vpop.permute.xlu1 %5541  ;;  %v6077_v38 = vrot.slane %v15217_v53, %v17867_v0 }
 0x569   : > { %v6082_v17 = vrot.slane %v15219_v13, %v17171_v9  ;;  %v6044_v13 = vsel %vm4052_vm2, %v6043_v27, %v6039_v1 }
 0x56a   : > { %v6078_v24 = vsel %vm4045_vm1, %v6077_v38, %v6073_v34 }
 0x56b   : > { %v15221_v42 = vpop.permute.xlu0 %5544  ;;  %v6083_v57 = vsel %vm4052_vm2, %v6082_v17, %v6078_v24 }
 0x56c   : > { %v15223_v61 = vpop.permute.xlu1 %5547  ;;  %v6087_v10 = vrot.slane %v15221_v42, %v17868_v12 }
 0x56e   : > { %v6088_v42 = vsel %vm4059_vm3, %v6087_v10, %v6083_v57 }
 0x56f   : > { %v15225_v33 = vpop.permute.xlu0 %5550 }
 0x570   : > { %v15227_v30 = vpop.permute.xlu1 %5553  ;;  %v6097_v37 = vrot.slane %v15225_v33, %v17878_v48 }
 0x573   : > { %v5557_v3 = vpop.permute.xlu0 %5556 }
 0x574   : > { %v5560_v39 = vpop.permute.xlu1 %5559 }
 0x575   : > { %v6111_v35 = vrot.slane %v5560_v39, %v17863_v22  ;;  %v6107_v39 = vrot.slane %v5557_v3, %v17866_v18  ;;  %v6053_v3 = vrot.slane %v15211_v21, %v17870_v28  ;;  %v6024_v21 = vrot.slane %v15168_v52, %v17875_v4 }
 0x576   : > { %v6063_v52 = vrot.slane %v15215_v58, %v17875_v4 }
 0x577   : > { %v15229_v23 = vpop.permute.xlu0 %5562  ;;  %v6112_v50 = vsel %vm4038_vm0, %v6111_v35, %v6107_v39  ;;  %v6092_v35 = vrot.slane %v15223_v61, %v17870_v28  ;;  %v6058_v39 = vrot.slane %v15213_v54, %v17878_v48  ;;  %v15363_v58 = vsel %vm4080_vm6, %v6024_v21, %v6020_v29 }
 0x578   : > { %v15231_v36 = vpop.permute.xlu1 %5565  ;;  %v6116_v53 = vrot.slane %v15229_v23, %v17867_v0 }
 0x579   : > { %v6121_v26 = vrot.slane %v15231_v36, %v17171_v9  ;;  %v6048_v36 = vrot.slane %v15207_v25, %v17868_v12  ;;  %v6093_v6 = vsel %vm4066_vm4, %v6092_v35, %v6088_v42 }
 0x57a   : > { %v6117_v23 = vsel %vm4045_vm1, %v6116_v53, %v6112_v50  ;;  %v6098_v33 = vsel %vm4073_vm5, %v6097_v37, %v6093_v6 }
 0x57b   : > { %v15233_v45 = vpop.permute.xlu0 %5568  ;;  %v6049_v51 = vsel %vm4059_vm3, %v6048_v36, %v6044_v13  ;;  %v6122_v27 = vsel %vm4052_vm2, %v6121_v26, %v6117_v23 }
 0x57c   : > { %v15235_v20 = vpop.permute.xlu1 %5571  ;;  %v6054_v61 = vsel %vm4066_vm4, %v6053_v3, %v6049_v51  ;;  %v6126_v34 = vrot.slane %v15233_v45, %v17868_v12 }
 0x57d   : > { %v6131_v25 = vrot.slane %v15235_v20, %v17870_v28  ;;  %v6102_v20 = vrot.slane %v15227_v30, %v17875_v4  ;;  %v6059_v54 = vsel %vm4073_vm5, %v6058_v39, %v6054_v61 }
 0x57e   : > { %v6127_v45 = vsel %vm4059_vm3, %v6126_v34, %v6122_v27  ;;  %v6064_v13 = vsel %vm4080_vm6, %v6063_v52, %v6059_v54 }
 0x57f   : > { %v15237_v7 = vpop.permute.xlu0 %5574  ;;  %v6132_v30 = vsel %vm4066_vm4, %v6131_v25, %v6127_v45 }
 0x580   : > { %v15239_v40 = vpop.permute.xlu1 %5577  ;;  %v6136_v3 = vrot.slane %v15237_v7, %v17878_v48 }
 0x581   : > { %v6141_v35 = vrot.slane %v15239_v40, %v17875_v4 }
 0x582   : > { %v6137_v57 = vsel %vm4073_vm5, %v6136_v3, %v6132_v30 }
 0x583   : > { %v15241_v46 = vpop.permute.xlu0 %5580 }
 0x584   : > { %v15243_v11 = vpop.permute.xlu1 %5583  ;;  %v6146_v50 = vrot.slane %v15241_v46, %v17866_v18  ;;  %v6103_v46 = vsel %vm4080_vm6, %v6102_v20, %v6098_v33 }
 0x585   : > { %v6150_v38 = vrot.slane %v15243_v11, %v17863_v22 }
 0x587   : > { %v15245_v62 = vpop.permute.xlu0 %5586  ;;  %v6151_v53 = vsel %vm4038_vm0, %v6150_v38, %v6146_v50 }
 0x588   : > { %v15247_v56 = vpop.permute.xlu1 %5589  ;;  %v6155_v36 = vrot.slane %v15245_v62, %v17867_v0 }
 0x58a   : > { %v6156_v62 = vsel %vm4045_vm1, %v6155_v36, %v6151_v53  ;;  %v6306_v36 = vsel %vm4667_vm7, %v6064_v13, %v15363_v58 }
 0x58b   : > { %v15249_v16 = vpop.permute.xlu0 %5592 }
 0x58c   : > { %v15251_v8 = vpop.permute.xlu1 %5595  ;;  %v6165_v40 = vrot.slane %v15249_v16, %v17868_v12 }
 0x58d   : > { %v6170_v27 = vrot.slane %v15251_v8, %v17870_v28 }
 0x58f   : > { %v15253_v41 = vpop.permute.xlu0 %5598 }
 0x590   : > { %v15255_v19 = vpop.permute.xlu1 %5601  ;;  %v6175_v6 = vrot.slane %v15253_v41, %v17878_v48 }
 0x591   : > { %v6180_v45 = vrot.slane %v15255_v19, %v17875_v4 }
 0x593   : > { %v15257_v59 = vpop.permute.xlu0 %5604 }
 0x594   : > { %v15259_v32 = vpop.permute.xlu1 %5607 }
 0x595   : > { %v6189_v1 = vrot.slane %v15259_v32, %v17863_v22  ;;  %v6185_v32 = vrot.slane %v15257_v59, %v17866_v18 }
 0x597   : > { %v15261_v49 = vpop.permute.xlu0 %5610  ;;  %v6190_v7 = vsel %vm4038_vm0, %v6189_v1, %v6185_v32 }
 0x598   : > { %v15263_v43 = vpop.permute.xlu1 %5613  ;;  %v6194_v21 = vrot.slane %v15261_v49, %v17867_v0 }
 0x599   : > { %v6199_v59 = vrot.slane %v15263_v43, %v17171_v9 }
 0x59b   : > { %v15265_v14 = vpop.permute.xlu0 %5616 }
 0x59c   : > { %v15269_v2 = vpop.permute.xlu1 %5619  ;;  %v6204_v42 = vrot.slane %v15265_v14, %v17868_v12 }
 0x59f   : > { %v15271_v55 = vpop.permute.xlu0 %5622 }
 0x5a0   : > { %17890 = vst [vmem:[#allocation49_spill] sm:$0xff] %v15271_v55  ;;  %v15278_v60 = vpop.permute.xlu1 %5625 }
 0x5a1   : > { %v6219_v41 = vrot.slane %v15278_v60, %v17875_v4 }
 0x5a3   : > { %v15284_v15 = vpop.permute.xlu0 %5628 }
 0x5a4   : > { %v15295_v55 = vpop.permute.xlu1 %5631  ;;  %v6224_v44 = vrot.slane %v15284_v15, %v17866_v18 }
 0x5a5   : > { %v6228_v11 = vrot.slane %v15295_v55, %v17863_v22  ;;  %v6160_v55 = vrot.slane %v15247_v56, %v17171_v9 }
 0x5a7   : > { %v15302_v5 = vpop.permute.xlu0 %5634  ;;  %v6229_v56 = vsel %vm4038_vm0, %v6228_v11, %v6224_v44  ;;  %v6161_v49 = vsel %vm4052_vm2, %v6160_v55, %v6156_v62  ;;  %v17891_v30 = vld [vmem:[#allocation49_spill] sm:$0xff] }
 0x5a8   : > { %v15318_v63 = vpop.permute.xlu1 %5637  ;;  %v6233_v23 = vrot.slane %v15302_v5, %v17867_v0  ;;  %v6209_v5 = vrot.slane %v15269_v2, %v17870_v28  ;;  %v6166_v2 = vsel %vm4059_vm3, %v6165_v40, %v6161_v49  ;;  %v6214_v11 = vrot.slane %v17891_v30, %v17878_v48 }
 0x5a9   : > { %v6238_v15 = vrot.slane %v15318_v63, %v17171_v9  ;;  %v6195_v63 = vsel %vm4045_vm1, %v6194_v21, %v6190_v7  ;;  %v6171_v14 = vsel %vm4066_vm4, %v6170_v27, %v6166_v2  ;;  %v6307_v21 = vsel %vm4669_vm8, %v6103_v46, %v6306_v36  ;;  %v17909_v36 = vld [vmem:[#allocation71_spill] sm:$0xff] }
 0x5aa   : > { %v6200_v25 = vsel %vm4052_vm2, %v6199_v59, %v6195_v63  ;;  %v6234_v61 = vsel %vm4045_vm1, %v6233_v23, %v6229_v56  ;;  %v6176_v53 = vsel %vm4073_vm5, %v6175_v6, %v6171_v14  ;;  %v17892_v63 = vld [vmem:[#allocation41_spill] sm:$0xff]  ;;  %v17897_v6 = vld [vmem:[#allocation136_spill] sm:$0xff] }
 0x5ab   : > { %v15326_v47 = vpop.permute.xlu0 %5640  ;;  %v6239_v16 = vsel %vm4052_vm2, %v6238_v15, %v6234_v61  ;;  %v6181_v7 = vsel %vm4080_vm6, %v6180_v45, %v6176_v53  ;;  %v17900_v45 = vld [vmem:[#allocation101_spill] sm:$0xff] }
 0x5ac   : > { %v15345_v31 = vpop.permute.xlu1 %5643  ;;  %v6243_v20 = vrot.slane %v15326_v47, %v17868_v12  ;;  %v17907_v53 = vld [vmem:[#allocation9_spill] sm:$0xff] }
 0x5ad   : > { %v6248_v34 = vrot.slane %v15345_v31, %v17870_v28  ;;  %v6205_v31 = vsel %vm4059_vm3, %v6204_v42, %v6200_v25 }
 0x5ae   : > { %v6210_v54 = vsel %vm4066_vm4, %v6209_v5, %v6205_v31  ;;  %v6244_v50 = vsel %vm4059_vm3, %v6243_v20, %v6239_v16  ;;  %v17893_v5 = vld [vmem:[#allocation8_spill] sm:$0xff]  ;;  %v17895_v16 = vld [vmem:[#allocation70_spill] sm:$0xff] }
 0x5af   : > { %v15353_v17 = vpop.permute.xlu0 %5646  ;;  %v6249_v33 = vsel %vm4066_vm4, %v6248_v34, %v6244_v50  ;;  %v17898_v20 = vld [vmem:[#allocation28_spill] sm:$0xff] }
 0x5b0   : > { %v15376_v26 = vpop.permute.xlu1 %5649  ;;  %v6253_v60 = vrot.slane %v15353_v17, %v17878_v48 }
 0x5b1   : > { %v6258_v19 = vrot.slane %v15376_v26, %v17875_v4  ;;  %v6215_v26 = vsel %vm4073_vm5, %v6214_v11, %v6210_v54  ;;  %v17904_v11 = vld [vmem:[#allocation83_spill] sm:$0xff] }
 0x5b3   : > { %v5653_v24 = vpop.permute.xlu0 %5652 }
 0x5b4   : > { %v5656_v10 = vpop.permute.xlu1 %5655  ;;  %v6263_v29 = vrot.slane %v5653_v24, %v17866_v18  ;;  %v6142_v24 = vsel %vm4080_vm6, %v6141_v35, %v6137_v57  ;;  %v6220_v57 = vsel %vm4080_vm6, %v6219_v41, %v6215_v26  ;;  %v6254_v35 = vsel %vm4073_vm5, %v6253_v60, %v6249_v33  ;;  %v17902_v41 = vld [vmem:[#allocation120_spill] sm:$0xff] }
 0x5b5   : > { %v6267_v51 = vrot.slane %v5656_v10, %v17863_v22  ;;  %v6308_v56 = vsel %vm4671_vm9, %v6142_v24, %v6307_v21  ;;  %v6259_v15 = vsel %vm4080_vm6, %v6258_v19, %v6254_v35  ;;  %v17905_v19 = vld [vmem:[#allocation6_spill] sm:$0xff]  ;;  %v17910_v26 = vld [vmem:[#allocation44_spill] sm:$0xff] }
 0x5b6   : > { %v6309_v10 = vsel %vm4673_vm10, %v6181_v7, %v6308_v56  ;;  %v17911_v21 = vld [vmem:[#allocation118_spill] sm:$0xff]  ;;  %v17913_v56 = vld [vmem:[#allocation123_spill] sm:$0xff] }
 0x5b7   : > { %v5659_v43 = vpop.permute.xlu0 %5658  ;;  %v6268_v52 = vsel %vm4038_vm0, %v6267_v51, %v6263_v29  ;;  %v6310_v46 = vsel %vm4675_vm11, %v6220_v57, %v6309_v10  ;;  %v17912_v35 = vld [vmem:[#allocation26_spill] sm:$0xff]  ;;  %v17915_v10 = vld [vmem:[#allocation69_spill] sm:$0xff] }
 0x5b8   : > { %v6272_v8 = vrot.slane %v5659_v43, %v17867_v0  ;;  %v5662_v39 = vpop.permute.xlu1 %5661  ;;  %v6311_v43 = vsel %vm4677_vm12, %v6259_v15, %v6310_v46 }
 0x5b9   : > { %v6277_v37 = vrot.slane %v5662_v39, %v17171_v9 }
 0x5ba   : > { %v6273_v1 = vsel %vm4045_vm1, %v6272_v8, %v6268_v52  ;;  %v17894_v52 = vld [vmem:[#allocation60_spill] sm:$0xff]  ;;  %v17896_v8 = vld [vmem:[#allocation109_spill] sm:$0xff] }
 0x5bb   : > { %v5665_v38 = vpop.permute.xlu0 %5664  ;;  %v6278_v47 = vsel %vm4052_vm2, %v6277_v37, %v6273_v1  ;;  %v17899_v37 = vld [vmem:[#allocation72_spill] sm:$0xff]  ;;  %v17901_v1 = vld [vmem:[#allocation43_spill] sm:$0xff] }
 0x5bc   : > { %v6282_v3 = vrot.slane %v5665_v38, %v17868_v12  ;;  %v5668_v32 = vpop.permute.xlu1 %5667 }
 0x5bd   : > { %v6287_v44 = vrot.slane %v5668_v32, %v17870_v28  ;;  %v17906_v32 = vld [vmem:[#allocation137_spill] sm:$0xff] }
 0x5be   : > { %v6283_v59 = vsel %vm4059_vm3, %v6282_v3, %v6278_v47  ;;  %v17903_v47 = vld [vmem:[#allocation13_spill] sm:$0xff] }
 0x5bf   : > { %v5671_v55 = vpop.permute.xlu0 %5670  ;;  %v6288_v17 = vsel %vm4066_vm4, %v6287_v44, %v6283_v59 }
 0x5c0   : > { %v6292_v58 = vrot.slane %v5671_v55, %v17878_v48  ;;  %v5674_v13 = vpop.permute.xlu1 %5673  ;;  %v17908_v55 = vld [vmem:[#allocation79_spill] sm:$0xff] }
 0x5c1   : > { %v6297_v62 = vrot.slane %v5674_v13, %v17875_v4 }
 0x5c2   : > { %v6293_v23 = vsel %vm4073_vm5, %v6292_v58, %v6288_v17  ;;  %v17914_v58 = vld [vmem:[#allocation27_spill] sm:$0xff] }
 0x5c3   : > { %v6298_v29 = vsel %vm4080_vm6, %v6297_v62, %v6293_v23  ;;  %v17916_v23 = vld [vmem:[#allocation22_spill] sm:$0xff] }
 0x5c4   : > { %v6312_v51 = vsel %vm4679_vm13, %v6298_v29, %v6311_v43  ;;  %v17917_v29 = vld [vmem:[#allocation112_spill] sm:$0xff] }
 0x5c5   : > { %v6318_v40 = vsel %vm4690_vm14, %v6312_v51, 0.0  ;;  %v17918_v51 = vld [vmem:[#allocation119_spill] sm:$0xff] }
 0x5c6   : > { %6319 = vadd.xlane.f32.xlu1 %v6318_v40 }
 0x5ec   : > { %v6317_v49 = vpop.xlane.xlu0 %6316 }
 0x5ed   : > { %9358 = vrcp.f32 %v6317_v49  ;;  %v17919_v49 = vld [vmem:[#allocation45_spill] sm:$0xff] }
 0x5f7   : > { %v15472_v27 = vpop.eup %9358 }
 0x5f8   : > { %v6328_v25 = vrot.slane %v15472_v27, %v17892_v63  ;;  %v6332_v54 = vrot.slane %v15472_v27, %v17901_v1  ;;  %v6336_v59 = vrot.slane %v15472_v27, %v17910_v26 }
 0x5fa   : > { %v6406_v61 = vmul.f32 %v17893_v5, %v6328_v25  ;;  %v6405_v42 = vmul.f32 %v17894_v52, %v6328_v25  ;;  %v6408_v34 = vmul.f32 %v17895_v16, %v6328_v25  ;;  %v6407_v39 = vmul.f32 %v17896_v8, %v6328_v25  ;;  %v17920_v5 = vld [vmem:[#allocation129_spill] sm:$0xff]  ;;  %v17923_v8 = vld [vmem:[#allocation111_spill] sm:$0xff] }
 0x5fb   : > { %v6410_v2 = vmul.f32 %v17897_v6, %v6328_v25  ;;  %v6409_v38 = vmul.f32 %v17898_v20, %v6328_v25  ;;  %v6412_v14 = vmul.f32 %v17899_v37, %v6328_v25  ;;  %v6411_v31 = vmul.f32 %v17900_v45, %v6328_v25  ;;  %v17921_v52 = vld [vmem:[#allocation125_spill] sm:$0xff]  ;;  %v17924_v6 = vld [vmem:[#allocation40_spill] sm:$0xff]  ;;  %v17926_v37 = vld [vmem:[#allocation102_spill] sm:$0xff] }
 0x5fc   : > { %6665 = vperm.xlu1 %7933, %v6406_v61   ;;  %6662 = vperm.xlu0 %7932, %v6405_v42   ;;  %v6414_v50 = vmul.f32 %v17902_v41, %v6332_v54  ;;  %v6413_v30 = vmul.f32 %v17903_v47, %v6332_v54  ;;  %v6416_v33 = vmul.f32 %v17904_v11, %v6332_v54  ;;  %v17922_v16 = vld [vmem:[#allocation77_spill] sm:$0xff]  ;;  %v17925_v20 = vld [vmem:[#allocation88_spill] sm:$0xff]  ;;  %v17927_v45 = vld [vmem:[#allocation67_spill] sm:$0xff] }
 0x5fd   : > { %v6415_v3 = vmul.f32 %v17905_v19, %v6332_v54  ;;  %v6418_v24 = vmul.f32 %v17906_v32, %v6332_v54  ;;  %v6417_v60 = vmul.f32 %v17907_v53, %v6332_v54  ;;  %v6420_v44 = vmul.f32 %v17908_v55, %v6332_v54 }
 0x5fe   : > { %v6419_v7 = vmul.f32 %v17909_v36, %v6332_v54  ;;  %v6422_v57 = vmul.f32 %v17911_v21, %v6336_v59  ;;  %v6421_v17 = vmul.f32 %v17912_v35, %v6336_v59  ;;  %v6424_v15 = vmul.f32 %v17913_v56, %v6336_v59  ;;  %v17928_v54 = vld [vmem:[#allocation29_spill] sm:$0xff]  ;;  %v17939_v56 = vld [vmem:[#allocation76_spill] sm:$0xff] }
 0x5ff   : > { %v6423_v13 = vmul.f32 %v17914_v58, %v6336_v59  ;;  %v6426_v62 = vmul.f32 %v17915_v10, %v6336_v59  ;;  %v6425_v46 = vmul.f32 %v17916_v23, %v6336_v59  ;;  %v6428_v43 = vmul.f32 %v17917_v29, %v6336_v59  ;;  %v17937_v21 = vld [vmem:[#allocation85_spill] sm:$0xff]  ;;  %v17942_v23 = vld [vmem:[#allocation74_spill] sm:$0xff] }
 0x600   : > { %6671 = vperm.xlu1 %7933, %v6408_v34   ;;  %6668 = vperm.xlu0 %7932, %v6407_v39   ;;  %v6427_v40 = vmul.f32 %v17918_v51, %v6336_v59  ;;  %v6340_v25 = vrot.slane %v15472_v27, %v17919_v49  ;;  %v6344_v41 = vrot.slane %v15472_v27, %v17928_v54  ;;  %v17938_v35 = vld [vmem:[#allocation61_spill] sm:$0xff]  ;;  %v17943_v29 = vld [vmem:[#allocation82_spill] sm:$0xff]  ;;  %v17944_v51 = vld [vmem:[#allocation63_spill] sm:$0xff] }
 0x601   : > { %v17940_v58 = vld [vmem:[#allocation89_spill] sm:$0xff] }
 0x602   : > { %v6430_v61 = vmul.f32 %v17920_v5, %v6340_v25  ;;  %v6429_v42 = vmul.f32 %v17921_v52, %v6340_v25  ;;  %v6432_v34 = vmul.f32 %v17922_v16, %v6340_v25  ;;  %v6431_v39 = vmul.f32 %v17923_v8, %v6340_v25  ;;  %v17941_v10 = vld [vmem:[#allocation121_spill] sm:$0xff] }
 0x604   : > { %6677 = vperm.xlu1 %7933, %v6410_v2   ;;  %6674 = vperm.xlu0 %7932, %v6409_v38   ;;  %v6434_v2 = vmul.f32 %v17924_v6, %v6340_v25  ;;  %v6433_v38 = vmul.f32 %v17925_v20, %v6340_v25 }
 0x608   : > { %6683 = vperm.xlu1 %7933, %v6412_v14   ;;  %6680 = vperm.xlu0 %7932, %v6411_v31   ;;  %v6436_v14 = vmul.f32 %v17926_v37, %v6340_v25  ;;  %v6435_v31 = vmul.f32 %v17927_v45, %v6340_v25  ;;  %v17945_v25 = vld [vmem:[#allocation139_spill] sm:$0xff] }
 0x60c   : > { %6689 = vperm.xlu1 %7933, %v6414_v50   ;;  %6686 = vperm.xlu0 %7932, %v6413_v30   ;;  %v17929_v50 = vld [vmem:[#allocation128_spill] sm:$0xff]  ;;  %v17930_v30 = vld [vmem:[#allocation105_spill] sm:$0xff] }
 0x60d   : > { %v6438_v47 = vmul.f32 %v17929_v50, %v6344_v41  ;;  %v6437_v11 = vmul.f32 %v17930_v30, %v6344_v41 }
 0x610   : > { %6695 = vperm.xlu1 %7933, %v6416_v33   ;;  %6692 = vperm.xlu0 %7932, %v6415_v3   ;;  %v17931_v33 = vld [vmem:[#allocation113_spill] sm:$0xff]  ;;  %v17932_v3 = vld [vmem:[#allocation94_spill] sm:$0xff] }
 0x611   : > { %v6440_v19 = vmul.f32 %v17931_v33, %v6344_v41  ;;  %v6439_v32 = vmul.f32 %v17932_v3, %v6344_v41 }
 0x614   : > { %6701 = vperm.xlu1 %7933, %v6418_v24   ;;  %6698 = vperm.xlu0 %7932, %v6417_v60   ;;  %v17933_v24 = vld [vmem:[#allocation53_spill] sm:$0xff] }
 0x615   : > { %v6442_v53 = vmul.f32 %v17933_v24, %v6344_v41  ;;  %v17934_v60 = vld [vmem:[#allocation73_spill] sm:$0xff] }
 0x616   : > { %v6441_v55 = vmul.f32 %v17934_v60, %v6344_v41 }
 0x618   : > { %6707 = vperm.xlu1 %7933, %v6420_v44   ;;  %6704 = vperm.xlu0 %7932, %v6419_v7   ;;  %v17935_v44 = vld [vmem:[#allocation65_spill] sm:$0xff]  ;;  %v17936_v7 = vld [vmem:[#allocation56_spill] sm:$0xff] }
 0x619   : > { %v6444_v36 = vmul.f32 %v17935_v44, %v6344_v41  ;;  %v6443_v59 = vmul.f32 %v17936_v7, %v6344_v41  ;;  %v17953_v41 = vld [vmem:[#allocation54_spill] sm:$0xff] }
 0x61c   : > { %6713 = vperm.xlu1 %7933, %v6422_v57   ;;  %6710 = vperm.xlu0 %7932, %v6421_v17   ;;  %v6348_v57 = vrot.slane %v15472_v27, %v17937_v21 }
 0x61e   : > { %v6446_v17 = vmul.f32 %v17938_v35, %v6348_v57  ;;  %v6451_v5 = vmul.f32 %v17945_v25, %v6348_v57  ;;  %v17962_v35 = vld [vmem:[#allocation87_spill] sm:$0xff] }
 0x620   : > { %6719 = vperm.xlu1 %7933, %v6424_v15   ;;  %6716 = vperm.xlu0 %7932, %v6423_v13   ;;  %v6445_v15 = vmul.f32 %v17939_v56, %v6348_v57  ;;  %v6448_v13 = vmul.f32 %v17940_v58, %v6348_v57  ;;  %v17963_v56 = vld [vmem:[#allocation51_spill] sm:$0xff] }
 0x624   : > { %6725 = vperm.xlu1 %7933, %v6426_v62   ;;  %6722 = vperm.xlu0 %7932, %v6425_v46   ;;  %v6447_v62 = vmul.f32 %v17941_v10, %v6348_v57  ;;  %v6450_v46 = vmul.f32 %v17942_v23, %v6348_v57 }
 0x628   : > { %6731 = vperm.xlu1 %7933, %v6428_v43   ;;  %6728 = vperm.xlu0 %7932, %v6427_v40   ;;  %v6449_v43 = vmul.f32 %v17943_v29, %v6348_v57  ;;  %v6452_v40 = vmul.f32 %v17944_v51, %v6348_v57 }
 0x62c   : > { %6737 = vperm.xlu1 %7933, %v6430_v61   ;;  %6734 = vperm.xlu0 %7932, %v6429_v42   ;;  %v17946_v61 = vld [vmem:[#allocation108_spill] sm:$0xff] }
 0x62d   : > { %v6352_v52 = vrot.slane %v15472_v27, %v17946_v61  ;;  %v17947_v42 = vld [vmem:[#allocation64_spill] sm:$0xff] }
 0x62f   : > { %v6454_v16 = vmul.f32 %v17947_v42, %v6352_v52  ;;  %v6460_v50 = vmul.f32 %v17953_v41, %v6352_v52 }
 0x630   : > { %6743 = vperm.xlu1 %7933, %v6432_v34   ;;  %6740 = vperm.xlu0 %7932, %v6431_v39   ;;  %v17948_v34 = vld [vmem:[#allocation135_spill] sm:$0xff]  ;;  %v17949_v39 = vld [vmem:[#allocation134_spill] sm:$0xff] }
 0x631   : > { %v6453_v8 = vmul.f32 %v17948_v34, %v6352_v52  ;;  %v6456_v6 = vmul.f32 %v17949_v39, %v6352_v52 }
 0x634   : > { %6749 = vperm.xlu1 %7933, %v6434_v2   ;;  %6746 = vperm.xlu0 %7932, %v6433_v38   ;;  %v17950_v2 = vld [vmem:[#allocation110_spill] sm:$0xff] }
 0x635   : > { %v6455_v20 = vmul.f32 %v17950_v2, %v6352_v52  ;;  %v17951_v38 = vld [vmem:[#allocation122_spill] sm:$0xff] }
 0x636   : > { %v6458_v37 = vmul.f32 %v17951_v38, %v6352_v52 }
 0x638   : > { %6755 = vperm.xlu1 %7933, %v6436_v14   ;;  %6752 = vperm.xlu0 %7932, %v6435_v31   ;;  %v17952_v14 = vld [vmem:[#allocation138_spill] sm:$0xff] }
 0x639   : > { %v6457_v45 = vmul.f32 %v17952_v14, %v6352_v52 }
 0x63c   : > { %6761 = vperm.xlu1 %7933, %v6438_v47   ;;  %6758 = vperm.xlu0 %7932, %v6437_v11   ;;  %v17954_v47 = vld [vmem:[#allocation36_spill] sm:$0xff]  ;;  %v17955_v11 = vld [vmem:[#allocation81_spill] sm:$0xff] }
 0x63d   : > { %v6459_v30 = vmul.f32 %v17954_v47, %v6352_v52  ;;  %v6356_v33 = vrot.slane %v15472_v27, %v17955_v11 }
 0x640   : > { %6767 = vperm.xlu1 %7933, %v6440_v19   ;;  %6764 = vperm.xlu0 %7932, %v6439_v32   ;;  %v17956_v19 = vld [vmem:[#allocation124_spill] sm:$0xff] }
 0x641   : > { %v6462_v3 = vmul.f32 %v17956_v19, %v6356_v33  ;;  %v17957_v32 = vld [vmem:[#allocation84_spill] sm:$0xff]  ;;  %v17974_v19 = vld [vmem:[#allocation86_spill] sm:$0xff] }
 0x642   : > { %v6461_v24 = vmul.f32 %v17957_v32, %v6356_v33  ;;  %v17975_v32 = vld [vmem:[#allocation117_spill] sm:$0xff] }
 0x644   : > { %6773 = vperm.xlu1 %7933, %v6442_v53   ;;  %6770 = vperm.xlu0 %7932, %v6441_v55   ;;  %v17958_v53 = vld [vmem:[#allocation104_spill] sm:$0xff] }
 0x645   : > { %v6464_v60 = vmul.f32 %v17958_v53, %v6356_v33  ;;  %v17959_v55 = vld [vmem:[#allocation80_spill] sm:$0xff] }
 0x646   : > { %v6463_v44 = vmul.f32 %v17959_v55, %v6356_v33 }
 0x648   : > { %6779 = vperm.xlu1 %7933, %v6444_v36   ;;  %6776 = vperm.xlu0 %7932, %v6443_v59   ;;  %v17960_v36 = vld [vmem:[#allocation130_spill] sm:$0xff]  ;;  %v17961_v59 = vld [vmem:[#allocation95_spill] sm:$0xff] }
 0x649   : > { %v6466_v7 = vmul.f32 %v17960_v36, %v6356_v33  ;;  %v6465_v57 = vmul.f32 %v17961_v59, %v6356_v33 }
 0x64c   : > { %6785 = vperm.xlu1 %7933, %v6446_v17   ;;  %6782 = vperm.xlu0 %7932, %v6445_v15   ;;  %v6468_v17 = vmul.f32 %v17962_v35, %v6356_v33  ;;  %v6467_v15 = vmul.f32 %v17963_v56, %v6356_v33 }
 0x650   : > { %6791 = vperm.xlu1 %7933, %v6448_v13   ;;  %6788 = vperm.xlu0 %7932, %v6447_v62   ;;  %v17964_v13 = vld [vmem:[#allocation68_spill] sm:$0xff]  ;;  %v17965_v62 = vld [vmem:[#allocation78_spill] sm:$0xff] }
 0x653   : > { %v6320_v31 = vpop.xlane.xlu1 %6319 }
 0x654   : > { %6797 = vperm.xlu1 %7933, %v6450_v46   ;;  %6794 = vperm.xlu0 %7932, %v6449_v43   ;;  %9360 = vrcp.f32 %v6320_v31  ;;  %v17966_v43 = vld [vmem:[#allocation66_spill] sm:$0xff]  ;;  %v17972_v31 = vld [vmem:[#allocation91_spill] sm:$0xff] }
 0x658   : > { %6803 = vperm.xlu1 %7933, %v6452_v40   ;;  %6800 = vperm.xlu0 %7932, %v6451_v5   ;;  %v17967_v40 = vld [vmem:[#allocation90_spill] sm:$0xff] }
 0x65c   : > { %6809 = vperm.xlu1 %7933, %v6454_v16   ;;  %6806 = vperm.xlu0 %7932, %v6453_v8   ;;  %v17969_v16 = vld [vmem:[#allocation100_spill] sm:$0xff] }
 0x65e   : > { %v15552_v27 = vpop.eup %9360 }
 0x65f   : > { %v6360_v58 = vrot.slane %v15552_v27, %v17892_v63  ;;  %v17968_v63 = vld [vmem:[#allocation99_spill] sm:$0xff] }
 0x660   : > { %6815 = vperm.xlu1 %7933, %v6456_v6   ;;  %6812 = vperm.xlu0 %7932, %v6455_v20   ;;  %v17970_v6 = vld [vmem:[#allocation57_spill] sm:$0xff] }
 0x661   : > { %v6470_v10 = vmul.f32 %v17964_v13, %v6360_v58  ;;  %v6469_v23 = vmul.f32 %v17965_v62, %v6360_v58  ;;  %v6472_v51 = vmul.f32 %v17966_v43, %v6360_v58  ;;  %v6471_v25 = vmul.f32 %v17967_v40, %v6360_v58  ;;  %v17971_v20 = vld [vmem:[#allocation133_spill] sm:$0xff] }
 0x662   : > { %v6474_v42 = vmul.f32 %v17968_v63, %v6360_v58  ;;  %v6473_v34 = vmul.f32 %v17969_v16, %v6360_v58  ;;  %v6476_v2 = vmul.f32 %v17970_v6, %v6360_v58  ;;  %v6475_v38 = vmul.f32 %v17971_v20, %v6360_v58  ;;  %v17984_v6 = vld [vmem:[#allocation35_spill] sm:$0xff]  ;;  %v17985_v20 = vld [vmem:[#allocation30_spill] sm:$0xff] }
 0x664   : > { %6821 = vperm.xlu1 %7933, %v6458_v37   ;;  %6818 = vperm.xlu0 %7932, %v6457_v45   ;;  %v6364_v37 = vrot.slane %v15552_v27, %v17901_v1 }
 0x666   : > { %v6478_v41 = vmul.f32 %v17972_v31, %v6364_v37  ;;  %v6479_v1 = vmul.f32 %v17975_v32, %v6364_v37 }
 0x668   : > { %6827 = vperm.xlu1 %7933, %v6460_v50   ;;  %6824 = vperm.xlu0 %7932, %v6459_v30   ;;  %v17973_v50 = vld [vmem:[#allocation106_spill] sm:$0xff] }
 0x669   : > { %v6477_v47 = vmul.f32 %v17973_v50, %v6364_v37 }
 0x66c   : > { %6833 = vperm.xlu1 %7933, %v6462_v3   ;;  %6830 = vperm.xlu0 %7932, %v6461_v24   ;;  %v6480_v3 = vmul.f32 %v17974_v19, %v6364_v37 }
 0x670   : > { %6839 = vperm.xlu1 %7933, %v6464_v60   ;;  %6836 = vperm.xlu0 %7932, %v6463_v44   ;;  %v17976_v60 = vld [vmem:[#allocation97_spill] sm:$0xff]  ;;  %v17977_v44 = vld [vmem:[#allocation114_spill] sm:$0xff] }
 0x671   : > { %v6482_v55 = vmul.f32 %v17976_v60, %v6364_v37  ;;  %v6481_v36 = vmul.f32 %v17977_v44, %v6364_v37  ;;  %v17988_v60 = vld [vmem:[#allocation33_spill] sm:$0xff]  ;;  %v17989_v44 = vld [vmem:[#allocation31_spill] sm:$0xff] }
 0x674   : > { %6845 = vperm.xlu1 %7933, %v6466_v7   ;;  %6842 = vperm.xlu0 %7932, %v6465_v57   ;;  %v17978_v57 = vld [vmem:[#allocation92_spill] sm:$0xff] }
 0x675   : > { %v6484_v35 = vmul.f32 %v17978_v57, %v6364_v37 }
 0x678   : > { %6851 = vperm.xlu1 %7933, %v6468_v17   ;;  %6848 = vperm.xlu0 %7932, %v6467_v15   ;;  %v17979_v17 = vld [vmem:[#allocation132_spill] sm:$0xff]  ;;  %v6368_v15 = vrot.slane %v15552_v27, %v17910_v26 }
 0x679   : > { %v6483_v56 = vmul.f32 %v17979_v17, %v6364_v37 }
 0x67b   : > { %v15560_v46 = vpop.permute.xlu1 %6665  ;;  %v15562_v29 = vpop.permute.xlu0 %6662 }
 0x67c   : > { %6857 = vperm.xlu1 %7933, %v6470_v10   ;;  %6854 = vperm.xlu0 %7932, %v6469_v23   ;;  %v17980_v10 = vld [vmem:[#allocation98_spill] sm:$0xff] }
 0x67d   : > { %v6486_v62 = vmul.f32 %v17980_v10, %v6368_v15  ;;  %v17981_v23 = vld [vmem:[#allocation62_spill] sm:$0xff] }
 0x67e   : > { %v6485_v43 = vmul.f32 %v17981_v23, %v6368_v15  ;;  %v17991_v10 = vld [vmem:[#allocation10_spill] sm:$0xff] }
 0x67f   : > { %v15566_v5 = vpop.permute.xlu1 %6671  ;;  %v15568_v52 = vpop.permute.xlu0 %6668 }
 0x680   : > { %6863 = vperm.xlu1 %7933, %v6472_v51   ;;  %6860 = vperm.xlu0 %7932, %v6471_v25   ;;  %v17982_v25 = vld [vmem:[#allocation93_spill] sm:$0xff] }
 0x681   : > { %v6488_v63 = vmul.f32 %v17982_v25, %v6368_v15 }
 0x683   : > { %v15572_v8 = vpop.permute.xlu1 %6677  ;;  %v15574_v39 = vpop.permute.xlu0 %6674 }
 0x684   : > { %6869 = vperm.xlu1 %7933, %v6474_v42   ;;  %6866 = vperm.xlu0 %7932, %v6473_v34   ;;  %v17983_v42 = vld [vmem:[#allocation34_spill] sm:$0xff] }
 0x685   : > { %v6487_v26 = vmul.f32 %v17983_v42, %v6368_v15 }
 0x687   : > { %v15580_v14 = vpop.permute.xlu1 %6683  ;;  %v15582_v45 = vpop.permute.xlu0 %6680 }
 0x688   : > { %6875 = vperm.xlu1 %7933, %v6476_v2   ;;  %6872 = vperm.xlu0 %7932, %v6475_v38   ;;  %v6490_v2 = vmul.f32 %v17984_v6, %v6368_v15  ;;  %v6489_v38 = vmul.f32 %v17985_v20, %v6368_v15  ;;  %v17992_v6 = vld [vmem:[#allocation25_spill] sm:$0xff]  ;;  %v17993_v20 = vld [vmem:[#allocation96_spill] sm:$0xff] }
 0x68b   : > { %v15586_v30 = vpop.permute.xlu1 %6689  ;;  %v15588_v33 = vpop.permute.xlu0 %6686 }
 0x68c   : > { %6881 = vperm.xlu1 %7933, %v6478_v41   ;;  %6878 = vperm.xlu0 %7932, %v6477_v47   ;;  %v17986_v41 = vld [vmem:[#allocation23_spill] sm:$0xff] }
 0x68d   : > { %v6492_v50 = vmul.f32 %v17986_v41, %v6368_v15  ;;  %v17987_v47 = vld [vmem:[#allocation15_spill] sm:$0xff] }
 0x68e   : > { %v6491_v19 = vmul.f32 %v17987_v47, %v6368_v15  ;;  %v17990_v15 = vld [vmem:[#allocation131_spill] sm:$0xff] }
 0x68f   : > { %v15592_v24 = vpop.permute.xlu1 %6695  ;;  %v15594_v53 = vpop.permute.xlu0 %6692 }
 0x690   : > { %6887 = vperm.xlu1 %7933, %v6480_v3   ;;  %6884 = vperm.xlu0 %7932, %v6479_v1   ;;  %v6372_v3 = vrot.slane %v15552_v27, %v17919_v49 }
 0x692   : > { %v6496_v49 = vmul.f32 %v17990_v15, %v6372_v3 }
 0x693   : > { %v15598_v7 = vpop.permute.xlu1 %6701  ;;  %v15600_v59 = vpop.permute.xlu0 %6698 }
 0x694   : > { %6893 = vperm.xlu1 %7933, %v6482_v55   ;;  %6890 = vperm.xlu0 %7932, %v6481_v36   ;;  %v6494_v55 = vmul.f32 %v17988_v60, %v6372_v3  ;;  %v6493_v36 = vmul.f32 %v17989_v44, %v6372_v3  ;;  %v17994_v44 = vld [vmem:[#allocation115_spill] sm:$0xff] }
 0x697   : > { %v15606_v58 = vpop.permute.xlu1 %6707  ;;  %v15608_v13 = vpop.permute.xlu0 %6704 }
 0x698   : > { %6899 = vperm.xlu1 %7933, %v6484_v35   ;;  %6896 = vperm.xlu0 %7932, %v6483_v56  }
 0x69b   : > { %v15612_v51 = vpop.permute.xlu1 %6713  ;;  %v15614_v40 = vpop.permute.xlu0 %6710 }
 0x69c   : > { %6905 = vperm.xlu1 %7933, %v6486_v62   ;;  %6902 = vperm.xlu0 %7932, %v6485_v43   ;;  %v6495_v62 = vmul.f32 %v17991_v10, %v6372_v3  ;;  %v17996_v10 = vld [vmem:[#allocation18_spill] sm:$0xff] }
 0x69f   : > { %v15618_v16 = vpop.permute.xlu1 %6719  ;;  %v15620_v34 = vpop.permute.xlu0 %6716 }
 0x6a0   : > { %6911 = vperm.xlu1 %7933, %v6488_v63   ;;  %6908 = vperm.xlu0 %7932, %v6487_v26  }
 0x6a3   : > { %v15624_v37 = vpop.permute.xlu1 %6725  ;;  %v15626_v31 = vpop.permute.xlu0 %6722 }
 0x6a4   : > { %6917 = vperm.xlu1 %7933, %v6490_v2   ;;  %6914 = vperm.xlu0 %7932, %v6489_v38   ;;  %v6498_v2 = vmul.f32 %v17992_v6, %v6372_v3  ;;  %v6497_v38 = vmul.f32 %v17993_v20, %v6372_v3  ;;  %v18000_v20 = vld [vmem:[#allocation24_spill] sm:$0xff] }
 0x6a7   : > { %v15632_v32 = vpop.permute.xlu1 %6731  ;;  %v15634_v1 = vpop.permute.xlu0 %6728 }
 0x6a8   : > { %6923 = vperm.xlu1 %7933, %v6492_v50   ;;  %6920 = vperm.xlu0 %7932, %v6491_v19  }
 0x6ab   : > { %v6738_v57 = vpop.permute.xlu1 %6737  ;;  %v6735_v35 = vpop.permute.xlu0 %6734 }
 0x6ac   : > { %6929 = vperm.xlu1 %7933, %v6494_v55   ;;  %6926 = vperm.xlu0 %7932, %v6493_v36   ;;  %v7169_v17 = vrot.slane %v6738_v57, %v17863_v22  ;;  %v7165_v56 = vrot.slane %v6735_v35, %v17866_v18  ;;  %v6500_v36 = vmul.f32 %v17994_v44, %v6372_v3  ;;  %v17995_v57 = vld [vmem:[#allocation116_spill] sm:$0xff]  ;;  %v18003_v44 = vld [vmem:[#allocation17_spill] sm:$0xff] }
 0x6ad   : > { %v6499_v35 = vmul.f32 %v17995_v57, %v6372_v3  ;;  %v15685_v57 = vrot.slane %v15552_v27, %v17937_v21  ;;  %v18007_v21 = vld [vmem:[#allocation142_spill] sm:$0xff] }
 0x6ae   : > { %v7170_v63 = vsel %vm4038_vm0, %v7169_v17, %v7165_v56  ;;  %v6376_v17 = vrot.slane %v15552_v27, %v17928_v54  ;;  %v17998_v54 = vld [vmem:[#allocation14_spill] sm:$0xff] }
 0x6af   : > { %v6744_v23 = vpop.permute.xlu1 %6743  ;;  %v6741_v43 = vpop.permute.xlu0 %6740 }
 0x6b0   : > { %v7174_v25 = vrot.slane %v6741_v43, %v17867_v0  ;;  %6935 = vperm.xlu1 %7933, %v6496_v49   ;;  %6932 = vperm.xlu0 %7932, %v6495_v62   ;;  %v7179_v42 = vrot.slane %v6744_v23, %v17171_v9  ;;  %v6502_v62 = vmul.f32 %v17996_v10, %v6376_v17  ;;  %v17997_v23 = vld [vmem:[#allocation7_spill] sm:$0xff] }
 0x6b1   : > { %v6501_v43 = vmul.f32 %v17997_v23, %v6376_v17  ;;  %v6504_v3 = vmul.f32 %v17998_v54, %v6376_v17 }
 0x6b2   : > { %v7175_v26 = vsel %vm4045_vm1, %v7174_v25, %v7170_v63 }
 0x6b3   : > { %v6750_v41 = vpop.permute.xlu1 %6749  ;;  %v6747_v50 = vpop.permute.xlu0 %6746  ;;  %v7180_v60 = vsel %vm4052_vm2, %v7179_v42, %v7175_v26  ;;  %v17999_v42 = vld [vmem:[#allocation19_spill] sm:$0xff] }
 0x6b4   : > { %v7189_v47 = vrot.slane %v6750_v41, %v17870_v28  ;;  %v7184_v19 = vrot.slane %v6747_v50, %v17868_v12  ;;  %6941 = vperm.xlu1 %7933, %v6498_v2   ;;  %6938 = vperm.xlu0 %7932, %v6497_v38   ;;  %v6503_v26 = vmul.f32 %v17999_v42, %v6376_v17  ;;  %v18001_v41 = vld [vmem:[#allocation21_spill] sm:$0xff] }
 0x6b5   : > { %v6506_v38 = vmul.f32 %v18000_v20, %v6376_v17  ;;  %v6505_v50 = vmul.f32 %v18001_v41, %v6376_v17 }
 0x6b6   : > { %v7185_v55 = vsel %vm4059_vm3, %v7184_v19, %v7180_v60  ;;  %v18002_v60 = vld [vmem:[#allocation12_spill] sm:$0xff] }
 0x6b7   : > { %v15656_v56 = vpop.permute.xlu1 %6755  ;;  %v15659_v15 = vsel %vm4066_vm4, %v7189_v47, %v7185_v55  ;;  %v15661_v49 = vpop.permute.xlu0 %6752  ;;  %v6508_v55 = vmul.f32 %v18002_v60, %v6376_v17  ;;  %v18009_v60 = vld [vmem:[#allocation147_spill] sm:$0xff] }
 0x6b8   : > { %6947 = vperm.xlu1 %7933, %v6500_v36   ;;  %6944 = vperm.xlu0 %7932, %v6499_v35   ;;  %v6507_v36 = vmul.f32 %v18003_v44, %v6376_v17  ;;  %v6512_v17 = vmul.f32 %v18007_v21, %v15685_v57  ;;  %v18010_v44 = vld [vmem:[#allocation143_spill] sm:$0xff]  ;;  %v18011_v21 = vld [vmem:[#allocation148_spill] sm:$0xff] }
 0x6bb   : > { %v15665_v25 = vpop.permute.xlu1 %6761  ;;  %v15667_v63 = vpop.permute.xlu0 %6758 }
 0x6bc   : > { %6953 = vperm.xlu1 %7933, %v6502_v62   ;;  %6950 = vperm.xlu0 %7932, %v6501_v43   ;;  %v18005_v62 = vld [vmem:[#allocation52_spill] sm:$0xff]  ;;  %v18006_v43 = vld [vmem:[#allocation141_spill] sm:$0xff] }
 0x6bd   : > { %v6510_v23 = vmul.f32 %v18005_v62, %v15685_v57  ;;  %v6509_v54 = vmul.f32 %v18006_v43, %v15685_v57  ;;  %v7052_v43 = vrot.slane %v15560_v46, %v17863_v22 }
 0x6bf   : > { %v15671_v6 = vpop.permute.xlu1 %6767  ;;  %v15673_v2 = vpop.permute.xlu0 %6764 }
 0x6c0   : > { %6959 = vperm.xlu1 %7933, %v6504_v3   ;;  %6956 = vperm.xlu0 %7932, %v6503_v26   ;;  %v18008_v26 = vld [vmem:[#allocation55_spill] sm:$0xff] }
 0x6c1   : > { %v6511_v20 = vmul.f32 %v18008_v26, %v15685_v57  ;;  %v18012_v26 = vld [vmem:[#allocation11_spill] sm:$0xff] }
 0x6c3   : > { %v15677_v47 = vpop.permute.xlu1 %6773  ;;  %v15679_v19 = vpop.permute.xlu0 %6770 }
 0x6c4   : > { %6965 = vperm.xlu1 %7933, %v6506_v38   ;;  %6962 = vperm.xlu0 %7932, %v6505_v50   ;;  %v15705_v38 = vrot.slane %v15552_v27, %v17946_v61  ;;  %v15721_v61 = vrot.slane %v15552_v27, %v17955_v11  ;;  %v7087_v11 = vrot.slane %v15588_v33, %v17866_v18 }
 0x6c7   : > { %v15687_v35 = vpop.permute.xlu1 %6779  ;;  %v15689_v10 = vpop.permute.xlu0 %6776 }
 0x6c8   : > { %18004 = vst [vmem:[#allocation48_spill] sm:$0xff] %v15687_v35  ;;  %6971 = vperm.xlu1 %7933, %v6508_v55   ;;  %6968 = vperm.xlu0 %7932, %v6507_v36   ;;  %v6517_v55 = vmul.f32 %v18009_v60, %v15705_v38  ;;  %v6513_v36 = vmul.f32 %v18010_v44, %v15685_v57 }
 0x6c9   : > { %v7057_v60 = vrot.slane %v15568_v52, %v17867_v0  ;;  %v7130_v44 = vrot.slane %v15612_v51, %v17863_v22  ;;  %v7135_v52 = vrot.slane %v15620_v34, %v17867_v0  ;;  %v18016_v51 = vld [vmem:[#allocation155_spill] sm:$0xff]  ;;  %v7067_v34 = vrot.slane %v15574_v39, %v17868_v12 }
 0x6ca   : > { %v6527_v35 = vmul.f32 %v18016_v51, %v15721_v61  ;;  %v7106_v39 = vrot.slane %v15600_v59, %v17868_v12  ;;  %v7072_v59 = vrot.slane %v15572_v8, %v17870_v28 }
 0x6cb   : > { %v15695_v3 = vpop.permute.xlu1 %6785  ;;  %v15697_v42 = vpop.permute.xlu0 %6782 }
 0x6cc   : > { %6977 = vperm.xlu1 %7933, %v6510_v23   ;;  %6974 = vperm.xlu0 %7932, %v6509_v54   ;;  %v7048_v54 = vrot.slane %v15562_v29, %v17866_v18  ;;  %v7096_v29 = vrot.slane %v15594_v53, %v17867_v0  ;;  %v7062_v53 = vrot.slane %v15566_v5, %v17171_v9 }
 0x6cf   : > { %v15707_v41 = vpop.permute.xlu1 %6791  ;;  %v15709_v50 = vpop.permute.xlu0 %6788 }
 0x6d0   : > { %6983 = vperm.xlu1 %7933, %v6512_v17   ;;  %6980 = vperm.xlu0 %7932, %v6511_v20   ;;  %v6519_v17 = vmul.f32 %v18011_v21, %v15705_v38  ;;  %v6518_v20 = vmul.f32 %v18012_v26, %v15705_v38  ;;  %v18015_v21 = vld [vmem:[#allocation154_spill] sm:$0xff] }
 0x6d1   : > { %v6525_v26 = vmul.f32 %v18015_v21, %v15721_v61  ;;  %v7101_v21 = vrot.slane %v15592_v24, %v17171_v9  ;;  %v7145_v24 = vrot.slane %v15626_v31, %v17868_v12  ;;  %v7077_v31 = vrot.slane %v15582_v45, %v17878_v48 }
 0x6d2   : > { %v7116_v45 = vrot.slane %v15608_v13, %v17878_v48  ;;  %v7082_v13 = vrot.slane %v15580_v14, %v17875_v4 }
 0x6d3   : > { %v15715_v62 = vpop.permute.xlu1 %6797  ;;  %v15717_v23 = vpop.permute.xlu0 %6794 }
 0x6d4   : > { %6998 = vperm.xlu1 %7933, %v6517_v55   ;;  %6986 = vperm.xlu0 %7932, %v6513_v36   ;;  %v7091_v55 = vrot.slane %v15586_v30, %v17863_v22  ;;  %v7126_v36 = vrot.slane %v15614_v40, %v17866_v18  ;;  %v18014_v30 = vld [vmem:[#allocation38_spill] sm:$0xff]  ;;  %v18017_v40 = vld [vmem:[#allocation149_spill] sm:$0xff] }
 0x6d5   : > { %v6526_v33 = vmul.f32 %v18014_v30, %v15721_v61 }
 0x6d6   : > { %v7092_v30 = vsel %vm4038_vm0, %v7091_v55, %v7087_v11  ;;  %v7131_v51 = vsel %vm4038_vm0, %v7130_v44, %v7126_v36  ;;  %v18018_v55 = vld [vmem:[#allocation150_spill] sm:$0xff] }
 0x6d7   : > { %v15737_v27 = vpop.permute.xlu1 %6803  ;;  %v15739_v46 = vpop.permute.xlu0 %6800  ;;  %v7097_v5 = vsel %vm4045_vm1, %v7096_v29, %v7092_v30  ;;  %v6521_v11 = vmul.f32 %v18018_v55, %v15705_v38  ;;  %v18019_v29 = vld [vmem:[#allocation144_spill] sm:$0xff]  ;;  %v7150_v55 = vrot.slane %v15624_v37, %v17870_v28 }
 0x6d8   : > { %18013 = vst [vmem:[#allocation126_spill] sm:$0xff] %v15737_v27  ;;  %7004 = vperm.xlu1 %7933, %v6519_v17   ;;  %7001 = vperm.xlu0 %7932, %v6518_v20   ;;  %v7053_v27 = vsel %vm4038_vm0, %v7052_v43, %v7048_v54  ;;  %v6520_v17 = vmul.f32 %v18017_v40, %v15705_v38 }
 0x6d9   : > { %v7058_v20 = vsel %vm4045_vm1, %v7057_v60, %v7053_v27  ;;  %v7140_v40 = vrot.slane %v15618_v16, %v17171_v9  ;;  %v7136_v60 = vsel %vm4045_vm1, %v7135_v52, %v7131_v51  ;;  %v6514_v44 = vmul.f32 %v18019_v29, %v15685_v57  ;;  %v18020_v16 = vld [vmem:[#allocation145_spill] sm:$0xff] }
 0x6da   : > { %v7063_v27 = vsel %vm4052_vm2, %v7062_v53, %v7058_v20  ;;  %v6515_v36 = vmul.f32 %v18020_v16, %v15685_v57  ;;  %v7102_v30 = vsel %vm4052_vm2, %v7101_v21, %v7097_v5  ;;  %v7111_v51 = vrot.slane %v15598_v7, %v17870_v28  ;;  %v18022_v5 = vld [vmem:[#allocation39_spill] sm:$0xff]  ;;  %v18026_v16 = vld [vmem:[#allocation153_spill] sm:$0xff] }
 0x6db   : > { %v15766_v43 = vpop.permute.xlu1 %6809  ;;  %v15768_v54 = vpop.permute.xlu0 %6806  ;;  %v7068_v52 = vsel %vm4059_vm3, %v7067_v34, %v7063_v27  ;;  %v7141_v29 = vsel %vm4052_vm2, %v7140_v40, %v7136_v60  ;;  %v7107_v8 = vsel %vm4059_vm3, %v7106_v39, %v7102_v30  ;;  %v7155_v21 = vrot.slane %v15634_v1, %v17878_v48  ;;  %v18023_v27 = vld [vmem:[#allocation151_spill] sm:$0xff]  ;;  %v18024_v40 = vld [vmem:[#allocation152_spill] sm:$0xff]  ;;  %v18027_v30 = vld [vmem:[#allocation42_spill] sm:$0xff] }
 0x6dc   : > { %7025 = vperm.xlu1 %7933, %v6526_v33   ;;  %7022 = vperm.xlu0 %7932, %v6525_v26   ;;  %v18021_v33 = vld [vmem:[#allocation37_spill] sm:$0xff]  ;;  %v7146_v34 = vsel %vm4059_vm3, %v7145_v24, %v7141_v29  ;;  %v6529_v7 = vmul.f32 %v18022_v5, %v15721_v61  ;;  %v6522_v37 = vmul.f32 %v18023_v27, %v15705_v38 }
 0x6dd   : > { %v6528_v26 = vmul.f32 %v18021_v33, %v15721_v61  ;;  %v7073_v60 = vsel %vm4066_vm4, %v7072_v59, %v7068_v52  ;;  %v15830_v33 = vmul.f32 %v18026_v16, %v15705_v38  ;;  %v15834_v29 = vmul.f32 %v18027_v30, %v15721_v61 }
 0x6de   : > { %v7112_v5 = vsel %vm4066_vm4, %v7111_v51, %v7107_v8  ;;  %v7151_v14 = vsel %vm4066_vm4, %v7150_v55, %v7146_v34  ;;  %v7121_v59 = vrot.slane %v15606_v58, %v17875_v4  ;;  %v7252_v51 = vrot.slane %v15709_v50, %v17867_v0 }
 0x6df   : > { %v15794_v53 = vpop.permute.xlu1 %6815  ;;  %v15796_v20 = vpop.permute.xlu0 %6812  ;;  %v7117_v52 = vsel %vm4073_vm5, %v7116_v45, %v7112_v5  ;;  %v7156_v27 = vsel %vm4073_vm5, %v7155_v21, %v7151_v14  ;;  %v7199_v34 = vrot.slane %v15656_v56, %v17875_v4  ;;  %v7228_v5 = vrot.slane %v15677_v47, %v17870_v28 }
 0x6e0   : > { %7028 = vperm.xlu1 %7933, %v6527_v35   ;;  %7007 = vperm.xlu0 %7932, %v6520_v17   ;;  %v15815_v35 = vmul.f32 %v18024_v40, %v15705_v38  ;;  %v18025_v17 = vld [vmem:[#allocation146_spill] sm:$0xff]  ;;  %v7160_v38 = vrot.slane %v15632_v32, %v17875_v4  ;;  %v7208_v40 = vrot.slane %v15665_v25, %v17863_v22 }
 0x6e1   : > { %v15819_v39 = vmul.f32 %v18025_v17, %v15685_v57  ;;  %v7078_v57 = vsel %vm4073_vm5, %v7077_v31, %v7073_v60  ;;  %v7204_v31 = vrot.slane %v15667_v63, %v17866_v18  ;;  %v7213_v32 = vrot.slane %v15673_v2, %v17867_v0  ;;  %v18028_v63 = vld [vmem:[#allocation58_spill] sm:$0xff] }
 0x6e2   : > { %v15854_v58 = vsel %vm4080_vm6, %v7082_v13, %v7078_v57  ;;  %v15866_v8 = vmul.f32 %v18028_v63, %v15721_v61  ;;  %v7282_v2 = vrot.slane %v15768_v54, %v17866_v18  ;;  %v7122_v50 = vsel %vm4080_vm6, %v7121_v59, %v7117_v52  ;;  %v18030_v63 = vld [vmem:[#allocation126_spill] sm:$0xff] }
 0x6e3   : > { %v15824_v1 = vpop.permute.xlu1 %6821  ;;  %v15826_v24 = vpop.permute.xlu0 %6818  ;;  %v7161_v45 = vsel %vm4080_vm6, %v7160_v38, %v7156_v27  ;;  %v7291_v21 = vrot.slane %v15796_v20, %v17867_v0  ;;  %v7257_v54 = vrot.slane %v15707_v41, %v17171_v9  ;;  %v7262_v20 = vrot.slane %v15717_v23, %v17868_v12 }
 0x6e4   : > { %7010 = vperm.xlu1 %7933, %v6521_v11   ;;  %6989 = vperm.xlu0 %7932, %v6514_v44   ;;  %v7247_v11 = vrot.slane %v15695_v3, %v17863_v22  ;;  %v7243_v44 = vrot.slane %v15697_v42, %v17866_v18  ;;  %v7194_v3 = vrot.slane %v15661_v49, %v17878_v48 }
 0x6e5   : > { %v7286_v42 = vrot.slane %v15766_v43, %v17863_v22  ;;  %v7209_v49 = vsel %vm4038_vm0, %v7208_v40, %v7204_v31  ;;  %v7218_v43 = vrot.slane %v15671_v6, %v17171_v9  ;;  %v7296_v41 = vrot.slane %v15794_v53, %v17171_v9 }
 0x6e6   : > { %v7248_v17 = vsel %vm4038_vm0, %v7247_v11, %v7243_v44  ;;  %v7195_v6 = vsel %vm4073_vm5, %v7194_v3, %v15659_v15  ;;  %v7267_v14 = vrot.slane %v15715_v62, %v17870_v28  ;;  %v7272_v59 = vrot.slane %v15739_v46, %v17878_v48  ;;  %v18029_v11 = vld [vmem:[#allocation48_spill] sm:$0xff] }
 0x6e7   : > { %v15860_v55 = vpop.permute.xlu1 %6827  ;;  %v15862_v25 = vpop.permute.xlu0 %6824  ;;  %v7253_v56 = vsel %vm4045_vm1, %v7252_v51, %v7248_v17  ;;  %v7287_v16 = vsel %vm4038_vm0, %v7286_v42, %v7282_v2  ;;  %v7306_v47 = vrot.slane %v15824_v1, %v17870_v28  ;;  %v7238_v1 = vrot.slane %v18029_v11, %v17875_v4 }
 0x6e8   : > { %6992 = vperm.xlu1 %7933, %v6515_v36   ;;  %7031 = vperm.xlu0 %7932, %v6528_v26   ;;  %v7214_v36 = vsel %vm4045_vm1, %v7213_v32, %v7209_v49  ;;  %v7223_v26 = vrot.slane %v15679_v19, %v17868_v12  ;;  %v7292_v30 = vsel %vm4045_vm1, %v7291_v21, %v7287_v16 }
 0x6e9   : > { %v7301_v19 = vrot.slane %v15826_v24, %v17868_v12  ;;  %v7219_v15 = vsel %vm4052_vm2, %v7218_v43, %v7214_v36  ;;  %v7258_v53 = vsel %vm4052_vm2, %v7257_v54, %v7253_v56  ;;  %v7297_v27 = vsel %vm4052_vm2, %v7296_v41, %v7292_v30 }
 0x6ea   : > { %v7263_v24 = vsel %vm4059_vm3, %v7262_v20, %v7258_v53  ;;  %v7311_v40 = vrot.slane %v15862_v25, %v17878_v48  ;;  %v7277_v25 = vrot.slane %v18030_v63, %v17875_v4  ;;  %v7316_v21 = vrot.slane %v15860_v55, %v17875_v4  ;;  %v18031_v20 = vld [vmem:[#allocation46_spill] sm:$0xff] }
 0x6eb   : > { %v6834_v13 = vpop.permute.xlu1 %6833  ;;  %v6831_v60 = vpop.permute.xlu0 %6830  ;;  %v7268_v32 = vsel %vm4066_vm4, %v7267_v14, %v7263_v24 }
 0x6ec   : > { %7034 = vperm.xlu1 %7933, %v6529_v7   ;;  %7013 = vperm.xlu0 %7932, %v6522_v37   ;;  %v7325_v57 = vrot.slane %v6834_v13, %v17863_v22  ;;  %v7321_v23 = vrot.slane %v6831_v60, %v17866_v18  ;;  %v7224_v7 = vsel %vm4059_vm3, %v7223_v26, %v7219_v15 }
 0x6ed   : > { %v7233_v37 = vrot.slane %v15689_v10, %v17878_v48  ;;  %v7302_v10 = vsel %vm4059_vm3, %v7301_v19, %v7297_v27  ;;  %v7229_v44 = vsel %vm4066_vm4, %v7228_v5, %v7224_v7  ;;  %v7273_v3 = vsel %vm4073_vm5, %v7272_v59, %v7268_v32 }
 0x6ee   : > { %v7326_v46 = vsel %vm4038_vm0, %v7325_v57, %v7321_v23  ;;  %v7307_v49 = vsel %vm4066_vm4, %v7306_v47, %v7302_v10  ;;  %v7278_v13 = vsel %vm4080_vm6, %v7277_v25, %v7273_v3 }
 0x6ef   : > { %v6840_v52 = vpop.permute.xlu1 %6839  ;;  %v6837_v38 = vpop.permute.xlu0 %6836  ;;  %v7234_v51 = vsel %vm4073_vm5, %v7233_v37, %v7229_v44  ;;  %v7312_v17 = vsel %vm4073_vm5, %v7311_v40, %v7307_v49 }
 0x6f0   : > { %v7330_v62 = vrot.slane %v6837_v38, %v17867_v0  ;;  %7016 = vperm.xlu1 %7933, %v15815_v35   ;;  %6995 = vperm.xlu0 %7932, %v15819_v39   ;;  %v7335_v31 = vrot.slane %v6840_v52, %v17171_v9  ;;  %v7200_v39 = vsel %vm4080_vm6, %v7199_v34, %v7195_v6 }
 0x6f1   : > { %v7669_v34 = vsel %vm4667_vm7, %v7122_v50, %v15854_v58  ;;  %v7239_v55 = vsel %vm4080_vm6, %v7238_v1, %v7234_v51  ;;  %v7317_v60 = vsel %vm4080_vm6, %v7316_v21, %v7312_v17 }
 0x6f2   : > { %v7331_v35 = vsel %vm4045_vm1, %v7330_v62, %v7326_v46  ;;  %v7670_v26 = vsel %vm4669_vm8, %v7161_v45, %v7669_v34 }
 0x6f3   : > { %v6846_v42 = vpop.permute.xlu1 %6845  ;;  %v6843_v2 = vpop.permute.xlu0 %6842  ;;  %v7336_v36 = vsel %vm4052_vm2, %v7335_v31, %v7331_v35 }
 0x6f4   : > { %v7340_v43 = vrot.slane %v6843_v2, %v17868_v12  ;;  %7019 = vperm.xlu1 %7933, %v15830_v33   ;;  %7037 = vperm.xlu0 %7932, %v15834_v29   ;;  %v7345_v54 = vrot.slane %v6846_v42, %v17870_v28  ;;  %v6531_v33 = vmul.f32 %v18031_v20, %v15721_v61 }
 0x6f5   : > { %v7671_v29 = vsel %vm4671_vm9, %v7200_v39, %v7670_v26 }
 0x6f6   : > { %v7341_v56 = vsel %vm4059_vm3, %v7340_v43, %v7336_v36  ;;  %v7672_v16 = vsel %vm4673_vm10, %v7239_v55, %v7671_v29 }
 0x6f7   : > { %v6852_v58 = vpop.permute.xlu1 %6851  ;;  %v6849_v50 = vpop.permute.xlu0 %6848  ;;  %v7346_v61 = vsel %vm4066_vm4, %v7345_v54, %v7341_v56  ;;  %v7673_v41 = vsel %vm4675_vm11, %v7278_v13, %v7672_v16 }
 0x6f8   : > { %v7355_v6 = vrot.slane %v6852_v58, %v17875_v4  ;;  %v7350_v45 = vrot.slane %v6849_v50, %v17878_v48  ;;  %7043 = vperm.xlu1 %7933, %v15866_v8   ;;  %7040 = vperm.xlu0 %7932, %v6531_v33   ;;  %v7674_v19 = vsel %vm4677_vm12, %v7317_v60, %v7673_v41 }
 0x6fa   : > { %v7351_v30 = vsel %vm4073_vm5, %v7350_v45, %v7346_v61 }
 0x6fb   : > { %v7356_v57 = vsel %vm4080_vm6, %v7355_v6, %v7351_v30  ;;  %v6858_v23 = vpop.permute.xlu1 %6857  ;;  %v6855_v5 = vpop.permute.xlu0 %6854 }
 0x6fc   : > { %v7675_v15 = vsel %vm4679_vm13, %v7356_v57, %v7674_v19  ;;  %v7364_v14 = vrot.slane %v6858_v23, %v17863_v22  ;;  %v7360_v8 = vrot.slane %v6855_v5, %v17866_v18 }
 0x6fd   : > { %7685 = vst.msk [vmem:[%s15970_s19] sm:$0xff] %vm4690_vm14, %v7675_v15 }
 0x6fe   : > { %v7365_v53 = vsel %vm4038_vm0, %v7364_v14, %v7360_v8 }
 0x6ff   : > { %v6864_v7 = vpop.permute.xlu1 %6863  ;;  %v6861_v37 = vpop.permute.xlu0 %6860 }
 0x700   : > { %v7374_v24 = vrot.slane %v6864_v7, %v17171_v9  ;;  %v7369_v59 = vrot.slane %v6861_v37, %v17867_v0 }
 0x702   : > { %v7370_v52 = vsel %vm4045_vm1, %v7369_v59, %v7365_v53 }
 0x703   : > { %v6870_v38 = vpop.permute.xlu1 %6869  ;;  %v7375_v47 = vsel %vm4052_vm2, %v7374_v24, %v7370_v52  ;;  %v6867_v27 = vpop.permute.xlu0 %6866 }
 0x704   : > { %v7384_v62 = vrot.slane %v6870_v38, %v17870_v28  ;;  %v7379_v10 = vrot.slane %v6867_v27, %v17868_v12 }
 0x706   : > { %v7380_v40 = vsel %vm4059_vm3, %v7379_v10, %v7375_v47 }
 0x707   : > { %v6876_v46 = vpop.permute.xlu1 %6875  ;;  %v7385_v31 = vsel %vm4066_vm4, %v7384_v62, %v7380_v40  ;;  %v6873_v11 = vpop.permute.xlu0 %6872 }
 0x708   : > { %v7394_v1 = vrot.slane %v6876_v46, %v17875_v4  ;;  %v7389_v44 = vrot.slane %v6873_v11, %v17878_v48 }
 0x70a   : > { %v7390_v32 = vsel %vm4073_vm5, %v7389_v44, %v7385_v31 }
 0x70b   : > { %v7395_v35 = vsel %vm4080_vm6, %v7394_v1, %v7390_v32  ;;  %v6882_v39 = vpop.permute.xlu1 %6881  ;;  %v6879_v51 = vpop.permute.xlu0 %6878 }
 0x70c   : > { %v7403_v63 = vrot.slane %v6882_v39, %v17863_v22  ;;  %v7399_v25 = vrot.slane %v6879_v51, %v17866_v18 }
 0x70e   : > { %v7404_v3 = vsel %vm4038_vm0, %v7403_v63, %v7399_v25 }
 0x70f   : > { %v6888_v42 = vpop.permute.xlu1 %6887  ;;  %v6885_v2 = vpop.permute.xlu0 %6884 }
 0x710   : > { %v7413_v21 = vrot.slane %v6888_v42, %v17171_v9  ;;  %v7408_v49 = vrot.slane %v6885_v2, %v17867_v0 }
 0x712   : > { %v7409_v43 = vsel %vm4045_vm1, %v7408_v49, %v7404_v3 }
 0x713   : > { %v6894_v34 = vpop.permute.xlu1 %6893  ;;  %v7414_v17 = vsel %vm4052_vm2, %v7413_v21, %v7409_v43  ;;  %v6891_v54 = vpop.permute.xlu0 %6890 }
 0x714   : > { %v7423_v36 = vrot.slane %v6894_v34, %v17870_v28  ;;  %v7418_v26 = vrot.slane %v6891_v54, %v17868_v12 }
 0x716   : > { %v7419_v55 = vsel %vm4059_vm3, %v7418_v26, %v7414_v17 }
 0x717   : > { %v6900_v56 = vpop.permute.xlu1 %6899  ;;  %v7424_v20 = vsel %vm4066_vm4, %v7423_v36, %v7419_v55  ;;  %v6897_v33 = vpop.permute.xlu0 %6896 }
 0x718   : > { %v7433_v29 = vrot.slane %v6900_v56, %v17875_v4  ;;  %v7428_v13 = vrot.slane %v6897_v33, %v17878_v48 }
 0x71a   : > { %v7429_v58 = vsel %vm4073_vm5, %v7428_v13, %v7424_v20 }
 0x71b   : > { %v7434_v50 = vsel %vm4080_vm6, %v7433_v29, %v7429_v58  ;;  %v6906_v60 = vpop.permute.xlu1 %6905  ;;  %v6903_v6 = vpop.permute.xlu0 %6902 }
 0x71c   : > { %v7676_v45 = vsel %vm4667_vm7, %v7434_v50, %v7395_v35  ;;  %v7442_v16 = vrot.slane %v6906_v60, %v17863_v22  ;;  %v7438_v61 = vrot.slane %v6903_v6, %v17866_v18 }
 0x71e   : > { %v7443_v41 = vsel %vm4038_vm0, %v7442_v16, %v7438_v61 }
 0x71f   : > { %v6912_v30 = vpop.permute.xlu1 %6911  ;;  %v6909_v19 = vpop.permute.xlu0 %6908 }
 0x720   : > { %v7452_v57 = vrot.slane %v6912_v30, %v17171_v9  ;;  %v7447_v23 = vrot.slane %v6909_v19, %v17867_v0 }
 0x722   : > { %v7448_v5 = vsel %vm4045_vm1, %v7447_v23, %v7443_v41 }
 0x723   : > { %v6918_v15 = vpop.permute.xlu1 %6917  ;;  %v7453_v14 = vsel %vm4052_vm2, %v7452_v57, %v7448_v5  ;;  %v6915_v8 = vpop.permute.xlu0 %6914 }
 0x724   : > { %v7462_v53 = vrot.slane %v6918_v15, %v17870_v28  ;;  %v7457_v7 = vrot.slane %v6915_v8, %v17868_v12 }
 0x726   : > { %v7458_v37 = vsel %vm4059_vm3, %v7457_v7, %v7453_v14 }
 0x727   : > { %v6924_v24 = vpop.permute.xlu1 %6923  ;;  %v7463_v59 = vsel %vm4066_vm4, %v7462_v53, %v7458_v37  ;;  %v6921_v52 = vpop.permute.xlu0 %6920 }
 0x728   : > { %v7472_v38 = vrot.slane %v6924_v24, %v17875_v4  ;;  %v7467_v47 = vrot.slane %v6921_v52, %v17878_v48 }
 0x72a   : > { %v7468_v27 = vsel %vm4073_vm5, %v7467_v47, %v7463_v59 }
 0x72b   : > { %v7473_v62 = vsel %vm4080_vm6, %v7472_v38, %v7468_v27  ;;  %v6930_v10 = vpop.permute.xlu1 %6929  ;;  %v6927_v40 = vpop.permute.xlu0 %6926 }
 0x72c   : > { %v7677_v46 = vsel %vm4669_vm8, %v7473_v62, %v7676_v45  ;;  %v7481_v31 = vrot.slane %v6930_v10, %v17863_v22  ;;  %v7477_v11 = vrot.slane %v6927_v40, %v17866_v18 }
 0x72e   : > { %v7482_v1 = vsel %vm4038_vm0, %v7481_v31, %v7477_v11 }
 0x72f   : > { %v6936_v44 = vpop.permute.xlu1 %6935  ;;  %v6933_v32 = vpop.permute.xlu0 %6932 }
 0x730   : > { %v7491_v35 = vrot.slane %v6936_v44, %v17171_v9  ;;  %v7486_v39 = vrot.slane %v6933_v32, %v17867_v0 }
 0x732   : > { %v7487_v51 = vsel %vm4045_vm1, %v7486_v39, %v7482_v1 }
 0x733   : > { %v6942_v63 = vpop.permute.xlu1 %6941  ;;  %v7492_v25 = vsel %vm4052_vm2, %v7491_v35, %v7487_v51  ;;  %v6939_v3 = vpop.permute.xlu0 %6938 }
 0x734   : > { %v7496_v42 = vrot.slane %v6939_v3, %v17868_v12  ;;  %v7501_v2 = vrot.slane %v6942_v63, %v17870_v28 }
 0x736   : > { %v7497_v21 = vsel %vm4059_vm3, %v7496_v42, %v7492_v25 }
 0x737   : > { %v6948_v49 = vpop.permute.xlu1 %6947  ;;  %v6945_v43 = vpop.permute.xlu0 %6944  ;;  %v7502_v54 = vsel %vm4066_vm4, %v7501_v2, %v7497_v21 }
 0x738   : > { %v7511_v34 = vrot.slane %v6948_v49, %v17875_v4  ;;  %v7506_v17 = vrot.slane %v6945_v43, %v17878_v48 }
 0x73a   : > { %v7507_v36 = vsel %vm4073_vm5, %v7506_v17, %v7502_v54 }
 0x73b   : > { %v7512_v26 = vsel %vm4080_vm6, %v7511_v34, %v7507_v36  ;;  %v6954_v55 = vpop.permute.xlu1 %6953  ;;  %v6951_v56 = vpop.permute.xlu0 %6950 }
 0x73c   : > { %v16034_v20 = vsel %vm4671_vm9, %v7512_v26, %v7677_v46  ;;  %v7520_v8 = vrot.slane %v6954_v55, %v17863_v22  ;;  %v7516_v53 = vrot.slane %v6951_v56, %v17866_v18 }
 0x73e   : > { %v7521_v59 = vsel %vm4038_vm0, %v7520_v8, %v7516_v53 }
 0x73f   : > { %v6960_v33 = vpop.permute.xlu1 %6959  ;;  %v6957_v29 = vpop.permute.xlu0 %6956 }
 0x740   : > { %v7525_v24 = vrot.slane %v6957_v29, %v17867_v0  ;;  %v7530_v52 = vrot.slane %v6960_v33, %v17171_v9 }
 0x742   : > { %v7526_v27 = vsel %vm4045_vm1, %v7525_v24, %v7521_v59 }
 0x743   : > { %v6966_v13 = vpop.permute.xlu1 %6965  ;;  %v6963_v58 = vpop.permute.xlu0 %6962  ;;  %v7531_v31 = vsel %vm4052_vm2, %v7530_v52, %v7526_v27 }
 0x744   : > { %v7535_v62 = vrot.slane %v6963_v58, %v17868_v12  ;;  %v7540_v46 = vrot.slane %v6966_v13, %v17870_v28 }
 0x746   : > { %v7536_v32 = vsel %vm4059_vm3, %v7535_v62, %v7531_v31 }
 0x747   : > { %v16036_v50 = vpop.permute.xlu1 %6971  ;;  %v6969_v60 = vpop.permute.xlu0 %6968  ;;  %v7541_v42 = vsel %vm4066_vm4, %v7540_v46, %v7536_v32 }
 0x748   : > { %v7545_v35 = vrot.slane %v6969_v60, %v17878_v48  ;;  %v7550_v3 = vrot.slane %v16036_v50, %v17875_v4 }
 0x74a   : > { %v7546_v34 = vsel %vm4073_vm5, %v7545_v35, %v7541_v42 }
 0x74b   : > { %v6978_v6 = vpop.permute.xlu1 %6977  ;;  %v6975_v45 = vpop.permute.xlu0 %6974 }
 0x74c   : > { %v7559_v10 = vrot.slane %v6978_v6, %v17863_v22  ;;  %v7555_v40 = vrot.slane %v6975_v45, %v17866_v18 }
 0x74e   : > { %v7560_v51 = vsel %vm4038_vm0, %v7559_v10, %v7555_v40 }
 0x74f   : > { %v6984_v16 = vpop.permute.xlu1 %6983  ;;  %v6981_v61 = vpop.permute.xlu0 %6980 }
 0x750   : > { %v7564_v11 = vrot.slane %v6981_v61, %v17867_v0  ;;  %v7569_v63 = vrot.slane %v6984_v16, %v17171_v9 }
 0x752   : > { %v7565_v2 = vsel %vm4045_vm1, %v7564_v11, %v7560_v51 }
 0x753   : > { %v6999_v41 = vpop.permute.xlu1 %6998  ;;  %v6987_v30 = vpop.permute.xlu0 %6986  ;;  %v7570_v29 = vsel %vm4052_vm2, %v7569_v63, %v7565_v2 }
 0x754   : > { %v7594_v25 = vrot.slane %v6999_v41, %v17866_v18  ;;  %v7574_v17 = vrot.slane %v6987_v30, %v17868_v12 }
 0x756   : > { %v7575_v61 = vsel %vm4059_vm3, %v7574_v17, %v7570_v29 }
 0x757   : > { %v7005_v19 = vpop.permute.xlu1 %7004  ;;  %v7002_v57 = vpop.permute.xlu0 %7001 }
 0x758   : > { %v7598_v39 = vrot.slane %v7002_v57, %v17863_v22  ;;  %v7603_v21 = vrot.slane %v7005_v19, %v17867_v0 }
 0x75a   : > { %v7599_v54 = vsel %vm4038_vm0, %v7598_v39, %v7594_v25 }
 0x75b   : > { %v7026_v23 = vpop.permute.xlu1 %7025  ;;  %v7023_v5 = vpop.permute.xlu0 %7022  ;;  %v7604_v60 = vsel %vm4045_vm1, %v7603_v21, %v7599_v54 }
 0x75c   : > { %v7637_v26 = vrot.slane %v7026_v23, %v17863_v22  ;;  %v7633_v55 = vrot.slane %v7023_v5, %v17866_v18  ;;  %v7551_v5 = vsel %vm4080_vm6, %v7550_v3, %v7546_v34 }
 0x75e   : > { %v7638_v19 = vsel %vm4038_vm0, %v7637_v26, %v7633_v55 }
 0x75f   : > { %v7029_v15 = vpop.permute.xlu1 %7028  ;;  %v7008_v14 = vpop.permute.xlu0 %7007 }
 0x760   : > { %v7608_v36 = vrot.slane %v7008_v14, %v17171_v9  ;;  %v7642_v13 = vrot.slane %v7029_v15, %v17867_v0 }
 0x762   : > { %v7609_v41 = vsel %vm4052_vm2, %v7608_v36, %v7604_v60  ;;  %v7643_v15 = vsel %vm4045_vm1, %v7642_v13, %v7638_v19 }
 0x763   : > { %v7011_v7 = vpop.permute.xlu1 %7010  ;;  %v6990_v37 = vpop.permute.xlu0 %6989 }
 0x764   : > { %v7613_v56 = vrot.slane %v7011_v7, %v17868_v12  ;;  %v7579_v33 = vrot.slane %v6990_v37, %v17870_v28 }
 0x766   : > { %v7580_v57 = vsel %vm4066_vm4, %v7579_v33, %v7575_v61 }
 0x767   : > { %v6993_v38 = vpop.permute.xlu1 %6992  ;;  %v7032_v47 = vpop.permute.xlu0 %7031 }
 0x768   : > { %v7584_v58 = vrot.slane %v6993_v38, %v17878_v48  ;;  %v7647_v6 = vrot.slane %v7032_v47, %v17171_v9  ;;  %v7614_v9 = vsel %vm4059_vm3, %v7613_v56, %v7609_v41  ;;  %v7679_v47 = vsel %vm4673_vm10, %v7551_v5, %v16034_v20 }
 0x76a   : > { %v7585_v14 = vsel %vm4073_vm5, %v7584_v58, %v7580_v57 }
 0x76b   : > { %v7035_v1 = vpop.permute.xlu1 %7034  ;;  %v7014_v44 = vpop.permute.xlu0 %7013 }
 0x76c   : > { %v7618_v50 = vrot.slane %v7014_v44, %v17870_v28  ;;  %v7652_v0 = vrot.slane %v7035_v1, %v17868_v12  ;;  %v7648_v12 = vsel %vm4052_vm2, %v7647_v6, %v7643_v15 }
 0x76e   : > { %v7619_v8 = vsel %vm4066_vm4, %v7618_v50, %v7614_v9 }
 0x76f   : > { %v7017_v49 = vpop.permute.xlu1 %7016  ;;  %v6996_v43 = vpop.permute.xlu0 %6995 }
 0x770   : > { %v7623_v22 = vrot.slane %v7017_v49, %v17878_v48  ;;  %v7589_v18 = vrot.slane %v6996_v43, %v17875_v4 }
 0x772   : > { %v7624_v53 = vsel %vm4073_vm5, %v7623_v22, %v7619_v8  ;;  %v7590_v7 = vsel %vm4080_vm6, %v7589_v18, %v7585_v14 }
 0x773   : > { %v7020_v45 = vpop.permute.xlu1 %7019  ;;  %v7038_v16 = vpop.permute.xlu0 %7037  ;;  %v7680_v62 = vsel %vm4675_vm11, %v7590_v7, %v7679_v47 }
 0x774   : > { %v7628_v30 = vrot.slane %v7020_v45, %v17875_v4  ;;  %v7657_v23 = vrot.slane %v7038_v16, %v17870_v28  ;;  %v7653_v28 = vsel %vm4059_vm3, %v7652_v0, %v7648_v12 }
 0x776   : > { %v7629_v59 = vsel %vm4080_vm6, %v7628_v30, %v7624_v53  ;;  %v7658_v27 = vsel %vm4066_vm4, %v7657_v23, %v7653_v28 }
 0x777   : > { %v7044_v37 = vpop.permute.xlu1 %7043  ;;  %v7041_v24 = vpop.permute.xlu0 %7040 }
 0x778   : > { %v7667_v52 = vrot.slane %v7044_v37, %v17875_v4  ;;  %v7662_v38 = vrot.slane %v7041_v24, %v17878_v48  ;;  %v7681_v4 = vsel %vm4677_vm12, %v7629_v59, %v7680_v62 }
 0x77a   : > { %v7663_v10 = vsel %vm4073_vm5, %v7662_v38, %v7658_v27 }
 0x77b   : > { %v7668_v48 = vsel %vm4080_vm6, %v7667_v52, %v7663_v10 }
 0x77c   : > { %v7682_v20 = vsel %vm4679_vm13, %v7668_v48, %v7681_v4 }
 0x77d   : > { %7686 = vst.msk [vmem:[%s15970_s19 + $0x8] sm:$0xff] %vm4690_vm14, %v7682_v20 }
 0x77e   : > { %9375 = shalt.err (!%p9372_p3)
}
 0x77f   : > { %s9376_s22 = scalar_lea.hbm %s16106_s10, 256  ;;  %s9380_s17 = scalar_lea.hbm %s16164_s6, 512 }
 0x780   : > { %p9377_p4 = scmp.ne.s32.totalorder %s16106_s10, %s9376_s22  ;;  %p9381_p9 = scmp.lt.u32.totalorder %s16106_s10, %s16164_s6 }
 0x781   : > { %p9382_p10 = scmp.lt.u32.totalorder %s9380_s17, %s9376_s22  ;;  %p9384_p12 = scmp.lt.u32.totalorder %s9376_s22, %s16106_s10 }
 0x782   : > { %p9378_p7 = pnand %p9377_p4, %p9507_p5 }
 0x783   : > { %p9383_p11 = por %p9382_p10, %p9381_p9 }
 0x784   : > { %p9379_p8 = pneg %p9378_p7 }
 0x785   : > { %p9385_p13 = por %p9384_p12, %p9383_p11 }
 0x787   : > { %p9386_p0 = pnand %p9385_p13, %p9379_p8 }
 0x789   : > { %9389 = shalt.err (!%p9386_p0)
}
 0x78a   : > { %s9429_s19 = smov 128   ;;  %s9430_s27 = smov 8  }
 0x78b   : > { %7889 = dma.vmem_to_hbm [thread:$0]  (%p9507_p5), %s16108_s29, 256, %s16106_s10, %s16117_s11, %s9429_s19, %s9429_s19, %s9430_s27  }
 0x78c PF: > { %p7895_p1 = scmp.ge.s32.totalorder %s9424_s26, 2  ;;  %s7716_s5 = sand.u32 1, %s9412_s23  }
 0x78d   : > { %s7717_s30 = scalar_lea.sflag [#allocation4], %s7716_s5 }
 0x78e   : > { %p7892_p2 = pnand %p7895_p1, %p9511_p6 }
 0x790   : > { %9407 = dma.done.wait (!%p7892_p2), %s7717_s30, 256  }
 0x791   : > { %9409 = vsyncadd (!%p7892_p2), %s7717_s30, 4294967040  ;;  %p18_p3 = scmp.ge.s32.totalorder %s9494_s28, 4   ;;  %s18032_s23 = smov %s9416_s24 }
 0x792   : > { %s18033_s24 = smov %s9420_s25  ;;  %s18034_s25 = smov %s9505_s7 }
 0x793   : > { %s18035_s26 = smov %s9494_s28  ;;  %20 = sbr.rel (!%p18_p3) target bundleno = 6 (0x6), region = 82 }
 0x79a   :  { %7722 = vsyncpa [#allocation4], 1 }
 0x79b   :  { %7724 = vsyncpa [#allocation4 + $0x1], 1 }

</bundles_post_ra>
